<compile_context>
chip_gen: v5e
topology: v5e:2x2
jax: 0.10.0
libtpu: 0.0.40
codegen_flags: <defaults>
</compile_context>

<pallas_src>
import jax
import jax.numpy as jnp
from jax.experimental import pallas as pl
from jax.experimental.pallas import tpu as pltpu


def make_gru_kernel(num_layers, seq_len, batch_pad, input_size, hidden_size):
    S, BP, Din, H = seq_len, batch_pad, input_size, hidden_size
    # Full unroll for short sequences (static scratch indices, LLO visibility);
    # partial unroll for long sequences (bounds vreg live ranges / compile time).
    unroll = True if S <= 32 else 8

    def kernel(*refs):
        z_ref, y_ref = refs[0], refs[1]
        idx = 2
        layer_refs = []
        for _ in range(num_layers):
            layer_refs.append(refs[idx:idx + 10])
            idx += 10
        w_lin_ref, b_lin_ref = refs[idx], refs[idx + 1]
        out_ref = refs[idx + 2]
        gi_r_ref, gi_z_ref, gi_n_ref, hseq_ref = refs[idx + 3: idx + 7]

        # x = y + z on the 2-D (S*BP, Din) time-major layout (elementwise in f32).
        layer_in = y_ref[...] + z_ref[...]

        for l in range(num_layers):
            (wir_ref, wiz_ref, win_ref,
             whr_ref, whz_ref, whn_ref,
             bgr_ref, bgz_ref, bin_ref, bhn_ref) = layer_refs[l]

            # Input-to-hidden projection for ALL timesteps, one MXU pass per gate.
            # bf16 operands, f32 accumulate.  b_ih (+ folded b_hr/b_hz) added once here.
            x_bf = layer_in.astype(jnp.bfloat16)
            gi_r = jnp.dot(x_bf, wir_ref[...],
                           preferred_element_type=jnp.float32) + bgr_ref[...]
            gi_z = jnp.dot(x_bf, wiz_ref[...],
                           preferred_element_type=jnp.float32) + bgz_ref[...]
            gi_n = jnp.dot(x_bf, win_ref[...],
                           preferred_element_type=jnp.float32) + bin_ref[...]
            # (S*BP, H) -> (S, BP, H): tile-aligned view when BP == 8 (no relayout copy).
            gi_r_ref[...] = gi_r.reshape(S, BP, H)
            gi_z_ref[...] = gi_z.reshape(S, BP, H)
            gi_n_ref[...] = gi_n.reshape(S, BP, H)

            # Recurrent per-gate weights (already bf16) + hoisted b_hn broadcast.
            w_hr = whr_ref[...]
            w_hz = whz_ref[...]
            w_hn = whn_ref[...]
            b_hn = jnp.broadcast_to(bhn_ref[...], (BP, H))  # hoisted: one broadcast per layer

            def step(t, h):
                # Only the small (BP, H) @ (H, H) recurrence runs inside the time loop.
                h_bf = h.astype(jnp.bfloat16)
                gh_r = jnp.dot(h_bf, w_hr, preferred_element_type=jnp.float32)
                gh_z = jnp.dot(h_bf, w_hz, preferred_element_type=jnp.float32)
                gh_n = jnp.dot(h_bf, w_hn, preferred_element_type=jnp.float32)
                # Gate-split refs: leading-axis indexing only, no lane-offset slices.
                r = jax.nn.sigmoid(gi_r_ref[t] + gh_r)
                u = jax.nn.sigmoid(gi_z_ref[t] + gh_z)
                n = jnp.tanh(gi_n_ref[t] + r * (gh_n + b_hn))
                h_new = (1.0 - u) * n + u * h
                hseq_ref[t] = h_new
                return h_new

            jax.lax.fori_loop(0, S, step, jnp.zeros((BP, H), jnp.float32),
                              unroll=unroll)

            # Layer output feeds the next layer (Dropout(0.0) == identity).
            layer_in = hseq_ref[...].reshape(S * BP, H)

        # Final Linear(hidden -> input) over all S*BP rows at once, residual with y.
        out = jnp.dot(layer_in.astype(jnp.bfloat16), w_lin_ref[...],
                      preferred_element_type=jnp.float32) + b_lin_ref[...]
        out_ref[...] = y_ref[...] + out

    return kernel


def basic_gru_block(z, y, params, num_layers, hidden_size):
    """z, y: (B, S, input_size) float32.  Returns (B, S, input_size)."""
    B, S, Din = z.shape
    H = hidden_size
    BP = max(8, ((B + 7) // 8) * 8)  # pad batch to full sublane tiles

    def to_2d(a):
        a = jnp.transpose(a, (1, 0, 2))                   # time-major (S, B, Din)
        a = jnp.pad(a, ((0, 0), (0, BP - B), (0, 0)))     # (S, BP, Din), dead rows = 0
        return a.reshape(S * BP, Din)

    z2d, y2d = to_2d(z), to_2d(y)

    def full(shape):
        return pl.BlockSpec(shape, lambda i, _n=len(shape): (0,) * _n)

    in_specs = [full((S * BP, Din)), full((S * BP, Din))]
    args = [z2d, y2d]
    for l in range(num_layers):
        din_l = Din if l == 0 else H
        in_specs += ([full((din_l, H))] * 3 + [full((H, H))] * 3 + [full((1, H))] * 4)
        args += [params[f"w_ir_{l}"], params[f"w_iz_{l}"], params[f"w_in_{l}"],
                 params[f"w_hr_{l}"], params[f"w_hz_{l}"], params[f"w_hn_{l}"],
                 params[f"b_gr_{l}"], params[f"b_gz_{l}"], params[f"b_in_{l}"],
                 params[f"b_hn_{l}"]]
    in_specs += [full((H, Din)), full((1, Din))]
    args += [params["w_lin"], params["b_lin"]]

    kernel = make_gru_kernel(num_layers, S, BP, Din, H)

    out2d = pl.pallas_call(
        kernel,
        out_shape=jax.ShapeDtypeStruct((S * BP, Din), jnp.float32),
        grid_spec=pltpu.PrefetchScalarGridSpec(
            num_scalar_prefetch=0,
            grid=(1,),
            in_specs=in_specs,
            out_specs=full((S * BP, Din)),
            scratch_shapes=[
                pltpu.VMEM((S, BP, H), jnp.float32),   # gi_r, all timesteps
                pltpu.VMEM((S, BP, H), jnp.float32),   # gi_z
                pltpu.VMEM((S, BP, H), jnp.float32),   # gi_n
                pltpu.VMEM((S, BP, H), jnp.float32),   # hidden sequence
            ],
        ),
        compiler_params=pltpu.CompilerParams(
            dimension_semantics=("arbitrary",),
            vmem_limit_bytes=32 * 1024 * 1024,
        ),
    )(*args)

    out = out2d.reshape(S, BP, Din)[:, :B]
    return jnp.transpose(out, (1, 0, 2))


def make_torch_params(key, input_size, hidden_size, num_layers):
    """PyTorch-native parameter shapes (nn.GRU / nn.Linear), deterministic init."""
    H = hidden_size
    bound = 1.0 / (H ** 0.5)
    keys = jax.random.split(key, 4 * num_layers + 2)
    tp = {}
    ki = 0
    for l in range(num_layers):
        din = input_size if l == 0 else H
        tp[f"weight_ih_l{l}"] = jax.random.uniform(keys[ki], (3 * H, din), jnp.float32, -bound, bound); ki += 1
        tp[f"weight_hh_l{l}"] = jax.random.uniform(keys[ki], (3 * H, H), jnp.float32, -bound, bound); ki += 1
        tp[f"bias_ih_l{l}"]   = jax.random.uniform(keys[ki], (3 * H,), jnp.float32, -bound, bound); ki += 1
        tp[f"bias_hh_l{l}"]   = jax.random.uniform(keys[ki], (3 * H,), jnp.float32, -bound, bound); ki += 1
    tp["linear_weight"] = jax.random.uniform(keys[ki], (input_size, H), jnp.float32, -bound, bound); ki += 1
    tp["linear_bias"]   = jax.random.uniform(keys[ki], (input_size,), jnp.float32, -bound, bound)
    return tp


def prep_params(tp, num_layers, hidden_size):
    """Kernel layout: gate-split, pre-transposed bf16 weights; f32 biases, b_hr/b_hz folded."""
    H = hidden_size
    p = {}
    for l in range(num_layers):
        w_ih = tp[f"weight_ih_l{l}"]   # (3H, din), gate order [r|z|n]
        w_hh = tp[f"weight_hh_l{l}"]   # (3H, H)
        b_ih = tp[f"bias_ih_l{l}"]     # (3H,)
        b_hh = tp[f"bias_hh_l{l}"]     # (3H,)
        p[f"w_ir_{l}"] = w_ih[:H].T.astype(jnp.bfloat16)           # (din, H)
        p[f"w_iz_{l}"] = w_ih[H:2 * H].T.astype(jnp.bfloat16)
        p[f"w_in_{l}"] = w_ih[2 * H:].T.astype(jnp.bfloat16)
        p[f"w_hr_{l}"] = w_hh[:H].T.astype(jnp.bfloat16)           # (H, H)
        p[f"w_hz_{l}"] = w_hh[H:2 * H].T.astype(jnp.bfloat16)
        p[f"w_hn_{l}"] = w_hh[2 * H:].T.astype(jnp.bfloat16)
        # b_hr / b_hz are plain additive -> fold into the precomputed input-gate bias.
        # b_hn multiplies r, so it must stay inside the recurrent step.
        p[f"b_gr_{l}"] = (b_ih[:H] + b_hh[:H]).reshape(1, H)
        p[f"b_gz_{l}"] = (b_ih[H:2 * H] + b_hh[H:2 * H]).reshape(1, H)
        p[f"b_in_{l}"] = b_ih[2 * H:].reshape(1, H)
        p[f"b_hn_{l}"] = b_hh[2 * H:].reshape(1, H)
    p["w_lin"] = tp["linear_weight"].T.astype(jnp.bfloat16)        # (H, input)
    p["b_lin"] = tp["linear_bias"].reshape(1, -1)
    return p


def reference(z, y, tp, num_layers, hidden_size, bf16_matmul=False):
    """Pure-JAX reference of the PyTorch module from native-shaped parameters.

    bf16_matmul=True rounds matmul operands to bf16 exactly as the kernel does,
    to isolate kernel-math bugs from bf16 quantization noise.
    """
    H = hidden_size
    hp = jax.lax.Precision.HIGHEST

    def mm(a, b):
        if bf16_matmul:
            a = a.astype(jnp.bfloat16).astype(jnp.float32)
            b = b.astype(jnp.bfloat16).astype(jnp.float32)
        return jnp.dot(a, b, precision=hp)

    x = y + z
    B = x.shape[0]
    inp = x
    for l in range(num_layers):
        w_ih = tp[f"weight_ih_l{l}"]
        w_hh = tp[f"weight_hh_l{l}"]
        b_ih = tp[f"bias_ih_l{l}"]
        b_hh = tp[f"bias_hh_l{l}"]

        def step(h, x_t):
            gi = mm(x_t, w_ih.T) + b_ih
            gh = mm(h, w_hh.T) + b_hh
            r = jax.nn.sigmoid(gi[:, :H] + gh[:, :H])
            u = jax.nn.sigmoid(gi[:, H:2 * H] + gh[:, H:2 * H])
            n = jnp.tanh(gi[:, 2 * H:] + r * gh[:, 2 * H:])
            h_new = (1.0 - u) * n + u * h
            return h_new, h_new

        h0 = jnp.zeros((B, H), jnp.float32)
        _, hs = jax.lax.scan(step, h0, jnp.transpose(inp, (1, 0, 2)))
        inp = jnp.transpose(hs, (1, 0, 2))
    out = mm(inp, tp["linear_weight"].T) + tp["linear_bias"]
    return y + out


if __name__ == "__main__":
    B, S = 2, 16
    INPUT, HIDDEN, LAYERS = 8, 32, 2

    key = jax.random.PRNGKey(0)
    kz, ky, kp = jax.random.split(key, 3)
    z = jax.random.normal(kz, (B, S, INPUT), jnp.float32)
    y = jax.random.normal(ky, (B, S, INPUT), jnp.float32)

    torch_params = make_torch_params(kp, INPUT, HIDDEN, LAYERS)
    params = prep_params(torch_params, LAYERS, HIDDEN)

    out = jax.block_until_ready(basic_gru_block(z, y, params, LAYERS, HIDDEN))
    assert out.shape == (B, S, INPUT)

    # Tight check against a reference that rounds matmul operands to bf16 exactly like
    # the kernel (verifies the GRU math / layout transformations themselves).
    ref_bf16 = jax.block_until_ready(
        reference(z, y, torch_params, LAYERS, HIDDEN, bf16_matmul=True))
    assert jnp.allclose(out, ref_bf16, rtol=2e-2, atol=2e-2), "mismatch vs bf16-operand reference"

    # Loose check against the full-f32 PyTorch-semantics reference (bf16 MXU operands
    # through a 2-layer, 16-step recurrence accumulate ~1e-2-level deviations).
    ref_f32 = jax.block_until_ready(
        reference(z, y, torch_params, LAYERS, HIDDEN, bf16_matmul=False))
    assert jnp.allclose(out, ref_f32, rtol=1e-1, atol=1e-1), "mismatch vs f32 reference"

    print("KERNEL_OK")
</pallas_src>

<mosaic_0001>
module attributes {stable_mosaic.version = 11 : i64} {
  func.func @kernel(%arg0: i32, %arg1: memref<128x8xf32, #tpu.memory_space<vmem>>, %arg2: memref<128x8xf32, #tpu.memory_space<vmem>>, %arg3: memref<8x32xbf16, #tpu.memory_space<vmem>>, %arg4: memref<8x32xbf16, #tpu.memory_space<vmem>>, %arg5: memref<8x32xbf16, #tpu.memory_space<vmem>>, %arg6: memref<32x32xbf16, #tpu.memory_space<vmem>>, %arg7: memref<32x32xbf16, #tpu.memory_space<vmem>>, %arg8: memref<32x32xbf16, #tpu.memory_space<vmem>>, %arg9: memref<1x32xf32, #tpu.memory_space<vmem>>, %arg10: memref<1x32xf32, #tpu.memory_space<vmem>>, %arg11: memref<1x32xf32, #tpu.memory_space<vmem>>, %arg12: memref<1x32xf32, #tpu.memory_space<vmem>>, %arg13: memref<32x32xbf16, #tpu.memory_space<vmem>>, %arg14: memref<32x32xbf16, #tpu.memory_space<vmem>>, %arg15: memref<32x32xbf16, #tpu.memory_space<vmem>>, %arg16: memref<32x32xbf16, #tpu.memory_space<vmem>>, %arg17: memref<32x32xbf16, #tpu.memory_space<vmem>>, %arg18: memref<32x32xbf16, #tpu.memory_space<vmem>>, %arg19: memref<1x32xf32, #tpu.memory_space<vmem>>, %arg20: memref<1x32xf32, #tpu.memory_space<vmem>>, %arg21: memref<1x32xf32, #tpu.memory_space<vmem>>, %arg22: memref<1x32xf32, #tpu.memory_space<vmem>>, %arg23: memref<32x8xbf16, #tpu.memory_space<vmem>>, %arg24: memref<1x8xf32, #tpu.memory_space<vmem>>, %arg25: memref<128x8xf32, #tpu.memory_space<vmem>>, %arg26: memref<16x8x32xf32, #tpu.memory_space<vmem>>, %arg27: memref<16x8x32xf32, #tpu.memory_space<vmem>>, %arg28: memref<16x8x32xf32, #tpu.memory_space<vmem>>, %arg29: memref<16x8x32xf32, #tpu.memory_space<vmem>>) attributes {dimension_semantics = [#tpu.dimension_semantics<arbitrary>], iteration_bounds = array<i64: 1>, scalar_prefetch = 0 : i64, scratch_operands = 4 : i64, tpu.core_type = #tpu.core_type<tc>, window_params = [{pipeline_mode = #tpu.pipeline_mode<synchronous>, transform_indices = @transform_0, window_bounds = array<i64: 128, 8>}, {pipeline_mode = #tpu.pipeline_mode<synchronous>, transform_indices = @transform_1, window_bounds = array<i64: 128, 8>}, {pipeline_mode = #tpu.pipeline_mode<synchronous>, transform_indices = @transform_2, window_bounds = array<i64: 8, 32>}, {pipeline_mode = #tpu.pipeline_mode<synchronous>, transform_indices = @transform_3, window_bounds = array<i64: 8, 32>}, {pipeline_mode = #tpu.pipeline_mode<synchronous>, transform_indices = @transform_4, window_bounds = array<i64: 8, 32>}, {pipeline_mode = #tpu.pipeline_mode<synchronous>, transform_indices = @transform_5, window_bounds = array<i64: 32, 32>}, {pipeline_mode = #tpu.pipeline_mode<synchronous>, transform_indices = @transform_6, window_bounds = array<i64: 32, 32>}, {pipeline_mode = #tpu.pipeline_mode<synchronous>, transform_indices = @transform_7, window_bounds = array<i64: 32, 32>}, {pipeline_mode = #tpu.pipeline_mode<synchronous>, transform_indices = @transform_8, window_bounds = array<i64: 1, 32>}, {pipeline_mode = #tpu.pipeline_mode<synchronous>, transform_indices = @transform_9, window_bounds = array<i64: 1, 32>}, {pipeline_mode = #tpu.pipeline_mode<synchronous>, transform_indices = @transform_10, window_bounds = array<i64: 1, 32>}, {pipeline_mode = #tpu.pipeline_mode<synchronous>, transform_indices = @transform_11, window_bounds = array<i64: 1, 32>}, {pipeline_mode = #tpu.pipeline_mode<synchronous>, transform_indices = @transform_12, window_bounds = array<i64: 32, 32>}, {pipeline_mode = #tpu.pipeline_mode<synchronous>, transform_indices = @transform_13, window_bounds = array<i64: 32, 32>}, {pipeline_mode = #tpu.pipeline_mode<synchronous>, transform_indices = @transform_14, window_bounds = array<i64: 32, 32>}, {pipeline_mode = #tpu.pipeline_mode<synchronous>, transform_indices = @transform_15, window_bounds = array<i64: 32, 32>}, {pipeline_mode = #tpu.pipeline_mode<synchronous>, transform_indices = @transform_16, window_bounds = array<i64: 32, 32>}, {pipeline_mode = #tpu.pipeline_mode<synchronous>, transform_indices = @transform_17, window_bounds = array<i64: 32, 32>}, {pipeline_mode = #tpu.pipeline_mode<synchronous>, transform_indices = @transform_18, window_bounds = array<i64: 1, 32>}, {pipeline_mode = #tpu.pipeline_mode<synchronous>, transform_indices = @transform_19, window_bounds = array<i64: 1, 32>}, {pipeline_mode = #tpu.pipeline_mode<synchronous>, transform_indices = @transform_20, window_bounds = array<i64: 1, 32>}, {pipeline_mode = #tpu.pipeline_mode<synchronous>, transform_indices = @transform_21, window_bounds = array<i64: 1, 32>}, {pipeline_mode = #tpu.pipeline_mode<synchronous>, transform_indices = @transform_22, window_bounds = array<i64: 32, 8>}, {pipeline_mode = #tpu.pipeline_mode<synchronous>, transform_indices = @transform_23, window_bounds = array<i64: 1, 8>}, {pipeline_mode = #tpu.pipeline_mode<synchronous>, transform_indices = @transform_24, window_bounds = array<i64: 128, 8>}]} {
    %c0 = arith.constant 0 : index
    %c0_0 = arith.constant 0 : index
    %0 = vector.load %arg2[%c0, %c0_0] : memref<128x8xf32, #tpu.memory_space<vmem>>, vector<128x8xf32>
    %c0_1 = arith.constant 0 : index
    %c0_2 = arith.constant 0 : index
    %1 = vector.load %arg1[%c0_1, %c0_2] : memref<128x8xf32, #tpu.memory_space<vmem>>, vector<128x8xf32>
    %2 = arith.addf %0, %1 : vector<128x8xf32>
    %3 = arith.truncf %2 : vector<128x8xf32> to vector<128x8xbf16>
    %c0_3 = arith.constant 0 : index
    %c0_4 = arith.constant 0 : index
    %4 = vector.load %arg3[%c0_3, %c0_4] : memref<8x32xbf16, #tpu.memory_space<vmem>>, vector<8x32xbf16>
    %cst = arith.constant dense<0.000000e+00> : vector<128x32xf32>
    %5 = tpu.matmul %3, %4, %cst {dimension_numbers = #tpu.dot_dimension_numbers<[1], [0], [0], [1], [0, 0, 1, 1], [], []>} : vector<128x8xbf16>, vector<8x32xbf16>, vector<128x32xf32> -> vector<128x32xf32>
    %c0_5 = arith.constant 0 : index
    %c0_6 = arith.constant 0 : index
    %6 = vector.load %arg9[%c0_5, %c0_6] : memref<1x32xf32, #tpu.memory_space<vmem>>, vector<1x32xf32>
    %7 = vector.broadcast %6 : vector<1x32xf32> to vector<128x32xf32>
    %8 = arith.addf %5, %7 : vector<128x32xf32>
    %c0_7 = arith.constant 0 : index
    %c0_8 = arith.constant 0 : index
    %9 = vector.load %arg4[%c0_7, %c0_8] : memref<8x32xbf16, #tpu.memory_space<vmem>>, vector<8x32xbf16>
    %cst_9 = arith.constant dense<0.000000e+00> : vector<128x32xf32>
    %10 = tpu.matmul %3, %9, %cst_9 {dimension_numbers = #tpu.dot_dimension_numbers<[1], [0], [0], [1], [0, 0, 1, 1], [], []>} : vector<128x8xbf16>, vector<8x32xbf16>, vector<128x32xf32> -> vector<128x32xf32>
    %c0_10 = arith.constant 0 : index
    %c0_11 = arith.constant 0 : index
    %11 = vector.load %arg10[%c0_10, %c0_11] : memref<1x32xf32, #tpu.memory_space<vmem>>, vector<1x32xf32>
    %12 = vector.broadcast %11 : vector<1x32xf32> to vector<128x32xf32>
    %13 = arith.addf %10, %12 : vector<128x32xf32>
    %c0_12 = arith.constant 0 : index
    %c0_13 = arith.constant 0 : index
    %14 = vector.load %arg5[%c0_12, %c0_13] : memref<8x32xbf16, #tpu.memory_space<vmem>>, vector<8x32xbf16>
    %cst_14 = arith.constant dense<0.000000e+00> : vector<128x32xf32>
    %15 = tpu.matmul %3, %14, %cst_14 {dimension_numbers = #tpu.dot_dimension_numbers<[1], [0], [0], [1], [0, 0, 1, 1], [], []>} : vector<128x8xbf16>, vector<8x32xbf16>, vector<128x32xf32> -> vector<128x32xf32>
    %c0_15 = arith.constant 0 : index
    %c0_16 = arith.constant 0 : index
    %16 = vector.load %arg11[%c0_15, %c0_16] : memref<1x32xf32, #tpu.memory_space<vmem>>, vector<1x32xf32>
    %17 = vector.broadcast %16 : vector<1x32xf32> to vector<128x32xf32>
    %18 = arith.addf %15, %17 : vector<128x32xf32>
    %19 = vector.shape_cast %8 : vector<128x32xf32> to vector<16x8x32xf32>
    %c0_17 = arith.constant 0 : index
    %c0_18 = arith.constant 0 : index
    %c0_19 = arith.constant 0 : index
    %20 = vector.load %arg26[%c0_17, %c0_18, %c0_19] : memref<16x8x32xf32, #tpu.memory_space<vmem>>, vector<16x8x32xf32>
    tpu.vector_store %arg26[%c0_17, %c0_18, %c0_19], %19 {strides = array<i32>} : memref<16x8x32xf32, #tpu.memory_space<vmem>>, vector<16x8x32xf32>,
    %21 = vector.shape_cast %13 : vector<128x32xf32> to vector<16x8x32xf32>
    %c0_20 = arith.constant 0 : index
    %c0_21 = arith.constant 0 : index
    %c0_22 = arith.constant 0 : index
    %22 = vector.load %arg27[%c0_20, %c0_21, %c0_22] : memref<16x8x32xf32, #tpu.memory_space<vmem>>, vector<16x8x32xf32>
    tpu.vector_store %arg27[%c0_20, %c0_21, %c0_22], %21 {strides = array<i32>} : memref<16x8x32xf32, #tpu.memory_space<vmem>>, vector<16x8x32xf32>,
    %23 = vector.shape_cast %18 : vector<128x32xf32> to vector<16x8x32xf32>
    %c0_23 = arith.constant 0 : index
    %c0_24 = arith.constant 0 : index
    %c0_25 = arith.constant 0 : index
    %24 = vector.load %arg28[%c0_23, %c0_24, %c0_25] : memref<16x8x32xf32, #tpu.memory_space<vmem>>, vector<16x8x32xf32>
    tpu.vector_store %arg28[%c0_23, %c0_24, %c0_25], %23 {strides = array<i32>} : memref<16x8x32xf32, #tpu.memory_space<vmem>>, vector<16x8x32xf32>,
    %c0_26 = arith.constant 0 : index
    %c0_27 = arith.constant 0 : index
    %25 = vector.load %arg6[%c0_26, %c0_27] : memref<32x32xbf16, #tpu.memory_space<vmem>>, vector<32x32xbf16>
    %c0_28 = arith.constant 0 : index
    %c0_29 = arith.constant 0 : index
    %26 = vector.load %arg7[%c0_28, %c0_29] : memref<32x32xbf16, #tpu.memory_space<vmem>>, vector<32x32xbf16>
    %c0_30 = arith.constant 0 : index
    %c0_31 = arith.constant 0 : index
    %27 = vector.load %arg8[%c0_30, %c0_31] : memref<32x32xbf16, #tpu.memory_space<vmem>>, vector<32x32xbf16>
    %c0_32 = arith.constant 0 : index
    %c0_33 = arith.constant 0 : index
    %28 = vector.load %arg12[%c0_32, %c0_33] : memref<1x32xf32, #tpu.memory_space<vmem>>, vector<1x32xf32>
    %29 = vector.shape_cast %28 : vector<1x32xf32> to vector<1x32xf32>
    %30 = vector.broadcast %29 : vector<1x32xf32> to vector<8x32xf32>
    %cst_34 = arith.constant 0.000000e+00 : f32
    %31 = vector.broadcast %cst_34 : f32 to vector<8x32xf32>
    %c0_i32 = arith.constant 0 : i32
    %32 = arith.truncf %31 : vector<8x32xf32> to vector<8x32xbf16>
    %cst_35 = arith.constant dense<0.000000e+00> : vector<8x32xf32>
    %33 = tpu.matmul %32, %25, %cst_35 {dimension_numbers = #tpu.dot_dimension_numbers<[1], [0], [0], [1], [0, 0, 1, 1], [], []>} : vector<8x32xbf16>, vector<32x32xbf16>, vector<8x32xf32> -> vector<8x32xf32>
    %cst_36 = arith.constant dense<0.000000e+00> : vector<8x32xf32>
    %34 = tpu.matmul %32, %26, %cst_36 {dimension_numbers = #tpu.dot_dimension_numbers<[1], [0], [0], [1], [0, 0, 1, 1], [], []>} : vector<8x32xbf16>, vector<32x32xbf16>, vector<8x32xf32> -> vector<8x32xf32>
    %cst_37 = arith.constant dense<0.000000e+00> : vector<8x32xf32>
    %35 = tpu.matmul %32, %27, %cst_37 {dimension_numbers = #tpu.dot_dimension_numbers<[1], [0], [0], [1], [0, 0, 1, 1], [], []>} : vector<8x32xbf16>, vector<32x32xbf16>, vector<8x32xf32> -> vector<8x32xf32>
    %36 = arith.index_cast %c0_i32 : i32 to index
    %c0_38 = arith.constant 0 : index
    %c0_39 = arith.constant 0 : index
    %37 = vector.load %arg26[%36, %c0_38, %c0_39] : memref<16x8x32xf32, #tpu.memory_space<vmem>>, vector<1x8x32xf32>
    %38 = vector.shape_cast %37 : vector<1x8x32xf32> to vector<8x32xf32>
    %39 = arith.addf %38, %33 : vector<8x32xf32>
    %40 = arith.negf %39 : vector<8x32xf32>
    %41 = math.exp %40 : vector<8x32xf32>
    %cst_40 = arith.constant 1.000000e+00 : f32
    %42 = vector.broadcast %cst_40 : f32 to vector<8x32xf32>
    %43 = arith.addf %42, %41 : vector<8x32xf32>
    %44 = arith.divf %42, %43 : vector<8x32xf32>
    %45 = arith.index_cast %c0_i32 : i32 to index
    %c0_41 = arith.constant 0 : index
    %c0_42 = arith.constant 0 : index
    %46 = vector.load %arg27[%45, %c0_41, %c0_42] : memref<16x8x32xf32, #tpu.memory_space<vmem>>, vector<1x8x32xf32>
    %47 = vector.shape_cast %46 : vector<1x8x32xf32> to vector<8x32xf32>
    %48 = arith.addf %47, %34 : vector<8x32xf32>
    %49 = arith.negf %48 : vector<8x32xf32>
    %50 = math.exp %49 : vector<8x32xf32>
    %cst_43 = arith.constant 1.000000e+00 : f32
    %51 = vector.broadcast %cst_43 : f32 to vector<8x32xf32>
    %52 = arith.addf %51, %50 : vector<8x32xf32>
    %53 = arith.divf %51, %52 : vector<8x32xf32>
    %54 = arith.index_cast %c0_i32 : i32 to index
    %c0_44 = arith.constant 0 : index
    %c0_45 = arith.constant 0 : index
    %55 = vector.load %arg28[%54, %c0_44, %c0_45] : memref<16x8x32xf32, #tpu.memory_space<vmem>>, vector<1x8x32xf32>
    %56 = vector.shape_cast %55 : vector<1x8x32xf32> to vector<8x32xf32>
    %57 = arith.addf %35, %30 : vector<8x32xf32>
    %58 = arith.mulf %44, %57 : vector<8x32xf32>
    %59 = arith.addf %56, %58 : vector<8x32xf32>
    %60 = math.tanh %59 : vector<8x32xf32>
    %cst_46 = arith.constant 1.000000e+00 : f32
    %61 = vector.broadcast %cst_46 : f32 to vector<8x32xf32>
    %62 = arith.subf %61, %53 : vector<8x32xf32>
    %63 = arith.mulf %62, %60 : vector<8x32xf32>
    %64 = arith.mulf %53, %31 : vector<8x32xf32>
    %65 = arith.addf %63, %64 : vector<8x32xf32>
    %66 = arith.index_cast %c0_i32 : i32 to index
    %c0_47 = arith.constant 0 : index
    %c0_48 = arith.constant 0 : index
    %67 = vector.load %arg29[%66, %c0_47, %c0_48] : memref<16x8x32xf32, #tpu.memory_space<vmem>>, vector<1x8x32xf32>
    %68 = vector.shape_cast %67 : vector<1x8x32xf32> to vector<8x32xf32>
    %69 = vector.shape_cast %65 : vector<8x32xf32> to vector<1x8x32xf32>
    tpu.vector_store %arg29[%66, %c0_47, %c0_48], %69 {strides = array<i32>} : memref<16x8x32xf32, #tpu.memory_space<vmem>>, vector<1x8x32xf32>,
    %c1_i32 = arith.constant 1 : i32
    %70 = arith.truncf %65 : vector<8x32xf32> to vector<8x32xbf16>
    %cst_49 = arith.constant dense<0.000000e+00> : vector<8x32xf32>
    %71 = tpu.matmul %70, %25, %cst_49 {dimension_numbers = #tpu.dot_dimension_numbers<[1], [0], [0], [1], [0, 0, 1, 1], [], []>} : vector<8x32xbf16>, vector<32x32xbf16>, vector<8x32xf32> -> vector<8x32xf32>
    %cst_50 = arith.constant dense<0.000000e+00> : vector<8x32xf32>
    %72 = tpu.matmul %70, %26, %cst_50 {dimension_numbers = #tpu.dot_dimension_numbers<[1], [0], [0], [1], [0, 0, 1, 1], [], []>} : vector<8x32xbf16>, vector<32x32xbf16>, vector<8x32xf32> -> vector<8x32xf32>
    %cst_51 = arith.constant dense<0.000000e+00> : vector<8x32xf32>
    %73 = tpu.matmul %70, %27, %cst_51 {dimension_numbers = #tpu.dot_dimension_numbers<[1], [0], [0], [1], [0, 0, 1, 1], [], []>} : vector<8x32xbf16>, vector<32x32xbf16>, vector<8x32xf32> -> vector<8x32xf32>
    %74 = arith.index_cast %c1_i32 : i32 to index
    %c0_52 = arith.constant 0 : index
    %c0_53 = arith.constant 0 : index
    %75 = vector.load %arg26[%74, %c0_52, %c0_53] : memref<16x8x32xf32, #tpu.memory_space<vmem>>, vector<1x8x32xf32>
    %76 = vector.shape_cast %75 : vector<1x8x32xf32> to vector<8x32xf32>
    %77 = arith.addf %76, %71 : vector<8x32xf32>
    %78 = arith.negf %77 : vector<8x32xf32>
    %79 = math.exp %78 : vector<8x32xf32>
    %cst_54 = arith.constant 1.000000e+00 : f32
    %80 = vector.broadcast %cst_54 : f32 to vector<8x32xf32>
    %81 = arith.addf %80, %79 : vector<8x32xf32>
    %82 = arith.divf %80, %81 : vector<8x32xf32>
    %83 = arith.index_cast %c1_i32 : i32 to index
    %c0_55 = arith.constant 0 : index
    %c0_56 = arith.constant 0 : index
    %84 = vector.load %arg27[%83, %c0_55, %c0_56] : memref<16x8x32xf32, #tpu.memory_space<vmem>>, vector<1x8x32xf32>
    %85 = vector.shape_cast %84 : vector<1x8x32xf32> to vector<8x32xf32>
    %86 = arith.addf %85, %72 : vector<8x32xf32>
    %87 = arith.negf %86 : vector<8x32xf32>
    %88 = math.exp %87 : vector<8x32xf32>
    %cst_57 = arith.constant 1.000000e+00 : f32
    %89 = vector.broadcast %cst_57 : f32 to vector<8x32xf32>
    %90 = arith.addf %89, %88 : vector<8x32xf32>
    %91 = arith.divf %89, %90 : vector<8x32xf32>
    %92 = arith.index_cast %c1_i32 : i32 to index
    %c0_58 = arith.constant 0 : index
    %c0_59 = arith.constant 0 : index
    %93 = vector.load %arg28[%92, %c0_58, %c0_59] : memref<16x8x32xf32, #tpu.memory_space<vmem>>, vector<1x8x32xf32>
    %94 = vector.shape_cast %93 : vector<1x8x32xf32> to vector<8x32xf32>
    %95 = arith.addf %73, %30 : vector<8x32xf32>
    %96 = arith.mulf %82, %95 : vector<8x32xf32>
    %97 = arith.addf %94, %96 : vector<8x32xf32>
    %98 = math.tanh %97 : vector<8x32xf32>
    %cst_60 = arith.constant 1.000000e+00 : f32
    %99 = vector.broadcast %cst_60 : f32 to vector<8x32xf32>
    %100 = arith.subf %99, %91 : vector<8x32xf32>
    %101 = arith.mulf %100, %98 : vector<8x32xf32>
    %102 = arith.mulf %91, %65 : vector<8x32xf32>
    %103 = arith.addf %101, %102 : vector<8x32xf32>
    %104 = arith.index_cast %c1_i32 : i32 to index
    %c0_61 = arith.constant 0 : index
    %c0_62 = arith.constant 0 : index
    %105 = vector.load %arg29[%104, %c0_61, %c0_62] : memref<16x8x32xf32, #tpu.memory_space<vmem>>, vector<1x8x32xf32>
    %106 = vector.shape_cast %105 : vector<1x8x32xf32> to vector<8x32xf32>
    %107 = vector.shape_cast %103 : vector<8x32xf32> to vector<1x8x32xf32>
    tpu.vector_store %arg29[%104, %c0_61, %c0_62], %107 {strides = array<i32>} : memref<16x8x32xf32, #tpu.memory_space<vmem>>, vector<1x8x32xf32>,
    %c2_i32 = arith.constant 2 : i32
    %108 = arith.truncf %103 : vector<8x32xf32> to vector<8x32xbf16>
    %cst_63 = arith.constant dense<0.000000e+00> : vector<8x32xf32>
    %109 = tpu.matmul %108, %25, %cst_63 {dimension_numbers = #tpu.dot_dimension_numbers<[1], [0], [0], [1], [0, 0, 1, 1], [], []>} : vector<8x32xbf16>, vector<32x32xbf16>, vector<8x32xf32> -> vector<8x32xf32>
    %cst_64 = arith.constant dense<0.000000e+00> : vector<8x32xf32>
    %110 = tpu.matmul %108, %26, %cst_64 {dimension_numbers = #tpu.dot_dimension_numbers<[1], [0], [0], [1], [0, 0, 1, 1], [], []>} : vector<8x32xbf16>, vector<32x32xbf16>, vector<8x32xf32> -> vector<8x32xf32>
    %cst_65 = arith.constant dense<0.000000e+00> : vector<8x32xf32>
    %111 = tpu.matmul %108, %27, %cst_65 {dimension_numbers = #tpu.dot_dimension_numbers<[1], [0], [0], [1], [0, 0, 1, 1], [], []>} : vector<8x32xbf16>, vector<32x32xbf16>, vector<8x32xf32> -> vector<8x32xf32>
    %112 = arith.index_cast %c2_i32 : i32 to index
    %c0_66 = arith.constant 0 : index
    %c0_67 = arith.constant 0 : index
    %113 = vector.load %arg26[%112, %c0_66, %c0_67] : memref<16x8x32xf32, #tpu.memory_space<vmem>>, vector<1x8x32xf32>
    %114 = vector.shape_cast %113 : vector<1x8x32xf32> to vector<8x32xf32>
    %115 = arith.addf %114, %109 : vector<8x32xf32>
    %116 = arith.negf %115 : vector<8x32xf32>
    %117 = math.exp %116 : vector<8x32xf32>
    %cst_68 = arith.constant 1.000000e+00 : f32
    %118 = vector.broadcast %cst_68 : f32 to vector<8x32xf32>
    %119 = arith.addf %118, %117 : vector<8x32xf32>
    %120 = arith.divf %118, %119 : vector<8x32xf32>
    %121 = arith.index_cast %c2_i32 : i32 to index
    %c0_69 = arith.constant 0 : index
    %c0_70 = arith.constant 0 : index
    %122 = vector.load %arg27[%121, %c0_69, %c0_70] : memref<16x8x32xf32, #tpu.memory_space<vmem>>, vector<1x8x32xf32>
    %123 = vector.shape_cast %122 : vector<1x8x32xf32> to vector<8x32xf32>
    %124 = arith.addf %123, %110 : vector<8x32xf32>
    %125 = arith.negf %124 : vector<8x32xf32>
    %126 = math.exp %125 : vector<8x32xf32>
    %cst_71 = arith.constant 1.000000e+00 : f32
    %127 = vector.broadcast %cst_71 : f32 to vector<8x32xf32>
    %128 = arith.addf %127, %126 : vector<8x32xf32>
    %129 = arith.divf %127, %128 : vector<8x32xf32>
    %130 = arith.index_cast %c2_i32 : i32 to index
    %c0_72 = arith.constant 0 : index
    %c0_73 = arith.constant 0 : index
    %131 = vector.load %arg28[%130, %c0_72, %c0_73] : memref<16x8x32xf32, #tpu.memory_space<vmem>>, vector<1x8x32xf32>
    %132 = vector.shape_cast %131 : vector<1x8x32xf32> to vector<8x32xf32>
    %133 = arith.addf %111, %30 : vector<8x32xf32>
    %134 = arith.mulf %120, %133 : vector<8x32xf32>
    %135 = arith.addf %132, %134 : vector<8x32xf32>
    %136 = math.tanh %135 : vector<8x32xf32>
    %cst_74 = arith.constant 1.000000e+00 : f32
    %137 = vector.broadcast %cst_74 : f32 to vector<8x32xf32>
    %138 = arith.subf %137, %129 : vector<8x32xf32>
    %139 = arith.mulf %138, %136 : vector<8x32xf32>
    %140 = arith.mulf %129, %103 : vector<8x32xf32>
    %141 = arith.addf %139, %140 : vector<8x32xf32>
    %142 = arith.index_cast %c2_i32 : i32 to index
    %c0_75 = arith.constant 0 : index
    %c0_76 = arith.constant 0 : index
    %143 = vector.load %arg29[%142, %c0_75, %c0_76] : memref<16x8x32xf32, #tpu.memory_space<vmem>>, vector<1x8x32xf32>
    %144 = vector.shape_cast %143 : vector<1x8x32xf32> to vector<8x32xf32>
    %145 = vector.shape_cast %141 : vector<8x32xf32> to vector<1x8x32xf32>
    tpu.vector_store %arg29[%142, %c0_75, %c0_76], %145 {strides = array<i32>} : memref<16x8x32xf32, #tpu.memory_space<vmem>>, vector<1x8x32xf32>,
    %c3_i32 = arith.constant 3 : i32
    %146 = arith.truncf %141 : vector<8x32xf32> to vector<8x32xbf16>
    %cst_77 = arith.constant dense<0.000000e+00> : vector<8x32xf32>
    %147 = tpu.matmul %146, %25, %cst_77 {dimension_numbers = #tpu.dot_dimension_numbers<[1], [0], [0], [1], [0, 0, 1, 1], [], []>} : vector<8x32xbf16>, vector<32x32xbf16>, vector<8x32xf32> -> vector<8x32xf32>
    %cst_78 = arith.constant dense<0.000000e+00> : vector<8x32xf32>
    %148 = tpu.matmul %146, %26, %cst_78 {dimension_numbers = #tpu.dot_dimension_numbers<[1], [0], [0], [1], [0, 0, 1, 1], [], []>} : vector<8x32xbf16>, vector<32x32xbf16>, vector<8x32xf32> -> vector<8x32xf32>
    %cst_79 = arith.constant dense<0.000000e+00> : vector<8x32xf32>
    %149 = tpu.matmul %146, %27, %cst_79 {dimension_numbers = #tpu.dot_dimension_numbers<[1], [0], [0], [1], [0, 0, 1, 1], [], []>} : vector<8x32xbf16>, vector<32x32xbf16>, vector<8x32xf32> -> vector<8x32xf32>
    %150 = arith.index_cast %c3_i32 : i32 to index
    %c0_80 = arith.constant 0 : index
    %c0_81 = arith.constant 0 : index
    %151 = vector.load %arg26[%150, %c0_80, %c0_81] : memref<16x8x32xf32, #tpu.memory_space<vmem>>, vector<1x8x32xf32>
    %152 = vector.shape_cast %151 : vector<1x8x32xf32> to vector<8x32xf32>
    %153 = arith.addf %152, %147 : vector<8x32xf32>
    %154 = arith.negf %153 : vector<8x32xf32>
    %155 = math.exp %154 : vector<8x32xf32>
    %cst_82 = arith.constant 1.000000e+00 : f32
    %156 = vector.broadcast %cst_82 : f32 to vector<8x32xf32>
    %157 = arith.addf %156, %155 : vector<8x32xf32>
    %158 = arith.divf %156, %157 : vector<8x32xf32>
    %159 = arith.index_cast %c3_i32 : i32 to index
    %c0_83 = arith.constant 0 : index
    %c0_84 = arith.constant 0 : index
    %160 = vector.load %arg27[%159, %c0_83, %c0_84] : memref<16x8x32xf32, #tpu.memory_space<vmem>>, vector<1x8x32xf32>
    %161 = vector.shape_cast %160 : vector<1x8x32xf32> to vector<8x32xf32>
    %162 = arith.addf %161, %148 : vector<8x32xf32>
    %163 = arith.negf %162 : vector<8x32xf32>
    %164 = math.exp %163 : vector<8x32xf32>
    %cst_85 = arith.constant 1.000000e+00 : f32
    %165 = vector.broadcast %cst_85 : f32 to vector<8x32xf32>
    %166 = arith.addf %165, %164 : vector<8x32xf32>
    %167 = arith.divf %165, %166 : vector<8x32xf32>
    %168 = arith.index_cast %c3_i32 : i32 to index
    %c0_86 = arith.constant 0 : index
    %c0_87 = arith.constant 0 : index
    %169 = vector.load %arg28[%168, %c0_86, %c0_87] : memref<16x8x32xf32, #tpu.memory_space<vmem>>, vector<1x8x32xf32>
    %170 = vector.shape_cast %169 : vector<1x8x32xf32> to vector<8x32xf32>
    %171 = arith.addf %149, %30 : vector<8x32xf32>
    %172 = arith.mulf %158, %171 : vector<8x32xf32>
    %173 = arith.addf %170, %172 : vector<8x32xf32>
    %174 = math.tanh %173 : vector<8x32xf32>
    %cst_88 = arith.constant 1.000000e+00 : f32
    %175 = vector.broadcast %cst_88 : f32 to vector<8x32xf32>
    %176 = arith.subf %175, %167 : vector<8x32xf32>
    %177 = arith.mulf %176, %174 : vector<8x32xf32>
    %178 = arith.mulf %167, %141 : vector<8x32xf32>
    %179 = arith.addf %177, %178 : vector<8x32xf32>
    %180 = arith.index_cast %c3_i32 : i32 to index
    %c0_89 = arith.constant 0 : index
    %c0_90 = arith.constant 0 : index
    %181 = vector.load %arg29[%180, %c0_89, %c0_90] : memref<16x8x32xf32, #tpu.memory_space<vmem>>, vector<1x8x32xf32>
    %182 = vector.shape_cast %181 : vector<1x8x32xf32> to vector<8x32xf32>
    %183 = vector.shape_cast %179 : vector<8x32xf32> to vector<1x8x32xf32>
    tpu.vector_store %arg29[%180, %c0_89, %c0_90], %183 {strides = array<i32>} : memref<16x8x32xf32, #tpu.memory_space<vmem>>, vector<1x8x32xf32>,
    %c4_i32 = arith.constant 4 : i32
    %184 = arith.truncf %179 : vector<8x32xf32> to vector<8x32xbf16>
    %cst_91 = arith.constant dense<0.000000e+00> : vector<8x32xf32>
    %185 = tpu.matmul %184, %25, %cst_91 {dimension_numbers = #tpu.dot_dimension_numbers<[1], [0], [0], [1], [0, 0, 1, 1], [], []>} : vector<8x32xbf16>, vector<32x32xbf16>, vector<8x32xf32> -> vector<8x32xf32>
    %cst_92 = arith.constant dense<0.000000e+00> : vector<8x32xf32>
    %186 = tpu.matmul %184, %26, %cst_92 {dimension_numbers = #tpu.dot_dimension_numbers<[1], [0], [0], [1], [0, 0, 1, 1], [], []>} : vector<8x32xbf16>, vector<32x32xbf16>, vector<8x32xf32> -> vector<8x32xf32>
    %cst_93 = arith.constant dense<0.000000e+00> : vector<8x32xf32>
    %187 = tpu.matmul %184, %27, %cst_93 {dimension_numbers = #tpu.dot_dimension_numbers<[1], [0], [0], [1], [0, 0, 1, 1], [], []>} : vector<8x32xbf16>, vector<32x32xbf16>, vector<8x32xf32> -> vector<8x32xf32>
    %188 = arith.index_cast %c4_i32 : i32 to index
    %c0_94 = arith.constant 0 : index
    %c0_95 = arith.constant 0 : index
    %189 = vector.load %arg26[%188, %c0_94, %c0_95] : memref<16x8x32xf32, #tpu.memory_space<vmem>>, vector<1x8x32xf32>
    %190 = vector.shape_cast %189 : vector<1x8x32xf32> to vector<8x32xf32>
    %191 = arith.addf %190, %185 : vector<8x32xf32>
    %192 = arith.negf %191 : vector<8x32xf32>
    %193 = math.exp %192 : vector<8x32xf32>
    %cst_96 = arith.constant 1.000000e+00 : f32
    %194 = vector.broadcast %cst_96 : f32 to vector<8x32xf32>
    %195 = arith.addf %194, %193 : vector<8x32xf32>
    %196 = arith.divf %194, %195 : vector<8x32xf32>
    %197 = arith.index_cast %c4_i32 : i32 to index
    %c0_97 = arith.constant 0 : index
    %c0_98 = arith.constant 0 : index
    %198 = vector.load %arg27[%197, %c0_97, %c0_98] : memref<16x8x32xf32, #tpu.memory_space<vmem>>, vector<1x8x32xf32>
    %199 = vector.shape_cast %198 : vector<1x8x32xf32> to vector<8x32xf32>
    %200 = arith.addf %199, %186 : vector<8x32xf32>
    %201 = arith.negf %200 : vector<8x32xf32>
    %202 = math.exp %201 : vector<8x32xf32>
    %cst_99 = arith.constant 1.000000e+00 : f32
    %203 = vector.broadcast %cst_99 : f32 to vector<8x32xf32>
    %204 = arith.addf %203, %202 : vector<8x32xf32>
    %205 = arith.divf %203, %204 : vector<8x32xf32>
    %206 = arith.index_cast %c4_i32 : i32 to index
    %c0_100 = arith.constant 0 : index
    %c0_101 = arith.constant 0 : index
    %207 = vector.load %arg28[%206, %c0_100, %c0_101] : memref<16x8x32xf32, #tpu.memory_space<vmem>>, vector<1x8x32xf32>
    %208 = vector.shape_cast %207 : vector<1x8x32xf32> to vector<8x32xf32>
    %209 = arith.addf %187, %30 : vector<8x32xf32>
    %210 = arith.mulf %196, %209 : vector<8x32xf32>
    %211 = arith.addf %208, %210 : vector<8x32xf32>
    %212 = math.tanh %211 : vector<8x32xf32>
    %cst_102 = arith.constant 1.000000e+00 : f32
    %213 = vector.broadcast %cst_102 : f32 to vector<8x32xf32>
    %214 = arith.subf %213, %205 : vector<8x32xf32>
    %215 = arith.mulf %214, %212 : vector<8x32xf32>
    %216 = arith.mulf %205, %179 : vector<8x32xf32>
    %217 = arith.addf %215, %216 : vector<8x32xf32>
    %218 = arith.index_cast %c4_i32 : i32 to index
    %c0_103 = arith.constant 0 : index
    %c0_104 = arith.constant 0 : index
    %219 = vector.load %arg29[%218, %c0_103, %c0_104] : memref<16x8x32xf32, #tpu.memory_space<vmem>>, vector<1x8x32xf32>
    %220 = vector.shape_cast %219 : vector<1x8x32xf32> to vector<8x32xf32>
    %221 = vector.shape_cast %217 : vector<8x32xf32> to vector<1x8x32xf32>
    tpu.vector_store %arg29[%218, %c0_103, %c0_104], %221 {strides = array<i32>} : memref<16x8x32xf32, #tpu.memory_space<vmem>>, vector<1x8x32xf32>,
    %c5_i32 = arith.constant 5 : i32
    %222 = arith.truncf %217 : vector<8x32xf32> to vector<8x32xbf16>
    %cst_105 = arith.constant dense<0.000000e+00> : vector<8x32xf32>
    %223 = tpu.matmul %222, %25, %cst_105 {dimension_numbers = #tpu.dot_dimension_numbers<[1], [0], [0], [1], [0, 0, 1, 1], [], []>} : vector<8x32xbf16>, vector<32x32xbf16>, vector<8x32xf32> -> vector<8x32xf32>
    %cst_106 = arith.constant dense<0.000000e+00> : vector<8x32xf32>
    %224 = tpu.matmul %222, %26, %cst_106 {dimension_numbers = #tpu.dot_dimension_numbers<[1], [0], [0], [1], [0, 0, 1, 1], [], []>} : vector<8x32xbf16>, vector<32x32xbf16>, vector<8x32xf32> -> vector<8x32xf32>
    %cst_107 = arith.constant dense<0.000000e+00> : vector<8x32xf32>
    %225 = tpu.matmul %222, %27, %cst_107 {dimension_numbers = #tpu.dot_dimension_numbers<[1], [0], [0], [1], [0, 0, 1, 1], [], []>} : vector<8x32xbf16>, vector<32x32xbf16>, vector<8x32xf32> -> vector<8x32xf32>
    %226 = arith.index_cast %c5_i32 : i32 to index
    %c0_108 = arith.constant 0 : index
    %c0_109 = arith.constant 0 : index
    %227 = vector.load %arg26[%226, %c0_108, %c0_109] : memref<16x8x32xf32, #tpu.memory_space<vmem>>, vector<1x8x32xf32>
    %228 = vector.shape_cast %227 : vector<1x8x32xf32> to vector<8x32xf32>
    %229 = arith.addf %228, %223 : vector<8x32xf32>
    %230 = arith.negf %229 : vector<8x32xf32>
    %231 = math.exp %230 : vector<8x32xf32>
    %cst_110 = arith.constant 1.000000e+00 : f32
    %232 = vector.broadcast %cst_110 : f32 to vector<8x32xf32>
    %233 = arith.addf %232, %231 : vector<8x32xf32>
    %234 = arith.divf %232, %233 : vector<8x32xf32>
    %235 = arith.index_cast %c5_i32 : i32 to index
    %c0_111 = arith.constant 0 : index
    %c0_112 = arith.constant 0 : index
    %236 = vector.load %arg27[%235, %c0_111, %c0_112] : memref<16x8x32xf32, #tpu.memory_space<vmem>>, vector<1x8x32xf32>
    %237 = vector.shape_cast %236 : vector<1x8x32xf32> to vector<8x32xf32>
    %238 = arith.addf %237, %224 : vector<8x32xf32>
    %239 = arith.negf %238 : vector<8x32xf32>
    %240 = math.exp %239 : vector<8x32xf32>
    %cst_113 = arith.constant 1.000000e+00 : f32
    %241 = vector.broadcast %cst_113 : f32 to vector<8x32xf32>
    %242 = arith.addf %241, %240 : vector<8x32xf32>
    %243 = arith.divf %241, %242 : vector<8x32xf32>
    %244 = arith.index_cast %c5_i32 : i32 to index
    %c0_114 = arith.constant 0 : index
    %c0_115 = arith.constant 0 : index
    %245 = vector.load %arg28[%244, %c0_114, %c0_115] : memref<16x8x32xf32, #tpu.memory_space<vmem>>, vector<1x8x32xf32>
    %246 = vector.shape_cast %245 : vector<1x8x32xf32> to vector<8x32xf32>
    %247 = arith.addf %225, %30 : vector<8x32xf32>
    %248 = arith.mulf %234, %247 : vector<8x32xf32>
    %249 = arith.addf %246, %248 : vector<8x32xf32>
    %250 = math.tanh %249 : vector<8x32xf32>
    %cst_116 = arith.constant 1.000000e+00 : f32
    %251 = vector.broadcast %cst_116 : f32 to vector<8x32xf32>
    %252 = arith.subf %251, %243 : vector<8x32xf32>
    %253 = arith.mulf %252, %250 : vector<8x32xf32>
    %254 = arith.mulf %243, %217 : vector<8x32xf32>
    %255 = arith.addf %253, %254 : vector<8x32xf32>
    %256 = arith.index_cast %c5_i32 : i32 to index
    %c0_117 = arith.constant 0 : index
    %c0_118 = arith.constant 0 : index
    %257 = vector.load %arg29[%256, %c0_117, %c0_118] : memref<16x8x32xf32, #tpu.memory_space<vmem>>, vector<1x8x32xf32>
    %258 = vector.shape_cast %257 : vector<1x8x32xf32> to vector<8x32xf32>
    %259 = vector.shape_cast %255 : vector<8x32xf32> to vector<1x8x32xf32>
    tpu.vector_store %arg29[%256, %c0_117, %c0_118], %259 {strides = array<i32>} : memref<16x8x32xf32, #tpu.memory_space<vmem>>, vector<1x8x32xf32>,
    %c6_i32 = arith.constant 6 : i32
    %260 = arith.truncf %255 : vector<8x32xf32> to vector<8x32xbf16>
    %cst_119 = arith.constant dense<0.000000e+00> : vector<8x32xf32>
    %261 = tpu.matmul %260, %25, %cst_119 {dimension_numbers = #tpu.dot_dimension_numbers<[1], [0], [0], [1], [0, 0, 1, 1], [], []>} : vector<8x32xbf16>, vector<32x32xbf16>, vector<8x32xf32> -> vector<8x32xf32>
    %cst_120 = arith.constant dense<0.000000e+00> : vector<8x32xf32>
    %262 = tpu.matmul %260, %26, %cst_120 {dimension_numbers = #tpu.dot_dimension_numbers<[1], [0], [0], [1], [0, 0, 1, 1], [], []>} : vector<8x32xbf16>, vector<32x32xbf16>, vector<8x32xf32> -> vector<8x32xf32>
    %cst_121 = arith.constant dense<0.000000e+00> : vector<8x32xf32>
    %263 = tpu.matmul %260, %27, %cst_121 {dimension_numbers = #tpu.dot_dimension_numbers<[1], [0], [0], [1], [0, 0, 1, 1], [], []>} : vector<8x32xbf16>, vector<32x32xbf16>, vector<8x32xf32> -> vector<8x32xf32>
    %264 = arith.index_cast %c6_i32 : i32 to index
    %c0_122 = arith.constant 0 : index
    %c0_123 = arith.constant 0 : index
    %265 = vector.load %arg26[%264, %c0_122, %c0_123] : memref<16x8x32xf32, #tpu.memory_space<vmem>>, vector<1x8x32xf32>
    %266 = vector.shape_cast %265 : vector<1x8x32xf32> to vector<8x32xf32>
    %267 = arith.addf %266, %261 : vector<8x32xf32>
    %268 = arith.negf %267 : vector<8x32xf32>
    %269 = math.exp %268 : vector<8x32xf32>
    %cst_124 = arith.constant 1.000000e+00 : f32
    %270 = vector.broadcast %cst_124 : f32 to vector<8x32xf32>
    %271 = arith.addf %270, %269 : vector<8x32xf32>
    %272 = arith.divf %270, %271 : vector<8x32xf32>
    %273 = arith.index_cast %c6_i32 : i32 to index
    %c0_125 = arith.constant 0 : index
    %c0_126 = arith.constant 0 : index
    %274 = vector.load %arg27[%273, %c0_125, %c0_126] : memref<16x8x32xf32, #tpu.memory_space<vmem>>, vector<1x8x32xf32>
    %275 = vector.shape_cast %274 : vector<1x8x32xf32> to vector<8x32xf32>
    %276 = arith.addf %275, %262 : vector<8x32xf32>
    %277 = arith.negf %276 : vector<8x32xf32>
    %278 = math.exp %277 : vector<8x32xf32>
    %cst_127 = arith.constant 1.000000e+00 : f32
    %279 = vector.broadcast %cst_127 : f32 to vector<8x32xf32>
    %280 = arith.addf %279, %278 : vector<8x32xf32>
    %281 = arith.divf %279, %280 : vector<8x32xf32>
    %282 = arith.index_cast %c6_i32 : i32 to index
    %c0_128 = arith.constant 0 : index
    %c0_129 = arith.constant 0 : index
    %283 = vector.load %arg28[%282, %c0_128, %c0_129] : memref<16x8x32xf32, #tpu.memory_space<vmem>>, vector<1x8x32xf32>
    %284 = vector.shape_cast %283 : vector<1x8x32xf32> to vector<8x32xf32>
    %285 = arith.addf %263, %30 : vector<8x32xf32>
    %286 = arith.mulf %272, %285 : vector<8x32xf32>
    %287 = arith.addf %284, %286 : vector<8x32xf32>
    %288 = math.tanh %287 : vector<8x32xf32>
    %cst_130 = arith.constant 1.000000e+00 : f32
    %289 = vector.broadcast %cst_130 : f32 to vector<8x32xf32>
    %290 = arith.subf %289, %281 : vector<8x32xf32>
    %291 = arith.mulf %290, %288 : vector<8x32xf32>
    %292 = arith.mulf %281, %255 : vector<8x32xf32>
    %293 = arith.addf %291, %292 : vector<8x32xf32>
    %294 = arith.index_cast %c6_i32 : i32 to index
    %c0_131 = arith.constant 0 : index
    %c0_132 = arith.constant 0 : index
    %295 = vector.load %arg29[%294, %c0_131, %c0_132] : memref<16x8x32xf32, #tpu.memory_space<vmem>>, vector<1x8x32xf32>
    %296 = vector.shape_cast %295 : vector<1x8x32xf32> to vector<8x32xf32>
    %297 = vector.shape_cast %293 : vector<8x32xf32> to vector<1x8x32xf32>
    tpu.vector_store %arg29[%294, %c0_131, %c0_132], %297 {strides = array<i32>} : memref<16x8x32xf32, #tpu.memory_space<vmem>>, vector<1x8x32xf32>,
    %c7_i32 = arith.constant 7 : i32
    %298 = arith.truncf %293 : vector<8x32xf32> to vector<8x32xbf16>
    %cst_133 = arith.constant dense<0.000000e+00> : vector<8x32xf32>
    %299 = tpu.matmul %298, %25, %cst_133 {dimension_numbers = #tpu.dot_dimension_numbers<[1], [0], [0], [1], [0, 0, 1, 1], [], []>} : vector<8x32xbf16>, vector<32x32xbf16>, vector<8x32xf32> -> vector<8x32xf32>
    %cst_134 = arith.constant dense<0.000000e+00> : vector<8x32xf32>
    %300 = tpu.matmul %298, %26, %cst_134 {dimension_numbers = #tpu.dot_dimension_numbers<[1], [0], [0], [1], [0, 0, 1, 1], [], []>} : vector<8x32xbf16>, vector<32x32xbf16>, vector<8x32xf32> -> vector<8x32xf32>
    %cst_135 = arith.constant dense<0.000000e+00> : vector<8x32xf32>
    %301 = tpu.matmul %298, %27, %cst_135 {dimension_numbers = #tpu.dot_dimension_numbers<[1], [0], [0], [1], [0, 0, 1, 1], [], []>} : vector<8x32xbf16>, vector<32x32xbf16>, vector<8x32xf32> -> vector<8x32xf32>
    %302 = arith.index_cast %c7_i32 : i32 to index
    %c0_136 = arith.constant 0 : index
    %c0_137 = arith.constant 0 : index
    %303 = vector.load %arg26[%302, %c0_136, %c0_137] : memref<16x8x32xf32, #tpu.memory_space<vmem>>, vector<1x8x32xf32>
    %304 = vector.shape_cast %303 : vector<1x8x32xf32> to vector<8x32xf32>
    %305 = arith.addf %304, %299 : vector<8x32xf32>
    %306 = arith.negf %305 : vector<8x32xf32>
    %307 = math.exp %306 : vector<8x32xf32>
    %cst_138 = arith.constant 1.000000e+00 : f32
    %308 = vector.broadcast %cst_138 : f32 to vector<8x32xf32>
    %309 = arith.addf %308, %307 : vector<8x32xf32>
    %310 = arith.divf %308, %309 : vector<8x32xf32>
    %311 = arith.index_cast %c7_i32 : i32 to index
    %c0_139 = arith.constant 0 : index
    %c0_140 = arith.constant 0 : index
    %312 = vector.load %arg27[%311, %c0_139, %c0_140] : memref<16x8x32xf32, #tpu.memory_space<vmem>>, vector<1x8x32xf32>
    %313 = vector.shape_cast %312 : vector<1x8x32xf32> to vector<8x32xf32>
    %314 = arith.addf %313, %300 : vector<8x32xf32>
    %315 = arith.negf %314 : vector<8x32xf32>
    %316 = math.exp %315 : vector<8x32xf32>
    %cst_141 = arith.constant 1.000000e+00 : f32
    %317 = vector.broadcast %cst_141 : f32 to vector<8x32xf32>
    %318 = arith.addf %317, %316 : vector<8x32xf32>
    %319 = arith.divf %317, %318 : vector<8x32xf32>
    %320 = arith.index_cast %c7_i32 : i32 to index
    %c0_142 = arith.constant 0 : index
    %c0_143 = arith.constant 0 : index
    %321 = vector.load %arg28[%320, %c0_142, %c0_143] : memref<16x8x32xf32, #tpu.memory_space<vmem>>, vector<1x8x32xf32>
    %322 = vector.shape_cast %321 : vector<1x8x32xf32> to vector<8x32xf32>
    %323 = arith.addf %301, %30 : vector<8x32xf32>
    %324 = arith.mulf %310, %323 : vector<8x32xf32>
    %325 = arith.addf %322, %324 : vector<8x32xf32>
    %326 = math.tanh %325 : vector<8x32xf32>
    %cst_144 = arith.constant 1.000000e+00 : f32
    %327 = vector.broadcast %cst_144 : f32 to vector<8x32xf32>
    %328 = arith.subf %327, %319 : vector<8x32xf32>
    %329 = arith.mulf %328, %326 : vector<8x32xf32>
    %330 = arith.mulf %319, %293 : vector<8x32xf32>
    %331 = arith.addf %329, %330 : vector<8x32xf32>
    %332 = arith.index_cast %c7_i32 : i32 to index
    %c0_145 = arith.constant 0 : index
    %c0_146 = arith.constant 0 : index
    %333 = vector.load %arg29[%332, %c0_145, %c0_146] : memref<16x8x32xf32, #tpu.memory_space<vmem>>, vector<1x8x32xf32>
    %334 = vector.shape_cast %333 : vector<1x8x32xf32> to vector<8x32xf32>
    %335 = vector.shape_cast %331 : vector<8x32xf32> to vector<1x8x32xf32>
    tpu.vector_store %arg29[%332, %c0_145, %c0_146], %335 {strides = array<i32>} : memref<16x8x32xf32, #tpu.memory_space<vmem>>, vector<1x8x32xf32>,
    %c8_i32 = arith.constant 8 : i32
    %336 = arith.truncf %331 : vector<8x32xf32> to vector<8x32xbf16>
    %cst_147 = arith.constant dense<0.000000e+00> : vector<8x32xf32>
    %337 = tpu.matmul %336, %25, %cst_147 {dimension_numbers = #tpu.dot_dimension_numbers<[1], [0], [0], [1], [0, 0, 1, 1], [], []>} : vector<8x32xbf16>, vector<32x32xbf16>, vector<8x32xf32> -> vector<8x32xf32>
    %cst_148 = arith.constant dense<0.000000e+00> : vector<8x32xf32>
    %338 = tpu.matmul %336, %26, %cst_148 {dimension_numbers = #tpu.dot_dimension_numbers<[1], [0], [0], [1], [0, 0, 1, 1], [], []>} : vector<8x32xbf16>, vector<32x32xbf16>, vector<8x32xf32> -> vector<8x32xf32>
    %cst_149 = arith.constant dense<0.000000e+00> : vector<8x32xf32>
    %339 = tpu.matmul %336, %27, %cst_149 {dimension_numbers = #tpu.dot_dimension_numbers<[1], [0], [0], [1], [0, 0, 1, 1], [], []>} : vector<8x32xbf16>, vector<32x32xbf16>, vector<8x32xf32> -> vector<8x32xf32>
    %340 = arith.index_cast %c8_i32 : i32 to index
    %c0_150 = arith.constant 0 : index
    %c0_151 = arith.constant 0 : index
    %341 = vector.load %arg26[%340, %c0_150, %c0_151] : memref<16x8x32xf32, #tpu.memory_space<vmem>>, vector<1x8x32xf32>
    %342 = vector.shape_cast %341 : vector<1x8x32xf32> to vector<8x32xf32>
    %343 = arith.addf %342, %337 : vector<8x32xf32>
    %344 = arith.negf %343 : vector<8x32xf32>
    %345 = math.exp %344 : vector<8x32xf32>
    %cst_152 = arith.constant 1.000000e+00 : f32
    %346 = vector.broadcast %cst_152 : f32 to vector<8x32xf32>
    %347 = arith.addf %346, %345 : vector<8x32xf32>
    %348 = arith.divf %346, %347 : vector<8x32xf32>
    %349 = arith.index_cast %c8_i32 : i32 to index
    %c0_153 = arith.constant 0 : index
    %c0_154 = arith.constant 0 : index
    %350 = vector.load %arg27[%349, %c0_153, %c0_154] : memref<16x8x32xf32, #tpu.memory_space<vmem>>, vector<1x8x32xf32>
    %351 = vector.shape_cast %350 : vector<1x8x32xf32> to vector<8x32xf32>
    %352 = arith.addf %351, %338 : vector<8x32xf32>
    %353 = arith.negf %352 : vector<8x32xf32>
    %354 = math.exp %353 : vector<8x32xf32>
    %cst_155 = arith.constant 1.000000e+00 : f32
    %355 = vector.broadcast %cst_155 : f32 to vector<8x32xf32>
    %356 = arith.addf %355, %354 : vector<8x32xf32>
    %357 = arith.divf %355, %356 : vector<8x32xf32>
    %358 = arith.index_cast %c8_i32 : i32 to index
    %c0_156 = arith.constant 0 : index
    %c0_157 = arith.constant 0 : index
    %359 = vector.load %arg28[%358, %c0_156, %c0_157] : memref<16x8x32xf32, #tpu.memory_space<vmem>>, vector<1x8x32xf32>
    %360 = vector.shape_cast %359 : vector<1x8x32xf32> to vector<8x32xf32>
    %361 = arith.addf %339, %30 : vector<8x32xf32>
    %362 = arith.mulf %348, %361 : vector<8x32xf32>
    %363 = arith.addf %360, %362 : vector<8x32xf32>
    %364 = math.tanh %363 : vector<8x32xf32>
    %cst_158 = arith.constant 1.000000e+00 : f32
    %365 = vector.broadcast %cst_158 : f32 to vector<8x32xf32>
    %366 = arith.subf %365, %357 : vector<8x32xf32>
    %367 = arith.mulf %366, %364 : vector<8x32xf32>
    %368 = arith.mulf %357, %331 : vector<8x32xf32>
    %369 = arith.addf %367, %368 : vector<8x32xf32>
    %370 = arith.index_cast %c8_i32 : i32 to index
    %c0_159 = arith.constant 0 : index
    %c0_160 = arith.constant 0 : index
    %371 = vector.load %arg29[%370, %c0_159, %c0_160] : memref<16x8x32xf32, #tpu.memory_space<vmem>>, vector<1x8x32xf32>
    %372 = vector.shape_cast %371 : vector<1x8x32xf32> to vector<8x32xf32>
    %373 = vector.shape_cast %369 : vector<8x32xf32> to vector<1x8x32xf32>
    tpu.vector_store %arg29[%370, %c0_159, %c0_160], %373 {strides = array<i32>} : memref<16x8x32xf32, #tpu.memory_space<vmem>>, vector<1x8x32xf32>,
    %c9_i32 = arith.constant 9 : i32
    %374 = arith.truncf %369 : vector<8x32xf32> to vector<8x32xbf16>
    %cst_161 = arith.constant dense<0.000000e+00> : vector<8x32xf32>
    %375 = tpu.matmul %374, %25, %cst_161 {dimension_numbers = #tpu.dot_dimension_numbers<[1], [0], [0], [1], [0, 0, 1, 1], [], []>} : vector<8x32xbf16>, vector<32x32xbf16>, vector<8x32xf32> -> vector<8x32xf32>
    %cst_162 = arith.constant dense<0.000000e+00> : vector<8x32xf32>
    %376 = tpu.matmul %374, %26, %cst_162 {dimension_numbers = #tpu.dot_dimension_numbers<[1], [0], [0], [1], [0, 0, 1, 1], [], []>} : vector<8x32xbf16>, vector<32x32xbf16>, vector<8x32xf32> -> vector<8x32xf32>
    %cst_163 = arith.constant dense<0.000000e+00> : vector<8x32xf32>
    %377 = tpu.matmul %374, %27, %cst_163 {dimension_numbers = #tpu.dot_dimension_numbers<[1], [0], [0], [1], [0, 0, 1, 1], [], []>} : vector<8x32xbf16>, vector<32x32xbf16>, vector<8x32xf32> -> vector<8x32xf32>
    %378 = arith.index_cast %c9_i32 : i32 to index
    %c0_164 = arith.constant 0 : index
    %c0_165 = arith.constant 0 : index
    %379 = vector.load %arg26[%378, %c0_164, %c0_165] : memref<16x8x32xf32, #tpu.memory_space<vmem>>, vector<1x8x32xf32>
    %380 = vector.shape_cast %379 : vector<1x8x32xf32> to vector<8x32xf32>
    %381 = arith.addf %380, %375 : vector<8x32xf32>
    %382 = arith.negf %381 : vector<8x32xf32>
    %383 = math.exp %382 : vector<8x32xf32>
    %cst_166 = arith.constant 1.000000e+00 : f32
    %384 = vector.broadcast %cst_166 : f32 to vector<8x32xf32>
    %385 = arith.addf %384, %383 : vector<8x32xf32>
    %386 = arith.divf %384, %385 : vector<8x32xf32>
    %387 = arith.index_cast %c9_i32 : i32 to index
    %c0_167 = arith.constant 0 : index
    %c0_168 = arith.constant 0 : index
    %388 = vector.load %arg27[%387, %c0_167, %c0_168] : memref<16x8x32xf32, #tpu.memory_space<vmem>>, vector<1x8x32xf32>
    %389 = vector.shape_cast %388 : vector<1x8x32xf32> to vector<8x32xf32>
    %390 = arith.addf %389, %376 : vector<8x32xf32>
    %391 = arith.negf %390 : vector<8x32xf32>
    %392 = math.exp %391 : vector<8x32xf32>
    %cst_169 = arith.constant 1.000000e+00 : f32
    %393 = vector.broadcast %cst_169 : f32 to vector<8x32xf32>
    %394 = arith.addf %393, %392 : vector<8x32xf32>
    %395 = arith.divf %393, %394 : vector<8x32xf32>
    %396 = arith.index_cast %c9_i32 : i32 to index
    %c0_170 = arith.constant 0 : index
    %c0_171 = arith.constant 0 : index
    %397 = vector.load %arg28[%396, %c0_170, %c0_171] : memref<16x8x32xf32, #tpu.memory_space<vmem>>, vector<1x8x32xf32>
    %398 = vector.shape_cast %397 : vector<1x8x32xf32> to vector<8x32xf32>
    %399 = arith.addf %377, %30 : vector<8x32xf32>
    %400 = arith.mulf %386, %399 : vector<8x32xf32>
    %401 = arith.addf %398, %400 : vector<8x32xf32>
    %402 = math.tanh %401 : vector<8x32xf32>
    %cst_172 = arith.constant 1.000000e+00 : f32
    %403 = vector.broadcast %cst_172 : f32 to vector<8x32xf32>
    %404 = arith.subf %403, %395 : vector<8x32xf32>
    %405 = arith.mulf %404, %402 : vector<8x32xf32>
    %406 = arith.mulf %395, %369 : vector<8x32xf32>
    %407 = arith.addf %405, %406 : vector<8x32xf32>
    %408 = arith.index_cast %c9_i32 : i32 to index
    %c0_173 = arith.constant 0 : index
    %c0_174 = arith.constant 0 : index
    %409 = vector.load %arg29[%408, %c0_173, %c0_174] : memref<16x8x32xf32, #tpu.memory_space<vmem>>, vector<1x8x32xf32>
    %410 = vector.shape_cast %409 : vector<1x8x32xf32> to vector<8x32xf32>
    %411 = vector.shape_cast %407 : vector<8x32xf32> to vector<1x8x32xf32>
    tpu.vector_store %arg29[%408, %c0_173, %c0_174], %411 {strides = array<i32>} : memref<16x8x32xf32, #tpu.memory_space<vmem>>, vector<1x8x32xf32>,
    %c10_i32 = arith.constant 10 : i32
    %412 = arith.truncf %407 : vector<8x32xf32> to vector<8x32xbf16>
    %cst_175 = arith.constant dense<0.000000e+00> : vector<8x32xf32>
    %413 = tpu.matmul %412, %25, %cst_175 {dimension_numbers = #tpu.dot_dimension_numbers<[1], [0], [0], [1], [0, 0, 1, 1], [], []>} : vector<8x32xbf16>, vector<32x32xbf16>, vector<8x32xf32> -> vector<8x32xf32>
    %cst_176 = arith.constant dense<0.000000e+00> : vector<8x32xf32>
    %414 = tpu.matmul %412, %26, %cst_176 {dimension_numbers = #tpu.dot_dimension_numbers<[1], [0], [0], [1], [0, 0, 1, 1], [], []>} : vector<8x32xbf16>, vector<32x32xbf16>, vector<8x32xf32> -> vector<8x32xf32>
    %cst_177 = arith.constant dense<0.000000e+00> : vector<8x32xf32>
    %415 = tpu.matmul %412, %27, %cst_177 {dimension_numbers = #tpu.dot_dimension_numbers<[1], [0], [0], [1], [0, 0, 1, 1], [], []>} : vector<8x32xbf16>, vector<32x32xbf16>, vector<8x32xf32> -> vector<8x32xf32>
    %416 = arith.index_cast %c10_i32 : i32 to index
    %c0_178 = arith.constant 0 : index
    %c0_179 = arith.constant 0 : index
    %417 = vector.load %arg26[%416, %c0_178, %c0_179] : memref<16x8x32xf32, #tpu.memory_space<vmem>>, vector<1x8x32xf32>
    %418 = vector.shape_cast %417 : vector<1x8x32xf32> to vector<8x32xf32>
    %419 = arith.addf %418, %413 : vector<8x32xf32>
    %420 = arith.negf %419 : vector<8x32xf32>
    %421 = math.exp %420 : vector<8x32xf32>
    %cst_180 = arith.constant 1.000000e+00 : f32
    %422 = vector.broadcast %cst_180 : f32 to vector<8x32xf32>
    %423 = arith.addf %422, %421 : vector<8x32xf32>
    %424 = arith.divf %422, %423 : vector<8x32xf32>
    %425 = arith.index_cast %c10_i32 : i32 to index
    %c0_181 = arith.constant 0 : index
    %c0_182 = arith.constant 0 : index
    %426 = vector.load %arg27[%425, %c0_181, %c0_182] : memref<16x8x32xf32, #tpu.memory_space<vmem>>, vector<1x8x32xf32>
    %427 = vector.shape_cast %426 : vector<1x8x32xf32> to vector<8x32xf32>
    %428 = arith.addf %427, %414 : vector<8x32xf32>
    %429 = arith.negf %428 : vector<8x32xf32>
    %430 = math.exp %429 : vector<8x32xf32>
    %cst_183 = arith.constant 1.000000e+00 : f32
    %431 = vector.broadcast %cst_183 : f32 to vector<8x32xf32>
    %432 = arith.addf %431, %430 : vector<8x32xf32>
    %433 = arith.divf %431, %432 : vector<8x32xf32>
    %434 = arith.index_cast %c10_i32 : i32 to index
    %c0_184 = arith.constant 0 : index
    %c0_185 = arith.constant 0 : index
    %435 = vector.load %arg28[%434, %c0_184, %c0_185] : memref<16x8x32xf32, #tpu.memory_space<vmem>>, vector<1x8x32xf32>
    %436 = vector.shape_cast %435 : vector<1x8x32xf32> to vector<8x32xf32>
    %437 = arith.addf %415, %30 : vector<8x32xf32>
    %438 = arith.mulf %424, %437 : vector<8x32xf32>
    %439 = arith.addf %436, %438 : vector<8x32xf32>
    %440 = math.tanh %439 : vector<8x32xf32>
    %cst_186 = arith.constant 1.000000e+00 : f32
    %441 = vector.broadcast %cst_186 : f32 to vector<8x32xf32>
    %442 = arith.subf %441, %433 : vector<8x32xf32>
    %443 = arith.mulf %442, %440 : vector<8x32xf32>
    %444 = arith.mulf %433, %407 : vector<8x32xf32>
    %445 = arith.addf %443, %444 : vector<8x32xf32>
    %446 = arith.index_cast %c10_i32 : i32 to index
    %c0_187 = arith.constant 0 : index
    %c0_188 = arith.constant 0 : index
    %447 = vector.load %arg29[%446, %c0_187, %c0_188] : memref<16x8x32xf32, #tpu.memory_space<vmem>>, vector<1x8x32xf32>
    %448 = vector.shape_cast %447 : vector<1x8x32xf32> to vector<8x32xf32>
    %449 = vector.shape_cast %445 : vector<8x32xf32> to vector<1x8x32xf32>
    tpu.vector_store %arg29[%446, %c0_187, %c0_188], %449 {strides = array<i32>} : memref<16x8x32xf32, #tpu.memory_space<vmem>>, vector<1x8x32xf32>,
    %c11_i32 = arith.constant 11 : i32
    %450 = arith.truncf %445 : vector<8x32xf32> to vector<8x32xbf16>
    %cst_189 = arith.constant dense<0.000000e+00> : vector<8x32xf32>
    %451 = tpu.matmul %450, %25, %cst_189 {dimension_numbers = #tpu.dot_dimension_numbers<[1], [0], [0], [1], [0, 0, 1, 1], [], []>} : vector<8x32xbf16>, vector<32x32xbf16>, vector<8x32xf32> -> vector<8x32xf32>
    %cst_190 = arith.constant dense<0.000000e+00> : vector<8x32xf32>
    %452 = tpu.matmul %450, %26, %cst_190 {dimension_numbers = #tpu.dot_dimension_numbers<[1], [0], [0], [1], [0, 0, 1, 1], [], []>} : vector<8x32xbf16>, vector<32x32xbf16>, vector<8x32xf32> -> vector<8x32xf32>
    %cst_191 = arith.constant dense<0.000000e+00> : vector<8x32xf32>
    %453 = tpu.matmul %450, %27, %cst_191 {dimension_numbers = #tpu.dot_dimension_numbers<[1], [0], [0], [1], [0, 0, 1, 1], [], []>} : vector<8x32xbf16>, vector<32x32xbf16>, vector<8x32xf32> -> vector<8x32xf32>
    %454 = arith.index_cast %c11_i32 : i32 to index
    %c0_192 = arith.constant 0 : index
    %c0_193 = arith.constant 0 : index
    %455 = vector.load %arg26[%454, %c0_192, %c0_193] : memref<16x8x32xf32, #tpu.memory_space<vmem>>, vector<1x8x32xf32>
    %456 = vector.shape_cast %455 : vector<1x8x32xf32> to vector<8x32xf32>
    %457 = arith.addf %456, %451 : vector<8x32xf32>
    %458 = arith.negf %457 : vector<8x32xf32>
    %459 = math.exp %458 : vector<8x32xf32>
    %cst_194 = arith.constant 1.000000e+00 : f32
    %460 = vector.broadcast %cst_194 : f32 to vector<8x32xf32>
    %461 = arith.addf %460, %459 : vector<8x32xf32>
    %462 = arith.divf %460, %461 : vector<8x32xf32>
    %463 = arith.index_cast %c11_i32 : i32 to index
    %c0_195 = arith.constant 0 : index
    %c0_196 = arith.constant 0 : index
    %464 = vector.load %arg27[%463, %c0_195, %c0_196] : memref<16x8x32xf32, #tpu.memory_space<vmem>>, vector<1x8x32xf32>
    %465 = vector.shape_cast %464 : vector<1x8x32xf32> to vector<8x32xf32>
    %466 = arith.addf %465, %452 : vector<8x32xf32>
    %467 = arith.negf %466 : vector<8x32xf32>
    %468 = math.exp %467 : vector<8x32xf32>
    %cst_197 = arith.constant 1.000000e+00 : f32
    %469 = vector.broadcast %cst_197 : f32 to vector<8x32xf32>
    %470 = arith.addf %469, %468 : vector<8x32xf32>
    %471 = arith.divf %469, %470 : vector<8x32xf32>
    %472 = arith.index_cast %c11_i32 : i32 to index
    %c0_198 = arith.constant 0 : index
    %c0_199 = arith.constant 0 : index
    %473 = vector.load %arg28[%472, %c0_198, %c0_199] : memref<16x8x32xf32, #tpu.memory_space<vmem>>, vector<1x8x32xf32>
    %474 = vector.shape_cast %473 : vector<1x8x32xf32> to vector<8x32xf32>
    %475 = arith.addf %453, %30 : vector<8x32xf32>
    %476 = arith.mulf %462, %475 : vector<8x32xf32>
    %477 = arith.addf %474, %476 : vector<8x32xf32>
    %478 = math.tanh %477 : vector<8x32xf32>
    %cst_200 = arith.constant 1.000000e+00 : f32
    %479 = vector.broadcast %cst_200 : f32 to vector<8x32xf32>
    %480 = arith.subf %479, %471 : vector<8x32xf32>
    %481 = arith.mulf %480, %478 : vector<8x32xf32>
    %482 = arith.mulf %471, %445 : vector<8x32xf32>
    %483 = arith.addf %481, %482 : vector<8x32xf32>
    %484 = arith.index_cast %c11_i32 : i32 to index
    %c0_201 = arith.constant 0 : index
    %c0_202 = arith.constant 0 : index
    %485 = vector.load %arg29[%484, %c0_201, %c0_202] : memref<16x8x32xf32, #tpu.memory_space<vmem>>, vector<1x8x32xf32>
    %486 = vector.shape_cast %485 : vector<1x8x32xf32> to vector<8x32xf32>
    %487 = vector.shape_cast %483 : vector<8x32xf32> to vector<1x8x32xf32>
    tpu.vector_store %arg29[%484, %c0_201, %c0_202], %487 {strides = array<i32>} : memref<16x8x32xf32, #tpu.memory_space<vmem>>, vector<1x8x32xf32>,
    %c12_i32 = arith.constant 12 : i32
    %488 = arith.truncf %483 : vector<8x32xf32> to vector<8x32xbf16>
    %cst_203 = arith.constant dense<0.000000e+00> : vector<8x32xf32>
    %489 = tpu.matmul %488, %25, %cst_203 {dimension_numbers = #tpu.dot_dimension_numbers<[1], [0], [0], [1], [0, 0, 1, 1], [], []>} : vector<8x32xbf16>, vector<32x32xbf16>, vector<8x32xf32> -> vector<8x32xf32>
    %cst_204 = arith.constant dense<0.000000e+00> : vector<8x32xf32>
    %490 = tpu.matmul %488, %26, %cst_204 {dimension_numbers = #tpu.dot_dimension_numbers<[1], [0], [0], [1], [0, 0, 1, 1], [], []>} : vector<8x32xbf16>, vector<32x32xbf16>, vector<8x32xf32> -> vector<8x32xf32>
    %cst_205 = arith.constant dense<0.000000e+00> : vector<8x32xf32>
    %491 = tpu.matmul %488, %27, %cst_205 {dimension_numbers = #tpu.dot_dimension_numbers<[1], [0], [0], [1], [0, 0, 1, 1], [], []>} : vector<8x32xbf16>, vector<32x32xbf16>, vector<8x32xf32> -> vector<8x32xf32>
    %492 = arith.index_cast %c12_i32 : i32 to index
    %c0_206 = arith.constant 0 : index
    %c0_207 = arith.constant 0 : index
    %493 = vector.load %arg26[%492, %c0_206, %c0_207] : memref<16x8x32xf32, #tpu.memory_space<vmem>>, vector<1x8x32xf32>
    %494 = vector.shape_cast %493 : vector<1x8x32xf32> to vector<8x32xf32>
    %495 = arith.addf %494, %489 : vector<8x32xf32>
    %496 = arith.negf %495 : vector<8x32xf32>
    %497 = math.exp %496 : vector<8x32xf32>
    %cst_208 = arith.constant 1.000000e+00 : f32
    %498 = vector.broadcast %cst_208 : f32 to vector<8x32xf32>
    %499 = arith.addf %498, %497 : vector<8x32xf32>
    %500 = arith.divf %498, %499 : vector<8x32xf32>
    %501 = arith.index_cast %c12_i32 : i32 to index
    %c0_209 = arith.constant 0 : index
    %c0_210 = arith.constant 0 : index
    %502 = vector.load %arg27[%501, %c0_209, %c0_210] : memref<16x8x32xf32, #tpu.memory_space<vmem>>, vector<1x8x32xf32>
    %503 = vector.shape_cast %502 : vector<1x8x32xf32> to vector<8x32xf32>
    %504 = arith.addf %503, %490 : vector<8x32xf32>
    %505 = arith.negf %504 : vector<8x32xf32>
    %506 = math.exp %505 : vector<8x32xf32>
    %cst_211 = arith.constant 1.000000e+00 : f32
    %507 = vector.broadcast %cst_211 : f32 to vector<8x32xf32>
    %508 = arith.addf %507, %506 : vector<8x32xf32>
    %509 = arith.divf %507, %508 : vector<8x32xf32>
    %510 = arith.index_cast %c12_i32 : i32 to index
    %c0_212 = arith.constant 0 : index
    %c0_213 = arith.constant 0 : index
    %511 = vector.load %arg28[%510, %c0_212, %c0_213] : memref<16x8x32xf32, #tpu.memory_space<vmem>>, vector<1x8x32xf32>
    %512 = vector.shape_cast %511 : vector<1x8x32xf32> to vector<8x32xf32>
    %513 = arith.addf %491, %30 : vector<8x32xf32>
    %514 = arith.mulf %500, %513 : vector<8x32xf32>
    %515 = arith.addf %512, %514 : vector<8x32xf32>
    %516 = math.tanh %515 : vector<8x32xf32>
    %cst_214 = arith.constant 1.000000e+00 : f32
    %517 = vector.broadcast %cst_214 : f32 to vector<8x32xf32>
    %518 = arith.subf %517, %509 : vector<8x32xf32>
    %519 = arith.mulf %518, %516 : vector<8x32xf32>
    %520 = arith.mulf %509, %483 : vector<8x32xf32>
    %521 = arith.addf %519, %520 : vector<8x32xf32>
    %522 = arith.index_cast %c12_i32 : i32 to index
    %c0_215 = arith.constant 0 : index
    %c0_216 = arith.constant 0 : index
    %523 = vector.load %arg29[%522, %c0_215, %c0_216] : memref<16x8x32xf32, #tpu.memory_space<vmem>>, vector<1x8x32xf32>
    %524 = vector.shape_cast %523 : vector<1x8x32xf32> to vector<8x32xf32>
    %525 = vector.shape_cast %521 : vector<8x32xf32> to vector<1x8x32xf32>
    tpu.vector_store %arg29[%522, %c0_215, %c0_216], %525 {strides = array<i32>} : memref<16x8x32xf32, #tpu.memory_space<vmem>>, vector<1x8x32xf32>,
    %c13_i32 = arith.constant 13 : i32
    %526 = arith.truncf %521 : vector<8x32xf32> to vector<8x32xbf16>
    %cst_217 = arith.constant dense<0.000000e+00> : vector<8x32xf32>
    %527 = tpu.matmul %526, %25, %cst_217 {dimension_numbers = #tpu.dot_dimension_numbers<[1], [0], [0], [1], [0, 0, 1, 1], [], []>} : vector<8x32xbf16>, vector<32x32xbf16>, vector<8x32xf32> -> vector<8x32xf32>
    %cst_218 = arith.constant dense<0.000000e+00> : vector<8x32xf32>
    %528 = tpu.matmul %526, %26, %cst_218 {dimension_numbers = #tpu.dot_dimension_numbers<[1], [0], [0], [1], [0, 0, 1, 1], [], []>} : vector<8x32xbf16>, vector<32x32xbf16>, vector<8x32xf32> -> vector<8x32xf32>
    %cst_219 = arith.constant dense<0.000000e+00> : vector<8x32xf32>
    %529 = tpu.matmul %526, %27, %cst_219 {dimension_numbers = #tpu.dot_dimension_numbers<[1], [0], [0], [1], [0, 0, 1, 1], [], []>} : vector<8x32xbf16>, vector<32x32xbf16>, vector<8x32xf32> -> vector<8x32xf32>
    %530 = arith.index_cast %c13_i32 : i32 to index
    %c0_220 = arith.constant 0 : index
    %c0_221 = arith.constant 0 : index
    %531 = vector.load %arg26[%530, %c0_220, %c0_221] : memref<16x8x32xf32, #tpu.memory_space<vmem>>, vector<1x8x32xf32>
    %532 = vector.shape_cast %531 : vector<1x8x32xf32> to vector<8x32xf32>
    %533 = arith.addf %532, %527 : vector<8x32xf32>
    %534 = arith.negf %533 : vector<8x32xf32>
    %535 = math.exp %534 : vector<8x32xf32>
    %cst_222 = arith.constant 1.000000e+00 : f32
    %536 = vector.broadcast %cst_222 : f32 to vector<8x32xf32>
    %537 = arith.addf %536, %535 : vector<8x32xf32>
    %538 = arith.divf %536, %537 : vector<8x32xf32>
    %539 = arith.index_cast %c13_i32 : i32 to index
    %c0_223 = arith.constant 0 : index
    %c0_224 = arith.constant 0 : index
    %540 = vector.load %arg27[%539, %c0_223, %c0_224] : memref<16x8x32xf32, #tpu.memory_space<vmem>>, vector<1x8x32xf32>
    %541 = vector.shape_cast %540 : vector<1x8x32xf32> to vector<8x32xf32>
    %542 = arith.addf %541, %528 : vector<8x32xf32>
    %543 = arith.negf %542 : vector<8x32xf32>
    %544 = math.exp %543 : vector<8x32xf32>
    %cst_225 = arith.constant 1.000000e+00 : f32
    %545 = vector.broadcast %cst_225 : f32 to vector<8x32xf32>
    %546 = arith.addf %545, %544 : vector<8x32xf32>
    %547 = arith.divf %545, %546 : vector<8x32xf32>
    %548 = arith.index_cast %c13_i32 : i32 to index
    %c0_226 = arith.constant 0 : index
    %c0_227 = arith.constant 0 : index
    %549 = vector.load %arg28[%548, %c0_226, %c0_227] : memref<16x8x32xf32, #tpu.memory_space<vmem>>, vector<1x8x32xf32>
    %550 = vector.shape_cast %549 : vector<1x8x32xf32> to vector<8x32xf32>
    %551 = arith.addf %529, %30 : vector<8x32xf32>
    %552 = arith.mulf %538, %551 : vector<8x32xf32>
    %553 = arith.addf %550, %552 : vector<8x32xf32>
    %554 = math.tanh %553 : vector<8x32xf32>
    %cst_228 = arith.constant 1.000000e+00 : f32
    %555 = vector.broadcast %cst_228 : f32 to vector<8x32xf32>
    %556 = arith.subf %555, %547 : vector<8x32xf32>
    %557 = arith.mulf %556, %554 : vector<8x32xf32>
    %558 = arith.mulf %547, %521 : vector<8x32xf32>
    %559 = arith.addf %557, %558 : vector<8x32xf32>
    %560 = arith.index_cast %c13_i32 : i32 to index
    %c0_229 = arith.constant 0 : index
    %c0_230 = arith.constant 0 : index
    %561 = vector.load %arg29[%560, %c0_229, %c0_230] : memref<16x8x32xf32, #tpu.memory_space<vmem>>, vector<1x8x32xf32>
    %562 = vector.shape_cast %561 : vector<1x8x32xf32> to vector<8x32xf32>
    %563 = vector.shape_cast %559 : vector<8x32xf32> to vector<1x8x32xf32>
    tpu.vector_store %arg29[%560, %c0_229, %c0_230], %563 {strides = array<i32>} : memref<16x8x32xf32, #tpu.memory_space<vmem>>, vector<1x8x32xf32>,
    %c14_i32 = arith.constant 14 : i32
    %564 = arith.truncf %559 : vector<8x32xf32> to vector<8x32xbf16>
    %cst_231 = arith.constant dense<0.000000e+00> : vector<8x32xf32>
    %565 = tpu.matmul %564, %25, %cst_231 {dimension_numbers = #tpu.dot_dimension_numbers<[1], [0], [0], [1], [0, 0, 1, 1], [], []>} : vector<8x32xbf16>, vector<32x32xbf16>, vector<8x32xf32> -> vector<8x32xf32>
    %cst_232 = arith.constant dense<0.000000e+00> : vector<8x32xf32>
    %566 = tpu.matmul %564, %26, %cst_232 {dimension_numbers = #tpu.dot_dimension_numbers<[1], [0], [0], [1], [0, 0, 1, 1], [], []>} : vector<8x32xbf16>, vector<32x32xbf16>, vector<8x32xf32> -> vector<8x32xf32>
    %cst_233 = arith.constant dense<0.000000e+00> : vector<8x32xf32>
    %567 = tpu.matmul %564, %27, %cst_233 {dimension_numbers = #tpu.dot_dimension_numbers<[1], [0], [0], [1], [0, 0, 1, 1], [], []>} : vector<8x32xbf16>, vector<32x32xbf16>, vector<8x32xf32> -> vector<8x32xf32>
    %568 = arith.index_cast %c14_i32 : i32 to index
    %c0_234 = arith.constant 0 : index
    %c0_235 = arith.constant 0 : index
    %569 = vector.load %arg26[%568, %c0_234, %c0_235] : memref<16x8x32xf32, #tpu.memory_space<vmem>>, vector<1x8x32xf32>
    %570 = vector.shape_cast %569 : vector<1x8x32xf32> to vector<8x32xf32>
    %571 = arith.addf %570, %565 : vector<8x32xf32>
    %572 = arith.negf %571 : vector<8x32xf32>
    %573 = math.exp %572 : vector<8x32xf32>
    %cst_236 = arith.constant 1.000000e+00 : f32
    %574 = vector.broadcast %cst_236 : f32 to vector<8x32xf32>
    %575 = arith.addf %574, %573 : vector<8x32xf32>
    %576 = arith.divf %574, %575 : vector<8x32xf32>
    %577 = arith.index_cast %c14_i32 : i32 to index
    %c0_237 = arith.constant 0 : index
    %c0_238 = arith.constant 0 : index
    %578 = vector.load %arg27[%577, %c0_237, %c0_238] : memref<16x8x32xf32, #tpu.memory_space<vmem>>, vector<1x8x32xf32>
    %579 = vector.shape_cast %578 : vector<1x8x32xf32> to vector<8x32xf32>
    %580 = arith.addf %579, %566 : vector<8x32xf32>
    %581 = arith.negf %580 : vector<8x32xf32>
    %582 = math.exp %581 : vector<8x32xf32>
    %cst_239 = arith.constant 1.000000e+00 : f32
    %583 = vector.broadcast %cst_239 : f32 to vector<8x32xf32>
    %584 = arith.addf %583, %582 : vector<8x32xf32>
    %585 = arith.divf %583, %584 : vector<8x32xf32>
    %586 = arith.index_cast %c14_i32 : i32 to index
    %c0_240 = arith.constant 0 : index
    %c0_241 = arith.constant 0 : index
    %587 = vector.load %arg28[%586, %c0_240, %c0_241] : memref<16x8x32xf32, #tpu.memory_space<vmem>>, vector<1x8x32xf32>
    %588 = vector.shape_cast %587 : vector<1x8x32xf32> to vector<8x32xf32>
    %589 = arith.addf %567, %30 : vector<8x32xf32>
    %590 = arith.mulf %576, %589 : vector<8x32xf32>
    %591 = arith.addf %588, %590 : vector<8x32xf32>
    %592 = math.tanh %591 : vector<8x32xf32>
    %cst_242 = arith.constant 1.000000e+00 : f32
    %593 = vector.broadcast %cst_242 : f32 to vector<8x32xf32>
    %594 = arith.subf %593, %585 : vector<8x32xf32>
    %595 = arith.mulf %594, %592 : vector<8x32xf32>
    %596 = arith.mulf %585, %559 : vector<8x32xf32>
    %597 = arith.addf %595, %596 : vector<8x32xf32>
    %598 = arith.index_cast %c14_i32 : i32 to index
    %c0_243 = arith.constant 0 : index
    %c0_244 = arith.constant 0 : index
    %599 = vector.load %arg29[%598, %c0_243, %c0_244] : memref<16x8x32xf32, #tpu.memory_space<vmem>>, vector<1x8x32xf32>
    %600 = vector.shape_cast %599 : vector<1x8x32xf32> to vector<8x32xf32>
    %601 = vector.shape_cast %597 : vector<8x32xf32> to vector<1x8x32xf32>
    tpu.vector_store %arg29[%598, %c0_243, %c0_244], %601 {strides = array<i32>} : memref<16x8x32xf32, #tpu.memory_space<vmem>>, vector<1x8x32xf32>,
    %c15_i32 = arith.constant 15 : i32
    %602 = arith.truncf %597 : vector<8x32xf32> to vector<8x32xbf16>
    %cst_245 = arith.constant dense<0.000000e+00> : vector<8x32xf32>
    %603 = tpu.matmul %602, %25, %cst_245 {dimension_numbers = #tpu.dot_dimension_numbers<[1], [0], [0], [1], [0, 0, 1, 1], [], []>} : vector<8x32xbf16>, vector<32x32xbf16>, vector<8x32xf32> -> vector<8x32xf32>
    %cst_246 = arith.constant dense<0.000000e+00> : vector<8x32xf32>
    %604 = tpu.matmul %602, %26, %cst_246 {dimension_numbers = #tpu.dot_dimension_numbers<[1], [0], [0], [1], [0, 0, 1, 1], [], []>} : vector<8x32xbf16>, vector<32x32xbf16>, vector<8x32xf32> -> vector<8x32xf32>
    %cst_247 = arith.constant dense<0.000000e+00> : vector<8x32xf32>
    %605 = tpu.matmul %602, %27, %cst_247 {dimension_numbers = #tpu.dot_dimension_numbers<[1], [0], [0], [1], [0, 0, 1, 1], [], []>} : vector<8x32xbf16>, vector<32x32xbf16>, vector<8x32xf32> -> vector<8x32xf32>
    %606 = arith.index_cast %c15_i32 : i32 to index
    %c0_248 = arith.constant 0 : index
    %c0_249 = arith.constant 0 : index
    %607 = vector.load %arg26[%606, %c0_248, %c0_249] : memref<16x8x32xf32, #tpu.memory_space<vmem>>, vector<1x8x32xf32>
    %608 = vector.shape_cast %607 : vector<1x8x32xf32> to vector<8x32xf32>
    %609 = arith.addf %608, %603 : vector<8x32xf32>
    %610 = arith.negf %609 : vector<8x32xf32>
    %611 = math.exp %610 : vector<8x32xf32>
    %cst_250 = arith.constant 1.000000e+00 : f32
    %612 = vector.broadcast %cst_250 : f32 to vector<8x32xf32>
    %613 = arith.addf %612, %611 : vector<8x32xf32>
    %614 = arith.divf %612, %613 : vector<8x32xf32>
    %615 = arith.index_cast %c15_i32 : i32 to index
    %c0_251 = arith.constant 0 : index
    %c0_252 = arith.constant 0 : index
    %616 = vector.load %arg27[%615, %c0_251, %c0_252] : memref<16x8x32xf32, #tpu.memory_space<vmem>>, vector<1x8x32xf32>
    %617 = vector.shape_cast %616 : vector<1x8x32xf32> to vector<8x32xf32>
    %618 = arith.addf %617, %604 : vector<8x32xf32>
    %619 = arith.negf %618 : vector<8x32xf32>
    %620 = math.exp %619 : vector<8x32xf32>
    %cst_253 = arith.constant 1.000000e+00 : f32
    %621 = vector.broadcast %cst_253 : f32 to vector<8x32xf32>
    %622 = arith.addf %621, %620 : vector<8x32xf32>
    %623 = arith.divf %621, %622 : vector<8x32xf32>
    %624 = arith.index_cast %c15_i32 : i32 to index
    %c0_254 = arith.constant 0 : index
    %c0_255 = arith.constant 0 : index
    %625 = vector.load %arg28[%624, %c0_254, %c0_255] : memref<16x8x32xf32, #tpu.memory_space<vmem>>, vector<1x8x32xf32>
    %626 = vector.shape_cast %625 : vector<1x8x32xf32> to vector<8x32xf32>
    %627 = arith.addf %605, %30 : vector<8x32xf32>
    %628 = arith.mulf %614, %627 : vector<8x32xf32>
    %629 = arith.addf %626, %628 : vector<8x32xf32>
    %630 = math.tanh %629 : vector<8x32xf32>
    %cst_256 = arith.constant 1.000000e+00 : f32
    %631 = vector.broadcast %cst_256 : f32 to vector<8x32xf32>
    %632 = arith.subf %631, %623 : vector<8x32xf32>
    %633 = arith.mulf %632, %630 : vector<8x32xf32>
    %634 = arith.mulf %623, %597 : vector<8x32xf32>
    %635 = arith.addf %633, %634 : vector<8x32xf32>
    %636 = arith.index_cast %c15_i32 : i32 to index
    %c0_257 = arith.constant 0 : index
    %c0_258 = arith.constant 0 : index
    %637 = vector.load %arg29[%636, %c0_257, %c0_258] : memref<16x8x32xf32, #tpu.memory_space<vmem>>, vector<1x8x32xf32>
    %638 = vector.shape_cast %637 : vector<1x8x32xf32> to vector<8x32xf32>
    %639 = vector.shape_cast %635 : vector<8x32xf32> to vector<1x8x32xf32>
    tpu.vector_store %arg29[%636, %c0_257, %c0_258], %639 {strides = array<i32>} : memref<16x8x32xf32, #tpu.memory_space<vmem>>, vector<1x8x32xf32>,
    %c16_i32 = arith.constant 16 : i32
    %c0_259 = arith.constant 0 : index
    %c0_260 = arith.constant 0 : index
    %c0_261 = arith.constant 0 : index
    %640 = vector.load %arg29[%c0_259, %c0_260, %c0_261] : memref<16x8x32xf32, #tpu.memory_space<vmem>>, vector<16x8x32xf32>
    %641 = vector.shape_cast %640 : vector<16x8x32xf32> to vector<128x32xf32>
    %642 = arith.truncf %641 : vector<128x32xf32> to vector<128x32xbf16>
    %c0_262 = arith.constant 0 : index
    %c0_263 = arith.constant 0 : index
    %643 = vector.load %arg13[%c0_262, %c0_263] : memref<32x32xbf16, #tpu.memory_space<vmem>>, vector<32x32xbf16>
    %cst_264 = arith.constant dense<0.000000e+00> : vector<128x32xf32>
    %644 = tpu.matmul %642, %643, %cst_264 {dimension_numbers = #tpu.dot_dimension_numbers<[1], [0], [0], [1], [0, 0, 1, 1], [], []>} : vector<128x32xbf16>, vector<32x32xbf16>, vector<128x32xf32> -> vector<128x32xf32>
    %c0_265 = arith.constant 0 : index
    %c0_266 = arith.constant 0 : index
    %645 = vector.load %arg19[%c0_265, %c0_266] : memref<1x32xf32, #tpu.memory_space<vmem>>, vector<1x32xf32>
    %646 = vector.broadcast %645 : vector<1x32xf32> to vector<128x32xf32>
    %647 = arith.addf %644, %646 : vector<128x32xf32>
    %c0_267 = arith.constant 0 : index
    %c0_268 = arith.constant 0 : index
    %648 = vector.load %arg14[%c0_267, %c0_268] : memref<32x32xbf16, #tpu.memory_space<vmem>>, vector<32x32xbf16>
    %cst_269 = arith.constant dense<0.000000e+00> : vector<128x32xf32>
    %649 = tpu.matmul %642, %648, %cst_269 {dimension_numbers = #tpu.dot_dimension_numbers<[1], [0], [0], [1], [0, 0, 1, 1], [], []>} : vector<128x32xbf16>, vector<32x32xbf16>, vector<128x32xf32> -> vector<128x32xf32>
    %c0_270 = arith.constant 0 : index
    %c0_271 = arith.constant 0 : index
    %650 = vector.load %arg20[%c0_270, %c0_271] : memref<1x32xf32, #tpu.memory_space<vmem>>, vector<1x32xf32>
    %651 = vector.broadcast %650 : vector<1x32xf32> to vector<128x32xf32>
    %652 = arith.addf %649, %651 : vector<128x32xf32>
    %c0_272 = arith.constant 0 : index
    %c0_273 = arith.constant 0 : index
    %653 = vector.load %arg15[%c0_272, %c0_273] : memref<32x32xbf16, #tpu.memory_space<vmem>>, vector<32x32xbf16>
    %cst_274 = arith.constant dense<0.000000e+00> : vector<128x32xf32>
    %654 = tpu.matmul %642, %653, %cst_274 {dimension_numbers = #tpu.dot_dimension_numbers<[1], [0], [0], [1], [0, 0, 1, 1], [], []>} : vector<128x32xbf16>, vector<32x32xbf16>, vector<128x32xf32> -> vector<128x32xf32>
    %c0_275 = arith.constant 0 : index
    %c0_276 = arith.constant 0 : index
    %655 = vector.load %arg21[%c0_275, %c0_276] : memref<1x32xf32, #tpu.memory_space<vmem>>, vector<1x32xf32>
    %656 = vector.broadcast %655 : vector<1x32xf32> to vector<128x32xf32>
    %657 = arith.addf %654, %656 : vector<128x32xf32>
    %658 = vector.shape_cast %647 : vector<128x32xf32> to vector<16x8x32xf32>
    %c0_277 = arith.constant 0 : index
    %c0_278 = arith.constant 0 : index
    %c0_279 = arith.constant 0 : index
    %659 = vector.load %arg26[%c0_277, %c0_278, %c0_279] : memref<16x8x32xf32, #tpu.memory_space<vmem>>, vector<16x8x32xf32>
    tpu.vector_store %arg26[%c0_277, %c0_278, %c0_279], %658 {strides = array<i32>} : memref<16x8x32xf32, #tpu.memory_space<vmem>>, vector<16x8x32xf32>,
    %660 = vector.shape_cast %652 : vector<128x32xf32> to vector<16x8x32xf32>
    %c0_280 = arith.constant 0 : index
    %c0_281 = arith.constant 0 : index
    %c0_282 = arith.constant 0 : index
    %661 = vector.load %arg27[%c0_280, %c0_281, %c0_282] : memref<16x8x32xf32, #tpu.memory_space<vmem>>, vector<16x8x32xf32>
    tpu.vector_store %arg27[%c0_280, %c0_281, %c0_282], %660 {strides = array<i32>} : memref<16x8x32xf32, #tpu.memory_space<vmem>>, vector<16x8x32xf32>,
    %662 = vector.shape_cast %657 : vector<128x32xf32> to vector<16x8x32xf32>
    %c0_283 = arith.constant 0 : index
    %c0_284 = arith.constant 0 : index
    %c0_285 = arith.constant 0 : index
    %663 = vector.load %arg28[%c0_283, %c0_284, %c0_285] : memref<16x8x32xf32, #tpu.memory_space<vmem>>, vector<16x8x32xf32>
    tpu.vector_store %arg28[%c0_283, %c0_284, %c0_285], %662 {strides = array<i32>} : memref<16x8x32xf32, #tpu.memory_space<vmem>>, vector<16x8x32xf32>,
    %c0_286 = arith.constant 0 : index
    %c0_287 = arith.constant 0 : index
    %664 = vector.load %arg16[%c0_286, %c0_287] : memref<32x32xbf16, #tpu.memory_space<vmem>>, vector<32x32xbf16>
    %c0_288 = arith.constant 0 : index
    %c0_289 = arith.constant 0 : index
    %665 = vector.load %arg17[%c0_288, %c0_289] : memref<32x32xbf16, #tpu.memory_space<vmem>>, vector<32x32xbf16>
    %c0_290 = arith.constant 0 : index
    %c0_291 = arith.constant 0 : index
    %666 = vector.load %arg18[%c0_290, %c0_291] : memref<32x32xbf16, #tpu.memory_space<vmem>>, vector<32x32xbf16>
    %c0_292 = arith.constant 0 : index
    %c0_293 = arith.constant 0 : index
    %667 = vector.load %arg22[%c0_292, %c0_293] : memref<1x32xf32, #tpu.memory_space<vmem>>, vector<1x32xf32>
    %668 = vector.shape_cast %667 : vector<1x32xf32> to vector<1x32xf32>
    %669 = vector.broadcast %668 : vector<1x32xf32> to vector<8x32xf32>
    %cst_294 = arith.constant 0.000000e+00 : f32
    %670 = vector.broadcast %cst_294 : f32 to vector<8x32xf32>
    %c0_i32_295 = arith.constant 0 : i32
    %671 = arith.truncf %670 : vector<8x32xf32> to vector<8x32xbf16>
    %cst_296 = arith.constant dense<0.000000e+00> : vector<8x32xf32>
    %672 = tpu.matmul %671, %664, %cst_296 {dimension_numbers = #tpu.dot_dimension_numbers<[1], [0], [0], [1], [0, 0, 1, 1], [], []>} : vector<8x32xbf16>, vector<32x32xbf16>, vector<8x32xf32> -> vector<8x32xf32>
    %cst_297 = arith.constant dense<0.000000e+00> : vector<8x32xf32>
    %673 = tpu.matmul %671, %665, %cst_297 {dimension_numbers = #tpu.dot_dimension_numbers<[1], [0], [0], [1], [0, 0, 1, 1], [], []>} : vector<8x32xbf16>, vector<32x32xbf16>, vector<8x32xf32> -> vector<8x32xf32>
    %cst_298 = arith.constant dense<0.000000e+00> : vector<8x32xf32>
    %674 = tpu.matmul %671, %666, %cst_298 {dimension_numbers = #tpu.dot_dimension_numbers<[1], [0], [0], [1], [0, 0, 1, 1], [], []>} : vector<8x32xbf16>, vector<32x32xbf16>, vector<8x32xf32> -> vector<8x32xf32>
    %675 = arith.index_cast %c0_i32_295 : i32 to index
    %c0_299 = arith.constant 0 : index
    %c0_300 = arith.constant 0 : index
    %676 = vector.load %arg26[%675, %c0_299, %c0_300] : memref<16x8x32xf32, #tpu.memory_space<vmem>>, vector<1x8x32xf32>
    %677 = vector.shape_cast %676 : vector<1x8x32xf32> to vector<8x32xf32>
    %678 = arith.addf %677, %672 : vector<8x32xf32>
    %679 = arith.negf %678 : vector<8x32xf32>
    %680 = math.exp %679 : vector<8x32xf32>
    %cst_301 = arith.constant 1.000000e+00 : f32
    %681 = vector.broadcast %cst_301 : f32 to vector<8x32xf32>
    %682 = arith.addf %681, %680 : vector<8x32xf32>
    %683 = arith.divf %681, %682 : vector<8x32xf32>
    %684 = arith.index_cast %c0_i32_295 : i32 to index
    %c0_302 = arith.constant 0 : index
    %c0_303 = arith.constant 0 : index
    %685 = vector.load %arg27[%684, %c0_302, %c0_303] : memref<16x8x32xf32, #tpu.memory_space<vmem>>, vector<1x8x32xf32>
    %686 = vector.shape_cast %685 : vector<1x8x32xf32> to vector<8x32xf32>
    %687 = arith.addf %686, %673 : vector<8x32xf32>
    %688 = arith.negf %687 : vector<8x32xf32>
    %689 = math.exp %688 : vector<8x32xf32>
    %cst_304 = arith.constant 1.000000e+00 : f32
    %690 = vector.broadcast %cst_304 : f32 to vector<8x32xf32>
    %691 = arith.addf %690, %689 : vector<8x32xf32>
    %692 = arith.divf %690, %691 : vector<8x32xf32>
    %693 = arith.index_cast %c0_i32_295 : i32 to index
    %c0_305 = arith.constant 0 : index
    %c0_306 = arith.constant 0 : index
    %694 = vector.load %arg28[%693, %c0_305, %c0_306] : memref<16x8x32xf32, #tpu.memory_space<vmem>>, vector<1x8x32xf32>
    %695 = vector.shape_cast %694 : vector<1x8x32xf32> to vector<8x32xf32>
    %696 = arith.addf %674, %669 : vector<8x32xf32>
    %697 = arith.mulf %683, %696 : vector<8x32xf32>
    %698 = arith.addf %695, %697 : vector<8x32xf32>
    %699 = math.tanh %698 : vector<8x32xf32>
    %cst_307 = arith.constant 1.000000e+00 : f32
    %700 = vector.broadcast %cst_307 : f32 to vector<8x32xf32>
    %701 = arith.subf %700, %692 : vector<8x32xf32>
    %702 = arith.mulf %701, %699 : vector<8x32xf32>
    %703 = arith.mulf %692, %670 : vector<8x32xf32>
    %704 = arith.addf %702, %703 : vector<8x32xf32>
    %705 = arith.index_cast %c0_i32_295 : i32 to index
    %c0_308 = arith.constant 0 : index
    %c0_309 = arith.constant 0 : index
    %706 = vector.load %arg29[%705, %c0_308, %c0_309] : memref<16x8x32xf32, #tpu.memory_space<vmem>>, vector<1x8x32xf32>
    %707 = vector.shape_cast %706 : vector<1x8x32xf32> to vector<8x32xf32>
    %708 = vector.shape_cast %704 : vector<8x32xf32> to vector<1x8x32xf32>
    tpu.vector_store %arg29[%705, %c0_308, %c0_309], %708 {strides = array<i32>} : memref<16x8x32xf32, #tpu.memory_space<vmem>>, vector<1x8x32xf32>,
    %c1_i32_310 = arith.constant 1 : i32
    %709 = arith.truncf %704 : vector<8x32xf32> to vector<8x32xbf16>
    %cst_311 = arith.constant dense<0.000000e+00> : vector<8x32xf32>
    %710 = tpu.matmul %709, %664, %cst_311 {dimension_numbers = #tpu.dot_dimension_numbers<[1], [0], [0], [1], [0, 0, 1, 1], [], []>} : vector<8x32xbf16>, vector<32x32xbf16>, vector<8x32xf32> -> vector<8x32xf32>
    %cst_312 = arith.constant dense<0.000000e+00> : vector<8x32xf32>
    %711 = tpu.matmul %709, %665, %cst_312 {dimension_numbers = #tpu.dot_dimension_numbers<[1], [0], [0], [1], [0, 0, 1, 1], [], []>} : vector<8x32xbf16>, vector<32x32xbf16>, vector<8x32xf32> -> vector<8x32xf32>
    %cst_313 = arith.constant dense<0.000000e+00> : vector<8x32xf32>
    %712 = tpu.matmul %709, %666, %cst_313 {dimension_numbers = #tpu.dot_dimension_numbers<[1], [0], [0], [1], [0, 0, 1, 1], [], []>} : vector<8x32xbf16>, vector<32x32xbf16>, vector<8x32xf32> -> vector<8x32xf32>
    %713 = arith.index_cast %c1_i32_310 : i32 to index
    %c0_314 = arith.constant 0 : index
    %c0_315 = arith.constant 0 : index
    %714 = vector.load %arg26[%713, %c0_314, %c0_315] : memref<16x8x32xf32, #tpu.memory_space<vmem>>, vector<1x8x32xf32>
    %715 = vector.shape_cast %714 : vector<1x8x32xf32> to vector<8x32xf32>
    %716 = arith.addf %715, %710 : vector<8x32xf32>
    %717 = arith.negf %716 : vector<8x32xf32>
    %718 = math.exp %717 : vector<8x32xf32>
    %cst_316 = arith.constant 1.000000e+00 : f32
    %719 = vector.broadcast %cst_316 : f32 to vector<8x32xf32>
    %720 = arith.addf %719, %718 : vector<8x32xf32>
    %721 = arith.divf %719, %720 : vector<8x32xf32>
    %722 = arith.index_cast %c1_i32_310 : i32 to index
    %c0_317 = arith.constant 0 : index
    %c0_318 = arith.constant 0 : index
    %723 = vector.load %arg27[%722, %c0_317, %c0_318] : memref<16x8x32xf32, #tpu.memory_space<vmem>>, vector<1x8x32xf32>
    %724 = vector.shape_cast %723 : vector<1x8x32xf32> to vector<8x32xf32>
    %725 = arith.addf %724, %711 : vector<8x32xf32>
    %726 = arith.negf %725 : vector<8x32xf32>
    %727 = math.exp %726 : vector<8x32xf32>
    %cst_319 = arith.constant 1.000000e+00 : f32
    %728 = vector.broadcast %cst_319 : f32 to vector<8x32xf32>
    %729 = arith.addf %728, %727 : vector<8x32xf32>
    %730 = arith.divf %728, %729 : vector<8x32xf32>
    %731 = arith.index_cast %c1_i32_310 : i32 to index
    %c0_320 = arith.constant 0 : index
    %c0_321 = arith.constant 0 : index
    %732 = vector.load %arg28[%731, %c0_320, %c0_321] : memref<16x8x32xf32, #tpu.memory_space<vmem>>, vector<1x8x32xf32>
    %733 = vector.shape_cast %732 : vector<1x8x32xf32> to vector<8x32xf32>
    %734 = arith.addf %712, %669 : vector<8x32xf32>
    %735 = arith.mulf %721, %734 : vector<8x32xf32>
    %736 = arith.addf %733, %735 : vector<8x32xf32>
    %737 = math.tanh %736 : vector<8x32xf32>
    %cst_322 = arith.constant 1.000000e+00 : f32
    %738 = vector.broadcast %cst_322 : f32 to vector<8x32xf32>
    %739 = arith.subf %738, %730 : vector<8x32xf32>
    %740 = arith.mulf %739, %737 : vector<8x32xf32>
    %741 = arith.mulf %730, %704 : vector<8x32xf32>
    %742 = arith.addf %740, %741 : vector<8x32xf32>
    %743 = arith.index_cast %c1_i32_310 : i32 to index
    %c0_323 = arith.constant 0 : index
    %c0_324 = arith.constant 0 : index
    %744 = vector.load %arg29[%743, %c0_323, %c0_324] : memref<16x8x32xf32, #tpu.memory_space<vmem>>, vector<1x8x32xf32>
    %745 = vector.shape_cast %744 : vector<1x8x32xf32> to vector<8x32xf32>
    %746 = vector.shape_cast %742 : vector<8x32xf32> to vector<1x8x32xf32>
    tpu.vector_store %arg29[%743, %c0_323, %c0_324], %746 {strides = array<i32>} : memref<16x8x32xf32, #tpu.memory_space<vmem>>, vector<1x8x32xf32>,
    %c2_i32_325 = arith.constant 2 : i32
    %747 = arith.truncf %742 : vector<8x32xf32> to vector<8x32xbf16>
    %cst_326 = arith.constant dense<0.000000e+00> : vector<8x32xf32>
    %748 = tpu.matmul %747, %664, %cst_326 {dimension_numbers = #tpu.dot_dimension_numbers<[1], [0], [0], [1], [0, 0, 1, 1], [], []>} : vector<8x32xbf16>, vector<32x32xbf16>, vector<8x32xf32> -> vector<8x32xf32>
    %cst_327 = arith.constant dense<0.000000e+00> : vector<8x32xf32>
    %749 = tpu.matmul %747, %665, %cst_327 {dimension_numbers = #tpu.dot_dimension_numbers<[1], [0], [0], [1], [0, 0, 1, 1], [], []>} : vector<8x32xbf16>, vector<32x32xbf16>, vector<8x32xf32> -> vector<8x32xf32>
    %cst_328 = arith.constant dense<0.000000e+00> : vector<8x32xf32>
    %750 = tpu.matmul %747, %666, %cst_328 {dimension_numbers = #tpu.dot_dimension_numbers<[1], [0], [0], [1], [0, 0, 1, 1], [], []>} : vector<8x32xbf16>, vector<32x32xbf16>, vector<8x32xf32> -> vector<8x32xf32>
    %751 = arith.index_cast %c2_i32_325 : i32 to index
    %c0_329 = arith.constant 0 : index
    %c0_330 = arith.constant 0 : index
    %752 = vector.load %arg26[%751, %c0_329, %c0_330] : memref<16x8x32xf32, #tpu.memory_space<vmem>>, vector<1x8x32xf32>
    %753 = vector.shape_cast %752 : vector<1x8x32xf32> to vector<8x32xf32>
    %754 = arith.addf %753, %748 : vector<8x32xf32>
    %755 = arith.negf %754 : vector<8x32xf32>
    %756 = math.exp %755 : vector<8x32xf32>
    %cst_331 = arith.constant 1.000000e+00 : f32
    %757 = vector.broadcast %cst_331 : f32 to vector<8x32xf32>
    %758 = arith.addf %757, %756 : vector<8x32xf32>
    %759 = arith.divf %757, %758 : vector<8x32xf32>
    %760 = arith.index_cast %c2_i32_325 : i32 to index
    %c0_332 = arith.constant 0 : index
    %c0_333 = arith.constant 0 : index
    %761 = vector.load %arg27[%760, %c0_332, %c0_333] : memref<16x8x32xf32, #tpu.memory_space<vmem>>, vector<1x8x32xf32>
    %762 = vector.shape_cast %761 : vector<1x8x32xf32> to vector<8x32xf32>
    %763 = arith.addf %762, %749 : vector<8x32xf32>
    %764 = arith.negf %763 : vector<8x32xf32>
    %765 = math.exp %764 : vector<8x32xf32>
    %cst_334 = arith.constant 1.000000e+00 : f32
    %766 = vector.broadcast %cst_334 : f32 to vector<8x32xf32>
    %767 = arith.addf %766, %765 : vector<8x32xf32>
    %768 = arith.divf %766, %767 : vector<8x32xf32>
    %769 = arith.index_cast %c2_i32_325 : i32 to index
    %c0_335 = arith.constant 0 : index
    %c0_336 = arith.constant 0 : index
    %770 = vector.load %arg28[%769, %c0_335, %c0_336] : memref<16x8x32xf32, #tpu.memory_space<vmem>>, vector<1x8x32xf32>
    %771 = vector.shape_cast %770 : vector<1x8x32xf32> to vector<8x32xf32>
    %772 = arith.addf %750, %669 : vector<8x32xf32>
    %773 = arith.mulf %759, %772 : vector<8x32xf32>
    %774 = arith.addf %771, %773 : vector<8x32xf32>
    %775 = math.tanh %774 : vector<8x32xf32>
    %cst_337 = arith.constant 1.000000e+00 : f32
    %776 = vector.broadcast %cst_337 : f32 to vector<8x32xf32>
    %777 = arith.subf %776, %768 : vector<8x32xf32>
    %778 = arith.mulf %777, %775 : vector<8x32xf32>
    %779 = arith.mulf %768, %742 : vector<8x32xf32>
    %780 = arith.addf %778, %779 : vector<8x32xf32>
    %781 = arith.index_cast %c2_i32_325 : i32 to index
    %c0_338 = arith.constant 0 : index
    %c0_339 = arith.constant 0 : index
    %782 = vector.load %arg29[%781, %c0_338, %c0_339] : memref<16x8x32xf32, #tpu.memory_space<vmem>>, vector<1x8x32xf32>
    %783 = vector.shape_cast %782 : vector<1x8x32xf32> to vector<8x32xf32>
    %784 = vector.shape_cast %780 : vector<8x32xf32> to vector<1x8x32xf32>
    tpu.vector_store %arg29[%781, %c0_338, %c0_339], %784 {strides = array<i32>} : memref<16x8x32xf32, #tpu.memory_space<vmem>>, vector<1x8x32xf32>,
    %c3_i32_340 = arith.constant 3 : i32
    %785 = arith.truncf %780 : vector<8x32xf32> to vector<8x32xbf16>
    %cst_341 = arith.constant dense<0.000000e+00> : vector<8x32xf32>
    %786 = tpu.matmul %785, %664, %cst_341 {dimension_numbers = #tpu.dot_dimension_numbers<[1], [0], [0], [1], [0, 0, 1, 1], [], []>} : vector<8x32xbf16>, vector<32x32xbf16>, vector<8x32xf32> -> vector<8x32xf32>
    %cst_342 = arith.constant dense<0.000000e+00> : vector<8x32xf32>
    %787 = tpu.matmul %785, %665, %cst_342 {dimension_numbers = #tpu.dot_dimension_numbers<[1], [0], [0], [1], [0, 0, 1, 1], [], []>} : vector<8x32xbf16>, vector<32x32xbf16>, vector<8x32xf32> -> vector<8x32xf32>
    %cst_343 = arith.constant dense<0.000000e+00> : vector<8x32xf32>
    %788 = tpu.matmul %785, %666, %cst_343 {dimension_numbers = #tpu.dot_dimension_numbers<[1], [0], [0], [1], [0, 0, 1, 1], [], []>} : vector<8x32xbf16>, vector<32x32xbf16>, vector<8x32xf32> -> vector<8x32xf32>
    %789 = arith.index_cast %c3_i32_340 : i32 to index
    %c0_344 = arith.constant 0 : index
    %c0_345 = arith.constant 0 : index
    %790 = vector.load %arg26[%789, %c0_344, %c0_345] : memref<16x8x32xf32, #tpu.memory_space<vmem>>, vector<1x8x32xf32>
    %791 = vector.shape_cast %790 : vector<1x8x32xf32> to vector<8x32xf32>
    %792 = arith.addf %791, %786 : vector<8x32xf32>
    %793 = arith.negf %792 : vector<8x32xf32>
    %794 = math.exp %793 : vector<8x32xf32>
    %cst_346 = arith.constant 1.000000e+00 : f32
    %795 = vector.broadcast %cst_346 : f32 to vector<8x32xf32>
    %796 = arith.addf %795, %794 : vector<8x32xf32>
    %797 = arith.divf %795, %796 : vector<8x32xf32>
    %798 = arith.index_cast %c3_i32_340 : i32 to index
    %c0_347 = arith.constant 0 : index
    %c0_348 = arith.constant 0 : index
    %799 = vector.load %arg27[%798, %c0_347, %c0_348] : memref<16x8x32xf32, #tpu.memory_space<vmem>>, vector<1x8x32xf32>
    %800 = vector.shape_cast %799 : vector<1x8x32xf32> to vector<8x32xf32>
    %801 = arith.addf %800, %787 : vector<8x32xf32>
    %802 = arith.negf %801 : vector<8x32xf32>
    %803 = math.exp %802 : vector<8x32xf32>
    %cst_349 = arith.constant 1.000000e+00 : f32
    %804 = vector.broadcast %cst_349 : f32 to vector<8x32xf32>
    %805 = arith.addf %804, %803 : vector<8x32xf32>
    %806 = arith.divf %804, %805 : vector<8x32xf32>
    %807 = arith.index_cast %c3_i32_340 : i32 to index
    %c0_350 = arith.constant 0 : index
    %c0_351 = arith.constant 0 : index
    %808 = vector.load %arg28[%807, %c0_350, %c0_351] : memref<16x8x32xf32, #tpu.memory_space<vmem>>, vector<1x8x32xf32>
    %809 = vector.shape_cast %808 : vector<1x8x32xf32> to vector<8x32xf32>
    %810 = arith.addf %788, %669 : vector<8x32xf32>
    %811 = arith.mulf %797, %810 : vector<8x32xf32>
    %812 = arith.addf %809, %811 : vector<8x32xf32>
    %813 = math.tanh %812 : vector<8x32xf32>
    %cst_352 = arith.constant 1.000000e+00 : f32
    %814 = vector.broadcast %cst_352 : f32 to vector<8x32xf32>
    %815 = arith.subf %814, %806 : vector<8x32xf32>
    %816 = arith.mulf %815, %813 : vector<8x32xf32>
    %817 = arith.mulf %806, %780 : vector<8x32xf32>
    %818 = arith.addf %816, %817 : vector<8x32xf32>
    %819 = arith.index_cast %c3_i32_340 : i32 to index
    %c0_353 = arith.constant 0 : index
    %c0_354 = arith.constant 0 : index
    %820 = vector.load %arg29[%819, %c0_353, %c0_354] : memref<16x8x32xf32, #tpu.memory_space<vmem>>, vector<1x8x32xf32>
    %821 = vector.shape_cast %820 : vector<1x8x32xf32> to vector<8x32xf32>
    %822 = vector.shape_cast %818 : vector<8x32xf32> to vector<1x8x32xf32>
    tpu.vector_store %arg29[%819, %c0_353, %c0_354], %822 {strides = array<i32>} : memref<16x8x32xf32, #tpu.memory_space<vmem>>, vector<1x8x32xf32>,
    %c4_i32_355 = arith.constant 4 : i32
    %823 = arith.truncf %818 : vector<8x32xf32> to vector<8x32xbf16>
    %cst_356 = arith.constant dense<0.000000e+00> : vector<8x32xf32>
    %824 = tpu.matmul %823, %664, %cst_356 {dimension_numbers = #tpu.dot_dimension_numbers<[1], [0], [0], [1], [0, 0, 1, 1], [], []>} : vector<8x32xbf16>, vector<32x32xbf16>, vector<8x32xf32> -> vector<8x32xf32>
    %cst_357 = arith.constant dense<0.000000e+00> : vector<8x32xf32>
    %825 = tpu.matmul %823, %665, %cst_357 {dimension_numbers = #tpu.dot_dimension_numbers<[1], [0], [0], [1], [0, 0, 1, 1], [], []>} : vector<8x32xbf16>, vector<32x32xbf16>, vector<8x32xf32> -> vector<8x32xf32>
    %cst_358 = arith.constant dense<0.000000e+00> : vector<8x32xf32>
    %826 = tpu.matmul %823, %666, %cst_358 {dimension_numbers = #tpu.dot_dimension_numbers<[1], [0], [0], [1], [0, 0, 1, 1], [], []>} : vector<8x32xbf16>, vector<32x32xbf16>, vector<8x32xf32> -> vector<8x32xf32>
    %827 = arith.index_cast %c4_i32_355 : i32 to index
    %c0_359 = arith.constant 0 : index
    %c0_360 = arith.constant 0 : index
    %828 = vector.load %arg26[%827, %c0_359, %c0_360] : memref<16x8x32xf32, #tpu.memory_space<vmem>>, vector<1x8x32xf32>
    %829 = vector.shape_cast %828 : vector<1x8x32xf32> to vector<8x32xf32>
    %830 = arith.addf %829, %824 : vector<8x32xf32>
    %831 = arith.negf %830 : vector<8x32xf32>
    %832 = math.exp %831 : vector<8x32xf32>
    %cst_361 = arith.constant 1.000000e+00 : f32
    %833 = vector.broadcast %cst_361 : f32 to vector<8x32xf32>
    %834 = arith.addf %833, %832 : vector<8x32xf32>
    %835 = arith.divf %833, %834 : vector<8x32xf32>
    %836 = arith.index_cast %c4_i32_355 : i32 to index
    %c0_362 = arith.constant 0 : index
    %c0_363 = arith.constant 0 : index
    %837 = vector.load %arg27[%836, %c0_362, %c0_363] : memref<16x8x32xf32, #tpu.memory_space<vmem>>, vector<1x8x32xf32>
    %838 = vector.shape_cast %837 : vector<1x8x32xf32> to vector<8x32xf32>
    %839 = arith.addf %838, %825 : vector<8x32xf32>
    %840 = arith.negf %839 : vector<8x32xf32>
    %841 = math.exp %840 : vector<8x32xf32>
    %cst_364 = arith.constant 1.000000e+00 : f32
    %842 = vector.broadcast %cst_364 : f32 to vector<8x32xf32>
    %843 = arith.addf %842, %841 : vector<8x32xf32>
    %844 = arith.divf %842, %843 : vector<8x32xf32>
    %845 = arith.index_cast %c4_i32_355 : i32 to index
    %c0_365 = arith.constant 0 : index
    %c0_366 = arith.constant 0 : index
    %846 = vector.load %arg28[%845, %c0_365, %c0_366] : memref<16x8x32xf32, #tpu.memory_space<vmem>>, vector<1x8x32xf32>
    %847 = vector.shape_cast %846 : vector<1x8x32xf32> to vector<8x32xf32>
    %848 = arith.addf %826, %669 : vector<8x32xf32>
    %849 = arith.mulf %835, %848 : vector<8x32xf32>
    %850 = arith.addf %847, %849 : vector<8x32xf32>
    %851 = math.tanh %850 : vector<8x32xf32>
    %cst_367 = arith.constant 1.000000e+00 : f32
    %852 = vector.broadcast %cst_367 : f32 to vector<8x32xf32>
    %853 = arith.subf %852, %844 : vector<8x32xf32>
    %854 = arith.mulf %853, %851 : vector<8x32xf32>
    %855 = arith.mulf %844, %818 : vector<8x32xf32>
    %856 = arith.addf %854, %855 : vector<8x32xf32>
    %857 = arith.index_cast %c4_i32_355 : i32 to index
    %c0_368 = arith.constant 0 : index
    %c0_369 = arith.constant 0 : index
    %858 = vector.load %arg29[%857, %c0_368, %c0_369] : memref<16x8x32xf32, #tpu.memory_space<vmem>>, vector<1x8x32xf32>
    %859 = vector.shape_cast %858 : vector<1x8x32xf32> to vector<8x32xf32>
    %860 = vector.shape_cast %856 : vector<8x32xf32> to vector<1x8x32xf32>
    tpu.vector_store %arg29[%857, %c0_368, %c0_369], %860 {strides = array<i32>} : memref<16x8x32xf32, #tpu.memory_space<vmem>>, vector<1x8x32xf32>,
    %c5_i32_370 = arith.constant 5 : i32
    %861 = arith.truncf %856 : vector<8x32xf32> to vector<8x32xbf16>
    %cst_371 = arith.constant dense<0.000000e+00> : vector<8x32xf32>
    %862 = tpu.matmul %861, %664, %cst_371 {dimension_numbers = #tpu.dot_dimension_numbers<[1], [0], [0], [1], [0, 0, 1, 1], [], []>} : vector<8x32xbf16>, vector<32x32xbf16>, vector<8x32xf32> -> vector<8x32xf32>
    %cst_372 = arith.constant dense<0.000000e+00> : vector<8x32xf32>
    %863 = tpu.matmul %861, %665, %cst_372 {dimension_numbers = #tpu.dot_dimension_numbers<[1], [0], [0], [1], [0, 0, 1, 1], [], []>} : vector<8x32xbf16>, vector<32x32xbf16>, vector<8x32xf32> -> vector<8x32xf32>
    %cst_373 = arith.constant dense<0.000000e+00> : vector<8x32xf32>
    %864 = tpu.matmul %861, %666, %cst_373 {dimension_numbers = #tpu.dot_dimension_numbers<[1], [0], [0], [1], [0, 0, 1, 1], [], []>} : vector<8x32xbf16>, vector<32x32xbf16>, vector<8x32xf32> -> vector<8x32xf32>
    %865 = arith.index_cast %c5_i32_370 : i32 to index
    %c0_374 = arith.constant 0 : index
    %c0_375 = arith.constant 0 : index
    %866 = vector.load %arg26[%865, %c0_374, %c0_375] : memref<16x8x32xf32, #tpu.memory_space<vmem>>, vector<1x8x32xf32>
    %867 = vector.shape_cast %866 : vector<1x8x32xf32> to vector<8x32xf32>
    %868 = arith.addf %867, %862 : vector<8x32xf32>
    %869 = arith.negf %868 : vector<8x32xf32>
    %870 = math.exp %869 : vector<8x32xf32>
    %cst_376 = arith.constant 1.000000e+00 : f32
    %871 = vector.broadcast %cst_376 : f32 to vector<8x32xf32>
    %872 = arith.addf %871, %870 : vector<8x32xf32>
    %873 = arith.divf %871, %872 : vector<8x32xf32>
    %874 = arith.index_cast %c5_i32_370 : i32 to index
    %c0_377 = arith.constant 0 : index
    %c0_378 = arith.constant 0 : index
    %875 = vector.load %arg27[%874, %c0_377, %c0_378] : memref<16x8x32xf32, #tpu.memory_space<vmem>>, vector<1x8x32xf32>
    %876 = vector.shape_cast %875 : vector<1x8x32xf32> to vector<8x32xf32>
    %877 = arith.addf %876, %863 : vector<8x32xf32>
    %878 = arith.negf %877 : vector<8x32xf32>
    %879 = math.exp %878 : vector<8x32xf32>
    %cst_379 = arith.constant 1.000000e+00 : f32
    %880 = vector.broadcast %cst_379 : f32 to vector<8x32xf32>
    %881 = arith.addf %880, %879 : vector<8x32xf32>
    %882 = arith.divf %880, %881 : vector<8x32xf32>
    %883 = arith.index_cast %c5_i32_370 : i32 to index
    %c0_380 = arith.constant 0 : index
    %c0_381 = arith.constant 0 : index
    %884 = vector.load %arg28[%883, %c0_380, %c0_381] : memref<16x8x32xf32, #tpu.memory_space<vmem>>, vector<1x8x32xf32>
    %885 = vector.shape_cast %884 : vector<1x8x32xf32> to vector<8x32xf32>
    %886 = arith.addf %864, %669 : vector<8x32xf32>
    %887 = arith.mulf %873, %886 : vector<8x32xf32>
    %888 = arith.addf %885, %887 : vector<8x32xf32>
    %889 = math.tanh %888 : vector<8x32xf32>
    %cst_382 = arith.constant 1.000000e+00 : f32
    %890 = vector.broadcast %cst_382 : f32 to vector<8x32xf32>
    %891 = arith.subf %890, %882 : vector<8x32xf32>
    %892 = arith.mulf %891, %889 : vector<8x32xf32>
    %893 = arith.mulf %882, %856 : vector<8x32xf32>
    %894 = arith.addf %892, %893 : vector<8x32xf32>
    %895 = arith.index_cast %c5_i32_370 : i32 to index
    %c0_383 = arith.constant 0 : index
    %c0_384 = arith.constant 0 : index
    %896 = vector.load %arg29[%895, %c0_383, %c0_384] : memref<16x8x32xf32, #tpu.memory_space<vmem>>, vector<1x8x32xf32>
    %897 = vector.shape_cast %896 : vector<1x8x32xf32> to vector<8x32xf32>
    %898 = vector.shape_cast %894 : vector<8x32xf32> to vector<1x8x32xf32>
    tpu.vector_store %arg29[%895, %c0_383, %c0_384], %898 {strides = array<i32>} : memref<16x8x32xf32, #tpu.memory_space<vmem>>, vector<1x8x32xf32>,
    %c6_i32_385 = arith.constant 6 : i32
    %899 = arith.truncf %894 : vector<8x32xf32> to vector<8x32xbf16>
    %cst_386 = arith.constant dense<0.000000e+00> : vector<8x32xf32>
    %900 = tpu.matmul %899, %664, %cst_386 {dimension_numbers = #tpu.dot_dimension_numbers<[1], [0], [0], [1], [0, 0, 1, 1], [], []>} : vector<8x32xbf16>, vector<32x32xbf16>, vector<8x32xf32> -> vector<8x32xf32>
    %cst_387 = arith.constant dense<0.000000e+00> : vector<8x32xf32>
    %901 = tpu.matmul %899, %665, %cst_387 {dimension_numbers = #tpu.dot_dimension_numbers<[1], [0], [0], [1], [0, 0, 1, 1], [], []>} : vector<8x32xbf16>, vector<32x32xbf16>, vector<8x32xf32> -> vector<8x32xf32>
    %cst_388 = arith.constant dense<0.000000e+00> : vector<8x32xf32>
    %902 = tpu.matmul %899, %666, %cst_388 {dimension_numbers = #tpu.dot_dimension_numbers<[1], [0], [0], [1], [0, 0, 1, 1], [], []>} : vector<8x32xbf16>, vector<32x32xbf16>, vector<8x32xf32> -> vector<8x32xf32>
    %903 = arith.index_cast %c6_i32_385 : i32 to index
    %c0_389 = arith.constant 0 : index
    %c0_390 = arith.constant 0 : index
    %904 = vector.load %arg26[%903, %c0_389, %c0_390] : memref<16x8x32xf32, #tpu.memory_space<vmem>>, vector<1x8x32xf32>
    %905 = vector.shape_cast %904 : vector<1x8x32xf32> to vector<8x32xf32>
    %906 = arith.addf %905, %900 : vector<8x32xf32>
    %907 = arith.negf %906 : vector<8x32xf32>
    %908 = math.exp %907 : vector<8x32xf32>
    %cst_391 = arith.constant 1.000000e+00 : f32
    %909 = vector.broadcast %cst_391 : f32 to vector<8x32xf32>
    %910 = arith.addf %909, %908 : vector<8x32xf32>
    %911 = arith.divf %909, %910 : vector<8x32xf32>
    %912 = arith.index_cast %c6_i32_385 : i32 to index
    %c0_392 = arith.constant 0 : index
    %c0_393 = arith.constant 0 : index
    %913 = vector.load %arg27[%912, %c0_392, %c0_393] : memref<16x8x32xf32, #tpu.memory_space<vmem>>, vector<1x8x32xf32>
    %914 = vector.shape_cast %913 : vector<1x8x32xf32> to vector<8x32xf32>
    %915 = arith.addf %914, %901 : vector<8x32xf32>
    %916 = arith.negf %915 : vector<8x32xf32>
    %917 = math.exp %916 : vector<8x32xf32>
    %cst_394 = arith.constant 1.000000e+00 : f32
    %918 = vector.broadcast %cst_394 : f32 to vector<8x32xf32>
    %919 = arith.addf %918, %917 : vector<8x32xf32>
    %920 = arith.divf %918, %919 : vector<8x32xf32>
    %921 = arith.index_cast %c6_i32_385 : i32 to index
    %c0_395 = arith.constant 0 : index
    %c0_396 = arith.constant 0 : index
    %922 = vector.load %arg28[%921, %c0_395, %c0_396] : memref<16x8x32xf32, #tpu.memory_space<vmem>>, vector<1x8x32xf32>
    %923 = vector.shape_cast %922 : vector<1x8x32xf32> to vector<8x32xf32>
    %924 = arith.addf %902, %669 : vector<8x32xf32>
    %925 = arith.mulf %911, %924 : vector<8x32xf32>
    %926 = arith.addf %923, %925 : vector<8x32xf32>
    %927 = math.tanh %926 : vector<8x32xf32>
    %cst_397 = arith.constant 1.000000e+00 : f32
    %928 = vector.broadcast %cst_397 : f32 to vector<8x32xf32>
    %929 = arith.subf %928, %920 : vector<8x32xf32>
    %930 = arith.mulf %929, %927 : vector<8x32xf32>
    %931 = arith.mulf %920, %894 : vector<8x32xf32>
    %932 = arith.addf %930, %931 : vector<8x32xf32>
    %933 = arith.index_cast %c6_i32_385 : i32 to index
    %c0_398 = arith.constant 0 : index
    %c0_399 = arith.constant 0 : index
    %934 = vector.load %arg29[%933, %c0_398, %c0_399] : memref<16x8x32xf32, #tpu.memory_space<vmem>>, vector<1x8x32xf32>
    %935 = vector.shape_cast %934 : vector<1x8x32xf32> to vector<8x32xf32>
    %936 = vector.shape_cast %932 : vector<8x32xf32> to vector<1x8x32xf32>
    tpu.vector_store %arg29[%933, %c0_398, %c0_399], %936 {strides = array<i32>} : memref<16x8x32xf32, #tpu.memory_space<vmem>>, vector<1x8x32xf32>,
    %c7_i32_400 = arith.constant 7 : i32
    %937 = arith.truncf %932 : vector<8x32xf32> to vector<8x32xbf16>
    %cst_401 = arith.constant dense<0.000000e+00> : vector<8x32xf32>
    %938 = tpu.matmul %937, %664, %cst_401 {dimension_numbers = #tpu.dot_dimension_numbers<[1], [0], [0], [1], [0, 0, 1, 1], [], []>} : vector<8x32xbf16>, vector<32x32xbf16>, vector<8x32xf32> -> vector<8x32xf32>
    %cst_402 = arith.constant dense<0.000000e+00> : vector<8x32xf32>
    %939 = tpu.matmul %937, %665, %cst_402 {dimension_numbers = #tpu.dot_dimension_numbers<[1], [0], [0], [1], [0, 0, 1, 1], [], []>} : vector<8x32xbf16>, vector<32x32xbf16>, vector<8x32xf32> -> vector<8x32xf32>
    %cst_403 = arith.constant dense<0.000000e+00> : vector<8x32xf32>
    %940 = tpu.matmul %937, %666, %cst_403 {dimension_numbers = #tpu.dot_dimension_numbers<[1], [0], [0], [1], [0, 0, 1, 1], [], []>} : vector<8x32xbf16>, vector<32x32xbf16>, vector<8x32xf32> -> vector<8x32xf32>
    %941 = arith.index_cast %c7_i32_400 : i32 to index
    %c0_404 = arith.constant 0 : index
    %c0_405 = arith.constant 0 : index
    %942 = vector.load %arg26[%941, %c0_404, %c0_405] : memref<16x8x32xf32, #tpu.memory_space<vmem>>, vector<1x8x32xf32>
    %943 = vector.shape_cast %942 : vector<1x8x32xf32> to vector<8x32xf32>
    %944 = arith.addf %943, %938 : vector<8x32xf32>
    %945 = arith.negf %944 : vector<8x32xf32>
    %946 = math.exp %945 : vector<8x32xf32>
    %cst_406 = arith.constant 1.000000e+00 : f32
    %947 = vector.broadcast %cst_406 : f32 to vector<8x32xf32>
    %948 = arith.addf %947, %946 : vector<8x32xf32>
    %949 = arith.divf %947, %948 : vector<8x32xf32>
    %950 = arith.index_cast %c7_i32_400 : i32 to index
    %c0_407 = arith.constant 0 : index
    %c0_408 = arith.constant 0 : index
    %951 = vector.load %arg27[%950, %c0_407, %c0_408] : memref<16x8x32xf32, #tpu.memory_space<vmem>>, vector<1x8x32xf32>
    %952 = vector.shape_cast %951 : vector<1x8x32xf32> to vector<8x32xf32>
    %953 = arith.addf %952, %939 : vector<8x32xf32>
    %954 = arith.negf %953 : vector<8x32xf32>
    %955 = math.exp %954 : vector<8x32xf32>
    %cst_409 = arith.constant 1.000000e+00 : f32
    %956 = vector.broadcast %cst_409 : f32 to vector<8x32xf32>
    %957 = arith.addf %956, %955 : vector<8x32xf32>
    %958 = arith.divf %956, %957 : vector<8x32xf32>
    %959 = arith.index_cast %c7_i32_400 : i32 to index
    %c0_410 = arith.constant 0 : index
    %c0_411 = arith.constant 0 : index
    %960 = vector.load %arg28[%959, %c0_410, %c0_411] : memref<16x8x32xf32, #tpu.memory_space<vmem>>, vector<1x8x32xf32>
    %961 = vector.shape_cast %960 : vector<1x8x32xf32> to vector<8x32xf32>
    %962 = arith.addf %940, %669 : vector<8x32xf32>
    %963 = arith.mulf %949, %962 : vector<8x32xf32>
    %964 = arith.addf %961, %963 : vector<8x32xf32>
    %965 = math.tanh %964 : vector<8x32xf32>
    %cst_412 = arith.constant 1.000000e+00 : f32
    %966 = vector.broadcast %cst_412 : f32 to vector<8x32xf32>
    %967 = arith.subf %966, %958 : vector<8x32xf32>
    %968 = arith.mulf %967, %965 : vector<8x32xf32>
    %969 = arith.mulf %958, %932 : vector<8x32xf32>
    %970 = arith.addf %968, %969 : vector<8x32xf32>
    %971 = arith.index_cast %c7_i32_400 : i32 to index
    %c0_413 = arith.constant 0 : index
    %c0_414 = arith.constant 0 : index
    %972 = vector.load %arg29[%971, %c0_413, %c0_414] : memref<16x8x32xf32, #tpu.memory_space<vmem>>, vector<1x8x32xf32>
    %973 = vector.shape_cast %972 : vector<1x8x32xf32> to vector<8x32xf32>
    %974 = vector.shape_cast %970 : vector<8x32xf32> to vector<1x8x32xf32>
    tpu.vector_store %arg29[%971, %c0_413, %c0_414], %974 {strides = array<i32>} : memref<16x8x32xf32, #tpu.memory_space<vmem>>, vector<1x8x32xf32>,
    %c8_i32_415 = arith.constant 8 : i32
    %975 = arith.truncf %970 : vector<8x32xf32> to vector<8x32xbf16>
    %cst_416 = arith.constant dense<0.000000e+00> : vector<8x32xf32>
    %976 = tpu.matmul %975, %664, %cst_416 {dimension_numbers = #tpu.dot_dimension_numbers<[1], [0], [0], [1], [0, 0, 1, 1], [], []>} : vector<8x32xbf16>, vector<32x32xbf16>, vector<8x32xf32> -> vector<8x32xf32>
    %cst_417 = arith.constant dense<0.000000e+00> : vector<8x32xf32>
    %977 = tpu.matmul %975, %665, %cst_417 {dimension_numbers = #tpu.dot_dimension_numbers<[1], [0], [0], [1], [0, 0, 1, 1], [], []>} : vector<8x32xbf16>, vector<32x32xbf16>, vector<8x32xf32> -> vector<8x32xf32>
    %cst_418 = arith.constant dense<0.000000e+00> : vector<8x32xf32>
    %978 = tpu.matmul %975, %666, %cst_418 {dimension_numbers = #tpu.dot_dimension_numbers<[1], [0], [0], [1], [0, 0, 1, 1], [], []>} : vector<8x32xbf16>, vector<32x32xbf16>, vector<8x32xf32> -> vector<8x32xf32>
    %979 = arith.index_cast %c8_i32_415 : i32 to index
    %c0_419 = arith.constant 0 : index
    %c0_420 = arith.constant 0 : index
    %980 = vector.load %arg26[%979, %c0_419, %c0_420] : memref<16x8x32xf32, #tpu.memory_space<vmem>>, vector<1x8x32xf32>
    %981 = vector.shape_cast %980 : vector<1x8x32xf32> to vector<8x32xf32>
    %982 = arith.addf %981, %976 : vector<8x32xf32>
    %983 = arith.negf %982 : vector<8x32xf32>
    %984 = math.exp %983 : vector<8x32xf32>
    %cst_421 = arith.constant 1.000000e+00 : f32
    %985 = vector.broadcast %cst_421 : f32 to vector<8x32xf32>
    %986 = arith.addf %985, %984 : vector<8x32xf32>
    %987 = arith.divf %985, %986 : vector<8x32xf32>
    %988 = arith.index_cast %c8_i32_415 : i32 to index
    %c0_422 = arith.constant 0 : index
    %c0_423 = arith.constant 0 : index
    %989 = vector.load %arg27[%988, %c0_422, %c0_423] : memref<16x8x32xf32, #tpu.memory_space<vmem>>, vector<1x8x32xf32>
    %990 = vector.shape_cast %989 : vector<1x8x32xf32> to vector<8x32xf32>
    %991 = arith.addf %990, %977 : vector<8x32xf32>
    %992 = arith.negf %991 : vector<8x32xf32>
    %993 = math.exp %992 : vector<8x32xf32>
    %cst_424 = arith.constant 1.000000e+00 : f32
    %994 = vector.broadcast %cst_424 : f32 to vector<8x32xf32>
    %995 = arith.addf %994, %993 : vector<8x32xf32>
    %996 = arith.divf %994, %995 : vector<8x32xf32>
    %997 = arith.index_cast %c8_i32_415 : i32 to index
    %c0_425 = arith.constant 0 : index
    %c0_426 = arith.constant 0 : index
    %998 = vector.load %arg28[%997, %c0_425, %c0_426] : memref<16x8x32xf32, #tpu.memory_space<vmem>>, vector<1x8x32xf32>
    %999 = vector.shape_cast %998 : vector<1x8x32xf32> to vector<8x32xf32>
    %1000 = arith.addf %978, %669 : vector<8x32xf32>
    %1001 = arith.mulf %987, %1000 : vector<8x32xf32>
    %1002 = arith.addf %999, %1001 : vector<8x32xf32>
    %1003 = math.tanh %1002 : vector<8x32xf32>
    %cst_427 = arith.constant 1.000000e+00 : f32
    %1004 = vector.broadcast %cst_427 : f32 to vector<8x32xf32>
    %1005 = arith.subf %1004, %996 : vector<8x32xf32>
    %1006 = arith.mulf %1005, %1003 : vector<8x32xf32>
    %1007 = arith.mulf %996, %970 : vector<8x32xf32>
    %1008 = arith.addf %1006, %1007 : vector<8x32xf32>
    %1009 = arith.index_cast %c8_i32_415 : i32 to index
    %c0_428 = arith.constant 0 : index
    %c0_429 = arith.constant 0 : index
    %1010 = vector.load %arg29[%1009, %c0_428, %c0_429] : memref<16x8x32xf32, #tpu.memory_space<vmem>>, vector<1x8x32xf32>
    %1011 = vector.shape_cast %1010 : vector<1x8x32xf32> to vector<8x32xf32>
    %1012 = vector.shape_cast %1008 : vector<8x32xf32> to vector<1x8x32xf32>
    tpu.vector_store %arg29[%1009, %c0_428, %c0_429], %1012 {strides = array<i32>} : memref<16x8x32xf32, #tpu.memory_space<vmem>>, vector<1x8x32xf32>,
    %c9_i32_430 = arith.constant 9 : i32
    %1013 = arith.truncf %1008 : vector<8x32xf32> to vector<8x32xbf16>
    %cst_431 = arith.constant dense<0.000000e+00> : vector<8x32xf32>
    %1014 = tpu.matmul %1013, %664, %cst_431 {dimension_numbers = #tpu.dot_dimension_numbers<[1], [0], [0], [1], [0, 0, 1, 1], [], []>} : vector<8x32xbf16>, vector<32x32xbf16>, vector<8x32xf32> -> vector<8x32xf32>
    %cst_432 = arith.constant dense<0.000000e+00> : vector<8x32xf32>
    %1015 = tpu.matmul %1013, %665, %cst_432 {dimension_numbers = #tpu.dot_dimension_numbers<[1], [0], [0], [1], [0, 0, 1, 1], [], []>} : vector<8x32xbf16>, vector<32x32xbf16>, vector<8x32xf32> -> vector<8x32xf32>
    %cst_433 = arith.constant dense<0.000000e+00> : vector<8x32xf32>
    %1016 = tpu.matmul %1013, %666, %cst_433 {dimension_numbers = #tpu.dot_dimension_numbers<[1], [0], [0], [1], [0, 0, 1, 1], [], []>} : vector<8x32xbf16>, vector<32x32xbf16>, vector<8x32xf32> -> vector<8x32xf32>
    %1017 = arith.index_cast %c9_i32_430 : i32 to index
    %c0_434 = arith.constant 0 : index
    %c0_435 = arith.constant 0 : index
    %1018 = vector.load %arg26[%1017, %c0_434, %c0_435] : memref<16x8x32xf32, #tpu.memory_space<vmem>>, vector<1x8x32xf32>
    %1019 = vector.shape_cast %1018 : vector<1x8x32xf32> to vector<8x32xf32>
    %1020 = arith.addf %1019, %1014 : vector<8x32xf32>
    %1021 = arith.negf %1020 : vector<8x32xf32>
    %1022 = math.exp %1021 : vector<8x32xf32>
    %cst_436 = arith.constant 1.000000e+00 : f32
    %1023 = vector.broadcast %cst_436 : f32 to vector<8x32xf32>
    %1024 = arith.addf %1023, %1022 : vector<8x32xf32>
    %1025 = arith.divf %1023, %1024 : vector<8x32xf32>
    %1026 = arith.index_cast %c9_i32_430 : i32 to index
    %c0_437 = arith.constant 0 : index
    %c0_438 = arith.constant 0 : index
    %1027 = vector.load %arg27[%1026, %c0_437, %c0_438] : memref<16x8x32xf32, #tpu.memory_space<vmem>>, vector<1x8x32xf32>
    %1028 = vector.shape_cast %1027 : vector<1x8x32xf32> to vector<8x32xf32>
    %1029 = arith.addf %1028, %1015 : vector<8x32xf32>
    %1030 = arith.negf %1029 : vector<8x32xf32>
    %1031 = math.exp %1030 : vector<8x32xf32>
    %cst_439 = arith.constant 1.000000e+00 : f32
    %1032 = vector.broadcast %cst_439 : f32 to vector<8x32xf32>
    %1033 = arith.addf %1032, %1031 : vector<8x32xf32>
    %1034 = arith.divf %1032, %1033 : vector<8x32xf32>
    %1035 = arith.index_cast %c9_i32_430 : i32 to index
    %c0_440 = arith.constant 0 : index
    %c0_441 = arith.constant 0 : index
    %1036 = vector.load %arg28[%1035, %c0_440, %c0_441] : memref<16x8x32xf32, #tpu.memory_space<vmem>>, vector<1x8x32xf32>
    %1037 = vector.shape_cast %1036 : vector<1x8x32xf32> to vector<8x32xf32>
    %1038 = arith.addf %1016, %669 : vector<8x32xf32>
    %1039 = arith.mulf %1025, %1038 : vector<8x32xf32>
    %1040 = arith.addf %1037, %1039 : vector<8x32xf32>
    %1041 = math.tanh %1040 : vector<8x32xf32>
    %cst_442 = arith.constant 1.000000e+00 : f32
    %1042 = vector.broadcast %cst_442 : f32 to vector<8x32xf32>
    %1043 = arith.subf %1042, %1034 : vector<8x32xf32>
    %1044 = arith.mulf %1043, %1041 : vector<8x32xf32>
    %1045 = arith.mulf %1034, %1008 : vector<8x32xf32>
    %1046 = arith.addf %1044, %1045 : vector<8x32xf32>
    %1047 = arith.index_cast %c9_i32_430 : i32 to index
    %c0_443 = arith.constant 0 : index
    %c0_444 = arith.constant 0 : index
    %1048 = vector.load %arg29[%1047, %c0_443, %c0_444] : memref<16x8x32xf32, #tpu.memory_space<vmem>>, vector<1x8x32xf32>
    %1049 = vector.shape_cast %1048 : vector<1x8x32xf32> to vector<8x32xf32>
    %1050 = vector.shape_cast %1046 : vector<8x32xf32> to vector<1x8x32xf32>
    tpu.vector_store %arg29[%1047, %c0_443, %c0_444], %1050 {strides = array<i32>} : memref<16x8x32xf32, #tpu.memory_space<vmem>>, vector<1x8x32xf32>,
    %c10_i32_445 = arith.constant 10 : i32
    %1051 = arith.truncf %1046 : vector<8x32xf32> to vector<8x32xbf16>
    %cst_446 = arith.constant dense<0.000000e+00> : vector<8x32xf32>
    %1052 = tpu.matmul %1051, %664, %cst_446 {dimension_numbers = #tpu.dot_dimension_numbers<[1], [0], [0], [1], [0, 0, 1, 1], [], []>} : vector<8x32xbf16>, vector<32x32xbf16>, vector<8x32xf32> -> vector<8x32xf32>
    %cst_447 = arith.constant dense<0.000000e+00> : vector<8x32xf32>
    %1053 = tpu.matmul %1051, %665, %cst_447 {dimension_numbers = #tpu.dot_dimension_numbers<[1], [0], [0], [1], [0, 0, 1, 1], [], []>} : vector<8x32xbf16>, vector<32x32xbf16>, vector<8x32xf32> -> vector<8x32xf32>
    %cst_448 = arith.constant dense<0.000000e+00> : vector<8x32xf32>
    %1054 = tpu.matmul %1051, %666, %cst_448 {dimension_numbers = #tpu.dot_dimension_numbers<[1], [0], [0], [1], [0, 0, 1, 1], [], []>} : vector<8x32xbf16>, vector<32x32xbf16>, vector<8x32xf32> -> vector<8x32xf32>
    %1055 = arith.index_cast %c10_i32_445 : i32 to index
    %c0_449 = arith.constant 0 : index
    %c0_450 = arith.constant 0 : index
    %1056 = vector.load %arg26[%1055, %c0_449, %c0_450] : memref<16x8x32xf32, #tpu.memory_space<vmem>>, vector<1x8x32xf32>
    %1057 = vector.shape_cast %1056 : vector<1x8x32xf32> to vector<8x32xf32>
    %1058 = arith.addf %1057, %1052 : vector<8x32xf32>
    %1059 = arith.negf %1058 : vector<8x32xf32>
    %1060 = math.exp %1059 : vector<8x32xf32>
    %cst_451 = arith.constant 1.000000e+00 : f32
    %1061 = vector.broadcast %cst_451 : f32 to vector<8x32xf32>
    %1062 = arith.addf %1061, %1060 : vector<8x32xf32>
    %1063 = arith.divf %1061, %1062 : vector<8x32xf32>
    %1064 = arith.index_cast %c10_i32_445 : i32 to index
    %c0_452 = arith.constant 0 : index
    %c0_453 = arith.constant 0 : index
    %1065 = vector.load %arg27[%1064, %c0_452, %c0_453] : memref<16x8x32xf32, #tpu.memory_space<vmem>>, vector<1x8x32xf32>
    %1066 = vector.shape_cast %1065 : vector<1x8x32xf32> to vector<8x32xf32>
    %1067 = arith.addf %1066, %1053 : vector<8x32xf32>
    %1068 = arith.negf %1067 : vector<8x32xf32>
    %1069 = math.exp %1068 : vector<8x32xf32>
    %cst_454 = arith.constant 1.000000e+00 : f32
    %1070 = vector.broadcast %cst_454 : f32 to vector<8x32xf32>
    %1071 = arith.addf %1070, %1069 : vector<8x32xf32>
    %1072 = arith.divf %1070, %1071 : vector<8x32xf32>
    %1073 = arith.index_cast %c10_i32_445 : i32 to index
    %c0_455 = arith.constant 0 : index
    %c0_456 = arith.constant 0 : index
    %1074 = vector.load %arg28[%1073, %c0_455, %c0_456] : memref<16x8x32xf32, #tpu.memory_space<vmem>>, vector<1x8x32xf32>
    %1075 = vector.shape_cast %1074 : vector<1x8x32xf32> to vector<8x32xf32>
    %1076 = arith.addf %1054, %669 : vector<8x32xf32>
    %1077 = arith.mulf %1063, %1076 : vector<8x32xf32>
    %1078 = arith.addf %1075, %1077 : vector<8x32xf32>
    %1079 = math.tanh %1078 : vector<8x32xf32>
    %cst_457 = arith.constant 1.000000e+00 : f32
    %1080 = vector.broadcast %cst_457 : f32 to vector<8x32xf32>
    %1081 = arith.subf %1080, %1072 : vector<8x32xf32>
    %1082 = arith.mulf %1081, %1079 : vector<8x32xf32>
    %1083 = arith.mulf %1072, %1046 : vector<8x32xf32>
    %1084 = arith.addf %1082, %1083 : vector<8x32xf32>
    %1085 = arith.index_cast %c10_i32_445 : i32 to index
    %c0_458 = arith.constant 0 : index
    %c0_459 = arith.constant 0 : index
    %1086 = vector.load %arg29[%1085, %c0_458, %c0_459] : memref<16x8x32xf32, #tpu.memory_space<vmem>>, vector<1x8x32xf32>
    %1087 = vector.shape_cast %1086 : vector<1x8x32xf32> to vector<8x32xf32>
    %1088 = vector.shape_cast %1084 : vector<8x32xf32> to vector<1x8x32xf32>
    tpu.vector_store %arg29[%1085, %c0_458, %c0_459], %1088 {strides = array<i32>} : memref<16x8x32xf32, #tpu.memory_space<vmem>>, vector<1x8x32xf32>,
    %c11_i32_460 = arith.constant 11 : i32
    %1089 = arith.truncf %1084 : vector<8x32xf32> to vector<8x32xbf16>
    %cst_461 = arith.constant dense<0.000000e+00> : vector<8x32xf32>
    %1090 = tpu.matmul %1089, %664, %cst_461 {dimension_numbers = #tpu.dot_dimension_numbers<[1], [0], [0], [1], [0, 0, 1, 1], [], []>} : vector<8x32xbf16>, vector<32x32xbf16>, vector<8x32xf32> -> vector<8x32xf32>
    %cst_462 = arith.constant dense<0.000000e+00> : vector<8x32xf32>
    %1091 = tpu.matmul %1089, %665, %cst_462 {dimension_numbers = #tpu.dot_dimension_numbers<[1], [0], [0], [1], [0, 0, 1, 1], [], []>} : vector<8x32xbf16>, vector<32x32xbf16>, vector<8x32xf32> -> vector<8x32xf32>
    %cst_463 = arith.constant dense<0.000000e+00> : vector<8x32xf32>
    %1092 = tpu.matmul %1089, %666, %cst_463 {dimension_numbers = #tpu.dot_dimension_numbers<[1], [0], [0], [1], [0, 0, 1, 1], [], []>} : vector<8x32xbf16>, vector<32x32xbf16>, vector<8x32xf32> -> vector<8x32xf32>
    %1093 = arith.index_cast %c11_i32_460 : i32 to index
    %c0_464 = arith.constant 0 : index
    %c0_465 = arith.constant 0 : index
    %1094 = vector.load %arg26[%1093, %c0_464, %c0_465] : memref<16x8x32xf32, #tpu.memory_space<vmem>>, vector<1x8x32xf32>
    %1095 = vector.shape_cast %1094 : vector<1x8x32xf32> to vector<8x32xf32>
    %1096 = arith.addf %1095, %1090 : vector<8x32xf32>
    %1097 = arith.negf %1096 : vector<8x32xf32>
    %1098 = math.exp %1097 : vector<8x32xf32>
    %cst_466 = arith.constant 1.000000e+00 : f32
    %1099 = vector.broadcast %cst_466 : f32 to vector<8x32xf32>
    %1100 = arith.addf %1099, %1098 : vector<8x32xf32>
    %1101 = arith.divf %1099, %1100 : vector<8x32xf32>
    %1102 = arith.index_cast %c11_i32_460 : i32 to index
    %c0_467 = arith.constant 0 : index
    %c0_468 = arith.constant 0 : index
    %1103 = vector.load %arg27[%1102, %c0_467, %c0_468] : memref<16x8x32xf32, #tpu.memory_space<vmem>>, vector<1x8x32xf32>
    %1104 = vector.shape_cast %1103 : vector<1x8x32xf32> to vector<8x32xf32>
    %1105 = arith.addf %1104, %1091 : vector<8x32xf32>
    %1106 = arith.negf %1105 : vector<8x32xf32>
    %1107 = math.exp %1106 : vector<8x32xf32>
    %cst_469 = arith.constant 1.000000e+00 : f32
    %1108 = vector.broadcast %cst_469 : f32 to vector<8x32xf32>
    %1109 = arith.addf %1108, %1107 : vector<8x32xf32>
    %1110 = arith.divf %1108, %1109 : vector<8x32xf32>
    %1111 = arith.index_cast %c11_i32_460 : i32 to index
    %c0_470 = arith.constant 0 : index
    %c0_471 = arith.constant 0 : index
    %1112 = vector.load %arg28[%1111, %c0_470, %c0_471] : memref<16x8x32xf32, #tpu.memory_space<vmem>>, vector<1x8x32xf32>
    %1113 = vector.shape_cast %1112 : vector<1x8x32xf32> to vector<8x32xf32>
    %1114 = arith.addf %1092, %669 : vector<8x32xf32>
    %1115 = arith.mulf %1101, %1114 : vector<8x32xf32>
    %1116 = arith.addf %1113, %1115 : vector<8x32xf32>
    %1117 = math.tanh %1116 : vector<8x32xf32>
    %cst_472 = arith.constant 1.000000e+00 : f32
    %1118 = vector.broadcast %cst_472 : f32 to vector<8x32xf32>
    %1119 = arith.subf %1118, %1110 : vector<8x32xf32>
    %1120 = arith.mulf %1119, %1117 : vector<8x32xf32>
    %1121 = arith.mulf %1110, %1084 : vector<8x32xf32>
    %1122 = arith.addf %1120, %1121 : vector<8x32xf32>
    %1123 = arith.index_cast %c11_i32_460 : i32 to index
    %c0_473 = arith.constant 0 : index
    %c0_474 = arith.constant 0 : index
    %1124 = vector.load %arg29[%1123, %c0_473, %c0_474] : memref<16x8x32xf32, #tpu.memory_space<vmem>>, vector<1x8x32xf32>
    %1125 = vector.shape_cast %1124 : vector<1x8x32xf32> to vector<8x32xf32>
    %1126 = vector.shape_cast %1122 : vector<8x32xf32> to vector<1x8x32xf32>
    tpu.vector_store %arg29[%1123, %c0_473, %c0_474], %1126 {strides = array<i32>} : memref<16x8x32xf32, #tpu.memory_space<vmem>>, vector<1x8x32xf32>,
    %c12_i32_475 = arith.constant 12 : i32
    %1127 = arith.truncf %1122 : vector<8x32xf32> to vector<8x32xbf16>
    %cst_476 = arith.constant dense<0.000000e+00> : vector<8x32xf32>
    %1128 = tpu.matmul %1127, %664, %cst_476 {dimension_numbers = #tpu.dot_dimension_numbers<[1], [0], [0], [1], [0, 0, 1, 1], [], []>} : vector<8x32xbf16>, vector<32x32xbf16>, vector<8x32xf32> -> vector<8x32xf32>
    %cst_477 = arith.constant dense<0.000000e+00> : vector<8x32xf32>
    %1129 = tpu.matmul %1127, %665, %cst_477 {dimension_numbers = #tpu.dot_dimension_numbers<[1], [0], [0], [1], [0, 0, 1, 1], [], []>} : vector<8x32xbf16>, vector<32x32xbf16>, vector<8x32xf32> -> vector<8x32xf32>
    %cst_478 = arith.constant dense<0.000000e+00> : vector<8x32xf32>
    %1130 = tpu.matmul %1127, %666, %cst_478 {dimension_numbers = #tpu.dot_dimension_numbers<[1], [0], [0], [1], [0, 0, 1, 1], [], []>} : vector<8x32xbf16>, vector<32x32xbf16>, vector<8x32xf32> -> vector<8x32xf32>
    %1131 = arith.index_cast %c12_i32_475 : i32 to index
    %c0_479 = arith.constant 0 : index
    %c0_480 = arith.constant 0 : index
    %1132 = vector.load %arg26[%1131, %c0_479, %c0_480] : memref<16x8x32xf32, #tpu.memory_space<vmem>>, vector<1x8x32xf32>
    %1133 = vector.shape_cast %1132 : vector<1x8x32xf32> to vector<8x32xf32>
    %1134 = arith.addf %1133, %1128 : vector<8x32xf32>
    %1135 = arith.negf %1134 : vector<8x32xf32>
    %1136 = math.exp %1135 : vector<8x32xf32>
    %cst_481 = arith.constant 1.000000e+00 : f32
    %1137 = vector.broadcast %cst_481 : f32 to vector<8x32xf32>
    %1138 = arith.addf %1137, %1136 : vector<8x32xf32>
    %1139 = arith.divf %1137, %1138 : vector<8x32xf32>
    %1140 = arith.index_cast %c12_i32_475 : i32 to index
    %c0_482 = arith.constant 0 : index
    %c0_483 = arith.constant 0 : index
    %1141 = vector.load %arg27[%1140, %c0_482, %c0_483] : memref<16x8x32xf32, #tpu.memory_space<vmem>>, vector<1x8x32xf32>
    %1142 = vector.shape_cast %1141 : vector<1x8x32xf32> to vector<8x32xf32>
    %1143 = arith.addf %1142, %1129 : vector<8x32xf32>
    %1144 = arith.negf %1143 : vector<8x32xf32>
    %1145 = math.exp %1144 : vector<8x32xf32>
    %cst_484 = arith.constant 1.000000e+00 : f32
    %1146 = vector.broadcast %cst_484 : f32 to vector<8x32xf32>
    %1147 = arith.addf %1146, %1145 : vector<8x32xf32>
    %1148 = arith.divf %1146, %1147 : vector<8x32xf32>
    %1149 = arith.index_cast %c12_i32_475 : i32 to index
    %c0_485 = arith.constant 0 : index
    %c0_486 = arith.constant 0 : index
    %1150 = vector.load %arg28[%1149, %c0_485, %c0_486] : memref<16x8x32xf32, #tpu.memory_space<vmem>>, vector<1x8x32xf32>
    %1151 = vector.shape_cast %1150 : vector<1x8x32xf32> to vector<8x32xf32>
    %1152 = arith.addf %1130, %669 : vector<8x32xf32>
    %1153 = arith.mulf %1139, %1152 : vector<8x32xf32>
    %1154 = arith.addf %1151, %1153 : vector<8x32xf32>
    %1155 = math.tanh %1154 : vector<8x32xf32>
    %cst_487 = arith.constant 1.000000e+00 : f32
    %1156 = vector.broadcast %cst_487 : f32 to vector<8x32xf32>
    %1157 = arith.subf %1156, %1148 : vector<8x32xf32>
    %1158 = arith.mulf %1157, %1155 : vector<8x32xf32>
    %1159 = arith.mulf %1148, %1122 : vector<8x32xf32>
    %1160 = arith.addf %1158, %1159 : vector<8x32xf32>
    %1161 = arith.index_cast %c12_i32_475 : i32 to index
    %c0_488 = arith.constant 0 : index
    %c0_489 = arith.constant 0 : index
    %1162 = vector.load %arg29[%1161, %c0_488, %c0_489] : memref<16x8x32xf32, #tpu.memory_space<vmem>>, vector<1x8x32xf32>
    %1163 = vector.shape_cast %1162 : vector<1x8x32xf32> to vector<8x32xf32>
    %1164 = vector.shape_cast %1160 : vector<8x32xf32> to vector<1x8x32xf32>
    tpu.vector_store %arg29[%1161, %c0_488, %c0_489], %1164 {strides = array<i32>} : memref<16x8x32xf32, #tpu.memory_space<vmem>>, vector<1x8x32xf32>,
    %c13_i32_490 = arith.constant 13 : i32
    %1165 = arith.truncf %1160 : vector<8x32xf32> to vector<8x32xbf16>
    %cst_491 = arith.constant dense<0.000000e+00> : vector<8x32xf32>
    %1166 = tpu.matmul %1165, %664, %cst_491 {dimension_numbers = #tpu.dot_dimension_numbers<[1], [0], [0], [1], [0, 0, 1, 1], [], []>} : vector<8x32xbf16>, vector<32x32xbf16>, vector<8x32xf32> -> vector<8x32xf32>
    %cst_492 = arith.constant dense<0.000000e+00> : vector<8x32xf32>
    %1167 = tpu.matmul %1165, %665, %cst_492 {dimension_numbers = #tpu.dot_dimension_numbers<[1], [0], [0], [1], [0, 0, 1, 1], [], []>} : vector<8x32xbf16>, vector<32x32xbf16>, vector<8x32xf32> -> vector<8x32xf32>
    %cst_493 = arith.constant dense<0.000000e+00> : vector<8x32xf32>
    %1168 = tpu.matmul %1165, %666, %cst_493 {dimension_numbers = #tpu.dot_dimension_numbers<[1], [0], [0], [1], [0, 0, 1, 1], [], []>} : vector<8x32xbf16>, vector<32x32xbf16>, vector<8x32xf32> -> vector<8x32xf32>
    %1169 = arith.index_cast %c13_i32_490 : i32 to index
    %c0_494 = arith.constant 0 : index
    %c0_495 = arith.constant 0 : index
    %1170 = vector.load %arg26[%1169, %c0_494, %c0_495] : memref<16x8x32xf32, #tpu.memory_space<vmem>>, vector<1x8x32xf32>
    %1171 = vector.shape_cast %1170 : vector<1x8x32xf32> to vector<8x32xf32>
    %1172 = arith.addf %1171, %1166 : vector<8x32xf32>
    %1173 = arith.negf %1172 : vector<8x32xf32>
    %1174 = math.exp %1173 : vector<8x32xf32>
    %cst_496 = arith.constant 1.000000e+00 : f32
    %1175 = vector.broadcast %cst_496 : f32 to vector<8x32xf32>
    %1176 = arith.addf %1175, %1174 : vector<8x32xf32>
    %1177 = arith.divf %1175, %1176 : vector<8x32xf32>
    %1178 = arith.index_cast %c13_i32_490 : i32 to index
    %c0_497 = arith.constant 0 : index
    %c0_498 = arith.constant 0 : index
    %1179 = vector.load %arg27[%1178, %c0_497, %c0_498] : memref<16x8x32xf32, #tpu.memory_space<vmem>>, vector<1x8x32xf32>
    %1180 = vector.shape_cast %1179 : vector<1x8x32xf32> to vector<8x32xf32>
    %1181 = arith.addf %1180, %1167 : vector<8x32xf32>
    %1182 = arith.negf %1181 : vector<8x32xf32>
    %1183 = math.exp %1182 : vector<8x32xf32>
    %cst_499 = arith.constant 1.000000e+00 : f32
    %1184 = vector.broadcast %cst_499 : f32 to vector<8x32xf32>
    %1185 = arith.addf %1184, %1183 : vector<8x32xf32>
    %1186 = arith.divf %1184, %1185 : vector<8x32xf32>
    %1187 = arith.index_cast %c13_i32_490 : i32 to index
    %c0_500 = arith.constant 0 : index
    %c0_501 = arith.constant 0 : index
    %1188 = vector.load %arg28[%1187, %c0_500, %c0_501] : memref<16x8x32xf32, #tpu.memory_space<vmem>>, vector<1x8x32xf32>
    %1189 = vector.shape_cast %1188 : vector<1x8x32xf32> to vector<8x32xf32>
    %1190 = arith.addf %1168, %669 : vector<8x32xf32>
    %1191 = arith.mulf %1177, %1190 : vector<8x32xf32>
    %1192 = arith.addf %1189, %1191 : vector<8x32xf32>
    %1193 = math.tanh %1192 : vector<8x32xf32>
    %cst_502 = arith.constant 1.000000e+00 : f32
    %1194 = vector.broadcast %cst_502 : f32 to vector<8x32xf32>
    %1195 = arith.subf %1194, %1186 : vector<8x32xf32>
    %1196 = arith.mulf %1195, %1193 : vector<8x32xf32>
    %1197 = arith.mulf %1186, %1160 : vector<8x32xf32>
    %1198 = arith.addf %1196, %1197 : vector<8x32xf32>
    %1199 = arith.index_cast %c13_i32_490 : i32 to index
    %c0_503 = arith.constant 0 : index
    %c0_504 = arith.constant 0 : index
    %1200 = vector.load %arg29[%1199, %c0_503, %c0_504] : memref<16x8x32xf32, #tpu.memory_space<vmem>>, vector<1x8x32xf32>
    %1201 = vector.shape_cast %1200 : vector<1x8x32xf32> to vector<8x32xf32>
    %1202 = vector.shape_cast %1198 : vector<8x32xf32> to vector<1x8x32xf32>
    tpu.vector_store %arg29[%1199, %c0_503, %c0_504], %1202 {strides = array<i32>} : memref<16x8x32xf32, #tpu.memory_space<vmem>>, vector<1x8x32xf32>,
    %c14_i32_505 = arith.constant 14 : i32
    %1203 = arith.truncf %1198 : vector<8x32xf32> to vector<8x32xbf16>
    %cst_506 = arith.constant dense<0.000000e+00> : vector<8x32xf32>
    %1204 = tpu.matmul %1203, %664, %cst_506 {dimension_numbers = #tpu.dot_dimension_numbers<[1], [0], [0], [1], [0, 0, 1, 1], [], []>} : vector<8x32xbf16>, vector<32x32xbf16>, vector<8x32xf32> -> vector<8x32xf32>
    %cst_507 = arith.constant dense<0.000000e+00> : vector<8x32xf32>
    %1205 = tpu.matmul %1203, %665, %cst_507 {dimension_numbers = #tpu.dot_dimension_numbers<[1], [0], [0], [1], [0, 0, 1, 1], [], []>} : vector<8x32xbf16>, vector<32x32xbf16>, vector<8x32xf32> -> vector<8x32xf32>
    %cst_508 = arith.constant dense<0.000000e+00> : vector<8x32xf32>
    %1206 = tpu.matmul %1203, %666, %cst_508 {dimension_numbers = #tpu.dot_dimension_numbers<[1], [0], [0], [1], [0, 0, 1, 1], [], []>} : vector<8x32xbf16>, vector<32x32xbf16>, vector<8x32xf32> -> vector<8x32xf32>
    %1207 = arith.index_cast %c14_i32_505 : i32 to index
    %c0_509 = arith.constant 0 : index
    %c0_510 = arith.constant 0 : index
    %1208 = vector.load %arg26[%1207, %c0_509, %c0_510] : memref<16x8x32xf32, #tpu.memory_space<vmem>>, vector<1x8x32xf32>
    %1209 = vector.shape_cast %1208 : vector<1x8x32xf32> to vector<8x32xf32>
    %1210 = arith.addf %1209, %1204 : vector<8x32xf32>
    %1211 = arith.negf %1210 : vector<8x32xf32>
    %1212 = math.exp %1211 : vector<8x32xf32>
    %cst_511 = arith.constant 1.000000e+00 : f32
    %1213 = vector.broadcast %cst_511 : f32 to vector<8x32xf32>
    %1214 = arith.addf %1213, %1212 : vector<8x32xf32>
    %1215 = arith.divf %1213, %1214 : vector<8x32xf32>
    %1216 = arith.index_cast %c14_i32_505 : i32 to index
    %c0_512 = arith.constant 0 : index
    %c0_513 = arith.constant 0 : index
    %1217 = vector.load %arg27[%1216, %c0_512, %c0_513] : memref<16x8x32xf32, #tpu.memory_space<vmem>>, vector<1x8x32xf32>
    %1218 = vector.shape_cast %1217 : vector<1x8x32xf32> to vector<8x32xf32>
    %1219 = arith.addf %1218, %1205 : vector<8x32xf32>
    %1220 = arith.negf %1219 : vector<8x32xf32>
    %1221 = math.exp %1220 : vector<8x32xf32>
    %cst_514 = arith.constant 1.000000e+00 : f32
    %1222 = vector.broadcast %cst_514 : f32 to vector<8x32xf32>
    %1223 = arith.addf %1222, %1221 : vector<8x32xf32>
    %1224 = arith.divf %1222, %1223 : vector<8x32xf32>
    %1225 = arith.index_cast %c14_i32_505 : i32 to index
    %c0_515 = arith.constant 0 : index
    %c0_516 = arith.constant 0 : index
    %1226 = vector.load %arg28[%1225, %c0_515, %c0_516] : memref<16x8x32xf32, #tpu.memory_space<vmem>>, vector<1x8x32xf32>
    %1227 = vector.shape_cast %1226 : vector<1x8x32xf32> to vector<8x32xf32>
    %1228 = arith.addf %1206, %669 : vector<8x32xf32>
    %1229 = arith.mulf %1215, %1228 : vector<8x32xf32>
    %1230 = arith.addf %1227, %1229 : vector<8x32xf32>
    %1231 = math.tanh %1230 : vector<8x32xf32>
    %cst_517 = arith.constant 1.000000e+00 : f32
    %1232 = vector.broadcast %cst_517 : f32 to vector<8x32xf32>
    %1233 = arith.subf %1232, %1224 : vector<8x32xf32>
    %1234 = arith.mulf %1233, %1231 : vector<8x32xf32>
    %1235 = arith.mulf %1224, %1198 : vector<8x32xf32>
    %1236 = arith.addf %1234, %1235 : vector<8x32xf32>
    %1237 = arith.index_cast %c14_i32_505 : i32 to index
    %c0_518 = arith.constant 0 : index
    %c0_519 = arith.constant 0 : index
    %1238 = vector.load %arg29[%1237, %c0_518, %c0_519] : memref<16x8x32xf32, #tpu.memory_space<vmem>>, vector<1x8x32xf32>
    %1239 = vector.shape_cast %1238 : vector<1x8x32xf32> to vector<8x32xf32>
    %1240 = vector.shape_cast %1236 : vector<8x32xf32> to vector<1x8x32xf32>
    tpu.vector_store %arg29[%1237, %c0_518, %c0_519], %1240 {strides = array<i32>} : memref<16x8x32xf32, #tpu.memory_space<vmem>>, vector<1x8x32xf32>,
    %c15_i32_520 = arith.constant 15 : i32
    %1241 = arith.truncf %1236 : vector<8x32xf32> to vector<8x32xbf16>
    %cst_521 = arith.constant dense<0.000000e+00> : vector<8x32xf32>
    %1242 = tpu.matmul %1241, %664, %cst_521 {dimension_numbers = #tpu.dot_dimension_numbers<[1], [0], [0], [1], [0, 0, 1, 1], [], []>} : vector<8x32xbf16>, vector<32x32xbf16>, vector<8x32xf32> -> vector<8x32xf32>
    %cst_522 = arith.constant dense<0.000000e+00> : vector<8x32xf32>
    %1243 = tpu.matmul %1241, %665, %cst_522 {dimension_numbers = #tpu.dot_dimension_numbers<[1], [0], [0], [1], [0, 0, 1, 1], [], []>} : vector<8x32xbf16>, vector<32x32xbf16>, vector<8x32xf32> -> vector<8x32xf32>
    %cst_523 = arith.constant dense<0.000000e+00> : vector<8x32xf32>
    %1244 = tpu.matmul %1241, %666, %cst_523 {dimension_numbers = #tpu.dot_dimension_numbers<[1], [0], [0], [1], [0, 0, 1, 1], [], []>} : vector<8x32xbf16>, vector<32x32xbf16>, vector<8x32xf32> -> vector<8x32xf32>
    %1245 = arith.index_cast %c15_i32_520 : i32 to index
    %c0_524 = arith.constant 0 : index
    %c0_525 = arith.constant 0 : index
    %1246 = vector.load %arg26[%1245, %c0_524, %c0_525] : memref<16x8x32xf32, #tpu.memory_space<vmem>>, vector<1x8x32xf32>
    %1247 = vector.shape_cast %1246 : vector<1x8x32xf32> to vector<8x32xf32>
    %1248 = arith.addf %1247, %1242 : vector<8x32xf32>
    %1249 = arith.negf %1248 : vector<8x32xf32>
    %1250 = math.exp %1249 : vector<8x32xf32>
    %cst_526 = arith.constant 1.000000e+00 : f32
    %1251 = vector.broadcast %cst_526 : f32 to vector<8x32xf32>
    %1252 = arith.addf %1251, %1250 : vector<8x32xf32>
    %1253 = arith.divf %1251, %1252 : vector<8x32xf32>
    %1254 = arith.index_cast %c15_i32_520 : i32 to index
    %c0_527 = arith.constant 0 : index
    %c0_528 = arith.constant 0 : index
    %1255 = vector.load %arg27[%1254, %c0_527, %c0_528] : memref<16x8x32xf32, #tpu.memory_space<vmem>>, vector<1x8x32xf32>
    %1256 = vector.shape_cast %1255 : vector<1x8x32xf32> to vector<8x32xf32>
    %1257 = arith.addf %1256, %1243 : vector<8x32xf32>
    %1258 = arith.negf %1257 : vector<8x32xf32>
    %1259 = math.exp %1258 : vector<8x32xf32>
    %cst_529 = arith.constant 1.000000e+00 : f32
    %1260 = vector.broadcast %cst_529 : f32 to vector<8x32xf32>
    %1261 = arith.addf %1260, %1259 : vector<8x32xf32>
    %1262 = arith.divf %1260, %1261 : vector<8x32xf32>
    %1263 = arith.index_cast %c15_i32_520 : i32 to index
    %c0_530 = arith.constant 0 : index
    %c0_531 = arith.constant 0 : index
    %1264 = vector.load %arg28[%1263, %c0_530, %c0_531] : memref<16x8x32xf32, #tpu.memory_space<vmem>>, vector<1x8x32xf32>
    %1265 = vector.shape_cast %1264 : vector<1x8x32xf32> to vector<8x32xf32>
    %1266 = arith.addf %1244, %669 : vector<8x32xf32>
    %1267 = arith.mulf %1253, %1266 : vector<8x32xf32>
    %1268 = arith.addf %1265, %1267 : vector<8x32xf32>
    %1269 = math.tanh %1268 : vector<8x32xf32>
    %cst_532 = arith.constant 1.000000e+00 : f32
    %1270 = vector.broadcast %cst_532 : f32 to vector<8x32xf32>
    %1271 = arith.subf %1270, %1262 : vector<8x32xf32>
    %1272 = arith.mulf %1271, %1269 : vector<8x32xf32>
    %1273 = arith.mulf %1262, %1236 : vector<8x32xf32>
    %1274 = arith.addf %1272, %1273 : vector<8x32xf32>
    %1275 = arith.index_cast %c15_i32_520 : i32 to index
    %c0_533 = arith.constant 0 : index
    %c0_534 = arith.constant 0 : index
    %1276 = vector.load %arg29[%1275, %c0_533, %c0_534] : memref<16x8x32xf32, #tpu.memory_space<vmem>>, vector<1x8x32xf32>
    %1277 = vector.shape_cast %1276 : vector<1x8x32xf32> to vector<8x32xf32>
    %1278 = vector.shape_cast %1274 : vector<8x32xf32> to vector<1x8x32xf32>
    tpu.vector_store %arg29[%1275, %c0_533, %c0_534], %1278 {strides = array<i32>} : memref<16x8x32xf32, #tpu.memory_space<vmem>>, vector<1x8x32xf32>,
    %c16_i32_535 = arith.constant 16 : i32
    %c0_536 = arith.constant 0 : index
    %c0_537 = arith.constant 0 : index
    %c0_538 = arith.constant 0 : index
    %1279 = vector.load %arg29[%c0_536, %c0_537, %c0_538] : memref<16x8x32xf32, #tpu.memory_space<vmem>>, vector<16x8x32xf32>
    %1280 = vector.shape_cast %1279 : vector<16x8x32xf32> to vector<128x32xf32>
    %1281 = arith.truncf %1280 : vector<128x32xf32> to vector<128x32xbf16>
    %c0_539 = arith.constant 0 : index
    %c0_540 = arith.constant 0 : index
    %1282 = vector.load %arg23[%c0_539, %c0_540] : memref<32x8xbf16, #tpu.memory_space<vmem>>, vector<32x8xbf16>
    %cst_541 = arith.constant dense<0.000000e+00> : vector<128x8xf32>
    %1283 = tpu.matmul %1281, %1282, %cst_541 {dimension_numbers = #tpu.dot_dimension_numbers<[1], [0], [0], [1], [0, 0, 1, 1], [], []>} : vector<128x32xbf16>, vector<32x8xbf16>, vector<128x8xf32> -> vector<128x8xf32>
    %c0_542 = arith.constant 0 : index
    %c0_543 = arith.constant 0 : index
    %1284 = vector.load %arg24[%c0_542, %c0_543] : memref<1x8xf32, #tpu.memory_space<vmem>>, vector<1x8xf32>
    %1285 = vector.broadcast %1284 : vector<1x8xf32> to vector<128x8xf32>
    %1286 = arith.addf %1283, %1285 : vector<128x8xf32>
    %c0_544 = arith.constant 0 : index
    %c0_545 = arith.constant 0 : index
    %1287 = vector.load %arg2[%c0_544, %c0_545] : memref<128x8xf32, #tpu.memory_space<vmem>>, vector<128x8xf32>
    %1288 = arith.addf %1287, %1286 : vector<128x8xf32>
    %c0_546 = arith.constant 0 : index
    %c0_547 = arith.constant 0 : index
    %1289 = vector.load %arg25[%c0_546, %c0_547] : memref<128x8xf32, #tpu.memory_space<vmem>>, vector<128x8xf32>
    tpu.vector_store %arg25[%c0_546, %c0_547], %1288 {strides = array<i32>} : memref<128x8xf32, #tpu.memory_space<vmem>>, vector<128x8xf32>,
    return
  }
  func.func @transform_0(%arg0: i32) -> (i32, i32) {
    %c0_i32 = arith.constant 0 : i32
    %c0_i32_0 = arith.constant 0 : i32
    %c0_i32_1 = arith.constant 0 : i32
    return %c0_i32, %c0_i32_0 : i32, i32
  }
  func.func @transform_1(%arg0: i32) -> (i32, i32) {
    %c0_i32 = arith.constant 0 : i32
    %c0_i32_0 = arith.constant 0 : i32
    %c0_i32_1 = arith.constant 0 : i32
    return %c0_i32, %c0_i32_0 : i32, i32
  }
  func.func @transform_2(%arg0: i32) -> (i32, i32) {
    %c0_i32 = arith.constant 0 : i32
    %c0_i32_0 = arith.constant 0 : i32
    %c0_i32_1 = arith.constant 0 : i32
    return %c0_i32, %c0_i32_0 : i32, i32
  }
  func.func @transform_3(%arg0: i32) -> (i32, i32) {
    %c0_i32 = arith.constant 0 : i32
    %c0_i32_0 = arith.constant 0 : i32
    %c0_i32_1 = arith.constant 0 : i32
    return %c0_i32, %c0_i32_0 : i32, i32
  }
  func.func @transform_4(%arg0: i32) -> (i32, i32) {
    %c0_i32 = arith.constant 0 : i32
    %c0_i32_0 = arith.constant 0 : i32
    %c0_i32_1 = arith.constant 0 : i32
    return %c0_i32, %c0_i32_0 : i32, i32
  }
  func.func @transform_5(%arg0: i32) -> (i32, i32) {
    %c0_i32 = arith.constant 0 : i32
    %c0_i32_0 = arith.constant 0 : i32
    %c0_i32_1 = arith.constant 0 : i32
    return %c0_i32, %c0_i32_0 : i32, i32
  }
  func.func @transform_6(%arg0: i32) -> (i32, i32) {
    %c0_i32 = arith.constant 0 : i32
    %c0_i32_0 = arith.constant 0 : i32
    %c0_i32_1 = arith.constant 0 : i32
    return %c0_i32, %c0_i32_0 : i32, i32
  }
  func.func @transform_7(%arg0: i32) -> (i32, i32) {
    %c0_i32 = arith.constant 0 : i32
    %c0_i32_0 = arith.constant 0 : i32
    %c0_i32_1 = arith.constant 0 : i32
    return %c0_i32, %c0_i32_0 : i32, i32
  }
  func.func @transform_8(%arg0: i32) -> (i32, i32) {
    %c0_i32 = arith.constant 0 : i32
    %c0_i32_0 = arith.constant 0 : i32
    %c0_i32_1 = arith.constant 0 : i32
    return %c0_i32, %c0_i32_0 : i32, i32
  }
  func.func @transform_9(%arg0: i32) -> (i32, i32) {
    %c0_i32 = arith.constant 0 : i32
    %c0_i32_0 = arith.constant 0 : i32
    %c0_i32_1 = arith.constant 0 : i32
    return %c0_i32, %c0_i32_0 : i32, i32
  }
  func.func @transform_10(%arg0: i32) -> (i32, i32) {
    %c0_i32 = arith.constant 0 : i32
    %c0_i32_0 = arith.constant 0 : i32
    %c0_i32_1 = arith.constant 0 : i32
    return %c0_i32, %c0_i32_0 : i32, i32
  }
  func.func @transform_11(%arg0: i32) -> (i32, i32) {
    %c0_i32 = arith.constant 0 : i32
    %c0_i32_0 = arith.constant 0 : i32
    %c0_i32_1 = arith.constant 0 : i32
    return %c0_i32, %c0_i32_0 : i32, i32
  }
  func.func @transform_12(%arg0: i32) -> (i32, i32) {
    %c0_i32 = arith.constant 0 : i32
    %c0_i32_0 = arith.constant 0 : i32
    %c0_i32_1 = arith.constant 0 : i32
    return %c0_i32, %c0_i32_0 : i32, i32
  }
  func.func @transform_13(%arg0: i32) -> (i32, i32) {
    %c0_i32 = arith.constant 0 : i32
    %c0_i32_0 = arith.constant 0 : i32
    %c0_i32_1 = arith.constant 0 : i32
    return %c0_i32, %c0_i32_0 : i32, i32
  }
  func.func @transform_14(%arg0: i32) -> (i32, i32) {
    %c0_i32 = arith.constant 0 : i32
    %c0_i32_0 = arith.constant 0 : i32
    %c0_i32_1 = arith.constant 0 : i32
    return %c0_i32, %c0_i32_0 : i32, i32
  }
  func.func @transform_15(%arg0: i32) -> (i32, i32) {
    %c0_i32 = arith.constant 0 : i32
    %c0_i32_0 = arith.constant 0 : i32
    %c0_i32_1 = arith.constant 0 : i32
    return %c0_i32, %c0_i32_0 : i32, i32
  }
  func.func @transform_16(%arg0: i32) -> (i32, i32) {
    %c0_i32 = arith.constant 0 : i32
    %c0_i32_0 = arith.constant 0 : i32
    %c0_i32_1 = arith.constant 0 : i32
    return %c0_i32, %c0_i32_0 : i32, i32
  }
  func.func @transform_17(%arg0: i32) -> (i32, i32) {
    %c0_i32 = arith.constant 0 : i32
    %c0_i32_0 = arith.constant 0 : i32
    %c0_i32_1 = arith.constant 0 : i32
    return %c0_i32, %c0_i32_0 : i32, i32
  }
  func.func @transform_18(%arg0: i32) -> (i32, i32) {
    %c0_i32 = arith.constant 0 : i32
    %c0_i32_0 = arith.constant 0 : i32
    %c0_i32_1 = arith.constant 0 : i32
    return %c0_i32, %c0_i32_0 : i32, i32
  }
  func.func @transform_19(%arg0: i32) -> (i32, i32) {
    %c0_i32 = arith.constant 0 : i32
    %c0_i32_0 = arith.constant 0 : i32
    %c0_i32_1 = arith.constant 0 : i32
    return %c0_i32, %c0_i32_0 : i32, i32
  }
  func.func @transform_20(%arg0: i32) -> (i32, i32) {
    %c0_i32 = arith.constant 0 : i32
    %c0_i32_0 = arith.constant 0 : i32
    %c0_i32_1 = arith.constant 0 : i32
    return %c0_i32, %c0_i32_0 : i32, i32
  }
  func.func @transform_21(%arg0: i32) -> (i32, i32) {
    %c0_i32 = arith.constant 0 : i32
    %c0_i32_0 = arith.constant 0 : i32
    %c0_i32_1 = arith.constant 0 : i32
    return %c0_i32, %c0_i32_0 : i32, i32
  }
  func.func @transform_22(%arg0: i32) -> (i32, i32) {
    %c0_i32 = arith.constant 0 : i32
    %c0_i32_0 = arith.constant 0 : i32
    %c0_i32_1 = arith.constant 0 : i32
    return %c0_i32, %c0_i32_0 : i32, i32
  }
  func.func @transform_23(%arg0: i32) -> (i32, i32) {
    %c0_i32 = arith.constant 0 : i32
    %c0_i32_0 = arith.constant 0 : i32
    %c0_i32_1 = arith.constant 0 : i32
    return %c0_i32, %c0_i32_0 : i32, i32
  }
  func.func @transform_24(%arg0: i32) -> (i32, i32) {
    %c0_i32 = arith.constant 0 : i32
    %c0_i32_0 = arith.constant 0 : i32
    %c0_i32_1 = arith.constant 0 : i32
    return %c0_i32, %c0_i32_0 : i32, i32
  }
}

</mosaic_0001>

<bundles_post_ra>
// kernel: tpu_custom_call.1
= control target key start
LH: loop header
LB: loop body
LE: loop exit
PB: predicated region body
PF: predicated region fallthrough
CT: control target
= control target key end

     0   :  { %vm164_vm0 = vcmask 1043456   ;;  %vm139_vm1 = vcmask 64512   ;;  %v4689_v61 = vmov 0   ;;  %vm331_vm2 = vcmask 261120   ;;  %s6136_s2 = inlined_call_operand.vmem [shape: bf16[8,32], index: 2, kind: input, shape index: {}]   ;;  %s6137_s0 = inlined_call_operand.vmem [shape: f32[128,8], index: 0, kind: input, shape index: {}]   ;;  %s6138_s1 = inlined_call_operand.vmem [shape: f32[128,8], index: 1, kind: input, shape index: {}]   ;;  %s6139_s5 = inlined_call_operand.vmem [shape: bf16[32,32], index: 5, kind: input, shape index: {}]   ;;  %s6140_s3 = inlined_call_operand.vmem [shape: bf16[8,32], index: 3, kind: input, shape index: {}]   ;;  %s6141_s4 = inlined_call_operand.vmem [shape: bf16[8,32], index: 4, kind: input, shape index: {}]   ;;  %s6142_s6 = inlined_call_operand.vmem [shape: bf16[32,32], index: 6, kind: input, shape index: {}]   ;;  %s6143_s8 = inlined_call_operand.vmem [shape: f32[1,32], index: 8, kind: input, shape index: {}]   ;;  %s6144_s7 = inlined_call_operand.vmem [shape: bf16[32,32], index: 7, kind: input, shape index: {}]   ;;  %s6145_s9 = inlined_call_operand.vmem [shape: f32[1,32], index: 9, kind: input, shape index: {}]   ;;  %s6146_s10 = inlined_call_operand.vmem [shape: f32[1,32], index: 10, kind: input, shape index: {}]   ;;  %s6147_s11 = inlined_call_operand.vmem [shape: f32[1,32], index: 11, kind: input, shape index: {}]   ;;  %s6148_s12 = inlined_call_operand.vmem [shape: bf16[32,32], index: 12, kind: input, shape index: {}]   ;;  %s6149_s18 = inlined_call_operand.vmem [shape: f32[1,32], index: 18, kind: input, shape index: {}]   ;;  %s6150_s15 = inlined_call_operand.vmem [shape: bf16[32,32], index: 15, kind: input, shape index: {}]   ;;  %s6151_s13 = inlined_call_operand.vmem [shape: bf16[32,32], index: 13, kind: input, shape index: {}]   ;;  %s6152_s14 = inlined_call_operand.vmem [shape: bf16[32,32], index: 14, kind: input, shape index: {}]   ;;  %s6153_s16 = inlined_call_operand.vmem [shape: bf16[32,32], index: 16, kind: input, shape index: {}]   ;;  %s6154_s17 = inlined_call_operand.vmem [shape: bf16[32,32], index: 17, kind: input, shape index: {}]   ;;  %s6155_s19 = inlined_call_operand.vmem [shape: f32[1,32], index: 19, kind: input, shape index: {}]   ;;  %s6156_s20 = inlined_call_operand.vmem [shape: f32[1,32], index: 20, kind: input, shape index: {}]   ;;  %s6157_s21 = inlined_call_operand.vmem [shape: f32[1,32], index: 21, kind: input, shape index: {}]   ;;  %s6158_s22 = inlined_call_operand.vmem [shape: bf16[32,8], index: 22, kind: input, shape index: {}]   ;;  %s6159_s23 = inlined_call_operand.vmem [shape: f32[1,8], index: 23, kind: input, shape index: {}]   ;;  %s6160_s24 = inlined_call_operand.vmem [shape: f32[128,8], index: 24, kind: output, shape index: {}]  }
   0x1   :  { %6166 = sst [smem:[#allocation6_spill]] %s6136_s2 }
   0x2   :  { %6167 = sst [smem:[#allocation7_spill]] %s6137_s0 }
   0x3   :  { %6168 = sst [smem:[#allocation8_spill]] %s6138_s1 }
   0x4   :  { %6169 = sst [smem:[#allocation9_spill]] %s6139_s5 }
   0x5   :  { %6170 = sst [smem:[#allocation10_spill]] %s6140_s3 }
   0x6   :  { %6171 = sst [smem:[#allocation11_spill]] %s6141_s4 }
   0x7   :  { %6172 = sst [smem:[#allocation12_spill]] %s6142_s6 }
   0x8   :  { %6173 = sst [smem:[#allocation13_spill]] %s6143_s8 }
   0x9   :  { %6174 = sst [smem:[#allocation14_spill]] %s6144_s7 }
   0xa   :  { %s6175_s27 = sld [smem:[#allocation6_spill]] }
   0xb   :  { %s6176_s1 = sld [smem:[#allocation8_spill]] }
   0xc   :  { %s6177_s5 = sld [smem:[#allocation7_spill]] }
   0xd   :  { %s6178_s4 = sld [smem:[#allocation9_spill]] }
   0xe   :  { %s6179_s3 = sld [smem:[#allocation10_spill]] }
   0xf   :  { %s6180_s30 = sld [smem:[#allocation11_spill]] }
  0x10   :  { %v134_v0 = vld [vmem:[%s6175_s27] sm:$0xf]  ;;  %s6182_s2 = sld [smem:[#allocation14_spill]] }
  0x11   :  { %v90_v1 = vld [vmem:[%s6176_s1 + $0x60] sm:$0xff]  ;;  %v91_v2 = vld [vmem:[%s6176_s1 + $0x68] sm:$0xff]  ;;  %v166_v3 = vsel %vm164_vm0, %v134_v0, 0  ;;  %v92_v33 = vld [vmem:[%s6176_s1 + $0x70] sm:$0xff]  ;;  %s6183_s0 = sld [smem:[#allocation13_spill]] }
  0x12   :  { %v106_v4 = vld [vmem:[%s6177_s5 + $0x60] sm:$0xff]  ;;  %v107_v5 = vld [vmem:[%s6177_s5 + $0x68] sm:$0xff]  ;;  %4331 = vmatpush.bf16.msra.mxu3 %v166_v3  ;;  %4329 = vmatpush.bf16.msra.mxu1 %v166_v3  ;;  %v93_v34 = vld [vmem:[%s6176_s1 + $0x78] sm:$0xff] }
  0x13   :  { %v4834_v6 = vld [vmem:[%s6178_s4 + $0x8] sm:$0xff]  ;;  %v122_v7 = vadd.f32 %v106_v4, %v90_v1  ;;  %v123_v8 = vadd.f32 %v107_v5, %v91_v2  ;;  %v82_v9 = vld [vmem:[%s6176_s1 + $0x20] sm:$0xff]  ;;  %4330 = vmatpush.bf16.msra.mxu2 %v166_v3  ;;  %175 = vmatpush.bf16.msra.mxu0 %v166_v3  ;;  %v108_v35 = vld [vmem:[%s6177_s5 + $0x70] sm:$0xff] }
  0x14   :  { %v83_v10 = vld [vmem:[%s6176_s1 + $0x28] sm:$0xff]  ;;  %v98_v11 = vld [vmem:[%s6177_s5 + $0x20] sm:$0xff]  ;;  %v109_v39 = vld [vmem:[%s6177_s5 + $0x78] sm:$0xff]  ;;  %v124_v46 = vadd.f32 %v108_v35, %v92_v33 }
  0x15   :  { %v99_v12 = vld [vmem:[%s6177_s5 + $0x28] sm:$0xff]  ;;  %v114_v13 = vadd.f32 %v98_v11, %v82_v9  ;;  %v217_v14 = vld [vmem:[%s6179_s3] sm:$0xf]  ;;  %v4852_v15 = vpack.c.bf16 %v123_v8, %v122_v7  ;;  %s6181_s3 = sld [smem:[#allocation12_spill]]  ;;  %v84_v41 = vld [vmem:[%s6176_s1 + $0x30] sm:$0xff]  ;;  %v125_v47 = vadd.f32 %v109_v39, %v93_v34 }
  0x16   :  { %417 = vmatpush.bf16.msrb.mxu3 %v4834_v6  ;;  %v115_v16 = vadd.f32 %v99_v12, %v83_v10  ;;  %v223_v17 = vsel %vm164_vm0, %v217_v14, 0  ;;  %v4858_v18 = vld [vmem:[%s6178_s4] sm:$0xff]  ;;  %v87_v21 = vld [vmem:[%s6176_s1 + $0x48] sm:$0xff]  ;;  %v85_v43 = vld [vmem:[%s6176_s1 + $0x38] sm:$0xff] }
  0x17   :  { %232 = vmatpush.bf16.msrb.mxu1 %v223_v17  ;;  %4025 = vmatmul.msk.bf16.vlgmr.msra.gmra.mxu3 %vm139_vm1, %v4852_v15  ;;  %v86_v20 = vld [vmem:[%s6176_s1 + $0x40] sm:$0xff]  ;;  %v103_v23 = vld [vmem:[%s6177_s5 + $0x48] sm:$0xff]  ;;  %v100_v44 = vld [vmem:[%s6177_s5 + $0x30] sm:$0xff]  ;;  %v4952_v54 = vpack.c.bf16 %v125_v47, %v124_v46 }
  0x18   :  { %v4862_v19 = vpack.c.bf16 %v115_v16, %v114_v13  ;;  %v102_v22 = vld [vmem:[%s6177_s5 + $0x40] sm:$0xff]  ;;  %v119_v25 = vadd.f32 %v103_v23, %v87_v21  ;;  %v79_v27 = vld [vmem:[%s6176_s1 + $0x8] sm:$0xff]  ;;  %v101_v45 = vld [vmem:[%s6177_s5 + $0x38] sm:$0xff]  ;;  %v116_v48 = vadd.f32 %v100_v44, %v84_v41 }
  0x19   :  { %v118_v24 = vadd.f32 %v102_v22, %v86_v20  ;;  %v78_v26 = vld [vmem:[%s6176_s1] sm:$0xff]  ;;  %v95_v29 = vld [vmem:[%s6177_s5 + $0x8] sm:$0xff]  ;;  %v117_v49 = vadd.f32 %v101_v45, %v85_v43  ;;  %v88_v50 = vld [vmem:[%s6176_s1 + $0x50] sm:$0xff] }
  0x1a   :  { %418 = vmatpush.bf16.msrb.mxu3 %v4858_v18  ;;  %4021 = vmatmul.msk.bf16.vlgmr.msra.gmra.mxu1 %vm139_vm1, %v4862_v19  ;;  %v94_v28 = vld [vmem:[%s6177_s5] sm:$0xff]  ;;  %v111_v37 = vadd.f32 %v95_v29, %v79_v27  ;;  %v89_v51 = vld [vmem:[%s6176_s1 + $0x58] sm:$0xff]  ;;  %v104_v52 = vld [vmem:[%s6177_s5 + $0x50] sm:$0xff] }
  0x1b   :  { %v110_v30 = vadd.f32 %v94_v28, %v78_v26  ;;  %v274_v31 = vld [vmem:[%s6180_s30] sm:$0xf]  ;;  %v4897_v32 = vld [vmem:[%s6181_s3 + $0x8] sm:$0xff]  ;;  %731 = vmatpush.bf16.msra.mxu1 %v4834_v6  ;;  %v4909_v36 = vpack.c.bf16 %v119_v25, %v118_v24  ;;  %v105_v53 = vld [vmem:[%s6177_s5 + $0x58] sm:$0xff]  ;;  %v4954_v55 = vpack.c.bf16 %v117_v49, %v116_v48  ;;  %v120_v56 = vadd.f32 %v104_v52, %v88_v50 }
  0x1c   :  { %v280_v38 = vsel %vm164_vm0, %v274_v31, 0  ;;  %v4919_v40 = vld [vmem:[%s6181_s3] sm:$0xff]  ;;  %v121_v57 = vadd.f32 %v105_v53, %v89_v51  ;;  %v4961_v58 = vld [vmem:[%s6182_s2 + $0x8] sm:$0xff] }
  0x1d   :  { %289 = vmatpush.bf16.msrb.mxu2 %v280_v38  ;;  %v126_v42 = vpack.c.bf16 %v111_v37, %v110_v30  ;;  %705 = vmatpush.bf16.msrb.mxu0 %v4961_v58  ;;  %v4971_v60 = vld [vmem:[%s6182_s2] sm:$0xff] }
  0x1e   :  { %442 = vmatpush.bf16.msra.mxu3 %v4897_v32  ;;  %4023 = vmatmul.msk.bf16.vlgmr.msra.gmra.mxu2 %vm139_vm1, %v4909_v36  ;;  %v4965_v59 = vpack.c.bf16 %v121_v57, %v120_v56  ;;  %v4996_v62 = vld [vmem:[%s6183_s0] ss:$0 sm:$0xff] }
  0x1f   :  { %732 = vmatpush.bf16.msra.mxu1 %v4858_v18  ;;  %4019 = vmatmul.msk.bf16.vlgmr.msra.gmra.mxu0 %vm139_vm1, %v126_v42  ;;  %v5025_v29 = vld [vmem:[%s6145_s9] ss:$0 sm:$0xff] }
  0x20   :  { %v5036_v41 = vld [vmem:[%s6146_s10] ss:$0 sm:$0xff] }
  0x21   :  { %744 = vmatpush.bf16.msra.mxu2 %v4897_v32  ;;  %706 = vmatpush.bf16.msrb.mxu0 %v4971_v60 }
  0x22   :  { %443 = vmatpush.bf16.msra.mxu3 %v4919_v40 }
  0x25   :  { %745 = vmatpush.bf16.msra.mxu2 %v4919_v40  ;;  %829 = vmatpush.bf16.msra.mxu0 %v4834_v6 }
  0x27   :  { %4026 = vmatmul.msk.bf16.gmra.mxu3 %vm139_vm1, %v4952_v54 }
  0x29   :  { %830 = vmatpush.bf16.msra.mxu0 %v4858_v18 }
  0x2a   :  { %4022 = vmatmul.msk.bf16.gmra.mxu1 %vm139_vm1, %v4954_v55 }
  0x2e   :  { %4024 = vmatmul.msk.bf16.gmra.mxu2 %vm139_vm1, %v4965_v59 }
  0x37   :  { %419 = vmatmul.bf16.vlgmr.msrb.gmra.mxu3 %v4689_v61 }
  0x38   :  { %510 = vmatpush.bf16.msrb.mxu3 %v4961_v58 }
  0x3a   :  { %4027 = vmatmul.msk.bf16.vlgmr.msrb.gmra.mxu1 %vm139_vm1, %v126_v42 }
  0x3b   :  { %842 = vmatpush.bf16.msrb.mxu1 %v4897_v32 }
  0x3c   :  { %511 = vmatpush.bf16.msrb.mxu3 %v4971_v60 }
  0x3e   :  { %4035 = vmatmul.msk.bf16.vlgmr.msrb.gmra.mxu2 %vm139_vm1, %v126_v42 }
  0x3f   :  { %901 = vmatpush.bf16.msrb.mxu2 %v4961_v58  ;;  %843 = vmatpush.bf16.msrb.mxu1 %v4919_v40 }
  0x43   :  { %902 = vmatpush.bf16.msrb.mxu2 %v4971_v60 }
  0x47   :  { %444 = vmatmul.bf16.vlgmr.msra.gmra.mxu3 %v4689_v61 }
  0x48   :  { %535 = vmatpush.bf16.msra.mxu3 %v4834_v6 }
  0x4c   :  { %536 = vmatpush.bf16.msra.mxu3 %v4858_v18 }
  0x57   :  { %512 = vmatmul.bf16.vlgmr.msrb.gmra.mxu3 %v4689_v61 }
  0x58   :  { %548 = vmatpush.bf16.msrb.mxu3 %v4897_v32 }
  0x5c   :  { %549 = vmatpush.bf16.msrb.mxu3 %v4919_v40 }
  0x97   :  { %v187_v63 = vpop.f32.mrf.mxu1 }
  0x98   :  { %v188_v0 = vadd.f32 %v4996_v62, %v187_v63 }
  0x9a   :  { %336 = vst.msk [vmem:[#allocation2 + $0x20] sm:$0xff] %vm331_vm2, %v188_v0  ;;  %v207_v1 = vpop.f32.mrf.mxu3 }
  0x9b   :  { %v208_v2 = vadd.f32 %v4996_v62, %v207_v1 }
  0x9c   :  { %v177_v3 = vpop.f32.mrf.mxu0 }
  0x9d   :  { %344 = vst.msk [vmem:[#allocation2 + $0x60] sm:$0xff] %vm331_vm2, %v208_v2  ;;  %v178_v4 = vadd.f32 %v4996_v62, %v177_v3 }
  0x9f   :  { %v189_v5 = vpop.f32.mrf.mxu1  ;;  %332 = vst.msk [vmem:[#allocation2] sm:$0xff] %vm331_vm2, %v178_v4 }
  0xa0   :  { %v190_v7 = vadd.f32 %v4996_v62, %v189_v5 }
  0xa1   :  { %v197_v8 = vpop.f32.mrf.mxu2 }
  0xa2   :  { %337 = vst.msk [vmem:[#allocation2 + $0x28] sm:$0xff] %vm331_vm2, %v190_v7  ;;  %v198_v9 = vadd.f32 %v4996_v62, %v197_v8  ;;  %v209_v10 = vpop.f32.mrf.mxu3  ;;  %v5047_v8 = vld [vmem:[%s6147_s11] ss:$0 sm:$0xff] }
  0xa3   :  { %v210_v11 = vadd.f32 %v4996_v62, %v209_v10 }
  0xa4   :  { %340 = vst.msk [vmem:[#allocation2 + $0x40] sm:$0xff] %vm331_vm2, %v198_v9  ;;  %v179_v12 = vpop.f32.mrf.mxu0 }
  0xa5   :  { %345 = vst.msk [vmem:[#allocation2 + $0x68] sm:$0xff] %vm331_vm2, %v210_v11  ;;  %v180_v13 = vadd.f32 %v4996_v62, %v179_v12 }
  0xa6   :  { %v449_v33 = vld [vmem:[#allocation2] sm:$0xff] }
  0xa7   :  { %v192_v14 = vpop.f32.mrf.mxu1  ;;  %333 = vst.msk [vmem:[#allocation2 + $0x8] sm:$0xff] %vm331_vm2, %v180_v13 }
  0xa8   :  { %v193_v16 = vadd.f32 %v4996_v62, %v192_v14 }
  0xa9   :  { %v199_v17 = vpop.f32.mrf.mxu2 }
  0xaa   :  { %338 = vst.msk [vmem:[#allocation2 + $0x30] sm:$0xff] %vm331_vm2, %v193_v16  ;;  %v200_v20 = vadd.f32 %v4996_v62, %v199_v17  ;;  %v212_v21 = vpop.f32.mrf.mxu3 }
  0xab   :  { %v213_v22 = vadd.f32 %v4996_v62, %v212_v21 }
  0xac   :  { %341 = vst.msk [vmem:[#allocation2 + $0x48] sm:$0xff] %vm331_vm2, %v200_v20 }
  0xad   :  { %346 = vst.msk [vmem:[#allocation2 + $0x70] sm:$0xff] %vm331_vm2, %v213_v22 }
  0xaf   :  { %v194_v23 = vpop.f32.mrf.mxu1 }
  0xb0   :  { %v195_v24 = vadd.f32 %v4996_v62, %v194_v23 }
  0xb1   :  { %v202_v25 = vpop.f32.mrf.mxu2 }
  0xb2   :  { %339 = vst.msk [vmem:[#allocation2 + $0x38] sm:$0xff] %vm331_vm2, %v195_v24  ;;  %v203_v26 = vadd.f32 %v4996_v62, %v202_v25  ;;  %v214_v27 = vpop.f32.mrf.mxu3 }
  0xb3   :  { %v215_v28 = vadd.f32 %v4996_v62, %v214_v27 }
  0xb4   :  { %342 = vst.msk [vmem:[#allocation2 + $0x50] sm:$0xff] %vm331_vm2, %v203_v26 }
  0xb5   :  { %347 = vst.msk [vmem:[#allocation2 + $0x78] sm:$0xff] %vm331_vm2, %v215_v28 }
  0xb7   :  { %v234_v30 = vpop.f32.mrf.mxu1 }
  0xb8   :  { %v235_v31 = vadd.f32 %v5025_v29, %v234_v30 }
  0xb9   :  { %v204_v34 = vpop.f32.mrf.mxu2 }
  0xba   :  { %348 = vst.msk [vmem:[#allocation3] sm:$0xff] %vm331_vm2, %v235_v31  ;;  %v205_v35 = vadd.f32 %v4996_v62, %v204_v34  ;;  %v420_v37 = vpop.f32.mrf.mxu3 }
  0xbb   :  { %v450_v38 = vadd.f32 %v449_v33, %v420_v37 }
  0xbc   :  { %343 = vst.msk [vmem:[#allocation2 + $0x58] sm:$0xff] %vm331_vm2, %v205_v35 }
  0xbd   :  { %v4059_v39 = vmul.f32 -1.442695, %v450_v38 }
  0xbf   :  { %v236_v42 = vpop.f32.mrf.mxu1  ;;  %4342 = vpow2.f32 %v4059_v39 }
  0xc0   :  { %v237_v43 = vadd.f32 %v5025_v29, %v236_v42 }
  0xc1   :  { %v291_v44 = vpop.f32.mrf.mxu2  ;;  %v470_v49 = vld [vmem:[#allocation3] sm:$0xff] }
  0xc2   :  { %349 = vst.msk [vmem:[#allocation3 + $0x8] sm:$0xff] %vm331_vm2, %v237_v43  ;;  %v292_v45 = vadd.f32 %v5036_v41, %v291_v44  ;;  %v422_v46 = vpop.f32.mrf.mxu3  ;;  %v556_v44 = vld [vmem:[#allocation2 + $0x8] sm:$0xff] }
  0xc4   :  { %364 = vst.msk [vmem:[#allocation4] sm:$0xff] %vm331_vm2, %v292_v45 }
  0xc5   :  { %v4343_v47 = vpop.eup %4342 }
  0xc6   :  { %v454_v48 = vadd.f32 1.0, %v4343_v47  ;;  %v80_v47 = vld [vmem:[%s6176_s1 + $0x10] sm:$0xff] }
  0xc8   :  { %4344 = vrcp.f32 %v454_v48  ;;  %v466_v7 = vand.u32 2147483648, %v454_v48  ;;  %vm460_vm4 = vweird.f32 %v454_v48  ;;  %v464_v9 = vand.u32 2147483647, %v454_v48 }
  0xc9   :  { %v293_v50 = vpop.f32.mrf.mxu2 }
  0xca   :  { %v294_v51 = vadd.f32 %v5036_v41, %v293_v50  ;;  %v445_v52 = vpop.f32.mrf.mxu3  ;;  %v467_v11 = vor.u32 1.1754944e-38, %v466_v7  ;;  %vm465_vm6 = vcmp.eq.f32.partialorder %v464_v9, 8.507059e+37  ;;  %v97_v50 = vld [vmem:[%s6177_s5 + $0x18] sm:$0xff] }
  0xcb   :  { %v471_v53 = vadd.f32 %v470_v49, %v445_v52  ;;  %v491_v16 = vld [vmem:[#allocation4] sm:$0xff]  ;;  %v96_v49 = vld [vmem:[%s6177_s5 + $0x10] sm:$0xff] }
  0xcc   :  { %365 = vst.msk [vmem:[#allocation4 + $0x8] sm:$0xff] %vm331_vm2, %v294_v51  ;;  %v112_v51 = vadd.f32 %v96_v49, %v80_v47 }
  0xcd   :  { %v4060_v56 = vmul.f32 -1.442695, %v471_v53 }
  0xce   :  { %v4345_v57 = vpop.eup %4344 }
  0xcf   :  { %4346 = vpow2.f32 %v4060_v56  ;;  %v456_v63 = vmul.f32 %v4345_v57, %v454_v48  ;;  %vm461_vm3 = vweird.f32 %v4345_v57  ;;  %v81_v48 = vld [vmem:[%s6176_s1 + $0x18] sm:$0xff] }
  0xd0   :  { %vm462_vm5 = vmor %vm460_vm4, %vm461_vm3  ;;  %v113_v52 = vadd.f32 %v97_v50, %v81_v48 }
  0xd1   :  { %v457_v0 = vsub.f32 1.0, %v456_v63 }
  0xd2   :  { %v447_v1 = vpop.f32.mrf.mxu3  ;;  %v127_v53 = vpack.c.bf16 %v113_v52, %v112_v51 }
  0xd3   :  { %v458_v2 = vmul.f32 %v4345_v57, %v457_v0  ;;  %v578_v1 = vld [vmem:[#allocation3 + $0x8] sm:$0xff] }
  0xd4   :  { %4020 = vmatmul.msk.bf16.gmra.mxu0 %vm139_vm1, %v127_v53  ;;  %4028 = vmatmul.msk.bf16.gmra.mxu1 %vm139_vm1, %v127_v53 }
  0xd5   :  { %v4347_v3 = vpop.eup %4346  ;;  %v459_v4 = vadd.f32 %v4345_v57, %v458_v2  ;;  %4036 = vmatmul.msk.bf16.gmra.mxu2 %vm139_vm1, %v127_v53 }
  0xd6   :  { %v475_v5 = vadd.f32 1.0, %v4347_v3 }
  0xd7   :  { %v463_v10 = vsel %vm462_vm5, %v4345_v57, %v459_v4 }
  0xd8   :  { %4348 = vrcp.f32 %v475_v5  ;;  %v468_v14 = vsel %vm465_vm6, %v467_v11, %v463_v10  ;;  %v487_v24 = vand.u32 2147483648, %v475_v5  ;;  %v485_v27 = vand.u32 2147483647, %v475_v5 }
  0xd9   :  { %vm481_vm8 = vweird.f32 %v475_v5 }
  0xda   :  { %v513_v12 = vpop.f32.mrf.mxu3  ;;  %v488_v30 = vor.u32 1.1754944e-38, %v487_v24  ;;  %vm486_vm10 = vcmp.eq.f32.partialorder %v485_v27, 8.507059e+37 }
  0xdb   :  { %v514_v13 = vadd.f32 %v5047_v8, %v513_v12 }
  0xdd   :  { %v517_v17 = vmul.f32 %v514_v13, %v468_v14 }
  0xde   :  { %v4349_v20 = vpop.eup %4348 }
  0xdf   :  { %v477_v21 = vmul.f32 %v4349_v20, %v475_v5  ;;  %v518_v22 = vadd.f32 %v517_v17, %v491_v16  ;;  %vm482_vm7 = vweird.f32 %v4349_v20 }
  0xe0   :  { %vm483_vm9 = vmor %vm481_vm8, %vm482_vm7 }
  0xe1   :  { %v478_v23 = vsub.f32 1.0, %v477_v21  ;;  %4350 = vtanh.f32 %v518_v22 }
  0xe2   :  { %v515_v25 = vpop.f32.mrf.mxu3 }
  0xe3   :  { %v479_v26 = vmul.f32 %v4349_v20, %v478_v23 }
  0xe4   :  { %4029 = vmatmul.msk.bf16.gmra.mxu1 %vm139_vm1, %v4862_v19 }
  0xe5   :  { %v480_v28 = vadd.f32 %v4349_v20, %v479_v26  ;;  %4037 = vmatmul.msk.bf16.gmra.mxu2 %vm139_vm1, %v4862_v19  ;;  %v600_v19 = vld [vmem:[#allocation4 + $0x8] sm:$0xff] }
  0xe7   :  { %v484_v31 = vsel %vm483_vm9, %v4349_v20, %v480_v28  ;;  %v4351_v35 = vpop.eup %4350 }
  0xe8   :  { %v489_v33 = vsel %vm486_vm10, %v488_v30, %v484_v31 }
  0xe9   :  { %v520_v34 = vsub.f32 1.0, %v489_v33  ;;  %v522_v38 = vmul.f32 0.0, %v489_v33 }
  0xeb   :  { %v521_v37 = vmul.f32 %v4351_v35, %v520_v34 }
  0xed   :  { %v5050_v39 = vadd.f32 %v522_v38, %v521_v37 }
  0xef   :  { %524 = vst.msk [vmem:[#allocation5] sm:$0xff] %vm331_vm2, %v5050_v39  ;;  %v525_v42 = vpack.c.bf16 %v5050_v39, %v5050_v39 }
  0xf1   :  { %4069 = vmatmul.msk.bf16.vlgmr.msra.gmra.mxu3 %vm331_vm2, %v525_v42 }
  0xf2   :  { %607 = vmatpush.bf16.msra.mxu3 %v4961_v58 }
  0xf4   :  { %4030 = vmatmul.msk.bf16.gmra.mxu1 %vm139_vm1, %v4954_v55 }
  0xf5   :  { %4038 = vmatmul.msk.bf16.gmra.mxu2 %vm139_vm1, %v4954_v55 }
  0xf6   :  { %608 = vmatpush.bf16.msra.mxu3 %v4971_v60 }
 0x101   :  { %4070 = vmatmul.msk.bf16.vlgmr.msrb.gmra.mxu3 %vm331_vm2, %v525_v42 }
 0x102   :  { %633 = vmatpush.bf16.msrb.mxu3 %v4834_v6 }
 0x104   :  { %4031 = vmatmul.msk.bf16.gmra.mxu1 %vm139_vm1, %v4909_v36 }
 0x105   :  { %4039 = vmatmul.msk.bf16.gmra.mxu2 %vm139_vm1, %v4909_v36 }
 0x106   :  { %634 = vmatpush.bf16.msrb.mxu3 %v4858_v18 }
 0x111   :  { %4073 = vmatmul.msk.bf16.vlgmr.msra.gmra.mxu3 %vm331_vm2, %v525_v42 }
 0x112   :  { %646 = vmatpush.bf16.msra.mxu3 %v4897_v32 }
 0x114   :  { %4032 = vmatmul.msk.bf16.gmra.mxu1 %vm139_vm1, %v4965_v59 }
 0x115   :  { %4040 = vmatmul.msk.bf16.gmra.mxu2 %vm139_vm1, %v4965_v59 }
 0x116   :  { %647 = vmatpush.bf16.msra.mxu3 %v4919_v40 }
 0x124   :  { %4033 = vmatmul.msk.bf16.gmra.mxu1 %vm139_vm1, %v4852_v15 }
 0x125   :  { %4041 = vmatmul.msk.bf16.gmra.mxu2 %vm139_vm1, %v4852_v15 }
 0x134   :  { %4034 = vmatmul.msk.bf16.gmra.mxu1 %vm139_vm1, %v4952_v54 }
 0x135   :  { %4042 = vmatmul.msk.bf16.gmra.mxu2 %vm139_vm1, %v4952_v54 }
 0x151   :  { %v182_v36 = vpop.f32.mrf.mxu0  ;;  %v239_v49 = vpop.f32.mrf.mxu1 }
 0x152   :  { %v240_v50 = vadd.f32 %v5025_v29, %v239_v49 }
 0x154   :  { %350 = vst.msk [vmem:[#allocation3 + $0x10] sm:$0xff] %vm331_vm2, %v240_v50 }
 0x158   :  { %v296_v54 = vpop.f32.mrf.mxu2 }
 0x159   :  { %v184_v59 = vpop.f32.mrf.mxu0  ;;  %v241_v15 = vpop.f32.mrf.mxu1  ;;  %v297_v52 = vadd.f32 %v5036_v41, %v296_v54 }
 0x15a   :  { %v185_v48 = vadd.f32 %v4996_v62, %v184_v59  ;;  %v242_v51 = vadd.f32 %v5025_v29, %v241_v15 }
 0x15b   :  { %366 = vst.msk [vmem:[#allocation4 + $0x10] sm:$0xff] %vm331_vm2, %v297_v52 }
 0x15c   :  { %335 = vst.msk [vmem:[#allocation2 + $0x18] sm:$0xff] %vm331_vm2, %v185_v48 }
 0x15d   :  { %351 = vst.msk [vmem:[#allocation3 + $0x18] sm:$0xff] %vm331_vm2, %v242_v51 }
 0x174   :  { %v538_v43 = vpop.f32.mrf.mxu3 }
 0x175   :  { %v557_v45 = vadd.f32 %v556_v44, %v538_v43 }
 0x177   :  { %v4071_v46 = vmul.f32 -1.442695, %v557_v45 }
 0x179   :  { %4352 = vpow2.f32 %v4071_v46 }
 0x17c   :  { %v540_v56 = vpop.f32.mrf.mxu3 }
 0x17f   :  { %v4353_v57 = vpop.eup %4352 }
 0x180   :  { %v561_v63 = vadd.f32 1.0, %v4353_v57 }
 0x182   :  { %4354 = vrcp.f32 %v561_v63  ;;  %v573_v14 = vand.u32 2147483648, %v561_v63  ;;  %vm567_vm12 = vweird.f32 %v561_v63  ;;  %v571_v16 = vand.u32 2147483647, %v561_v63 }
 0x184   :  { %v551_v0 = vpop.f32.mrf.mxu3  ;;  %v574_v20 = vor.u32 1.1754944e-38, %v573_v14  ;;  %vm572_vm14 = vcmp.eq.f32.partialorder %v571_v16, 8.507059e+37 }
 0x185   :  { %v579_v2 = vadd.f32 %v578_v1, %v551_v0 }
 0x187   :  { %v4072_v3 = vmul.f32 -1.442695, %v579_v2 }
 0x188   :  { %v4355_v4 = vpop.eup %4354 }
 0x189   :  { %4356 = vpow2.f32 %v4072_v3  ;;  %v563_v5 = vmul.f32 %v4355_v4, %v561_v63  ;;  %vm568_vm11 = vweird.f32 %v4355_v4 }
 0x18a   :  { %vm569_vm13 = vmor %vm567_vm12, %vm568_vm11 }
 0x18b   :  { %v564_v7 = vsub.f32 1.0, %v563_v5 }
 0x18c   :  { %v553_v9 = vpop.f32.mrf.mxu3 }
 0x18d   :  { %v565_v10 = vmul.f32 %v4355_v4, %v564_v7  ;;  %v676_v7 = vld [vmem:[#allocation3 + $0x10] sm:$0xff] }
 0x18f   :  { %v4357_v11 = vpop.eup %4356  ;;  %v566_v12 = vadd.f32 %v4355_v4, %v565_v10 }
 0x190   :  { %v583_v13 = vadd.f32 1.0, %v4357_v11 }
 0x191   :  { %v570_v17 = vsel %vm569_vm13, %v4355_v4, %v566_v12 }
 0x192   :  { %4358 = vrcp.f32 %v583_v13  ;;  %v575_v23 = vsel %vm572_vm14, %v574_v20, %v570_v17  ;;  %v595_v30 = vand.u32 2147483648, %v583_v13  ;;  %v593_v34 = vand.u32 2147483647, %v583_v13  ;;  %v244_v17 = vpop.f32.mrf.mxu1 }
 0x193   :  { %vm589_vm0 = vweird.f32 %v583_v13 }
 0x194   :  { %v610_v21 = vpop.f32.mrf.mxu3  ;;  %v596_v37 = vor.u32 1.1754944e-38, %v595_v30  ;;  %vm594_vm4 = vcmp.eq.f32.partialorder %v593_v34, 8.507059e+37 }
 0x195   :  { %v611_v22 = vadd.f32 %v5047_v8, %v610_v21 }
 0x197   :  { %v614_v24 = vmul.f32 %v611_v22, %v575_v23  ;;  %v245_v22 = vadd.f32 %v5025_v29, %v244_v17 }
 0x198   :  { %v4359_v25 = vpop.eup %4358 }
 0x199   :  { %v585_v26 = vmul.f32 %v4359_v25, %v583_v13  ;;  %v615_v27 = vadd.f32 %v614_v24, %v600_v19  ;;  %vm590_vm15 = vweird.f32 %v4359_v25  ;;  %352 = vst.msk [vmem:[#allocation3 + $0x20] sm:$0xff] %vm331_vm2, %v245_v22 }
 0x19a   :  { %vm591_vm3 = vmor %vm589_vm0, %vm590_vm15  ;;  %v246_v34 = vpop.f32.mrf.mxu1 }
 0x19b   :  { %v586_v28 = vsub.f32 1.0, %v585_v26  ;;  %4360 = vtanh.f32 %v615_v27 }
 0x19c   :  { %v612_v31 = vpop.f32.mrf.mxu3 }
 0x19d   :  { %v587_v33 = vmul.f32 %v4359_v25, %v586_v28 }
 0x19f   :  { %v588_v35 = vadd.f32 %v4359_v25, %v587_v33 }
 0x1a1   :  { %v592_v38 = vsel %vm591_vm3, %v4359_v25, %v588_v35  ;;  %v4361_v44 = vpop.eup %4360  ;;  %v247_v35 = vadd.f32 %v5025_v29, %v246_v34 }
 0x1a2   :  { %v597_v42 = vsel %vm594_vm4, %v596_v37, %v592_v38 }
 0x1a3   :  { %v617_v43 = vsub.f32 1.0, %v597_v42  ;;  %v619_v46 = vmul.f32 %v597_v42, %v5050_v39  ;;  %v183_v39 = vadd.f32 %v4996_v62, %v182_v36  ;;  %v298_v62 = vpop.f32.mrf.mxu2  ;;  %353 = vst.msk [vmem:[#allocation3 + $0x28] sm:$0xff] %vm331_vm2, %v247_v35 }
 0x1a4   :  { %v299_v57 = vadd.f32 %v5036_v41, %v298_v62 }
 0x1a5   :  { %v618_v45 = vmul.f32 %v4361_v44, %v617_v43  ;;  %334 = vst.msk [vmem:[#allocation2 + $0x10] sm:$0xff] %vm331_vm2, %v183_v39  ;;  %v698_v43 = vld [vmem:[#allocation4 + $0x10] sm:$0xff]  ;;  %v249_v39 = vpop.f32.mrf.mxu1 }
 0x1a6   :  { %367 = vst.msk [vmem:[#allocation4 + $0x18] sm:$0xff] %vm331_vm2, %v299_v57  ;;  %v250_v49 = vadd.f32 %v5025_v29, %v249_v39  ;;  %v774_v39 = vld [vmem:[#allocation3 + $0x18] sm:$0xff] }
 0x1a7   :  { %v5090_v47 = vadd.f32 %v619_v46, %v618_v45 }
 0x1a8   :  { %354 = vst.msk [vmem:[#allocation3 + $0x30] sm:$0xff] %vm331_vm2, %v250_v49 }
 0x1a9   :  { %622 = vst.msk [vmem:[#allocation5 + $0x8] sm:$0xff] %vm331_vm2, %v5090_v47  ;;  %v623_v55 = vpack.c.bf16 %v5090_v47, %v5090_v47 }
 0x1ab   :  { %4074 = vmatmul.msk.bf16.vlgmr.msrb.gmra.mxu3 %vm331_vm2, %v623_v55  ;;  %4078 = vmatmul.msk.bf16.vlgmr.msrb.gmra.mxu0 %vm331_vm2, %v623_v55  ;;  %v301_v23 = vpop.f32.mrf.mxu2 }
 0x1ac   :  { %803 = vmatpush.bf16.msrb.mxu3 %v4961_v58  ;;  %940 = vmatpush.bf16.msrb.mxu0 %v4897_v32  ;;  %v654_v56 = vld [vmem:[#allocation2 + $0x10] sm:$0xff]  ;;  %v302_v25 = vadd.f32 %v5036_v41, %v301_v23 }
 0x1ad   :  { %v251_v57 = vpop.f32.mrf.mxu1 }
 0x1ae   :  { %368 = vst.msk [vmem:[#allocation4 + $0x20] sm:$0xff] %vm331_vm2, %v302_v25 }
 0x1b0   :  { %804 = vmatpush.bf16.msrb.mxu3 %v4971_v60  ;;  %941 = vmatpush.bf16.msrb.mxu0 %v4919_v40 }
 0x1b3   :  { %v303_v37 = vpop.f32.mrf.mxu2 }
 0x1b4   :  { %v304_v42 = vadd.f32 %v5036_v41, %v303_v37 }
 0x1b6   :  { %369 = vst.msk [vmem:[#allocation4 + $0x28] sm:$0xff] %vm331_vm2, %v304_v42 }
 0x1bb   :  { %4075 = vmatmul.msk.bf16.vlgmr.msra.gmra.mxu3 %vm331_vm2, %v623_v55  ;;  %v306_v50 = vpop.f32.mrf.mxu2 }
 0x1bc   :  { %927 = vmatpush.bf16.msra.mxu3 %v4834_v6  ;;  %v307_v15 = vadd.f32 %v5036_v41, %v306_v50 }
 0x1be   :  { %370 = vst.msk [vmem:[#allocation4 + $0x30] sm:$0xff] %vm331_vm2, %v307_v15 }
 0x1c0   :  { %928 = vmatpush.bf16.msra.mxu3 %v4858_v18 }
 0x228   :  { %v708_v53 = vpop.f32.mrf.mxu0 }
 0x229   :  { %v709_v33 = vadd.f32 %v5047_v8, %v708_v53 }
 0x22e   :  { %v636_v63 = vpop.f32.mrf.mxu3 }
 0x22f   :  { %v655_v0 = vadd.f32 %v654_v56, %v636_v63 }
 0x230   :  { %v710_v1 = vpop.f32.mrf.mxu0 }
 0x231   :  { %v4076_v2 = vmul.f32 -1.442695, %v655_v0  ;;  %v252_v1 = vadd.f32 %v5025_v29, %v251_v57 }
 0x233   :  { %4362 = vpow2.f32 %v4076_v2  ;;  %v308_v2 = vpop.f32.mrf.mxu2  ;;  %355 = vst.msk [vmem:[#allocation3 + $0x38] sm:$0xff] %vm331_vm2, %v252_v1 }
 0x236   :  { %v638_v3 = vpop.f32.mrf.mxu3 }
 0x237   :  { %v309_v3 = vadd.f32 %v5036_v41, %v308_v2 }
 0x239   :  { %v4363_v4 = vpop.eup %4362  ;;  %371 = vst.msk [vmem:[#allocation4 + $0x38] sm:$0xff] %vm331_vm2, %v309_v3 }
 0x23a   :  { %v659_v5 = vadd.f32 1.0, %v4363_v4 }
 0x23c   :  { %4364 = vrcp.f32 %v659_v5  ;;  %v671_v21 = vand.u32 2147483648, %v659_v5  ;;  %v669_v24 = vand.u32 2147483647, %v659_v5  ;;  %vm665_vm6 = vweird.f32 %v659_v5 }
 0x23e   :  { %v649_v9 = vpop.f32.mrf.mxu3  ;;  %v672_v30 = vor.u32 1.1754944e-38, %v671_v21  ;;  %vm670_vm8 = vcmp.eq.f32.partialorder %v669_v24, 8.507059e+37 }
 0x23f   :  { %v677_v10 = vadd.f32 %v676_v7, %v649_v9  ;;  %v311_v9 = vpop.f32.mrf.mxu2 }
 0x241   :  { %v4077_v11 = vmul.f32 -1.442695, %v677_v10  ;;  %v312_v10 = vadd.f32 %v5036_v41, %v311_v9 }
 0x242   :  { %v4365_v12 = vpop.eup %4364 }
 0x243   :  { %v661_v13 = vmul.f32 %v4365_v12, %v659_v5  ;;  %4366 = vpow2.f32 %v4077_v11  ;;  %vm666_vm5 = vweird.f32 %v4365_v12  ;;  %372 = vst.msk [vmem:[#allocation4 + $0x40] sm:$0xff] %vm331_vm2, %v312_v10 }
 0x244   :  { %vm667_vm7 = vmor %vm665_vm6, %vm666_vm5 }
 0x245   :  { %v662_v14 = vsub.f32 1.0, %v661_v13 }
 0x246   :  { %v651_v16 = vpop.f32.mrf.mxu3 }
 0x247   :  { %v663_v20 = vmul.f32 %v4365_v12, %v662_v14  ;;  %v313_v13 = vpop.f32.mrf.mxu2 }
 0x249   :  { %v4367_v26 = vpop.eup %4366  ;;  %v664_v19 = vadd.f32 %v4365_v12, %v663_v20 }
 0x24a   :  { %v681_v27 = vadd.f32 1.0, %v4367_v26 }
 0x24b   :  { %v668_v28 = vsel %vm667_vm7, %v4365_v12, %v664_v19 }
 0x24c   :  { %4368 = vrcp.f32 %v681_v27  ;;  %v673_v31 = vsel %vm670_vm8, %v672_v30, %v668_v28  ;;  %v693_v36 = vand.u32 2147483648, %v681_v27  ;;  %v691_v48 = vand.u32 2147483647, %v681_v27 }
 0x24d   :  { %v712_v38 = vmul.f32 %v709_v33, %v673_v31  ;;  %vm687_vm10 = vweird.f32 %v681_v27 }
 0x24e   :  { %v694_v54 = vor.u32 1.1754944e-38, %v693_v36  ;;  %vm692_vm12 = vcmp.eq.f32.partialorder %v691_v48, 8.507059e+37 }
 0x24f   :  { %v713_v46 = vadd.f32 %v712_v38, %v698_v43  ;;  %v316_v16 = vpop.f32.mrf.mxu2 }
 0x250   :  { %v317_v17 = vadd.f32 %v5036_v41, %v316_v16 }
 0x251   :  { %4370 = vtanh.f32 %v713_v46 }
 0x252   :  { %v4369_v44 = vpop.eup %4368  ;;  %374 = vst.msk [vmem:[#allocation4 + $0x50] sm:$0xff] %vm331_vm2, %v317_v17 }
 0x253   :  { %v683_v45 = vmul.f32 %v4369_v44, %v681_v27  ;;  %vm688_vm9 = vweird.f32 %v4369_v44 }
 0x254   :  { %vm689_vm11 = vmor %vm687_vm10, %vm688_vm9 }
 0x255   :  { %v684_v55 = vsub.f32 1.0, %v683_v45  ;;  %v752_v45 = vld [vmem:[#allocation2 + $0x18] sm:$0xff] }
 0x257   :  { %v685_v59 = vmul.f32 %v4369_v44, %v684_v55  ;;  %v4371_v62 = vpop.eup %4370  ;;  %v318_v21 = vpop.f32.mrf.mxu2 }
 0x258   :  { %v319_v22 = vadd.f32 %v5036_v41, %v318_v21 }
 0x259   :  { %v686_v51 = vadd.f32 %v4369_v44, %v685_v59 }
 0x25a   :  { %375 = vst.msk [vmem:[#allocation4 + $0x58] sm:$0xff] %vm331_vm2, %v319_v22 }
 0x25b   :  { %v690_v52 = vsel %vm689_vm11, %v4369_v44, %v686_v51 }
 0x25c   :  { %v695_v53 = vsel %vm692_vm12, %v694_v54, %v690_v52 }
 0x25d   :  { %v715_v56 = vsub.f32 1.0, %v695_v53  ;;  %v717_v0 = vmul.f32 %v695_v53, %v5090_v47  ;;  %v254_v47 = vpop.f32.mrf.mxu1 }
 0x25e   :  { %v255_v7 = vadd.f32 %v5025_v29, %v254_v47 }
 0x25f   :  { %v716_v63 = vmul.f32 %v4371_v62, %v715_v56  ;;  %v321_v25 = vpop.f32.mrf.mxu2 }
 0x260   :  { %356 = vst.msk [vmem:[#allocation3 + $0x40] sm:$0xff] %vm331_vm2, %v255_v7  ;;  %v322_v26 = vadd.f32 %v5036_v41, %v321_v25 }
 0x261   :  { %v5149_v4 = vadd.f32 %v717_v0, %v716_v63 }
 0x262   :  { %376 = vst.msk [vmem:[#allocation4 + $0x60] sm:$0xff] %vm331_vm2, %v322_v26 }
 0x263   :  { %720 = vst.msk [vmem:[#allocation5 + $0x10] sm:$0xff] %vm331_vm2, %v5149_v4  ;;  %v721_v5 = vpack.c.bf16 %v5149_v4, %v5149_v4 }
 0x265   :  { %4079 = vmatmul.msk.bf16.vlgmr.msra.gmra.mxu1 %vm331_vm2, %v721_v5  ;;  %4080 = vmatmul.msk.bf16.vlgmr.msra.gmra.mxu2 %vm331_vm2, %v721_v5  ;;  %v256_v11 = vpop.f32.mrf.mxu1 }
 0x266   :  { %4083 = vmatmul.msk.bf16.vlgmr.msrb.gmra.mxu3 %vm331_vm2, %v721_v5  ;;  %999 = vmatpush.bf16.msra.mxu1 %v4961_v58  ;;  %v257_v12 = vadd.f32 %v5025_v29, %v256_v11 }
 0x267   :  { %1025 = vmatpush.bf16.msra.mxu2 %v4834_v6  ;;  %1038 = vmatpush.bf16.msrb.mxu3 %v4897_v32  ;;  %v314_v6 = vadd.f32 %v5036_v41, %v313_v13  ;;  %v323_v28 = vpop.f32.mrf.mxu2 }
 0x268   :  { %357 = vst.msk [vmem:[#allocation3 + $0x48] sm:$0xff] %vm331_vm2, %v257_v12  ;;  %v324_v30 = vadd.f32 %v5036_v41, %v323_v28  ;;  %v850_v28 = vld [vmem:[#allocation2 + $0x20] sm:$0xff] }
 0x269   :  { %373 = vst.msk [vmem:[#allocation4 + $0x48] sm:$0xff] %vm331_vm2, %v314_v6 }
 0x26a   :  { %1000 = vmatpush.bf16.msra.mxu1 %v4971_v60  ;;  %377 = vst.msk [vmem:[#allocation4 + $0x68] sm:$0xff] %vm331_vm2, %v324_v30 }
 0x26b   :  { %1026 = vmatpush.bf16.msra.mxu2 %v4858_v18  ;;  %1039 = vmatpush.bf16.msrb.mxu3 %v4919_v40 }
 0x26d   :  { %v259_v32 = vpop.f32.mrf.mxu1 }
 0x26e   :  { %v260_v14 = vadd.f32 %v5025_v29, %v259_v32  ;;  %v796_v32 = vld [vmem:[#allocation4 + $0x18] sm:$0xff] }
 0x26f   :  { %v326_v34 = vpop.f32.mrf.mxu2 }
 0x270   :  { %358 = vst.msk [vmem:[#allocation3 + $0x50] sm:$0xff] %vm331_vm2, %v260_v14  ;;  %v327_v35 = vadd.f32 %v5036_v41, %v326_v34 }
 0x272   :  { %378 = vst.msk [vmem:[#allocation4 + $0x70] sm:$0xff] %vm331_vm2, %v327_v35 }
 0x275   :  { %v261_v18 = vpop.f32.mrf.mxu1 }
 0x276   :  { %v262_v20 = vadd.f32 %v5025_v29, %v261_v18 }
 0x277   :  { %v328_v42 = vpop.f32.mrf.mxu2 }
 0x278   :  { %359 = vst.msk [vmem:[#allocation3 + $0x58] sm:$0xff] %vm331_vm2, %v262_v20  ;;  %v329_v43 = vadd.f32 %v5036_v41, %v328_v42 }
 0x27a   :  { %379 = vst.msk [vmem:[#allocation4 + $0x78] sm:$0xff] %vm331_vm2, %v329_v43 }
 0x27d   :  { %v264_v23 = vpop.f32.mrf.mxu1 }
 0x27e   :  { %v265_v24 = vadd.f32 %v5025_v29, %v264_v23 }
 0x280   :  { %360 = vst.msk [vmem:[#allocation3 + $0x60] sm:$0xff] %vm331_vm2, %v265_v24 }
 0x285   :  { %v266_v19 = vpop.f32.mrf.mxu1 }
 0x286   :  { %v267_v27 = vadd.f32 %v5025_v29, %v266_v19  ;;  %v5219_v19 = vld [vmem:[%s6181_s3 + $0x8] sm:$0xff] }
 0x288   :  { %361 = vst.msk [vmem:[#allocation3 + $0x68] sm:$0xff] %vm331_vm2, %v267_v27 }
 0x28d   :  { %v269_v31 = vpop.f32.mrf.mxu1 }
 0x28e   :  { %v270_v33 = vadd.f32 %v5025_v29, %v269_v31  ;;  %v872_v31 = vld [vmem:[#allocation3 + $0x20] sm:$0xff] }
 0x290   :  { %362 = vst.msk [vmem:[#allocation3 + $0x70] sm:$0xff] %vm331_vm2, %v270_v33 }
 0x295   :  { %v271_v37 = vpop.f32.mrf.mxu1 }
 0x296   :  { %v272_v38 = vadd.f32 %v5025_v29, %v271_v37 }
 0x298   :  { %363 = vst.msk [vmem:[#allocation3 + $0x78] sm:$0xff] %vm331_vm2, %v272_v38 }
 0x2e2   :  { %v734_v44 = vpop.f32.mrf.mxu1 }
 0x2e3   :  { %v753_v46 = vadd.f32 %v752_v45, %v734_v44 }
 0x2e5   :  { %v4081_v55 = vmul.f32 -1.442695, %v753_v46 }
 0x2e7   :  { %4372 = vpow2.f32 %v4081_v55 }
 0x2e8   :  { %v747_v36 = vpop.f32.mrf.mxu2 }
 0x2e9   :  { %v775_v59 = vadd.f32 %v774_v39, %v747_v36  ;;  %v806_v48 = vpop.f32.mrf.mxu3 }
 0x2ea   :  { %v736_v49 = vpop.f32.mrf.mxu1  ;;  %v807_v9 = vadd.f32 %v5047_v8, %v806_v48 }
 0x2eb   :  { %v4082_v50 = vmul.f32 -1.442695, %v775_v59 }
 0x2ed   :  { %v4373_v15 = vpop.eup %4372  ;;  %4374 = vpow2.f32 %v4082_v50 }
 0x2ee   :  { %v757_v29 = vadd.f32 1.0, %v4373_v15 }
 0x2f0   :  { %4376 = vrcp.f32 %v757_v29  ;;  %v749_v41 = vpop.f32.mrf.mxu2  ;;  %v769_v57 = vand.u32 2147483648, %v757_v29  ;;  %v767_v0 = vand.u32 2147483647, %v757_v29  ;;  %vm763_vm14 = vweird.f32 %v757_v29 }
 0x2f1   :  { %v808_v51 = vpop.f32.mrf.mxu3 }
 0x2f2   :  { %v770_v5 = vor.u32 1.1754944e-38, %v769_v57  ;;  %vm768_vm0 = vcmp.eq.f32.partialorder %v767_v0, 8.507059e+37 }
 0x2f3   :  { %v4375_v54 = vpop.eup %4374 }
 0x2f4   :  { %v779_v52 = vadd.f32 1.0, %v4375_v54 }
 0x2f6   :  { %v4377_v53 = vpop.eup %4376  ;;  %4378 = vrcp.f32 %v779_v52  ;;  %v791_v12 = vand.u32 2147483648, %v779_v52  ;;  %v789_v6 = vand.u32 2147483647, %v779_v52  ;;  %vm785_vm4 = vweird.f32 %v779_v52 }
 0x2f7   :  { %v759_v56 = vmul.f32 %v4377_v53, %v757_v29  ;;  %vm764_vm13 = vweird.f32 %v4377_v53 }
 0x2f8   :  { %vm765_vm15 = vmor %vm763_vm14, %vm764_vm13  ;;  %v792_v17 = vor.u32 1.1754944e-38, %v791_v12  ;;  %vm790_vm6 = vcmp.eq.f32.partialorder %v789_v6, 8.507059e+37  ;;  %v5244_v6 = vld [vmem:[%s6182_s2 + $0x8] sm:$0xff] }
 0x2f9   :  { %v760_v62 = vsub.f32 1.0, %v759_v56 }
 0x2fb   :  { %v761_v63 = vmul.f32 %v4377_v53, %v760_v62 }
 0x2fc   :  { %v4379_v1 = vpop.eup %4378 }
 0x2fd   :  { %v781_v2 = vmul.f32 %v4379_v1, %v779_v52  ;;  %v762_v3 = vadd.f32 %v4377_v53, %v761_v63  ;;  %vm786_vm3 = vweird.f32 %v4379_v1 }
 0x2fe   :  { %vm787_vm5 = vmor %vm785_vm4, %vm786_vm3 }
 0x2ff   :  { %v782_v47 = vsub.f32 1.0, %v781_v2  ;;  %v766_v7 = vsel %vm765_vm15, %v4377_v53, %v762_v3 }
 0x300   :  { %v771_v10 = vsel %vm768_vm0, %v770_v5, %v766_v7 }
 0x301   :  { %v783_v11 = vmul.f32 %v4379_v1, %v782_v47  ;;  %v810_v13 = vmul.f32 %v807_v9, %v771_v10 }
 0x303   :  { %v784_v14 = vadd.f32 %v4379_v1, %v783_v11  ;;  %v811_v16 = vadd.f32 %v810_v13, %v796_v32  ;;  %v5252_v32 = vld [vmem:[%s6182_s2] sm:$0xff] }
 0x305   :  { %v788_v18 = vsel %vm787_vm5, %v4379_v1, %v784_v14  ;;  %4380 = vtanh.f32 %v811_v16  ;;  %v894_v1 = vld [vmem:[#allocation4 + $0x20] sm:$0xff] }
 0x306   :  { %v793_v20 = vsel %vm790_vm6, %v792_v17, %v788_v18  ;;  %v5259_v14 = vld [vmem:[%s6181_s3] sm:$0xff]  ;;  %v970_v17 = vld [vmem:[#allocation3 + $0x28] sm:$0xff] }
 0x307   :  { %v813_v21 = vsub.f32 1.0, %v793_v20  ;;  %v815_v24 = vmul.f32 %v793_v20, %v5149_v4  ;;  %v5213_v4 = vld [vmem:[%s6178_s4 + $0x8] sm:$0xff] }
 0x30b   :  { %v4381_v22 = vpop.eup %4380 }
 0x30c   :  { %v814_v23 = vmul.f32 %v4381_v22, %v813_v21 }
 0x30e   :  { %v5200_v25 = vadd.f32 %v815_v24, %v814_v23  ;;  %v948_v23 = vld [vmem:[#allocation2 + $0x28] sm:$0xff] }
 0x310   :  { %818 = vst.msk [vmem:[#allocation5 + $0x18] sm:$0xff] %vm331_vm2, %v5200_v25  ;;  %v819_v26 = vpack.c.bf16 %v5200_v25, %v5200_v25 }
 0x312   :  { %4084 = vmatmul.msk.bf16.vlgmr.msra.gmra.mxu0 %vm331_vm2, %v819_v26  ;;  %4085 = vmatmul.msk.bf16.vlgmr.msrb.gmra.mxu1 %vm331_vm2, %v819_v26 }
 0x313   :  { %4088 = vmatmul.msk.bf16.vlgmr.msrb.gmra.mxu2 %vm331_vm2, %v819_v26  ;;  %1097 = vmatpush.bf16.msra.mxu0 %v4961_v58  ;;  %v5226_v58 = vld [vmem:[%s6178_s4] sm:$0xff] }
 0x314   :  { %1123 = vmatpush.bf16.msrb.mxu1 %v5213_v4  ;;  %1136 = vmatpush.bf16.msrb.mxu2 %v5219_v19 }
 0x317   :  { %1098 = vmatpush.bf16.msra.mxu0 %v4971_v60 }
 0x318   :  { %1124 = vmatpush.bf16.msrb.mxu1 %v5226_v58  ;;  %1137 = vmatpush.bf16.msrb.mxu2 %v4919_v40 }
 0x38f   :  { %v832_v27 = vpop.f32.mrf.mxu0  ;;  %v845_v30 = vpop.f32.mrf.mxu1 }
 0x390   :  { %v851_v33 = vadd.f32 %v850_v28, %v832_v27  ;;  %v873_v34 = vadd.f32 %v872_v31, %v845_v30 }
 0x392   :  { %v4086_v35 = vmul.f32 -1.442695, %v851_v33  ;;  %v4087_v37 = vmul.f32 -1.442695, %v873_v34 }
 0x394   :  { %4382 = vpow2.f32 %v4086_v35 }
 0x395   :  { %4384 = vpow2.f32 %v4087_v37 }
 0x396   :  { %v904_v60 = vpop.f32.mrf.mxu2 }
 0x397   :  { %v834_v38 = vpop.f32.mrf.mxu0  ;;  %v847_v42 = vpop.f32.mrf.mxu1  ;;  %v905_v53 = vadd.f32 %v5047_v8, %v904_v60 }
 0x39a   :  { %v4383_v43 = vpop.eup %4382 }
 0x39b   :  { %v4385_v44 = vpop.eup %4384  ;;  %v855_v45 = vadd.f32 1.0, %v4383_v43 }
 0x39c   :  { %v877_v46 = vadd.f32 1.0, %v4385_v44 }
 0x39d   :  { %4386 = vrcp.f32 %v855_v45  ;;  %v867_v50 = vand.u32 2147483648, %v855_v45  ;;  %v865_v29 = vand.u32 2147483647, %v855_v45  ;;  %vm861_vm8 = vweird.f32 %v855_v45 }
 0x39e   :  { %4388 = vrcp.f32 %v877_v46  ;;  %v906_v40 = vpop.f32.mrf.mxu2  ;;  %v889_v57 = vand.u32 2147483648, %v877_v46  ;;  %vm883_vm12 = vweird.f32 %v877_v46  ;;  %v887_v0 = vand.u32 2147483647, %v877_v46 }
 0x39f   :  { %v868_v54 = vor.u32 1.1754944e-38, %v867_v50  ;;  %vm866_vm10 = vcmp.eq.f32.partialorder %v865_v29, 8.507059e+37 }
 0x3a0   :  { %v890_v5 = vor.u32 1.1754944e-38, %v889_v57  ;;  %vm888_vm14 = vcmp.eq.f32.partialorder %v887_v0, 8.507059e+37 }
 0x3a3   :  { %v4387_v55 = vpop.eup %4386 }
 0x3a4   :  { %v4389_v36 = vpop.eup %4388  ;;  %v857_v39 = vmul.f32 %v4387_v55, %v855_v45  ;;  %vm862_vm7 = vweird.f32 %v4387_v55 }
 0x3a5   :  { %v879_v59 = vmul.f32 %v4389_v36, %v877_v46  ;;  %vm863_vm9 = vmor %vm861_vm8, %vm862_vm7  ;;  %vm884_vm11 = vweird.f32 %v4389_v36 }
 0x3a6   :  { %v858_v48 = vsub.f32 1.0, %v857_v39  ;;  %vm885_vm13 = vmor %vm883_vm12, %vm884_vm11 }
 0x3a7   :  { %v880_v49 = vsub.f32 1.0, %v879_v59 }
 0x3a8   :  { %v859_v15 = vmul.f32 %v4387_v55, %v858_v48 }
 0x3a9   :  { %v881_v41 = vmul.f32 %v4389_v36, %v880_v49 }
 0x3aa   :  { %v860_v51 = vadd.f32 %v4387_v55, %v859_v15 }
 0x3ab   :  { %v882_v56 = vadd.f32 %v4389_v36, %v881_v41  ;;  %v992_v41 = vld [vmem:[#allocation4 + $0x28] sm:$0xff] }
 0x3ac   :  { %v864_v52 = vsel %vm863_vm9, %v4387_v55, %v860_v51 }
 0x3ad   :  { %v869_v62 = vsel %vm866_vm10, %v868_v54, %v864_v52  ;;  %v886_v3 = vsel %vm885_vm13, %v4389_v36, %v882_v56 }
 0x3ae   :  { %v908_v63 = vmul.f32 %v905_v53, %v869_v62  ;;  %v891_v47 = vsel %vm888_vm14, %v890_v5, %v886_v3  ;;  %v1046_v3 = vld [vmem:[#allocation2 + $0x30] sm:$0xff] }
 0x3af   :  { %v911_v7 = vsub.f32 1.0, %v891_v47  ;;  %v913_v11 = vmul.f32 %v891_v47, %v5200_v25  ;;  %v1068_v47 = vld [vmem:[#allocation3 + $0x30] sm:$0xff] }
 0x3b0   :  { %v909_v2 = vadd.f32 %v908_v63, %v894_v1 }
 0x3b2   :  { %4390 = vtanh.f32 %v909_v2 }
 0x3b8   :  { %v4391_v9 = vpop.eup %4390 }
 0x3b9   :  { %v912_v10 = vmul.f32 %v4391_v9, %v911_v7 }
 0x3bb   :  { %v5232_v12 = vadd.f32 %v913_v11, %v912_v10 }
 0x3bd   :  { %916 = vst.msk [vmem:[#allocation5 + $0x20] sm:$0xff] %vm331_vm2, %v5232_v12  ;;  %v917_v13 = vpack.c.bf16 %v5232_v12, %v5232_v12 }
 0x3bf   :  { %4089 = vmatmul.msk.bf16.vlgmr.msra.gmra.mxu3 %vm331_vm2, %v917_v13  ;;  %4090 = vmatmul.msk.bf16.vlgmr.msrb.gmra.mxu0 %vm331_vm2, %v917_v13 }
 0x3c0   :  { %4093 = vmatmul.msk.bf16.vlgmr.msra.gmra.mxu1 %vm331_vm2, %v917_v13  ;;  %1195 = vmatpush.bf16.msra.mxu3 %v5244_v6 }
 0x3c1   :  { %1221 = vmatpush.bf16.msrb.mxu0 %v5213_v4  ;;  %1234 = vmatpush.bf16.msra.mxu1 %v5219_v19 }
 0x3c4   :  { %1196 = vmatpush.bf16.msra.mxu3 %v5252_v32 }
 0x3c5   :  { %1222 = vmatpush.bf16.msrb.mxu0 %v5226_v58  ;;  %1235 = vmatpush.bf16.msra.mxu1 %v5259_v14 }
 0x43c   :  { %v943_v16 = vpop.f32.mrf.mxu0 }
 0x43d   :  { %v971_v18 = vadd.f32 %v970_v17, %v943_v16  ;;  %v1002_v20 = vpop.f32.mrf.mxu1 }
 0x43e   :  { %v1003_v39 = vadd.f32 %v5047_v8, %v1002_v20 }
 0x43f   :  { %v4092_v21 = vmul.f32 -1.442695, %v971_v18 }
 0x441   :  { %4392 = vpow2.f32 %v4092_v21 }
 0x442   :  { %v930_v22 = vpop.f32.mrf.mxu3 }
 0x443   :  { %v949_v24 = vadd.f32 %v948_v23, %v930_v22 }
 0x444   :  { %v945_v25 = vpop.f32.mrf.mxu0 }
 0x445   :  { %v4091_v26 = vmul.f32 -1.442695, %v949_v24  ;;  %v1004_v27 = vpop.f32.mrf.mxu1 }
 0x447   :  { %v4393_v28 = vpop.eup %4392  ;;  %4394 = vpow2.f32 %v4091_v26 }
 0x448   :  { %v975_v30 = vadd.f32 1.0, %v4393_v28 }
 0x44a   :  { %v932_v31 = vpop.f32.mrf.mxu3  ;;  %4396 = vrcp.f32 %v975_v30  ;;  %v987_v50 = vand.u32 2147483648, %v975_v30  ;;  %vm981_vm6 = vweird.f32 %v975_v30  ;;  %v985_v29 = vand.u32 2147483647, %v975_v30 }
 0x44c   :  { %v988_v52 = vor.u32 1.1754944e-38, %v987_v50  ;;  %vm986_vm8 = vcmp.eq.f32.partialorder %v985_v29, 8.507059e+37 }
 0x44d   :  { %v4395_v33 = vpop.eup %4394 }
 0x44e   :  { %v953_v34 = vadd.f32 1.0, %v4395_v33 }
 0x450   :  { %4398 = vrcp.f32 %v953_v34  ;;  %v4397_v35 = vpop.eup %4396  ;;  %v965_v44 = vand.u32 2147483648, %v953_v34  ;;  %v963_v46 = vand.u32 2147483647, %v953_v34  ;;  %vm959_vm0 = vweird.f32 %v953_v34 }
 0x451   :  { %v977_v37 = vmul.f32 %v4397_v35, %v975_v30  ;;  %vm982_vm5 = vweird.f32 %v4397_v35 }
 0x452   :  { %v966_v36 = vor.u32 1.1754944e-38, %v965_v44  ;;  %vm964_vm4 = vcmp.eq.f32.partialorder %v963_v46, 8.507059e+37  ;;  %vm983_vm7 = vmor %vm981_vm6, %vm982_vm5  ;;  %v1090_v46 = vld [vmem:[#allocation4 + $0x30] sm:$0xff] }
 0x453   :  { %v978_v42 = vsub.f32 1.0, %v977_v37  ;;  %v5282_v37 = vld [vmem:[%s6147_s11] ss:$0 sm:$0xff] }
 0x455   :  { %v979_v40 = vmul.f32 %v4397_v35, %v978_v42 }
 0x456   :  { %v4399_v60 = vpop.eup %4398 }
 0x457   :  { %v955_v38 = vmul.f32 %v4399_v60, %v953_v34  ;;  %vm960_vm15 = vweird.f32 %v4399_v60  ;;  %v980_v48 = vadd.f32 %v4397_v35, %v979_v40 }
 0x458   :  { %vm961_vm3 = vmor %vm959_vm0, %vm960_vm15 }
 0x459   :  { %v956_v43 = vsub.f32 1.0, %v955_v38  ;;  %v984_v54 = vsel %vm983_vm7, %v4397_v35, %v980_v48 }
 0x45a   :  { %v989_v53 = vsel %vm986_vm8, %v988_v52, %v984_v54  ;;  %v1144_v54 = vld [vmem:[#allocation2 + $0x38] sm:$0xff] }
 0x45b   :  { %v957_v45 = vmul.f32 %v4399_v60, %v956_v43  ;;  %v1009_v56 = vsub.f32 1.0, %v989_v53  ;;  %v1011_v8 = vmul.f32 %v989_v53, %v5232_v12 }
 0x45d   :  { %v958_v55 = vadd.f32 %v4399_v60, %v957_v45 }
 0x45f   :  { %v962_v59 = vsel %vm961_vm3, %v4399_v60, %v958_v55 }
 0x460   :  { %v967_v49 = vsel %vm964_vm4, %v966_v36, %v962_v59 }
 0x461   :  { %v1006_v15 = vmul.f32 %v1003_v39, %v967_v49 }
 0x463   :  { %v1007_v51 = vadd.f32 %v1006_v15, %v992_v41 }
 0x465   :  { %4400 = vtanh.f32 %v1007_v51 }
 0x46b   :  { %v4401_v62 = vpop.eup %4400 }
 0x46c   :  { %v1010_v57 = vmul.f32 %v4401_v62, %v1009_v56  ;;  %v1166_v62 = vld [vmem:[#allocation3 + $0x38] sm:$0xff] }
 0x46e   :  { %v5264_v63 = vadd.f32 %v1011_v8, %v1010_v57 }
 0x470   :  { %1014 = vst.msk [vmem:[#allocation5 + $0x28] sm:$0xff] %vm331_vm2, %v5264_v63  ;;  %v1015_v0 = vpack.c.bf16 %v5264_v63, %v5264_v63 }
 0x472   :  { %4094 = vmatmul.msk.bf16.vlgmr.msra.gmra.mxu2 %vm331_vm2, %v1015_v0  ;;  %4095 = vmatmul.msk.bf16.vlgmr.msrb.gmra.mxu3 %vm331_vm2, %v1015_v0 }
 0x473   :  { %4098 = vmatmul.msk.bf16.vlgmr.msra.gmra.mxu0 %vm331_vm2, %v1015_v0  ;;  %1293 = vmatpush.bf16.msra.mxu2 %v5244_v6 }
 0x474   :  { %1319 = vmatpush.bf16.msrb.mxu3 %v5213_v4  ;;  %1332 = vmatpush.bf16.msra.mxu0 %v5219_v19 }
 0x477   :  { %1294 = vmatpush.bf16.msra.mxu2 %v5252_v32 }
 0x478   :  { %1320 = vmatpush.bf16.msrb.mxu3 %v5226_v58  ;;  %1333 = vmatpush.bf16.msra.mxu0 %v5259_v14 }
 0x4f0   :  { %v1100_v1 = vpop.f32.mrf.mxu0 }
 0x4f1   :  { %v1101_v60 = vadd.f32 %v5282_v37, %v1100_v1 }
 0x4f5   :  { %v1028_v2 = vpop.f32.mrf.mxu2  ;;  %v1041_v5 = vpop.f32.mrf.mxu3 }
 0x4f6   :  { %v1047_v7 = vadd.f32 %v1046_v3, %v1028_v2  ;;  %v1069_v9 = vadd.f32 %v1068_v47, %v1041_v5 }
 0x4f8   :  { %v4096_v10 = vmul.f32 -1.442695, %v1047_v7  ;;  %v4097_v11 = vmul.f32 -1.442695, %v1069_v9  ;;  %v1102_v12 = vpop.f32.mrf.mxu0 }
 0x4fa   :  { %4402 = vpow2.f32 %v4096_v10 }
 0x4fb   :  { %4404 = vpow2.f32 %v4097_v11 }
 0x4fd   :  { %v1030_v13 = vpop.f32.mrf.mxu2  ;;  %v1043_v16 = vpop.f32.mrf.mxu3 }
 0x500   :  { %v4403_v17 = vpop.eup %4402 }
 0x501   :  { %v4405_v18 = vpop.eup %4404  ;;  %v1051_v20 = vadd.f32 1.0, %v4403_v17 }
 0x502   :  { %v1073_v21 = vadd.f32 1.0, %v4405_v18 }
 0x503   :  { %4406 = vrcp.f32 %v1051_v20  ;;  %v1063_v27 = vand.u32 2147483648, %v1051_v20  ;;  %v1061_v31 = vand.u32 2147483647, %v1051_v20  ;;  %vm1057_vm10 = vweird.f32 %v1051_v20 }
 0x504   :  { %4408 = vrcp.f32 %v1073_v21  ;;  %v1085_v45 = vand.u32 2147483648, %v1073_v21  ;;  %vm1079_vm14 = vweird.f32 %v1073_v21  ;;  %v1083_v40 = vand.u32 2147483647, %v1073_v21 }
 0x505   :  { %v1064_v35 = vor.u32 1.1754944e-38, %v1063_v27  ;;  %vm1062_vm12 = vcmp.eq.f32.partialorder %v1061_v31, 8.507059e+37  ;;  %v1188_v31 = vld [vmem:[#allocation4 + $0x38] sm:$0xff] }
 0x506   :  { %v1086_v39 = vor.u32 1.1754944e-38, %v1085_v45  ;;  %vm1084_vm0 = vcmp.eq.f32.partialorder %v1083_v40, 8.507059e+37 }
 0x509   :  { %v4407_v22 = vpop.eup %4406 }
 0x50a   :  { %v4409_v23 = vpop.eup %4408  ;;  %v1053_v24 = vmul.f32 %v4407_v22, %v1051_v20  ;;  %vm1058_vm9 = vweird.f32 %v4407_v22 }
 0x50b   :  { %v1075_v25 = vmul.f32 %v4409_v23, %v1073_v21  ;;  %vm1059_vm11 = vmor %vm1057_vm10, %vm1058_vm9  ;;  %vm1080_vm13 = vweird.f32 %v4409_v23 }
 0x50c   :  { %v1054_v26 = vsub.f32 1.0, %v1053_v24  ;;  %vm1081_vm15 = vmor %vm1079_vm14, %vm1080_vm13 }
 0x50d   :  { %v1076_v28 = vsub.f32 1.0, %v1075_v25 }
 0x50e   :  { %v1055_v30 = vmul.f32 %v4407_v22, %v1054_v26 }
 0x50f   :  { %v1077_v33 = vmul.f32 %v4409_v23, %v1076_v28 }
 0x510   :  { %v1056_v34 = vadd.f32 %v4407_v22, %v1055_v30 }
 0x511   :  { %v1078_v43 = vadd.f32 %v4409_v23, %v1077_v33 }
 0x512   :  { %v1060_v38 = vsel %vm1059_vm11, %v4407_v22, %v1056_v34 }
 0x513   :  { %v1065_v42 = vsel %vm1062_vm12, %v1064_v35, %v1060_v38  ;;  %v1082_v36 = vsel %vm1081_vm15, %v4409_v23, %v1078_v43 }
 0x514   :  { %v1104_v44 = vmul.f32 %v1101_v60, %v1065_v42  ;;  %v1087_v59 = vsel %vm1084_vm0, %v1086_v39, %v1082_v36  ;;  %v1242_v36 = vld [vmem:[#allocation2 + $0x40] sm:$0xff] }
 0x515   :  { %v1107_v48 = vsub.f32 1.0, %v1087_v59  ;;  %v1109_v15 = vmul.f32 %v1087_v59, %v5264_v63  ;;  %v1264_v59 = vld [vmem:[#allocation3 + $0x40] sm:$0xff] }
 0x516   :  { %v1105_v55 = vadd.f32 %v1104_v44, %v1090_v46 }
 0x518   :  { %4410 = vtanh.f32 %v1105_v55 }
 0x51e   :  { %v4411_v49 = vpop.eup %4410 }
 0x51f   :  { %v1108_v50 = vmul.f32 %v4411_v49, %v1107_v48 }
 0x521   :  { %v5286_v29 = vadd.f32 %v1109_v15, %v1108_v50 }
 0x523   :  { %1112 = vst.msk [vmem:[#allocation5 + $0x30] sm:$0xff] %vm331_vm2, %v5286_v29  ;;  %v1113_v41 = vpack.c.bf16 %v5286_v29, %v5286_v29 }
 0x525   :  { %4099 = vmatmul.msk.bf16.vlgmr.msrb.gmra.mxu1 %vm331_vm2, %v1113_v41  ;;  %4100 = vmatmul.msk.bf16.vlgmr.msrb.gmra.mxu2 %vm331_vm2, %v1113_v41 }
 0x526   :  { %4103 = vmatmul.msk.bf16.vlgmr.msra.gmra.mxu3 %vm331_vm2, %v1113_v41  ;;  %1391 = vmatpush.bf16.msrb.mxu1 %v5244_v6 }
 0x527   :  { %1417 = vmatpush.bf16.msrb.mxu2 %v5213_v4  ;;  %1430 = vmatpush.bf16.msra.mxu3 %v5219_v19 }
 0x52a   :  { %1392 = vmatpush.bf16.msrb.mxu1 %v5252_v32 }
 0x52b   :  { %1418 = vmatpush.bf16.msrb.mxu2 %v5226_v58  ;;  %1431 = vmatpush.bf16.msra.mxu3 %v5259_v14 }
 0x5a2   :  { %v1126_v51 = vpop.f32.mrf.mxu1 }
 0x5a3   :  { %v1145_v52 = vadd.f32 %v1144_v54, %v1126_v51 }
 0x5a5   :  { %v4101_v53 = vmul.f32 -1.442695, %v1145_v52 }
 0x5a7   :  { %4412 = vpow2.f32 %v4101_v53 }
 0x5a8   :  { %v1139_v56 = vpop.f32.mrf.mxu2 }
 0x5a9   :  { %v1167_v8 = vadd.f32 %v1166_v62, %v1139_v56  ;;  %v1198_v57 = vpop.f32.mrf.mxu3 }
 0x5aa   :  { %v1128_v63 = vpop.f32.mrf.mxu1  ;;  %v1199_v24 = vadd.f32 %v5282_v37, %v1198_v57 }
 0x5ab   :  { %v4102_v0 = vmul.f32 -1.442695, %v1167_v8 }
 0x5ad   :  { %v4413_v1 = vpop.eup %4412  ;;  %4414 = vpow2.f32 %v4102_v0 }
 0x5ae   :  { %v1149_v2 = vadd.f32 1.0, %v4413_v1 }
 0x5b0   :  { %4416 = vrcp.f32 %v1149_v2  ;;  %v1141_v3 = vpop.f32.mrf.mxu2  ;;  %v1161_v12 = vand.u32 2147483648, %v1149_v2  ;;  %v1159_v16 = vand.u32 2147483647, %v1149_v2  ;;  %vm1155_vm4 = vweird.f32 %v1149_v2 }
 0x5b1   :  { %v1200_v5 = vpop.f32.mrf.mxu3 }
 0x5b2   :  { %v1162_v21 = vor.u32 1.1754944e-38, %v1161_v12  ;;  %vm1160_vm6 = vcmp.eq.f32.partialorder %v1159_v16, 8.507059e+37 }
 0x5b3   :  { %v4415_v47 = vpop.eup %4414 }
 0x5b4   :  { %v1171_v7 = vadd.f32 1.0, %v4415_v47 }
 0x5b6   :  { %v4417_v9 = vpop.eup %4416  ;;  %4418 = vrcp.f32 %v1171_v7  ;;  %v1183_v27 = vand.u32 2147483648, %v1171_v7  ;;  %v1181_v30 = vand.u32 2147483647, %v1171_v7  ;;  %vm1177_vm8 = vweird.f32 %v1171_v7 }
 0x5b7   :  { %v1151_v10 = vmul.f32 %v4417_v9, %v1149_v2  ;;  %vm1156_vm3 = vweird.f32 %v4417_v9 }
 0x5b8   :  { %vm1157_vm5 = vmor %vm1155_vm4, %vm1156_vm3  ;;  %v1184_v35 = vor.u32 1.1754944e-38, %v1183_v27  ;;  %vm1182_vm10 = vcmp.eq.f32.partialorder %v1181_v30, 8.507059e+37 }
 0x5b9   :  { %v1152_v11 = vsub.f32 1.0, %v1151_v10 }
 0x5bb   :  { %v1153_v13 = vmul.f32 %v4417_v9, %v1152_v11 }
 0x5bc   :  { %v4419_v17 = vpop.eup %4418 }
 0x5bd   :  { %v1173_v18 = vmul.f32 %v4419_v17, %v1171_v7  ;;  %v1154_v20 = vadd.f32 %v4417_v9, %v1153_v13  ;;  %vm1178_vm7 = vweird.f32 %v4419_v17 }
 0x5be   :  { %vm1179_vm9 = vmor %vm1177_vm8, %vm1178_vm7 }
 0x5bf   :  { %v1174_v22 = vsub.f32 1.0, %v1173_v18  ;;  %v1158_v23 = vsel %vm1157_vm5, %v4417_v9, %v1154_v20 }
 0x5c0   :  { %v1163_v25 = vsel %vm1160_vm6, %v1162_v21, %v1158_v23  ;;  %v1286_v21 = vld [vmem:[#allocation4 + $0x40] sm:$0xff] }
 0x5c1   :  { %v1175_v26 = vmul.f32 %v4419_v17, %v1174_v22  ;;  %v1202_v28 = vmul.f32 %v1199_v24, %v1163_v25 }
 0x5c3   :  { %v1176_v33 = vadd.f32 %v4419_v17, %v1175_v26  ;;  %v1203_v34 = vadd.f32 %v1202_v28, %v1188_v31 }
 0x5c5   :  { %v1180_v60 = vsel %vm1179_vm9, %v4419_v17, %v1176_v33  ;;  %4420 = vtanh.f32 %v1203_v34 }
 0x5c6   :  { %v1185_v38 = vsel %vm1182_vm10, %v1184_v35, %v1180_v60  ;;  %v1362_v35 = vld [vmem:[#allocation3 + $0x48] sm:$0xff] }
 0x5c7   :  { %v1205_v42 = vsub.f32 1.0, %v1185_v38  ;;  %v1207_v45 = vmul.f32 %v1185_v38, %v5286_v29 }
 0x5cb   :  { %v4421_v43 = vpop.eup %4420 }
 0x5cc   :  { %v1206_v44 = vmul.f32 %v4421_v43, %v1205_v42 }
 0x5ce   :  { %v5303_v46 = vadd.f32 %v1207_v45, %v1206_v44  ;;  %v1340_v44 = vld [vmem:[#allocation2 + $0x48] sm:$0xff] }
 0x5d0   :  { %1210 = vst.msk [vmem:[#allocation5 + $0x38] sm:$0xff] %vm331_vm2, %v5303_v46  ;;  %v1211_v40 = vpack.c.bf16 %v5303_v46, %v5303_v46 }
 0x5d2   :  { %4104 = vmatmul.msk.bf16.vlgmr.msrb.gmra.mxu0 %vm331_vm2, %v1211_v40  ;;  %4105 = vmatmul.msk.bf16.vlgmr.msra.gmra.mxu1 %vm331_vm2, %v1211_v40 }
 0x5d3   :  { %4108 = vmatmul.msk.bf16.vlgmr.msra.gmra.mxu2 %vm331_vm2, %v1211_v40  ;;  %1489 = vmatpush.bf16.msrb.mxu0 %v5244_v6 }
 0x5d4   :  { %1515 = vmatpush.bf16.msra.mxu1 %v5213_v4  ;;  %1528 = vmatpush.bf16.msra.mxu2 %v5219_v19 }
 0x5d7   :  { %1490 = vmatpush.bf16.msrb.mxu0 %v5252_v32 }
 0x5d8   :  { %1516 = vmatpush.bf16.msra.mxu1 %v5226_v58  ;;  %1529 = vmatpush.bf16.msra.mxu2 %v5259_v14 }
 0x64f   :  { %v1224_v55 = vpop.f32.mrf.mxu0  ;;  %v1237_v39 = vpop.f32.mrf.mxu1 }
 0x650   :  { %v1243_v48 = vadd.f32 %v1242_v36, %v1224_v55  ;;  %v1265_v49 = vadd.f32 %v1264_v59, %v1237_v39 }
 0x652   :  { %v4106_v50 = vmul.f32 -1.442695, %v1243_v48  ;;  %v4107_v15 = vmul.f32 -1.442695, %v1265_v49 }
 0x654   :  { %4422 = vpow2.f32 %v4106_v50 }
 0x655   :  { %4424 = vpow2.f32 %v4107_v15 }
 0x656   :  { %v1296_v29 = vpop.f32.mrf.mxu2 }
 0x657   :  { %v1226_v41 = vpop.f32.mrf.mxu0  ;;  %v1239_v51 = vpop.f32.mrf.mxu1  ;;  %v1297_v12 = vadd.f32 %v5282_v37, %v1296_v29 }
 0x65a   :  { %v4423_v54 = vpop.eup %4422 }
 0x65b   :  { %v4425_v52 = vpop.eup %4424  ;;  %v1247_v53 = vadd.f32 1.0, %v4423_v54 }
 0x65c   :  { %v1269_v56 = vadd.f32 1.0, %v4425_v52 }
 0x65d   :  { %4426 = vrcp.f32 %v1247_v53  ;;  %v1259_v3 = vand.u32 2147483648, %v1247_v53  ;;  %v1257_v47 = vand.u32 2147483647, %v1247_v53  ;;  %vm1253_vm12 = vweird.f32 %v1247_v53 }
 0x65e   :  { %4428 = vrcp.f32 %v1269_v56  ;;  %v1298_v62 = vpop.f32.mrf.mxu2  ;;  %v1281_v17 = vand.u32 2147483648, %v1269_v56  ;;  %vm1275_vm0 = vweird.f32 %v1269_v56  ;;  %v1279_v20 = vand.u32 2147483647, %v1269_v56 }
 0x65f   :  { %v1260_v10 = vor.u32 1.1754944e-38, %v1259_v3  ;;  %vm1258_vm14 = vcmp.eq.f32.partialorder %v1257_v47, 8.507059e+37 }
 0x660   :  { %v1282_v24 = vor.u32 1.1754944e-38, %v1281_v17  ;;  %vm1280_vm4 = vcmp.eq.f32.partialorder %v1279_v20, 8.507059e+37 }
 0x663   :  { %v4427_v8 = vpop.eup %4426 }
 0x664   :  { %v4429_v57 = vpop.eup %4428  ;;  %v1249_v63 = vmul.f32 %v4427_v8, %v1247_v53  ;;  %vm1254_vm11 = vweird.f32 %v4427_v8 }
 0x665   :  { %v1271_v0 = vmul.f32 %v4429_v57, %v1269_v56  ;;  %vm1255_vm13 = vmor %vm1253_vm12, %vm1254_vm11  ;;  %vm1276_vm15 = vweird.f32 %v4429_v57 }
 0x666   :  { %v1250_v1 = vsub.f32 1.0, %v1249_v63  ;;  %vm1277_vm3 = vmor %vm1275_vm0, %vm1276_vm15 }
 0x667   :  { %v1272_v2 = vsub.f32 1.0, %v1271_v0 }
 0x668   :  { %v1251_v5 = vmul.f32 %v4427_v8, %v1250_v1 }
 0x669   :  { %v1273_v7 = vmul.f32 %v4429_v57, %v1272_v2 }
 0x66a   :  { %v1252_v9 = vadd.f32 %v4427_v8, %v1251_v5 }
 0x66b   :  { %v1274_v13 = vadd.f32 %v4429_v57, %v1273_v7  ;;  %v1384_v7 = vld [vmem:[#allocation4 + $0x48] sm:$0xff] }
 0x66c   :  { %v1256_v11 = vsel %vm1255_vm13, %v4427_v8, %v1252_v9 }
 0x66d   :  { %v1261_v16 = vsel %vm1258_vm14, %v1260_v10, %v1256_v11  ;;  %v1278_v23 = vsel %vm1277_vm3, %v4429_v57, %v1274_v13 }
 0x66e   :  { %v1300_v18 = vmul.f32 %v1297_v12, %v1261_v16  ;;  %v1283_v25 = vsel %vm1280_vm4, %v1282_v24, %v1278_v23  ;;  %v1438_v24 = vld [vmem:[#allocation2 + $0x50] sm:$0xff] }
 0x66f   :  { %v1303_v26 = vsub.f32 1.0, %v1283_v25  ;;  %v1305_v30 = vmul.f32 %v1283_v25, %v5303_v46 }
 0x670   :  { %v1301_v22 = vadd.f32 %v1300_v18, %v1286_v21 }
 0x672   :  { %4430 = vtanh.f32 %v1301_v22 }
 0x678   :  { %v4431_v27 = vpop.eup %4430 }
 0x679   :  { %v1304_v28 = vmul.f32 %v4431_v27, %v1303_v26  ;;  %v1460_v26 = vld [vmem:[#allocation3 + $0x50] sm:$0xff] }
 0x67b   :  { %v5320_v31 = vadd.f32 %v1305_v30, %v1304_v28 }
 0x67d   :  { %1308 = vst.msk [vmem:[#allocation5 + $0x40] sm:$0xff] %vm331_vm2, %v5320_v31  ;;  %v1309_v33 = vpack.c.bf16 %v5320_v31, %v5320_v31 }
 0x67f   :  { %4109 = vmatmul.msk.bf16.vlgmr.msrb.gmra.mxu3 %vm331_vm2, %v1309_v33  ;;  %4110 = vmatmul.msk.bf16.vlgmr.msra.gmra.mxu0 %vm331_vm2, %v1309_v33 }
 0x680   :  { %4113 = vmatmul.msk.bf16.vlgmr.msrb.gmra.mxu1 %vm331_vm2, %v1309_v33  ;;  %1587 = vmatpush.bf16.msrb.mxu3 %v5244_v6 }
 0x681   :  { %1613 = vmatpush.bf16.msra.mxu0 %v5213_v4  ;;  %1626 = vmatpush.bf16.msrb.mxu1 %v5219_v19 }
 0x684   :  { %1588 = vmatpush.bf16.msrb.mxu3 %v5252_v32 }
 0x685   :  { %1614 = vmatpush.bf16.msra.mxu0 %v5226_v58  ;;  %1627 = vmatpush.bf16.msrb.mxu1 %v5259_v14 }
 0x6fc   :  { %v1335_v34 = vpop.f32.mrf.mxu0 }
 0x6fd   :  { %v1363_v60 = vadd.f32 %v1362_v35, %v1335_v34  ;;  %v1394_v38 = vpop.f32.mrf.mxu1 }
 0x6fe   :  { %v1395_v63 = vadd.f32 %v5282_v37, %v1394_v38 }
 0x6ff   :  { %v4112_v42 = vmul.f32 -1.442695, %v1363_v60 }
 0x701   :  { %4432 = vpow2.f32 %v4112_v42 }
 0x702   :  { %v1322_v43 = vpop.f32.mrf.mxu3 }
 0x703   :  { %v1341_v45 = vadd.f32 %v1340_v44, %v1322_v43 }
 0x704   :  { %v1337_v46 = vpop.f32.mrf.mxu0 }
 0x705   :  { %v4111_v40 = vmul.f32 -1.442695, %v1341_v45  ;;  %v1396_v55 = vpop.f32.mrf.mxu1 }
 0x707   :  { %v4433_v36 = vpop.eup %4432  ;;  %4434 = vpow2.f32 %v4111_v40 }
 0x708   :  { %v1367_v39 = vadd.f32 1.0, %v4433_v36 }
 0x70a   :  { %v1324_v59 = vpop.f32.mrf.mxu3  ;;  %4436 = vrcp.f32 %v1367_v39  ;;  %v1379_v3 = vand.u32 2147483648, %v1367_v39  ;;  %vm1373_vm10 = vweird.f32 %v1367_v39  ;;  %v1377_v47 = vand.u32 2147483647, %v1367_v39 }
 0x70c   :  { %v1380_v11 = vor.u32 1.1754944e-38, %v1379_v3  ;;  %vm1378_vm12 = vcmp.eq.f32.partialorder %v1377_v47, 8.507059e+37 }
 0x70d   :  { %v4435_v48 = vpop.eup %4434 }
 0x70e   :  { %v1345_v49 = vadd.f32 1.0, %v4435_v48 }
 0x710   :  { %4438 = vrcp.f32 %v1345_v49  ;;  %v4437_v50 = vpop.eup %4436  ;;  %v1357_v52 = vand.u32 2147483648, %v1345_v49  ;;  %v1355_v56 = vand.u32 2147483647, %v1345_v49  ;;  %vm1351_vm6 = vweird.f32 %v1345_v49 }
 0x711   :  { %v1369_v15 = vmul.f32 %v4437_v50, %v1367_v39  ;;  %vm1374_vm9 = vweird.f32 %v4437_v50 }
 0x712   :  { %v1358_v57 = vor.u32 1.1754944e-38, %v1357_v52  ;;  %vm1356_vm8 = vcmp.eq.f32.partialorder %v1355_v56, 8.507059e+37  ;;  %vm1375_vm11 = vmor %vm1373_vm10, %vm1374_vm9  ;;  %v1482_v56 = vld [vmem:[#allocation4 + $0x50] sm:$0xff] }
 0x713   :  { %v1370_v51 = vsub.f32 1.0, %v1369_v15 }
 0x715   :  { %v1371_v62 = vmul.f32 %v4437_v50, %v1370_v51 }
 0x716   :  { %v4439_v29 = vpop.eup %4438 }
 0x717   :  { %v1347_v41 = vmul.f32 %v4439_v29, %v1345_v49  ;;  %vm1352_vm5 = vweird.f32 %v4439_v29  ;;  %v1372_v1 = vadd.f32 %v4437_v50, %v1371_v62 }
 0x718   :  { %vm1353_vm7 = vmor %vm1351_vm6, %vm1352_vm5 }
 0x719   :  { %v1348_v54 = vsub.f32 1.0, %v1347_v41  ;;  %v1376_v10 = vsel %vm1375_vm11, %v4437_v50, %v1372_v1 }
 0x71a   :  { %v1381_v12 = vsel %vm1378_vm12, %v1380_v11, %v1376_v10  ;;  %v1536_v10 = vld [vmem:[#allocation2 + $0x58] sm:$0xff] }
 0x71b   :  { %v1349_v53 = vmul.f32 %v4439_v29, %v1348_v54  ;;  %v1401_v13 = vsub.f32 1.0, %v1381_v12  ;;  %v1403_v17 = vmul.f32 %v1381_v12, %v5320_v31 }
 0x71d   :  { %v1350_v8 = vadd.f32 %v4439_v29, %v1349_v53 }
 0x71f   :  { %v1354_v0 = vsel %vm1353_vm7, %v4439_v29, %v1350_v8 }
 0x720   :  { %v1359_v2 = vsel %vm1356_vm8, %v1358_v57, %v1354_v0 }
 0x721   :  { %v1398_v5 = vmul.f32 %v1395_v63, %v1359_v2 }
 0x723   :  { %v1399_v9 = vadd.f32 %v1398_v5, %v1384_v7 }
 0x725   :  { %4440 = vtanh.f32 %v1399_v9 }
 0x72b   :  { %v4441_v16 = vpop.eup %4440 }
 0x72c   :  { %v1402_v18 = vmul.f32 %v4441_v16, %v1401_v13  ;;  %v1558_v16 = vld [vmem:[#allocation3 + $0x58] sm:$0xff] }
 0x72e   :  { %v5337_v20 = vadd.f32 %v1403_v17, %v1402_v18 }
 0x730   :  { %1406 = vst.msk [vmem:[#allocation5 + $0x48] sm:$0xff] %vm331_vm2, %v5337_v20  ;;  %v1407_v21 = vpack.c.bf16 %v5337_v20, %v5337_v20 }
 0x732   :  { %4114 = vmatmul.msk.bf16.vlgmr.msrb.gmra.mxu2 %vm331_vm2, %v1407_v21  ;;  %4115 = vmatmul.msk.bf16.vlgmr.msra.gmra.mxu3 %vm331_vm2, %v1407_v21 }
 0x733   :  { %4118 = vmatmul.msk.bf16.vlgmr.msrb.gmra.mxu0 %vm331_vm2, %v1407_v21  ;;  %1685 = vmatpush.bf16.msrb.mxu2 %v5244_v6 }
 0x734   :  { %1711 = vmatpush.bf16.msra.mxu3 %v5213_v4  ;;  %1724 = vmatpush.bf16.msrb.mxu0 %v5219_v19 }
 0x737   :  { %1686 = vmatpush.bf16.msrb.mxu2 %v5252_v32 }
 0x738   :  { %1712 = vmatpush.bf16.msra.mxu3 %v5226_v58  ;;  %1725 = vmatpush.bf16.msrb.mxu0 %v5259_v14 }
 0x7b0   :  { %v1492_v22 = vpop.f32.mrf.mxu0 }
 0x7b1   :  { %v1493_v29 = vadd.f32 %v5282_v37, %v1492_v22 }
 0x7b5   :  { %v1420_v23 = vpop.f32.mrf.mxu2  ;;  %v1433_v25 = vpop.f32.mrf.mxu3 }
 0x7b6   :  { %v1439_v27 = vadd.f32 %v1438_v24, %v1420_v23  ;;  %v1461_v28 = vadd.f32 %v1460_v26, %v1433_v25 }
 0x7b8   :  { %v4116_v30 = vmul.f32 -1.442695, %v1439_v27  ;;  %v4117_v31 = vmul.f32 -1.442695, %v1461_v28  ;;  %v1494_v33 = vpop.f32.mrf.mxu0 }
 0x7ba   :  { %4442 = vpow2.f32 %v4116_v30 }
 0x7bb   :  { %4444 = vpow2.f32 %v4117_v31 }
 0x7bd   :  { %v1422_v34 = vpop.f32.mrf.mxu2  ;;  %v1435_v35 = vpop.f32.mrf.mxu3 }
 0x7c0   :  { %v4443_v60 = vpop.eup %4442 }
 0x7c1   :  { %v4445_v38 = vpop.eup %4444  ;;  %v1443_v42 = vadd.f32 1.0, %v4443_v60 }
 0x7c2   :  { %v1465_v43 = vadd.f32 1.0, %v4445_v38 }
 0x7c3   :  { %4446 = vrcp.f32 %v1443_v42  ;;  %v1455_v36 = vand.u32 2147483648, %v1443_v42  ;;  %v1453_v48 = vand.u32 2147483647, %v1443_v42  ;;  %vm1449_vm14 = vweird.f32 %v1443_v42 }
 0x7c4   :  { %4448 = vrcp.f32 %v1465_v43  ;;  %v1477_v53 = vand.u32 2147483648, %v1465_v43  ;;  %vm1471_vm4 = vweird.f32 %v1465_v43  ;;  %v1475_v62 = vand.u32 2147483647, %v1465_v43 }
 0x7c5   :  { %v1456_v15 = vor.u32 1.1754944e-38, %v1455_v36  ;;  %vm1454_vm0 = vcmp.eq.f32.partialorder %v1453_v48, 8.507059e+37  ;;  %v1580_v36 = vld [vmem:[#allocation4 + $0x58] sm:$0xff] }
 0x7c6   :  { %v1478_v63 = vor.u32 1.1754944e-38, %v1477_v53  ;;  %vm1476_vm6 = vcmp.eq.f32.partialorder %v1475_v62, 8.507059e+37  ;;  %v4669_v53 = vld [vmem:[%s6178_s4 + $0x8] sm:$0xff]  ;;  %v4671_v62 = vld [vmem:[%s6178_s4] sm:$0xff] }
 0x7c9   :  { %v4447_v44 = vpop.eup %4446 }
 0x7ca   :  { %v4449_v45 = vpop.eup %4448  ;;  %v1445_v46 = vmul.f32 %v4447_v44, %v1443_v42  ;;  %vm1450_vm13 = vweird.f32 %v4447_v44 }
 0x7cb   :  { %v1467_v40 = vmul.f32 %v4449_v45, %v1465_v43  ;;  %vm1451_vm15 = vmor %vm1449_vm14, %vm1450_vm13  ;;  %vm1472_vm3 = vweird.f32 %v4449_v45 }
 0x7cc   :  { %v1446_v55 = vsub.f32 1.0, %v1445_v46  ;;  %vm1473_vm5 = vmor %vm1471_vm4, %vm1472_vm3 }
 0x7cd   :  { %v1468_v39 = vsub.f32 1.0, %v1467_v40 }
 0x7ce   :  { %v1447_v59 = vmul.f32 %v4447_v44, %v1446_v55 }
 0x7cf   :  { %v1469_v49 = vmul.f32 %v4449_v45, %v1468_v39 }
 0x7d0   :  { %v1448_v50 = vadd.f32 %v4447_v44, %v1447_v59 }
 0x7d1   :  { %v1470_v54 = vadd.f32 %v4449_v45, %v1469_v49 }
 0x7d2   :  { %v1452_v41 = vsel %vm1451_vm15, %v4447_v44, %v1448_v50 }
 0x7d3   :  { %v1457_v51 = vsel %vm1454_vm0, %v1456_v15, %v1452_v41  ;;  %v1474_v57 = vsel %vm1473_vm5, %v4449_v45, %v1470_v54 }
 0x7d4   :  { %v1496_v52 = vmul.f32 %v1493_v29, %v1457_v51  ;;  %v1479_v0 = vsel %vm1476_vm6, %v1478_v63, %v1474_v57  ;;  %v1656_v63 = vld [vmem:[#allocation3 + $0x60] sm:$0xff] }
 0x7d5   :  { %v1499_v1 = vsub.f32 1.0, %v1479_v0  ;;  %v1501_v5 = vmul.f32 %v1479_v0, %v5337_v20 }
 0x7d6   :  { %v1497_v8 = vadd.f32 %v1496_v52, %v1482_v56  ;;  %v4670_v56 = vld [vmem:[%s6181_s3 + $0x8] sm:$0xff] }
 0x7d8   :  { %4450 = vtanh.f32 %v1497_v8  ;;  %v1634_v8 = vld [vmem:[#allocation2 + $0x60] sm:$0xff] }
 0x7de   :  { %v4451_v2 = vpop.eup %4450 }
 0x7df   :  { %v1500_v3 = vmul.f32 %v4451_v2, %v1499_v1 }
 0x7e1   :  { %v5354_v47 = vadd.f32 %v1501_v5, %v1500_v3 }
 0x7e3   :  { %1504 = vst.msk [vmem:[#allocation5 + $0x50] sm:$0xff] %vm331_vm2, %v5354_v47  ;;  %v1505_v7 = vpack.c.bf16 %v5354_v47, %v5354_v47 }
 0x7e5   :  { %4119 = vmatmul.msk.bf16.vlgmr.msra.gmra.mxu1 %vm331_vm2, %v1505_v7  ;;  %4120 = vmatmul.msk.bf16.vlgmr.msra.gmra.mxu2 %vm331_vm2, %v1505_v7 }
 0x7e6   :  { %4123 = vmatmul.msk.bf16.vlgmr.msrb.gmra.mxu3 %vm331_vm2, %v1505_v7  ;;  %1783 = vmatpush.bf16.msra.mxu1 %v5244_v6 }
 0x7e7   :  { %1809 = vmatpush.bf16.msra.mxu2 %v5213_v4  ;;  %1822 = vmatpush.bf16.msrb.mxu3 %v5219_v19 }
 0x7ea   :  { %1784 = vmatpush.bf16.msra.mxu1 %v5252_v32 }
 0x7eb   :  { %1810 = vmatpush.bf16.msra.mxu2 %v5226_v58  ;;  %1823 = vmatpush.bf16.msrb.mxu3 %v5259_v14 }
 0x862   :  { %v1518_v9 = vpop.f32.mrf.mxu1 }
 0x863   :  { %v1537_v11 = vadd.f32 %v1536_v10, %v1518_v9 }
 0x865   :  { %v4121_v12 = vmul.f32 -1.442695, %v1537_v11 }
 0x867   :  { %4452 = vpow2.f32 %v4121_v12 }
 0x868   :  { %v1531_v13 = vpop.f32.mrf.mxu2 }
 0x869   :  { %v1559_v17 = vadd.f32 %v1558_v16, %v1531_v13  ;;  %v1590_v18 = vpop.f32.mrf.mxu3 }
 0x86a   :  { %v1520_v20 = vpop.f32.mrf.mxu1  ;;  %v1591_v43 = vadd.f32 %v5282_v37, %v1590_v18 }
 0x86b   :  { %v4122_v21 = vmul.f32 -1.442695, %v1559_v17 }
 0x86d   :  { %v4453_v4 = vpop.eup %4452  ;;  %4454 = vpow2.f32 %v4122_v21 }
 0x86e   :  { %v1541_v19 = vadd.f32 1.0, %v4453_v4 }
 0x870   :  { %4456 = vrcp.f32 %v1541_v19  ;;  %v1533_v22 = vpop.f32.mrf.mxu2  ;;  %v1553_v28 = vand.u32 2147483648, %v1541_v19  ;;  %v1551_v31 = vand.u32 2147483647, %v1541_v19  ;;  %vm1547_vm8 = vweird.f32 %v1541_v19 }
 0x871   :  { %v1592_v23 = vpop.f32.mrf.mxu3 }
 0x872   :  { %v1554_v60 = vor.u32 1.1754944e-38, %v1553_v28  ;;  %vm1552_vm10 = vcmp.eq.f32.partialorder %v1551_v31, 8.507059e+37 }
 0x873   :  { %v4455_v58 = vpop.eup %4454 }
 0x874   :  { %v1563_v24 = vadd.f32 1.0, %v4455_v58 }
 0x876   :  { %v4457_v25 = vpop.eup %4456  ;;  %4458 = vrcp.f32 %v1563_v24  ;;  %v1575_v46 = vand.u32 2147483648, %v1563_v24  ;;  %v1573_v55 = vand.u32 2147483647, %v1563_v24  ;;  %vm1569_vm12 = vweird.f32 %v1563_v24 }
 0x877   :  { %v1543_v26 = vmul.f32 %v4457_v25, %v1541_v19  ;;  %vm1548_vm7 = vweird.f32 %v4457_v25 }
 0x878   :  { %vm1549_vm9 = vmor %vm1547_vm8, %vm1548_vm7  ;;  %v1576_v48 = vor.u32 1.1754944e-38, %v1575_v46  ;;  %vm1574_vm14 = vcmp.eq.f32.partialorder %v1573_v55, 8.507059e+37  ;;  %v4672_v55 = vld [vmem:[%s6182_s2 + $0x8] sm:$0xff] }
 0x879   :  { %v1544_v27 = vsub.f32 1.0, %v1543_v26 }
 0x87b   :  { %v1545_v30 = vmul.f32 %v4457_v25, %v1544_v27 }
 0x87c   :  { %v4459_v33 = vpop.eup %4458 }
 0x87d   :  { %v1565_v34 = vmul.f32 %v4459_v33, %v1563_v24  ;;  %v1546_v35 = vadd.f32 %v4457_v25, %v1545_v30  ;;  %vm1570_vm11 = vweird.f32 %v4459_v33 }
 0x87e   :  { %vm1571_vm13 = vmor %vm1569_vm12, %vm1570_vm11 }
 0x87f   :  { %v1566_v38 = vsub.f32 1.0, %v1565_v34  ;;  %v1550_v42 = vsel %vm1549_vm9, %v4457_v25, %v1546_v35 }
 0x880   :  { %v1555_v44 = vsel %vm1552_vm10, %v1554_v60, %v1550_v42 }
 0x881   :  { %v1567_v45 = vmul.f32 %v4459_v33, %v1566_v38  ;;  %v1594_v40 = vmul.f32 %v1591_v43, %v1555_v44 }
 0x883   :  { %v1568_v39 = vadd.f32 %v4459_v33, %v1567_v45  ;;  %v1595_v59 = vadd.f32 %v1594_v40, %v1580_v36  ;;  %v4673_v36 = vld [vmem:[%s6182_s2] sm:$0xff] }
 0x885   :  { %v1572_v49 = vsel %vm1571_vm13, %v4459_v33, %v1568_v39  ;;  %4460 = vtanh.f32 %v1595_v59  ;;  %v1678_v33 = vld [vmem:[#allocation4 + $0x60] sm:$0xff]  ;;  %v1754_v59 = vld [vmem:[#allocation3 + $0x68] sm:$0xff] }
 0x886   :  { %v1577_v50 = vsel %vm1574_vm14, %v1576_v48, %v1572_v49 }
 0x887   :  { %v1597_v15 = vsub.f32 1.0, %v1577_v50  ;;  %v1599_v51 = vmul.f32 %v1577_v50, %v5354_v47 }
 0x88b   :  { %v4461_v29 = vpop.eup %4460 }
 0x88c   :  { %v1598_v41 = vmul.f32 %v4461_v29, %v1597_v15  ;;  %v1732_v29 = vld [vmem:[#allocation2 + $0x68] sm:$0xff] }
 0x88e   :  { %v5371_v54 = vadd.f32 %v1599_v51, %v1598_v41 }
 0x890   :  { %1602 = vst.msk [vmem:[#allocation5 + $0x58] sm:$0xff] %vm331_vm2, %v5371_v54  ;;  %v1603_v52 = vpack.c.bf16 %v5371_v54, %v5371_v54 }
 0x892   :  { %4124 = vmatmul.msk.bf16.vlgmr.msra.gmra.mxu0 %vm331_vm2, %v1603_v52  ;;  %4125 = vmatmul.msk.bf16.vlgmr.msrb.gmra.mxu1 %vm331_vm2, %v1603_v52 }
 0x893   :  { %4128 = vmatmul.msk.bf16.vlgmr.msrb.gmra.mxu2 %vm331_vm2, %v1603_v52  ;;  %1881 = vmatpush.bf16.msra.mxu0 %v5244_v6 }
 0x894   :  { %1907 = vmatpush.bf16.msrb.mxu1 %v4669_v53  ;;  %1920 = vmatpush.bf16.msrb.mxu2 %v4670_v56 }
 0x897   :  { %1882 = vmatpush.bf16.msra.mxu0 %v5252_v32 }
 0x898   :  { %1908 = vmatpush.bf16.msrb.mxu1 %v4671_v62  ;;  %1921 = vmatpush.bf16.msrb.mxu2 %v5259_v14 }
 0x90f   :  { %v1616_v6 = vpop.f32.mrf.mxu0  ;;  %v1629_v57 = vpop.f32.mrf.mxu1 }
 0x910   :  { %v1635_v0 = vadd.f32 %v1634_v8, %v1616_v6  ;;  %v1657_v1 = vadd.f32 %v1656_v63, %v1629_v57  ;;  %v4316_v63 = vld [vmem:[%s6148_s12 + $0x8] sm:$0xff] }
 0x912   :  { %v4126_v2 = vmul.f32 -1.442695, %v1635_v0  ;;  %v4127_v3 = vmul.f32 -1.442695, %v1657_v1  ;;  %v4315_v1 = vld [vmem:[%s6148_s12] sm:$0xff] }
 0x914   :  { %4462 = vpow2.f32 %v4126_v2 }
 0x915   :  { %4464 = vpow2.f32 %v4127_v3 }
 0x916   :  { %v1688_v5 = vpop.f32.mrf.mxu2 }
 0x917   :  { %v1618_v47 = vpop.f32.mrf.mxu0  ;;  %v1631_v32 = vpop.f32.mrf.mxu1  ;;  %v1689_v25 = vadd.f32 %v5282_v37, %v1688_v5 }
 0x91a   :  { %v4463_v7 = vpop.eup %4462 }
 0x91b   :  { %v4465_v9 = vpop.eup %4464  ;;  %v1639_v10 = vadd.f32 1.0, %v4463_v7 }
 0x91c   :  { %v1661_v11 = vadd.f32 1.0, %v4465_v9 }
 0x91d   :  { %4466 = vrcp.f32 %v1639_v10  ;;  %v1651_v21 = vand.u32 2147483648, %v1639_v10  ;;  %v1649_v19 = vand.u32 2147483647, %v1639_v10  ;;  %vm1645_vm0 = vweird.f32 %v1639_v10 }
 0x91e   :  { %4468 = vrcp.f32 %v1661_v11  ;;  %v1690_v14 = vpop.f32.mrf.mxu2  ;;  %v1673_v28 = vand.u32 2147483648, %v1661_v11  ;;  %vm1667_vm6 = vweird.f32 %v1661_v11  ;;  %v1671_v31 = vand.u32 2147483647, %v1661_v11 }
 0x91f   :  { %v1652_v58 = vor.u32 1.1754944e-38, %v1651_v21  ;;  %vm1650_vm4 = vcmp.eq.f32.partialorder %v1649_v19, 8.507059e+37 }
 0x920   :  { %v1674_v60 = vor.u32 1.1754944e-38, %v1673_v28  ;;  %vm1672_vm8 = vcmp.eq.f32.partialorder %v1671_v31, 8.507059e+37  ;;  %v1995_v31 = vld [vmem:[#allocation5] sm:$0xff] }
 0x923   :  { %v4467_v12 = vpop.eup %4466 }
 0x924   :  { %v4469_v13 = vpop.eup %4468  ;;  %v1641_v16 = vmul.f32 %v4467_v12, %v1639_v10  ;;  %vm1646_vm15 = vweird.f32 %v4467_v12 }
 0x925   :  { %v1663_v17 = vmul.f32 %v4469_v13, %v1661_v11  ;;  %vm1647_vm3 = vmor %vm1645_vm0, %vm1646_vm15  ;;  %vm1668_vm5 = vweird.f32 %v4469_v13 }
 0x926   :  { %v1642_v18 = vsub.f32 1.0, %v1641_v16  ;;  %vm1669_vm7 = vmor %vm1667_vm6, %vm1668_vm5 }
 0x927   :  { %v1664_v20 = vsub.f32 1.0, %v1663_v17 }
 0x928   :  { %v1643_v4 = vmul.f32 %v4467_v12, %v1642_v18 }
 0x929   :  { %v1665_v22 = vmul.f32 %v4469_v13, %v1664_v20 }
 0x92a   :  { %v1644_v23 = vadd.f32 %v4467_v12, %v1643_v4  ;;  %v1776_v4 = vld [vmem:[#allocation4 + $0x68] sm:$0xff] }
 0x92b   :  { %v1666_v26 = vadd.f32 %v4469_v13, %v1665_v22 }
 0x92c   :  { %v1648_v24 = vsel %vm1647_vm3, %v4467_v12, %v1644_v23 }
 0x92d   :  { %v1653_v27 = vsel %vm1650_vm4, %v1652_v58, %v1648_v24  ;;  %v1670_v35 = vsel %vm1669_vm7, %v4469_v13, %v1666_v26 }
 0x92e   :  { %v1692_v30 = vmul.f32 %v1689_v25, %v1653_v27  ;;  %v1675_v38 = vsel %vm1672_vm8, %v1674_v60, %v1670_v35  ;;  %v1997_v35 = vld [vmem:[#allocation5 + $0x10] sm:$0xff] }
 0x92f   :  { %v1695_v42 = vsub.f32 1.0, %v1675_v38  ;;  %v1697_v45 = vmul.f32 %v1675_v38, %v5371_v54  ;;  %v2000_v38 = vld [vmem:[#allocation5 + $0x28] sm:$0xff] }
 0x930   :  { %v1693_v34 = vadd.f32 %v1692_v30, %v1678_v33  ;;  %v1996_v30 = vld [vmem:[#allocation5 + $0x8] sm:$0xff] }
 0x931   :  { %v5426_v33 = vpack.c.bf16 %v1996_v30, %v1995_v31  ;;  %v4317_v31 = vld [vmem:[%s6151_s13] sm:$0xff] }
 0x932   :  { %4470 = vtanh.f32 %v1693_v34  ;;  %v1998_v34 = vld [vmem:[#allocation5 + $0x18] sm:$0xff] }
 0x933   :  { %v5430_v60 = vpack.c.bf16 %v1998_v34, %v1997_v35  ;;  %v4319_v34 = vld [vmem:[%s6152_s14] sm:$0xff] }
 0x938   :  { %v4471_v43 = vpop.eup %4470 }
 0x939   :  { %v1696_v44 = vmul.f32 %v4471_v43, %v1695_v42  ;;  %v1999_v42 = vld [vmem:[#allocation5 + $0x20] sm:$0xff] }
 0x93a   :  { %v5434_v43 = vpack.c.bf16 %v2000_v38, %v1999_v42 }
 0x93b   :  { %v5394_v46 = vadd.f32 %v1697_v45, %v1696_v44  ;;  %v2002_v44 = vld [vmem:[#allocation5 + $0x38] sm:$0xff]  ;;  %v2001_v45 = vld [vmem:[#allocation5 + $0x30] sm:$0xff] }
 0x93d   :  { %1700 = vst.msk [vmem:[#allocation5 + $0x60] sm:$0xff] %vm331_vm2, %v5394_v46  ;;  %v1701_v40 = vpack.c.bf16 %v5394_v46, %v5394_v46 }
 0x93f   :  { %4129 = vmatmul.msk.bf16.vlgmr.msra.gmra.mxu3 %vm331_vm2, %v1701_v40  ;;  %4130 = vmatmul.msk.bf16.vlgmr.msrb.gmra.mxu0 %vm331_vm2, %v1701_v40 }
 0x940   :  { %4133 = vmatmul.msk.bf16.vlgmr.msra.gmra.mxu1 %vm331_vm2, %v1701_v40  ;;  %1979 = vmatpush.bf16.msra.mxu3 %v4672_v55  ;;  %v2004_v40 = vld [vmem:[#allocation5 + $0x48] sm:$0xff]  ;;  %v2003_v55 = vld [vmem:[#allocation5 + $0x40] sm:$0xff] }
 0x941   :  { %2069 = vmatpush.bf16.msrb.mxu0 %v4316_v63 }
 0x944   :  { %1980 = vmatpush.bf16.msra.mxu3 %v4673_v36  ;;  %v5442_v36 = vpack.c.bf16 %v2004_v40, %v2003_v55 }
 0x945   :  { %2070 = vmatpush.bf16.msrb.mxu0 %v4315_v1 }
 0x9bc   :  { %v1727_v39 = vpop.f32.mrf.mxu0 }
 0x9bd   :  { %v1755_v48 = vadd.f32 %v1754_v59, %v1727_v39  ;;  %v1786_v49 = vpop.f32.mrf.mxu1  ;;  %v2006_v39 = vld [vmem:[#allocation5 + $0x58] sm:$0xff]  ;;  %v2005_v59 = vld [vmem:[#allocation5 + $0x50] sm:$0xff] }
 0x9be   :  { %v1787_v12 = vadd.f32 %v5282_v37, %v1786_v49 }
 0x9bf   :  { %v4132_v50 = vmul.f32 -1.442695, %v1755_v48  ;;  %v5446_v48 = vpack.c.bf16 %v2006_v39, %v2005_v59 }
 0x9c1   :  { %4472 = vpow2.f32 %v4132_v50  ;;  %v2007_v50 = vld [vmem:[#allocation5 + $0x60] sm:$0xff] }
 0x9c2   :  { %v1714_v15 = vpop.f32.mrf.mxu3 }
 0x9c3   :  { %v1733_v41 = vadd.f32 %v1732_v29, %v1714_v15 }
 0x9c4   :  { %v1729_v51 = vpop.f32.mrf.mxu0 }
 0x9c5   :  { %v4131_v54 = vmul.f32 -1.442695, %v1733_v41  ;;  %v1788_v52 = vpop.f32.mrf.mxu1  ;;  %v1830_v51 = vld [vmem:[#allocation2 + $0x70] sm:$0xff] }
 0x9c6   :  { %v1852_v52 = vld [vmem:[#allocation3 + $0x70] sm:$0xff] }
 0x9c7   :  { %v4473_v53 = vpop.eup %4472  ;;  %4474 = vpow2.f32 %v4131_v54 }
 0x9c8   :  { %v1759_v56 = vadd.f32 1.0, %v4473_v53 }
 0x9ca   :  { %v1716_v62 = vpop.f32.mrf.mxu3  ;;  %4476 = vrcp.f32 %v1759_v56  ;;  %v1771_v18 = vand.u32 2147483648, %v1759_v56  ;;  %vm1765_vm14 = vweird.f32 %v1759_v56  ;;  %v1769_v21 = vand.u32 2147483647, %v1759_v56 }
 0x9cc   :  { %v1772_v23 = vor.u32 1.1754944e-38, %v1771_v18  ;;  %vm1770_vm0 = vcmp.eq.f32.partialorder %v1769_v21, 8.507059e+37 }
 0x9cd   :  { %v4475_v6 = vpop.eup %4474 }
 0x9ce   :  { %v1737_v8 = vadd.f32 1.0, %v4475_v6 }
 0x9d0   :  { %4478 = vrcp.f32 %v1737_v8  ;;  %v4477_v57 = vpop.eup %4476  ;;  %v1749_v32 = vand.u32 2147483648, %v1737_v8  ;;  %v1747_v9 = vand.u32 2147483647, %v1737_v8  ;;  %vm1743_vm10 = vweird.f32 %v1737_v8 }
 0x9d1   :  { %v1761_v0 = vmul.f32 %v4477_v57, %v1759_v56  ;;  %vm1766_vm13 = vweird.f32 %v4477_v57 }
 0x9d2   :  { %v1750_v14 = vor.u32 1.1754944e-38, %v1749_v32  ;;  %vm1748_vm12 = vcmp.eq.f32.partialorder %v1747_v9, 8.507059e+37  ;;  %vm1767_vm15 = vmor %vm1765_vm14, %vm1766_vm13 }
 0x9d3   :  { %v1762_v5 = vsub.f32 1.0, %v1761_v0  ;;  %v5457_v0 = vld [vmem:[%s6149_s18] ss:$0 sm:$0xff] }
 0x9d5   :  { %v1763_v10 = vmul.f32 %v4477_v57, %v1762_v5 }
 0x9d6   :  { %v4479_v2 = vpop.eup %4478 }
 0x9d7   :  { %v1739_v3 = vmul.f32 %v4479_v2, %v1737_v8  ;;  %vm1744_vm9 = vweird.f32 %v4479_v2  ;;  %v1764_v16 = vadd.f32 %v4477_v57, %v1763_v10 }
 0x9d8   :  { %vm1745_vm11 = vmor %vm1743_vm10, %vm1744_vm9 }
 0x9d9   :  { %v1740_v47 = vsub.f32 1.0, %v1739_v3  ;;  %v1768_v22 = vsel %vm1767_vm15, %v4477_v57, %v1764_v16  ;;  %v5472_v16 = vld [vmem:[%s6150_s15] sm:$0xff] }
 0x9da   :  { %v1773_v58 = vsel %vm1770_vm0, %v1772_v23, %v1768_v22 }
 0x9db   :  { %v1741_v7 = vmul.f32 %v4479_v2, %v1740_v47  ;;  %v1793_v24 = vsub.f32 1.0, %v1773_v58  ;;  %v1795_v37 = vmul.f32 %v1773_v58, %v5394_v46  ;;  %v5438_v46 = vpack.c.bf16 %v2002_v44, %v2001_v45  ;;  %v1874_v45 = vld [vmem:[#allocation4 + $0x70] sm:$0xff] }
 0x9dd   :  { %v1742_v11 = vadd.f32 %v4479_v2, %v1741_v7  ;;  %v5464_v7 = vld [vmem:[%s6150_s15 + $0x8] sm:$0xff] }
 0x9df   :  { %v1746_v13 = vsel %vm1745_vm11, %v4479_v2, %v1742_v11 }
 0x9e0   :  { %v1751_v17 = vsel %vm1748_vm12, %v1750_v14, %v1746_v13 }
 0x9e1   :  { %v1790_v20 = vmul.f32 %v1787_v12, %v1751_v17  ;;  %v4318_v17 = vld [vmem:[%s6151_s13 + $0x8] sm:$0xff] }
 0x9e2   :  { %2138 = vmatpush.bf16.msra.mxu1 %v4318_v17 }
 0x9e3   :  { %v1791_v19 = vadd.f32 %v1790_v20, %v1776_v4  ;;  %v4320_v20 = vld [vmem:[%s6152_s14 + $0x8] sm:$0xff] }
 0x9e5   :  { %4480 = vtanh.f32 %v1791_v19 }
 0x9e6   :  { %2139 = vmatpush.bf16.msra.mxu1 %v4317_v31 }
 0x9eb   :  { %v4481_v25 = vpop.eup %4480 }
 0x9ec   :  { %v1794_v26 = vmul.f32 %v4481_v25, %v1793_v24 }
 0x9ee   :  { %v5417_v27 = vadd.f32 %v1795_v37, %v1794_v26  ;;  %v5485_v26 = vld [vmem:[%s6147_s11] ss:$0 sm:$0xff] }
 0x9f0   :  { %1798 = vst.msk [vmem:[#allocation5 + $0x68] sm:$0xff] %vm331_vm2, %v5417_v27  ;;  %v1799_v28 = vpack.c.bf16 %v5417_v27, %v5417_v27 }
 0x9f2   :  { %4134 = vmatmul.msk.bf16.vlgmr.msra.gmra.mxu2 %vm331_vm2, %v1799_v28  ;;  %4135 = vmatmul.msk.bf16.vlgmr.msrb.gmra.mxu3 %vm331_vm2, %v1799_v28 }
 0x9f3   :  { %4138 = vmatmul.msk.bf16.vlgmr.msra.gmra.mxu0 %vm331_vm2, %v1799_v28  ;;  %2332 = vmatpush.bf16.msrb.mxu3 %v5464_v7 }
 0x9f4   :  { %2207 = vmatpush.bf16.msra.mxu2 %v4320_v20  ;;  %v1928_v20 = vld [vmem:[#allocation2 + $0x78] sm:$0xff] }
 0x9f7   :  { %v2008_v49 = vld [vmem:[#allocation5 + $0x68] sm:$0xff]  ;;  %2333 = vmatpush.bf16.msrb.mxu3 %v5472_v16 }
 0x9f8   :  { %v5450_v15 = vpack.c.bf16 %v2008_v49, %v2007_v50  ;;  %2208 = vmatpush.bf16.msra.mxu2 %v4319_v34 }
 0xa03   :  { %4152 = vmatmul.msk.bf16.vlgmr.msrb.gmra.mxu0 %vm331_vm2, %v5426_v33 }
 0xa13   :  { %4153 = vmatmul.msk.bf16.gmra.mxu0 %vm331_vm2, %v5430_v60 }
 0xa23   :  { %4154 = vmatmul.msk.bf16.gmra.mxu0 %vm331_vm2, %v5434_v43 }
 0xa33   :  { %4155 = vmatmul.msk.bf16.gmra.mxu0 %vm331_vm2, %v5438_v46 }
 0xa43   :  { %4156 = vmatmul.msk.bf16.gmra.mxu0 %vm331_vm2, %v5442_v36 }
 0xa53   :  { %4157 = vmatmul.msk.bf16.gmra.mxu0 %vm331_vm2, %v5446_v48 }
 0xa63   :  { %4158 = vmatmul.msk.bf16.gmra.mxu0 %vm331_vm2, %v5450_v15 }
 0xa70   :  { %v1884_v29 = vpop.f32.mrf.mxu0 }
 0xa71   :  { %v1885_v28 = vadd.f32 %v5485_v26, %v1884_v29 }
 0xa75   :  { %v1812_v41 = vpop.f32.mrf.mxu2  ;;  %v1825_v54 = vpop.f32.mrf.mxu3 }
 0xa76   :  { %v1831_v53 = vadd.f32 %v1830_v51, %v1812_v41  ;;  %v1853_v56 = vadd.f32 %v1852_v52, %v1825_v54 }
 0xa78   :  { %v4136_v62 = vmul.f32 -1.442695, %v1831_v53  ;;  %v4137_v6 = vmul.f32 -1.442695, %v1853_v56  ;;  %v1886_v8 = vpop.f32.mrf.mxu0 }
 0xa79   :  { %v5508_v8 = vld [vmem:[%s6153_s16 + $0x8] sm:$0xff] }
 0xa7a   :  { %4482 = vpow2.f32 %v4136_v62 }
 0xa7b   :  { %4484 = vpow2.f32 %v4137_v6 }
 0xa7d   :  { %v1814_v57 = vpop.f32.mrf.mxu2  ;;  %v1827_v63 = vpop.f32.mrf.mxu3 }
 0xa80   :  { %v4483_v1 = vpop.eup %4482  ;;  %v2072_v2 = vpop.f32.mrf.mxu0 }
 0xa81   :  { %v4485_v3 = vpop.eup %4484  ;;  %v1835_v5 = vadd.f32 1.0, %v4483_v1  ;;  %v2073_v47 = vadd.f32 %v5457_v0, %v2072_v2  ;;  %v5529_v1 = vld [vmem:[%s6154_s17 + $0x8] sm:$0xff] }
 0xa82   :  { %v1857_v32 = vadd.f32 1.0, %v4485_v3  ;;  %2613 = vmatpush.bf16.msra.mxu0 %v5529_v1 }
 0xa83   :  { %4486 = vrcp.f32 %v1835_v5  ;;  %2250 = vst.msk [vmem:[#allocation2] sm:$0xff] %vm331_vm2, %v2073_v47  ;;  %v1847_v21 = vand.u32 2147483648, %v1835_v5  ;;  %v1845_v22 = vand.u32 2147483647, %v1835_v5  ;;  %vm1841_vm4 = vweird.f32 %v1835_v5 }
 0xa84   :  { %4488 = vrcp.f32 %v1857_v32  ;;  %v1869_v44 = vand.u32 2147483648, %v1857_v32  ;;  %vm1863_vm8 = vweird.f32 %v1857_v32  ;;  %v1867_v40 = vand.u32 2147483647, %v1857_v32 }
 0xa85   :  { %v1848_v25 = vor.u32 1.1754944e-38, %v1847_v21  ;;  %vm1846_vm6 = vcmp.eq.f32.partialorder %v1845_v22, 8.507059e+37  ;;  %v1950_v22 = vld [vmem:[#allocation3 + $0x78] sm:$0xff] }
 0xa86   :  { %v1870_v59 = vor.u32 1.1754944e-38, %v1869_v44  ;;  %vm1868_vm10 = vcmp.eq.f32.partialorder %v1867_v40, 8.507059e+37 }
 0xa88   :  { %v2074_v9 = vpop.f32.mrf.mxu0 }
 0xa89   :  { %v4487_v10 = vpop.eup %4486  ;;  %v2075_v11 = vadd.f32 %v5457_v0, %v2074_v9 }
 0xa8a   :  { %v4489_v14 = vpop.eup %4488  ;;  %v1837_v12 = vmul.f32 %v4487_v10, %v1835_v5  ;;  %vm1842_vm3 = vweird.f32 %v4487_v10  ;;  %v5537_v5 = vld [vmem:[%s6154_s17] sm:$0xff] }
 0xa8b   :  { %v1859_v13 = vmul.f32 %v4489_v14, %v1857_v32  ;;  %2251 = vst.msk [vmem:[#allocation2 + $0x8] sm:$0xff] %vm331_vm2, %v2075_v11  ;;  %vm1843_vm5 = vmor %vm1841_vm4, %vm1842_vm3  ;;  %vm1864_vm7 = vweird.f32 %v4489_v14  ;;  %2614 = vmatpush.bf16.msra.mxu0 %v5537_v5 }
 0xa8c   :  { %v1838_v18 = vsub.f32 1.0, %v1837_v12  ;;  %vm1865_vm9 = vmor %vm1863_vm8, %vm1864_vm7 }
 0xa8d   :  { %v1860_v4 = vsub.f32 1.0, %v1859_v13 }
 0xa8e   :  { %v1839_v19 = vmul.f32 %v4487_v10, %v1838_v18 }
 0xa8f   :  { %v1861_v23 = vmul.f32 %v4489_v14, %v1860_v4  ;;  %2732 = vmatpush.bf16.msrb.mxu0 %v5464_v7 }
 0xa90   :  { %v1840_v58 = vadd.f32 %v4487_v10, %v1839_v19  ;;  %v2077_v24 = vpop.f32.mrf.mxu0 }
 0xa91   :  { %v2078_v37 = vadd.f32 %v5457_v0, %v2077_v24  ;;  %v1862_v38 = vadd.f32 %v4489_v14, %v1861_v23 }
 0xa92   :  { %v1844_v30 = vsel %vm1843_vm5, %v4487_v10, %v1840_v58 }
 0xa93   :  { %v1849_v35 = vsel %vm1846_vm6, %v1848_v25, %v1844_v30  ;;  %2252 = vst.msk [vmem:[#allocation2 + $0x10] sm:$0xff] %vm331_vm2, %v2078_v37  ;;  %v1866_v39 = vsel %vm1865_vm9, %v4489_v14, %v1862_v38  ;;  %2733 = vmatpush.bf16.msrb.mxu0 %v5472_v16  ;;  %v5601_v37 = vld [vmem:[%s6155_s19] ss:$0 sm:$0xff] }
 0xa94   :  { %v1888_v42 = vmul.f32 %v1885_v28, %v1849_v35  ;;  %v1871_v29 = vsel %vm1868_vm10, %v1870_v59, %v1866_v39  ;;  %v5608_v38 = vld [vmem:[%s6156_s20] ss:$0 sm:$0xff] }
 0xa95   :  { %v1891_v41 = vsub.f32 1.0, %v1871_v29  ;;  %v1893_v52 = vmul.f32 %v1871_v29, %v5417_v27  ;;  %v5519_v27 = vld [vmem:[%s6153_s16] sm:$0xff] }
 0xa96   :  { %v1889_v55 = vadd.f32 %v1888_v42, %v1874_v45  ;;  %v2364_v59 = vld [vmem:[#allocation2] sm:$0xff] }
 0xa98   :  { %4490 = vtanh.f32 %v1889_v55  ;;  %v2079_v49 = vpop.f32.mrf.mxu0 }
 0xa99   :  { %v2080_v50 = vadd.f32 %v5457_v0, %v2079_v49 }
 0xa9b   :  { %2253 = vst.msk [vmem:[#allocation2 + $0x18] sm:$0xff] %vm331_vm2, %v2080_v50 }
 0xa9e   :  { %v4491_v51 = vpop.eup %4490 }
 0xa9f   :  { %v1892_v54 = vmul.f32 %v4491_v51, %v1891_v41 }
 0xaa0   :  { %v2082_v53 = vpop.f32.mrf.mxu0 }
 0xaa1   :  { %v5498_v56 = vadd.f32 %v1893_v52, %v1892_v54  ;;  %v2083_v62 = vadd.f32 %v5457_v0, %v2082_v53 }
 0xaa3   :  { %1896 = vst.msk [vmem:[#allocation5 + $0x70] sm:$0xff] %vm331_vm2, %v5498_v56  ;;  %v1897_v6 = vpack.c.bf16 %v5498_v56, %v5498_v56 }
 0xaa4   :  { %2254 = vst.msk [vmem:[#allocation2 + $0x20] sm:$0xff] %vm331_vm2, %v2083_v62 }
 0xaa5   :  { %4139 = vmatmul.msk.bf16.vlgmr.msrb.gmra.mxu1 %vm331_vm2, %v1897_v6  ;;  %4140 = vmatmul.msk.bf16.vlgmr.msrb.gmra.mxu2 %vm331_vm2, %v1897_v6 }
 0xaa6   :  { %4143 = vmatmul.msk.bf16.vlgmr.msra.gmra.mxu3 %vm331_vm2, %v1897_v6  ;;  %2638 = vmatpush.bf16.msrb.mxu1 %v5464_v7 }
 0xaa7   :  { %2357 = vmatpush.bf16.msra.mxu3 %v5508_v8  ;;  %2651 = vmatpush.bf16.msrb.mxu2 %v5508_v8 }
 0xaa8   :  { %v2084_v57 = vpop.f32.mrf.mxu0 }
 0xaa9   :  { %v2085_v63 = vadd.f32 %v5457_v0, %v2084_v57 }
 0xaaa   :  { %2639 = vmatpush.bf16.msrb.mxu1 %v5472_v16 }
 0xaab   :  { %2255 = vst.msk [vmem:[#allocation2 + $0x28] sm:$0xff] %vm331_vm2, %v2085_v63  ;;  %2358 = vmatpush.bf16.msra.mxu3 %v5519_v27  ;;  %2652 = vmatpush.bf16.msrb.mxu2 %v5519_v27 }
 0xab0   :  { %v2087_v2 = vpop.f32.mrf.mxu0 }
 0xab1   :  { %v2088_v3 = vadd.f32 %v5457_v0, %v2087_v2 }
 0xab3   :  { %2256 = vst.msk [vmem:[#allocation2 + $0x30] sm:$0xff] %vm331_vm2, %v2088_v3 }
 0xab5   :  { %4168 = vmatmul.msk.bf16.vlgmr.msra.gmra.mxu1 %vm331_vm2, %v5426_v33  ;;  %4184 = vmatmul.msk.bf16.vlgmr.msra.gmra.mxu2 %vm331_vm2, %v5426_v33 }
 0xab6   :  { %2334 = vmatmul.bf16.vlgmr.msrb.gmra.mxu3 %v4689_v61  ;;  %2745 = vmatpush.bf16.msra.mxu1 %v5508_v8 }
 0xab7   :  { %2425 = vmatpush.bf16.msrb.mxu3 %v5529_v1  ;;  %2801 = vmatpush.bf16.msra.mxu2 %v5529_v1 }
 0xab8   :  { %v2089_v47 = vpop.f32.mrf.mxu0 }
 0xab9   :  { %v2090_v32 = vadd.f32 %v5457_v0, %v2089_v47 }
 0xaba   :  { %2746 = vmatpush.bf16.msra.mxu1 %v5519_v27 }
 0xabb   :  { %2257 = vst.msk [vmem:[#allocation2 + $0x38] sm:$0xff] %vm331_vm2, %v2090_v32  ;;  %2426 = vmatpush.bf16.msrb.mxu3 %v5537_v5  ;;  %2802 = vmatpush.bf16.msra.mxu2 %v5537_v5 }
 0xac0   :  { %v2092_v33 = vpop.f32.mrf.mxu0 }
 0xac1   :  { %v2093_v9 = vadd.f32 %v5457_v0, %v2092_v33 }
 0xac3   :  { %2258 = vst.msk [vmem:[#allocation2 + $0x40] sm:$0xff] %vm331_vm2, %v2093_v9 }
 0xac5   :  { %4169 = vmatmul.msk.bf16.gmra.mxu1 %vm331_vm2, %v5430_v60  ;;  %4185 = vmatmul.msk.bf16.gmra.mxu2 %vm331_vm2, %v5430_v60 }
 0xac6   :  { %2359 = vmatmul.bf16.vlgmr.msra.gmra.mxu3 %v4689_v61 }
 0xac7   :  { %2450 = vmatpush.bf16.msra.mxu3 %v5464_v7 }
 0xac8   :  { %v2094_v10 = vpop.f32.mrf.mxu0 }
 0xac9   :  { %v2095_v11 = vadd.f32 %v5457_v0, %v2094_v10 }
 0xacb   :  { %2259 = vst.msk [vmem:[#allocation2 + $0x48] sm:$0xff] %vm331_vm2, %v2095_v11  ;;  %2451 = vmatpush.bf16.msra.mxu3 %v5472_v16 }
 0xad0   :  { %v2097_v14 = vpop.f32.mrf.mxu0 }
 0xad1   :  { %v2098_v12 = vadd.f32 %v5457_v0, %v2097_v14 }
 0xad3   :  { %2260 = vst.msk [vmem:[#allocation2 + $0x50] sm:$0xff] %vm331_vm2, %v2098_v12 }
 0xad5   :  { %4170 = vmatmul.msk.bf16.gmra.mxu1 %vm331_vm2, %v5434_v43  ;;  %4186 = vmatmul.msk.bf16.gmra.mxu2 %vm331_vm2, %v5434_v43 }
 0xad6   :  { %2427 = vmatmul.bf16.vlgmr.msrb.gmra.mxu3 %v4689_v61 }
 0xad7   :  { %2463 = vmatpush.bf16.msrb.mxu3 %v5508_v8 }
 0xad8   :  { %v2099_v60 = vpop.f32.mrf.mxu0 }
 0xad9   :  { %v2100_v13 = vadd.f32 %v5457_v0, %v2099_v60  ;;  %v1972_v60 = vld [vmem:[#allocation4 + $0x78] sm:$0xff] }
 0xadb   :  { %2261 = vst.msk [vmem:[#allocation2 + $0x58] sm:$0xff] %vm331_vm2, %v2100_v13  ;;  %2464 = vmatpush.bf16.msrb.mxu3 %v5519_v27 }
 0xae0   :  { %v2102_v17 = vpop.f32.mrf.mxu0 }
 0xae1   :  { %v2103_v18 = vadd.f32 %v5457_v0, %v2102_v17 }
 0xae3   :  { %2262 = vst.msk [vmem:[#allocation2 + $0x60] sm:$0xff] %vm331_vm2, %v2103_v18 }
 0xae5   :  { %4171 = vmatmul.msk.bf16.gmra.mxu1 %vm331_vm2, %v5438_v46  ;;  %4187 = vmatmul.msk.bf16.gmra.mxu2 %vm331_vm2, %v5438_v46 }
 0xae8   :  { %v2104_v61 = vpop.f32.mrf.mxu0 }
 0xae9   :  { %v2105_v43 = vadd.f32 %v5457_v0, %v2104_v61 }
 0xaeb   :  { %2263 = vst.msk [vmem:[#allocation2 + $0x68] sm:$0xff] %vm331_vm2, %v2105_v43 }
 0xaf5   :  { %4172 = vmatmul.msk.bf16.gmra.mxu1 %vm331_vm2, %v5442_v36  ;;  %4188 = vmatmul.msk.bf16.gmra.mxu2 %vm331_vm2, %v5442_v36 }
 0xb05   :  { %4173 = vmatmul.msk.bf16.gmra.mxu1 %vm331_vm2, %v5446_v48  ;;  %4189 = vmatmul.msk.bf16.gmra.mxu2 %vm331_vm2, %v5446_v48 }
 0xb15   :  { %4174 = vmatmul.msk.bf16.gmra.mxu1 %vm331_vm2, %v5450_v15  ;;  %4190 = vmatmul.msk.bf16.gmra.mxu2 %vm331_vm2, %v5450_v15 }
 0xb22   :  { %v1910_v46 = vpop.f32.mrf.mxu1 }
 0xb23   :  { %v1929_v21 = vadd.f32 %v1928_v20, %v1910_v46 }
 0xb25   :  { %v4141_v4 = vmul.f32 -1.442695, %v1929_v21 }
 0xb27   :  { %4492 = vpow2.f32 %v4141_v4 }
 0xb28   :  { %v1923_v19 = vpop.f32.mrf.mxu2 }
 0xb29   :  { %v1951_v36 = vadd.f32 %v1950_v22, %v1923_v19  ;;  %v1982_v23 = vpop.f32.mrf.mxu3 }
 0xb2a   :  { %v1912_v58 = vpop.f32.mrf.mxu1  ;;  %v1983_v3 = vadd.f32 %v5485_v26, %v1982_v23 }
 0xb2b   :  { %v4142_v24 = vmul.f32 -1.442695, %v1951_v36 }
 0xb2d   :  { %v4493_v25 = vpop.eup %4492  ;;  %4494 = vpow2.f32 %v4142_v24 }
 0xb2e   :  { %v1933_v48 = vadd.f32 1.0, %v4493_v25 }
 0xb30   :  { %4496 = vrcp.f32 %v1933_v48  ;;  %v1925_v15 = vpop.f32.mrf.mxu2  ;;  %v1945_v49 = vand.u32 2147483648, %v1933_v48  ;;  %v1943_v51 = vand.u32 2147483647, %v1933_v48  ;;  %vm1939_vm12 = vweird.f32 %v1933_v48 }
 0xb31   :  { %v1984_v28 = vpop.f32.mrf.mxu3 }
 0xb32   :  { %v2141_v30 = vpop.f32.mrf.mxu1  ;;  %v1946_v57 = vor.u32 1.1754944e-38, %v1945_v49  ;;  %vm1944_vm14 = vcmp.eq.f32.partialorder %v1943_v51, 8.507059e+37 }
 0xb33   :  { %v4495_v31 = vpop.eup %4494  ;;  %v2142_v34 = vadd.f32 %v5601_v37, %v2141_v30 }
 0xb34   :  { %v1955_v35 = vadd.f32 1.0, %v4495_v31 }
 0xb35   :  { %2266 = vst.msk [vmem:[#allocation3] sm:$0xff] %vm331_vm2, %v2142_v34 }
 0xb36   :  { %v4497_v42 = vpop.eup %4496  ;;  %4498 = vrcp.f32 %v1955_v35  ;;  %v1967_v47 = vand.u32 2147483648, %v1955_v35  ;;  %v1965_v12 = vand.u32 2147483647, %v1955_v35  ;;  %vm1961_vm0 = vweird.f32 %v1955_v35 }
 0xb37   :  { %v1935_v44 = vmul.f32 %v4497_v42, %v1933_v48  ;;  %vm1940_vm11 = vweird.f32 %v4497_v42 }
 0xb38   :  { %v2210_v45 = vpop.f32.mrf.mxu2  ;;  %vm1941_vm13 = vmor %vm1939_vm12, %vm1940_vm11  ;;  %v1968_v43 = vor.u32 1.1754944e-38, %v1967_v47  ;;  %vm1966_vm4 = vcmp.eq.f32.partialorder %v1965_v12, 8.507059e+37 }
 0xb39   :  { %v1936_v40 = vsub.f32 1.0, %v1935_v44  ;;  %v2211_v55 = vadd.f32 %v5608_v38, %v2210_v45  ;;  %v2335_v39 = vpop.f32.mrf.mxu3 }
 0xb3a   :  { %v2365_v50 = vadd.f32 %v2364_v59, %v2335_v39  ;;  %v2143_v29 = vpop.f32.mrf.mxu1 }
 0xb3b   :  { %v1937_v41 = vmul.f32 %v4497_v42, %v1936_v40  ;;  %2282 = vst.msk [vmem:[#allocation4] sm:$0xff] %vm331_vm2, %v2211_v55  ;;  %v2144_v54 = vadd.f32 %v5601_v37, %v2143_v29 }
 0xb3c   :  { %v4499_v52 = vpop.eup %4498  ;;  %v4208_v53 = vmul.f32 -1.442695, %v2365_v50  ;;  %v2385_v36 = vld [vmem:[#allocation3] sm:$0xff] }
 0xb3d   :  { %v1957_v62 = vmul.f32 %v4499_v52, %v1955_v35  ;;  %v1938_v6 = vadd.f32 %v4497_v42, %v1937_v41  ;;  %2267 = vst.msk [vmem:[#allocation3 + $0x8] sm:$0xff] %vm331_vm2, %v2144_v54  ;;  %vm1962_vm15 = vweird.f32 %v4499_v52  ;;  %v5632_v41 = vld [vmem:[%s6157_s21] ss:$0 sm:$0xff] }
 0xb3e   :  { %4500 = vpow2.f32 %v4208_v53  ;;  %vm1963_vm3 = vmor %vm1961_vm0, %vm1962_vm15 }
 0xb3f   :  { %v1958_v63 = vsub.f32 1.0, %v1957_v62  ;;  %v1942_v2 = vsel %vm1941_vm13, %v4497_v42, %v1938_v6 }
 0xb40   :  { %v1947_v32 = vsel %vm1944_vm14, %v1946_v57, %v1942_v2  ;;  %v2212_v33 = vpop.f32.mrf.mxu2 }
 0xb41   :  { %v1959_v9 = vmul.f32 %v4499_v52, %v1958_v63  ;;  %v1986_v10 = vmul.f32 %v1983_v3, %v1947_v32  ;;  %v2213_v11 = vadd.f32 %v5608_v38, %v2212_v33  ;;  %v2337_v14 = vpop.f32.mrf.mxu3 }
 0xb42   :  { %v2146_v13 = vpop.f32.mrf.mxu1  ;;  %v2406_v12 = vld [vmem:[#allocation4] sm:$0xff] }
 0xb43   :  { %v1960_v17 = vadd.f32 %v4499_v52, %v1959_v9  ;;  %v1987_v18 = vadd.f32 %v1986_v10, %v1972_v60  ;;  %2283 = vst.msk [vmem:[#allocation4 + $0x8] sm:$0xff] %vm331_vm2, %v2213_v11  ;;  %v2147_v61 = vadd.f32 %v5601_v37, %v2146_v13 }
 0xb44   :  { %v4501_v26 = vpop.eup %4500 }
 0xb45   :  { %v1964_v46 = vsel %vm1963_vm3, %v4499_v52, %v1960_v17  ;;  %4502 = vtanh.f32 %v1987_v18  ;;  %v2369_v20 = vadd.f32 1.0, %v4501_v26  ;;  %2268 = vst.msk [vmem:[#allocation3 + $0x10] sm:$0xff] %vm331_vm2, %v2147_v61  ;;  %v2009_v52 = vld [vmem:[#allocation5 + $0x70] sm:$0xff] }
 0xb46   :  { %v1969_v21 = vsel %vm1966_vm4, %v1968_v43, %v1964_v46 }
 0xb47   :  { %4504 = vrcp.f32 %v2369_v20  ;;  %v1989_v23 = vsub.f32 1.0, %v1969_v21  ;;  %v1991_v28 = vmul.f32 %v1969_v21, %v5498_v56  ;;  %v2381_v29 = vand.u32 2147483648, %v2369_v20 }
 0xb48   :  { %v2215_v4 = vpop.f32.mrf.mxu2  ;;  %vm2375_vm6 = vweird.f32 %v2369_v20  ;;  %v2379_v51 = vand.u32 2147483647, %v2369_v20 }
 0xb49   :  { %v2216_v19 = vadd.f32 %v5608_v38, %v2215_v4  ;;  %v2360_v22 = vpop.f32.mrf.mxu3  ;;  %v2382_v2 = vor.u32 1.1754944e-38, %v2381_v29 }
 0xb4a   :  { %v2386_v58 = vadd.f32 %v2385_v36, %v2360_v22  ;;  %v2148_v24 = vpop.f32.mrf.mxu1  ;;  %vm2380_vm8 = vcmp.eq.f32.partialorder %v2379_v51, 8.507059e+37 }
 0xb4b   :  { %v4503_v25 = vpop.eup %4502  ;;  %2284 = vst.msk [vmem:[#allocation4 + $0x10] sm:$0xff] %vm331_vm2, %v2216_v19  ;;  %v2149_v48 = vadd.f32 %v5601_v37, %v2148_v24 }
 0xb4c   :  { %v1990_v15 = vmul.f32 %v4503_v25, %v1989_v23  ;;  %v4209_v30 = vmul.f32 -1.442695, %v2386_v58 }
 0xb4d   :  { %v4505_v31 = vpop.eup %4504  ;;  %2269 = vst.msk [vmem:[#allocation3 + $0x18] sm:$0xff] %vm331_vm2, %v2149_v48 }
 0xb4e   :  { %v1992_v34 = vadd.f32 %v1991_v28, %v1990_v15  ;;  %4506 = vpow2.f32 %v4209_v30  ;;  %v2371_v35 = vmul.f32 %v4505_v31, %v2369_v20  ;;  %vm2376_vm5 = vweird.f32 %v4505_v31 }
 0xb4f   :  { %vm5634_vm7 = vmor %vm2375_vm6, %vm2376_vm5 }
 0xb50   :  { %1994 = vst.msk [vmem:[#allocation5 + $0x78] sm:$0xff] %vm331_vm2, %v1992_v34  ;;  %v2217_v42 = vpop.f32.mrf.mxu2  ;;  %v2372_v44 = vsub.f32 1.0, %v2371_v35 }
 0xb51   :  { %v2218_v45 = vadd.f32 %v5608_v38, %v2217_v42  ;;  %v2362_v40 = vpop.f32.mrf.mxu3 }
 0xb52   :  { %v2151_v55 = vpop.f32.mrf.mxu1  ;;  %v2373_v39 = vmul.f32 %v4505_v31, %v2372_v44 }
 0xb53   :  { %2285 = vst.msk [vmem:[#allocation4 + $0x18] sm:$0xff] %vm331_vm2, %v2218_v45  ;;  %v2152_v56 = vadd.f32 %v5601_v37, %v2151_v55 }
 0xb54   :  { %v4507_v59 = vpop.eup %4506  ;;  %v2374_v49 = vadd.f32 %v4505_v31, %v2373_v39 }
 0xb55   :  { %v2390_v50 = vadd.f32 1.0, %v4507_v59  ;;  %2270 = vst.msk [vmem:[#allocation3 + $0x20] sm:$0xff] %vm331_vm2, %v2152_v56 }
 0xb56   :  { %v2378_v6 = vsel %vm5634_vm7, %v4505_v31, %v2374_v49 }
 0xb57   :  { %4508 = vrcp.f32 %v2390_v50  ;;  %v2010_v53 = vld [vmem:[#allocation5 + $0x78] sm:$0xff]  ;;  %v2383_v33 = vsel %vm2380_vm8, %v2382_v2, %v2378_v6  ;;  %v2402_v18 = vand.u32 2147483648, %v2390_v50  ;;  %v2400_v46 = vand.u32 2147483647, %v2390_v50 }
 0xb58   :  { %v2220_v62 = vpop.f32.mrf.mxu2  ;;  %v2018_v57 = vpack.c.bf16 %v2010_v53, %v2009_v52  ;;  %vm2396_vm10 = vweird.f32 %v2390_v50 }
 0xb59   :  { %v2221_v63 = vadd.f32 %v5608_v38, %v2220_v62  ;;  %v2428_v3 = vpop.f32.mrf.mxu3  ;;  %v2403_v19 = vor.u32 1.1754944e-38, %v2402_v18  ;;  %vm2401_vm12 = vcmp.eq.f32.partialorder %v2400_v46, 8.507059e+37 }
 0xb5a   :  { %v2429_v47 = vadd.f32 %v5632_v41, %v2428_v3  ;;  %4159 = vmatmul.msk.bf16.gmra.mxu0 %vm331_vm2, %v2018_v57  ;;  %v2153_v32 = vpop.f32.mrf.mxu1  ;;  %4175 = vmatmul.msk.bf16.gmra.mxu1 %vm331_vm2, %v2018_v57 }
 0xb5b   :  { %2286 = vst.msk [vmem:[#allocation4 + $0x20] sm:$0xff] %vm331_vm2, %v2221_v63  ;;  %v2154_v9 = vadd.f32 %v5601_v37, %v2153_v32  ;;  %4191 = vmatmul.msk.bf16.gmra.mxu2 %vm331_vm2, %v2018_v57 }
 0xb5c   :  { %v2432_v10 = vmul.f32 %v2429_v47, %v2383_v33 }
 0xb5d   :  { %v4509_v11 = vpop.eup %4508  ;;  %2271 = vst.msk [vmem:[#allocation3 + $0x28] sm:$0xff] %vm331_vm2, %v2154_v9 }
 0xb5e   :  { %v2392_v14 = vmul.f32 %v4509_v11, %v2390_v50  ;;  %v2433_v60 = vadd.f32 %v2432_v10, %v2406_v12  ;;  %vm2397_vm9 = vweird.f32 %v4509_v11 }
 0xb5f   :  { %vm2398_vm11 = vmor %vm2396_vm10, %vm2397_vm9 }
 0xb60   :  { %v2393_v13 = vsub.f32 1.0, %v2392_v14  ;;  %v2222_v17 = vpop.f32.mrf.mxu2  ;;  %4510 = vtanh.f32 %v2433_v60 }
 0xb61   :  { %v2223_v61 = vadd.f32 %v5608_v38, %v2222_v17  ;;  %v2430_v26 = vpop.f32.mrf.mxu3 }
 0xb62   :  { %v2394_v43 = vmul.f32 %v4509_v11, %v2393_v13  ;;  %v2156_v20 = vpop.f32.mrf.mxu1 }
 0xb63   :  { %2287 = vst.msk [vmem:[#allocation4 + $0x28] sm:$0xff] %vm331_vm2, %v2223_v61  ;;  %v2157_v21 = vadd.f32 %v5601_v37, %v2156_v20 }
 0xb64   :  { %v2395_v4 = vadd.f32 %v4509_v11, %v2394_v43 }
 0xb65   :  { %2272 = vst.msk [vmem:[#allocation3 + $0x30] sm:$0xff] %vm331_vm2, %v2157_v21  ;;  %v2470_v21 = vld [vmem:[#allocation2 + $0x8] sm:$0xff] }
 0xb66   :  { %v2399_v22 = vsel %vm2398_vm11, %v4509_v11, %v2395_v4  ;;  %v4511_v24 = vpop.eup %4510 }
 0xb67   :  { %v2404_v36 = vsel %vm2401_vm12, %v2403_v19, %v2399_v22 }
 0xb68   :  { %v2435_v23 = vsub.f32 1.0, %v2404_v36  ;;  %v2225_v58 = vpop.f32.mrf.mxu2  ;;  %v2437_v15 = vmul.f32 0.0, %v2404_v36 }
 0xb69   :  { %v2226_v25 = vadd.f32 %v5608_v38, %v2225_v58 }
 0xb6a   :  { %v2436_v48 = vmul.f32 %v4511_v24, %v2435_v23  ;;  %v2158_v28 = vpop.f32.mrf.mxu1  ;;  %v2491_v23 = vld [vmem:[#allocation3 + $0x8] sm:$0xff] }
 0xb6b   :  { %2288 = vst.msk [vmem:[#allocation4 + $0x30] sm:$0xff] %vm331_vm2, %v2226_v25  ;;  %v2159_v30 = vadd.f32 %v5601_v37, %v2158_v28 }
 0xb6c   :  { %v5655_v31 = vadd.f32 %v2437_v15, %v2436_v48 }
 0xb6d   :  { %2273 = vst.msk [vmem:[#allocation3 + $0x38] sm:$0xff] %vm331_vm2, %v2159_v30 }
 0xb6e   :  { %2439 = vst.msk [vmem:[#allocation5] sm:$0xff] %vm331_vm2, %v5655_v31  ;;  %v2440_v34 = vpack.c.bf16 %v5655_v31, %v5655_v31 }
 0xb70   :  { %4218 = vmatmul.msk.bf16.vlgmr.msra.gmra.mxu3 %vm331_vm2, %v2440_v34  ;;  %v2227_v35 = vpop.f32.mrf.mxu2 }
 0xb71   :  { %v2228_v42 = vadd.f32 %v5608_v38, %v2227_v35  ;;  %2519 = vmatpush.bf16.msra.mxu3 %v5529_v1 }
 0xb72   :  { %v2161_v44 = vpop.f32.mrf.mxu1 }
 0xb73   :  { %2289 = vst.msk [vmem:[#allocation4 + $0x38] sm:$0xff] %vm331_vm2, %v2228_v42  ;;  %v2162_v45 = vadd.f32 %v5601_v37, %v2161_v44 }
 0xb75   :  { %2274 = vst.msk [vmem:[#allocation3 + $0x40] sm:$0xff] %vm331_vm2, %v2162_v45  ;;  %2520 = vmatpush.bf16.msra.mxu3 %v5537_v5 }
 0xb78   :  { %v2230_v40 = vpop.f32.mrf.mxu2 }
 0xb79   :  { %v2231_v55 = vadd.f32 %v5608_v38, %v2230_v40 }
 0xb7a   :  { %v2163_v39 = vpop.f32.mrf.mxu1 }
 0xb7b   :  { %2290 = vst.msk [vmem:[#allocation4 + $0x40] sm:$0xff] %vm331_vm2, %v2231_v55  ;;  %v2164_v56 = vadd.f32 %v5601_v37, %v2163_v39 }
 0xb7d   :  { %2275 = vst.msk [vmem:[#allocation3 + $0x48] sm:$0xff] %vm331_vm2, %v2164_v56 }
 0xb80   :  { %4219 = vmatmul.msk.bf16.vlgmr.msrb.gmra.mxu3 %vm331_vm2, %v2440_v34  ;;  %v2232_v59 = vpop.f32.mrf.mxu2 }
 0xb81   :  { %v2233_v49 = vadd.f32 %v5608_v38, %v2232_v59  ;;  %2544 = vmatpush.bf16.msrb.mxu3 %v5464_v7 }
 0xb82   :  { %v2166_v50 = vpop.f32.mrf.mxu1 }
 0xb83   :  { %2291 = vst.msk [vmem:[#allocation4 + $0x48] sm:$0xff] %vm331_vm2, %v2233_v49  ;;  %v2167_v29 = vadd.f32 %v5601_v37, %v2166_v50 }
 0xb85   :  { %2276 = vst.msk [vmem:[#allocation3 + $0x50] sm:$0xff] %vm331_vm2, %v2167_v29  ;;  %2545 = vmatpush.bf16.msrb.mxu3 %v5472_v16  ;;  %v2512_v29 = vld [vmem:[#allocation4 + $0x8] sm:$0xff] }
 0xb88   :  { %v2235_v51 = vpop.f32.mrf.mxu2 }
 0xb89   :  { %v2236_v54 = vadd.f32 %v5608_v38, %v2235_v51 }
 0xb8a   :  { %v2168_v52 = vpop.f32.mrf.mxu1 }
 0xb8b   :  { %2292 = vst.msk [vmem:[#allocation4 + $0x50] sm:$0xff] %vm331_vm2, %v2236_v54  ;;  %v2169_v53 = vadd.f32 %v5601_v37, %v2168_v52 }
 0xb8d   :  { %2277 = vst.msk [vmem:[#allocation3 + $0x58] sm:$0xff] %vm331_vm2, %v2169_v53 }
 0xb90   :  { %4222 = vmatmul.msk.bf16.vlgmr.msra.gmra.mxu3 %vm331_vm2, %v2440_v34  ;;  %v2237_v62 = vpop.f32.mrf.mxu2 }
 0xb91   :  { %v2238_v6 = vadd.f32 %v5608_v38, %v2237_v62  ;;  %2557 = vmatpush.bf16.msra.mxu3 %v5508_v8 }
 0xb92   :  { %v2171_v57 = vpop.f32.mrf.mxu1 }
 0xb93   :  { %2293 = vst.msk [vmem:[#allocation4 + $0x58] sm:$0xff] %vm331_vm2, %v2238_v6  ;;  %v2172_v63 = vadd.f32 %v5601_v37, %v2171_v57 }
 0xb95   :  { %2278 = vst.msk [vmem:[#allocation3 + $0x60] sm:$0xff] %vm331_vm2, %v2172_v63  ;;  %2558 = vmatpush.bf16.msra.mxu3 %v5519_v27 }
 0xb98   :  { %v2240_v2 = vpop.f32.mrf.mxu2 }
 0xb99   :  { %v2241_v3 = vadd.f32 %v5608_v38, %v2240_v2 }
 0xb9a   :  { %v2173_v47 = vpop.f32.mrf.mxu1 }
 0xb9b   :  { %2294 = vst.msk [vmem:[#allocation4 + $0x60] sm:$0xff] %vm331_vm2, %v2241_v3  ;;  %v2174_v32 = vadd.f32 %v5601_v37, %v2173_v47 }
 0xb9d   :  { %2279 = vst.msk [vmem:[#allocation3 + $0x68] sm:$0xff] %vm331_vm2, %v2174_v32 }
 0xba0   :  { %v2242_v33 = vpop.f32.mrf.mxu2 }
 0xba1   :  { %v2243_v9 = vadd.f32 %v5608_v38, %v2242_v33 }
 0xba3   :  { %2295 = vst.msk [vmem:[#allocation4 + $0x68] sm:$0xff] %vm331_vm2, %v2243_v9 }
 0xbd7   :  { %v2107_v10 = vpop.f32.mrf.mxu0  ;;  %v2176_v11 = vpop.f32.mrf.mxu1 }
 0xbd8   :  { %v2108_v14 = vadd.f32 %v5457_v0, %v2107_v10  ;;  %v2177_v12 = vadd.f32 %v5601_v37, %v2176_v11 }
 0xbda   :  { %2264 = vst.msk [vmem:[#allocation2 + $0x70] sm:$0xff] %vm331_vm2, %v2108_v14 }
 0xbdb   :  { %2280 = vst.msk [vmem:[#allocation3 + $0x70] sm:$0xff] %vm331_vm2, %v2177_v12  ;;  %v2564_v12 = vld [vmem:[#allocation2 + $0x10] sm:$0xff] }
 0xbde   :  { %v2245_v60 = vpop.f32.mrf.mxu2 }
 0xbdf   :  { %v2246_v13 = vadd.f32 %v5608_v38, %v2245_v60  ;;  %v2109_v17 = vpop.f32.mrf.mxu0  ;;  %v2178_v18 = vpop.f32.mrf.mxu1 }
 0xbe0   :  { %v2110_v61 = vadd.f32 %v5457_v0, %v2109_v17  ;;  %v2179_v26 = vadd.f32 %v5601_v37, %v2178_v18 }
 0xbe1   :  { %2296 = vst.msk [vmem:[#allocation4 + $0x70] sm:$0xff] %vm331_vm2, %v2246_v13 }
 0xbe2   :  { %2265 = vst.msk [vmem:[#allocation2 + $0x78] sm:$0xff] %vm331_vm2, %v2110_v61 }
 0xbe3   :  { %2281 = vst.msk [vmem:[#allocation3 + $0x78] sm:$0xff] %vm331_vm2, %v2179_v26 }
 0xbe6   :  { %v2247_v43 = vpop.f32.mrf.mxu2 }
 0xbe7   :  { %v2248_v46 = vadd.f32 %v5608_v38, %v2247_v43 }
 0xbe9   :  { %2297 = vst.msk [vmem:[#allocation4 + $0x78] sm:$0xff] %vm331_vm2, %v2248_v46  ;;  %v2585_v46 = vld [vmem:[#allocation3 + $0x10] sm:$0xff] }
 0xbf3   :  { %v2453_v20 = vpop.f32.mrf.mxu3 }
 0xbf4   :  { %v2471_v4 = vadd.f32 %v2470_v21, %v2453_v20 }
 0xbf6   :  { %v4220_v19 = vmul.f32 -1.442695, %v2471_v4 }
 0xbf8   :  { %4512 = vpow2.f32 %v4220_v19 }
 0xbfb   :  { %v2455_v22 = vpop.f32.mrf.mxu3 }
 0xbfe   :  { %v4513_v0 = vpop.eup %4512 }
 0xbff   :  { %v2475_v36 = vadd.f32 1.0, %v4513_v0 }
 0xc01   :  { %4514 = vrcp.f32 %v2475_v36  ;;  %v2487_v42 = vand.u32 2147483648, %v2475_v36  ;;  %vm2481_vm14 = vweird.f32 %v2475_v36  ;;  %v2485_v44 = vand.u32 2147483647, %v2475_v36 }
 0xc03   :  { %v2466_v37 = vpop.f32.mrf.mxu3  ;;  %v2488_v40 = vor.u32 1.1754944e-38, %v2487_v42  ;;  %vm2486_vm0 = vcmp.eq.f32.partialorder %v2485_v44, 8.507059e+37 }
 0xc04   :  { %v2492_v58 = vadd.f32 %v2491_v23, %v2466_v37 }
 0xc06   :  { %v4221_v24 = vmul.f32 -1.442695, %v2492_v58 }
 0xc07   :  { %v4515_v25 = vpop.eup %4514 }
 0xc08   :  { %4516 = vpow2.f32 %v4221_v24  ;;  %v2477_v48 = vmul.f32 %v4515_v25, %v2475_v36  ;;  %vm2482_vm13 = vweird.f32 %v4515_v25 }
 0xc09   :  { %vm2483_vm15 = vmor %vm2481_vm14, %vm2482_vm13 }
 0xc0a   :  { %v2478_v15 = vsub.f32 1.0, %v2477_v48 }
 0xc0b   :  { %v2468_v38 = vpop.f32.mrf.mxu3 }
 0xc0c   :  { %v2479_v28 = vmul.f32 %v4515_v25, %v2478_v15 }
 0xc0e   :  { %v4517_v30 = vpop.eup %4516  ;;  %v2480_v34 = vadd.f32 %v4515_v25, %v2479_v28 }
 0xc0f   :  { %v2496_v35 = vadd.f32 1.0, %v4517_v30 }
 0xc10   :  { %v2484_v45 = vsel %vm2483_vm15, %v4515_v25, %v2480_v34  ;;  %v2606_v34 = vld [vmem:[#allocation4 + $0x10] sm:$0xff] }
 0xc11   :  { %4518 = vrcp.f32 %v2496_v35  ;;  %v2489_v56 = vsel %vm2486_vm0, %v2488_v40, %v2484_v45  ;;  %v2508_v52 = vand.u32 2147483648, %v2496_v35  ;;  %v2506_v6 = vand.u32 2147483647, %v2496_v35 }
 0xc12   :  { %vm2502_vm4 = vweird.f32 %v2496_v35 }
 0xc13   :  { %v2522_v55 = vpop.f32.mrf.mxu3  ;;  %v2509_v63 = vor.u32 1.1754944e-38, %v2508_v52  ;;  %vm2507_vm6 = vcmp.eq.f32.partialorder %v2506_v6, 8.507059e+37 }
 0xc14   :  { %v2523_v39 = vadd.f32 %v5632_v41, %v2522_v55 }
 0xc16   :  { %v2526_v59 = vmul.f32 %v2523_v39, %v2489_v56 }
 0xc17   :  { %v4519_v49 = vpop.eup %4518 }
 0xc18   :  { %v2498_v50 = vmul.f32 %v4519_v49, %v2496_v35  ;;  %v2527_v51 = vadd.f32 %v2526_v59, %v2512_v29  ;;  %vm2503_vm3 = vweird.f32 %v4519_v49 }
 0xc19   :  { %vm2504_vm5 = vmor %vm2502_vm4, %vm2503_vm3 }
 0xc1a   :  { %v2499_v54 = vsub.f32 1.0, %v2498_v50  ;;  %4520 = vtanh.f32 %v2527_v51 }
 0xc1b   :  { %v2524_v53 = vpop.f32.mrf.mxu3 }
 0xc1c   :  { %v2500_v62 = vmul.f32 %v4519_v49, %v2499_v54 }
 0xc1e   :  { %v2501_v57 = vadd.f32 %v4519_v49, %v2500_v62  ;;  %v5741_v62 = vld [vmem:[%s6150_s15 + $0x8] sm:$0xff] }
 0xc20   :  { %v2505_v2 = vsel %vm2504_vm5, %v4519_v49, %v2501_v57  ;;  %v4521_v32 = vpop.eup %4520  ;;  %v2658_v57 = vld [vmem:[#allocation2 + $0x18] sm:$0xff] }
 0xc21   :  { %v2510_v3 = vsel %vm2507_vm6, %v2509_v63, %v2505_v2 }
 0xc22   :  { %v2529_v47 = vsub.f32 1.0, %v2510_v3  ;;  %v2531_v9 = vmul.f32 %v2510_v3, %v5655_v31 }
 0xc24   :  { %v2530_v33 = vmul.f32 %v4521_v32, %v2529_v47  ;;  %v2679_v47 = vld [vmem:[#allocation3 + $0x18] sm:$0xff] }
 0xc26   :  { %v5711_v10 = vadd.f32 %v2531_v9, %v2530_v33 }
 0xc28   :  { %2533 = vst.msk [vmem:[#allocation5 + $0x8] sm:$0xff] %vm331_vm2, %v5711_v10  ;;  %v2534_v11 = vpack.c.bf16 %v5711_v10, %v5711_v10 }
 0xc2a   :  { %4223 = vmatmul.msk.bf16.vlgmr.msrb.gmra.mxu3 %vm331_vm2, %v2534_v11  ;;  %4227 = vmatmul.msk.bf16.vlgmr.msra.gmra.mxu0 %vm331_vm2, %v2534_v11 }
 0xc2b   :  { %2707 = vmatpush.bf16.msrb.mxu3 %v5529_v1  ;;  %2839 = vmatpush.bf16.msra.mxu0 %v5508_v8 }
 0xc2f   :  { %2708 = vmatpush.bf16.msrb.mxu3 %v5537_v5  ;;  %2840 = vmatpush.bf16.msra.mxu0 %v5519_v27 }
 0xc3a   :  { %4224 = vmatmul.msk.bf16.vlgmr.msra.gmra.mxu3 %vm331_vm2, %v2534_v11 }
 0xc3b   :  { %2826 = vmatpush.bf16.msra.mxu3 %v5464_v7 }
 0xc3f   :  { %2827 = vmatpush.bf16.msra.mxu3 %v5472_v16 }
 0xca7   :  { %v2616_v31 = vpop.f32.mrf.mxu0 }
 0xca8   :  { %v2617_v38 = vadd.f32 %v5632_v41, %v2616_v31 }
 0xcad   :  { %v2547_v14 = vpop.f32.mrf.mxu3 }
 0xcae   :  { %v2565_v60 = vadd.f32 %v2564_v12, %v2547_v14 }
 0xcaf   :  { %v2618_v13 = vpop.f32.mrf.mxu0 }
 0xcb0   :  { %v4225_v17 = vmul.f32 -1.442695, %v2565_v60 }
 0xcb2   :  { %4522 = vpow2.f32 %v4225_v17 }
 0xcb5   :  { %v2549_v18 = vpop.f32.mrf.mxu3 }
 0xcb8   :  { %v4523_v61 = vpop.eup %4522 }
 0xcb9   :  { %v2569_v26 = vadd.f32 1.0, %v4523_v61 }
 0xcbb   :  { %4524 = vrcp.f32 %v2569_v26  ;;  %v2581_v36 = vand.u32 2147483648, %v2569_v26  ;;  %v2579_v37 = vand.u32 2147483647, %v2569_v26  ;;  %vm2575_vm8 = vweird.f32 %v2569_v26 }
 0xcbd   :  { %v2560_v43 = vpop.f32.mrf.mxu3  ;;  %v2582_v48 = vor.u32 1.1754944e-38, %v2581_v36  ;;  %vm2580_vm10 = vcmp.eq.f32.partialorder %v2579_v37, 8.507059e+37 }
 0xcbe   :  { %v2586_v20 = vadd.f32 %v2585_v46, %v2560_v43 }
 0xcc0   :  { %v4226_v21 = vmul.f32 -1.442695, %v2586_v20 }
 0xcc1   :  { %v4525_v4 = vpop.eup %4524 }
 0xcc2   :  { %v2571_v19 = vmul.f32 %v4525_v4, %v2569_v26  ;;  %4526 = vpow2.f32 %v4226_v21  ;;  %vm2576_vm7 = vweird.f32 %v4525_v4 }
 0xcc3   :  { %vm2577_vm9 = vmor %vm2575_vm8, %vm2576_vm7 }
 0xcc4   :  { %v2572_v7 = vsub.f32 1.0, %v2571_v19 }
 0xcc5   :  { %v2562_v22 = vpop.f32.mrf.mxu3 }
 0xcc6   :  { %v2573_v0 = vmul.f32 %v4525_v4, %v2572_v7 }
 0xcc8   :  { %v4527_v23 = vpop.eup %4526  ;;  %v2574_v58 = vadd.f32 %v4525_v4, %v2573_v0 }
 0xcc9   :  { %v2590_v24 = vadd.f32 1.0, %v4527_v23  ;;  %v2700_v23 = vld [vmem:[#allocation4 + $0x18] sm:$0xff] }
 0xcca   :  { %v2578_v25 = vsel %vm2577_vm9, %v4525_v4, %v2574_v58 }
 0xccb   :  { %4528 = vrcp.f32 %v2590_v24  ;;  %v2583_v15 = vsel %vm2580_vm10, %v2582_v48, %v2578_v25  ;;  %v2602_v45 = vand.u32 2147483648, %v2590_v24  ;;  %v2600_v55 = vand.u32 2147483647, %v2590_v24 }
 0xccc   :  { %v2620_v28 = vmul.f32 %v2617_v38, %v2583_v15  ;;  %vm2596_vm12 = vweird.f32 %v2590_v24 }
 0xccd   :  { %v2603_v56 = vor.u32 1.1754944e-38, %v2602_v45  ;;  %vm2601_vm14 = vcmp.eq.f32.partialorder %v2600_v55, 8.507059e+37  ;;  %v5771_v45 = vld [vmem:[%s6150_s15] sm:$0xff] }
 0xcce   :  { %v2621_v42 = vadd.f32 %v2620_v28, %v2606_v34  ;;  %v2752_v55 = vld [vmem:[#allocation2 + $0x20] sm:$0xff] }
 0xcd0   :  { %4530 = vtanh.f32 %v2621_v42 }
 0xcd1   :  { %v4529_v30 = vpop.eup %4528 }
 0xcd2   :  { %v2592_v35 = vmul.f32 %v4529_v30, %v2590_v24  ;;  %vm2597_vm11 = vweird.f32 %v4529_v30 }
 0xcd3   :  { %vm2598_vm13 = vmor %vm2596_vm12, %vm2597_vm11 }
 0xcd4   :  { %v2593_v44 = vsub.f32 1.0, %v2592_v35 }
 0xcd6   :  { %v2594_v40 = vmul.f32 %v4529_v30, %v2593_v44  ;;  %v4531_v29 = vpop.eup %4530  ;;  %v5764_v44 = vld [vmem:[%s6153_s16 + $0x8] sm:$0xff] }
 0xcd8   :  { %v2595_v39 = vadd.f32 %v4529_v30, %v2594_v40 }
 0xcda   :  { %v2599_v59 = vsel %vm2598_vm13, %v4529_v30, %v2595_v39 }
 0xcdb   :  { %v2604_v49 = vsel %vm2601_vm14, %v2603_v56, %v2599_v59  ;;  %v2773_v56 = vld [vmem:[#allocation3 + $0x20] sm:$0xff] }
 0xcdc   :  { %v2623_v50 = vsub.f32 1.0, %v2604_v49  ;;  %v2625_v54 = vmul.f32 %v2604_v49, %v5711_v10 }
 0xcde   :  { %v2624_v51 = vmul.f32 %v4531_v29, %v2623_v50 }
 0xce0   :  { %v5728_v52 = vadd.f32 %v2625_v54, %v2624_v51 }
 0xce2   :  { %2627 = vst.msk [vmem:[#allocation5 + $0x10] sm:$0xff] %vm331_vm2, %v5728_v52  ;;  %v2628_v53 = vpack.c.bf16 %v5728_v52, %v5728_v52 }
 0xce4   :  { %4228 = vmatmul.msk.bf16.vlgmr.msrb.gmra.mxu1 %vm331_vm2, %v2628_v53  ;;  %4229 = vmatmul.msk.bf16.vlgmr.msrb.gmra.mxu2 %vm331_vm2, %v2628_v53 }
 0xce5   :  { %4232 = vmatmul.msk.bf16.vlgmr.msrb.gmra.mxu3 %vm331_vm2, %v2628_v53  ;;  %2895 = vmatpush.bf16.msrb.mxu1 %v5529_v1 }
 0xce6   :  { %2920 = vmatpush.bf16.msrb.mxu2 %v5741_v62  ;;  %2933 = vmatpush.bf16.msrb.mxu3 %v5508_v8 }
 0xce9   :  { %2896 = vmatpush.bf16.msrb.mxu1 %v5537_v5 }
 0xcea   :  { %2921 = vmatpush.bf16.msrb.mxu2 %v5472_v16  ;;  %2934 = vmatpush.bf16.msrb.mxu3 %v5519_v27 }
 0xd61   :  { %v2641_v6 = vpop.f32.mrf.mxu1 }
 0xd62   :  { %v2659_v63 = vadd.f32 %v2658_v57, %v2641_v6 }
 0xd64   :  { %v4230_v2 = vmul.f32 -1.442695, %v2659_v63 }
 0xd66   :  { %4532 = vpow2.f32 %v4230_v2 }
 0xd67   :  { %v2654_v3 = vpop.f32.mrf.mxu2 }
 0xd68   :  { %v2680_v32 = vadd.f32 %v2679_v47, %v2654_v3  ;;  %v2710_v33 = vpop.f32.mrf.mxu3 }
 0xd69   :  { %v2643_v9 = vpop.f32.mrf.mxu1  ;;  %v2711_v19 = vadd.f32 %v5632_v41, %v2710_v33 }
 0xd6a   :  { %v4231_v10 = vmul.f32 -1.442695, %v2680_v32 }
 0xd6c   :  { %v4533_v11 = vpop.eup %4532  ;;  %4534 = vpow2.f32 %v4231_v10 }
 0xd6d   :  { %v2663_v8 = vadd.f32 1.0, %v4533_v11 }
 0xd6f   :  { %4536 = vrcp.f32 %v2663_v8  ;;  %v2656_v31 = vpop.f32.mrf.mxu2  ;;  %v2675_v17 = vand.u32 2147483648, %v2663_v8  ;;  %v2673_v61 = vand.u32 2147483647, %v2663_v8  ;;  %vm2669_vm0 = vweird.f32 %v2663_v8 }
 0xd70   :  { %v2712_v14 = vpop.f32.mrf.mxu3 }
 0xd71   :  { %v2676_v20 = vor.u32 1.1754944e-38, %v2675_v17  ;;  %vm2674_vm4 = vcmp.eq.f32.partialorder %v2673_v61, 8.507059e+37 }
 0xd72   :  { %v4535_v16 = vpop.eup %4534 }
 0xd73   :  { %v2684_v12 = vadd.f32 1.0, %v4535_v16 }
 0xd75   :  { %v4537_v27 = vpop.eup %4536  ;;  %4538 = vrcp.f32 %v2684_v12  ;;  %v2696_v0 = vand.u32 2147483648, %v2684_v12  ;;  %v2694_v37 = vand.u32 2147483647, %v2684_v12  ;;  %vm2690_vm6 = vweird.f32 %v2684_v12 }
 0xd76   :  { %v2665_v60 = vmul.f32 %v4537_v27, %v2663_v8  ;;  %vm2670_vm15 = vweird.f32 %v4537_v27 }
 0xd77   :  { %vm2671_vm3 = vmor %vm2669_vm0, %vm2670_vm15  ;;  %v2697_v25 = vor.u32 1.1754944e-38, %v2696_v0  ;;  %vm2695_vm8 = vcmp.eq.f32.partialorder %v2694_v37, 8.507059e+37  ;;  %v5794_v37 = vld [vmem:[%s6154_s17 + $0x8] sm:$0xff] }
 0xd78   :  { %v2666_v13 = vsub.f32 1.0, %v2665_v60 }
 0xd7a   :  { %v2667_v18 = vmul.f32 %v4537_v27, %v2666_v13 }
 0xd7b   :  { %v4539_v26 = vpop.eup %4538 }
 0xd7c   :  { %v2686_v43 = vmul.f32 %v4539_v26, %v2684_v12  ;;  %v2668_v46 = vadd.f32 %v4537_v27, %v2667_v18  ;;  %vm2691_vm5 = vweird.f32 %v4539_v26 }
 0xd7d   :  { %vm2692_vm7 = vmor %vm2690_vm6, %vm2691_vm5 }
 0xd7e   :  { %v2687_v21 = vsub.f32 1.0, %v2686_v43  ;;  %v2672_v4 = vsel %vm2671_vm3, %v4537_v27, %v2668_v46 }
 0xd7f   :  { %v2677_v7 = vsel %vm2674_vm4, %v2676_v20, %v2672_v4 }
 0xd80   :  { %v2688_v22 = vmul.f32 %v4539_v26, %v2687_v21  ;;  %v2714_v36 = vmul.f32 %v2711_v19, %v2677_v7 }
 0xd82   :  { %v2689_v58 = vadd.f32 %v4539_v26, %v2688_v22  ;;  %v2715_v24 = vadd.f32 %v2714_v36, %v2700_v23  ;;  %v5802_v23 = vld [vmem:[%s6154_s17] sm:$0xff] }
 0xd84   :  { %v2693_v48 = vsel %vm2692_vm7, %v4539_v26, %v2689_v58  ;;  %4540 = vtanh.f32 %v2715_v24  ;;  %v2794_v26 = vld [vmem:[#allocation4 + $0x20] sm:$0xff]  ;;  %v2867_v24 = vld [vmem:[#allocation3 + $0x28] sm:$0xff] }
 0xd85   :  { %v2698_v15 = vsel %vm2695_vm8, %v2697_v25, %v2693_v48 }
 0xd86   :  { %v2717_v38 = vsub.f32 1.0, %v2698_v15  ;;  %v2719_v34 = vmul.f32 %v2698_v15, %v5728_v52 }
 0xd8a   :  { %v4541_v28 = vpop.eup %4540 }
 0xd8b   :  { %v2718_v30 = vmul.f32 %v4541_v28, %v2717_v38  ;;  %v2846_v28 = vld [vmem:[#allocation2 + $0x28] sm:$0xff] }
 0xd8d   :  { %v5750_v35 = vadd.f32 %v2719_v34, %v2718_v30 }
 0xd8f   :  { %2721 = vst.msk [vmem:[#allocation5 + $0x18] sm:$0xff] %vm331_vm2, %v5750_v35  ;;  %v2722_v42 = vpack.c.bf16 %v5750_v35, %v5750_v35 }
 0xd91   :  { %4233 = vmatmul.msk.bf16.vlgmr.msrb.gmra.mxu0 %vm331_vm2, %v2722_v42  ;;  %4234 = vmatmul.msk.bf16.vlgmr.msra.gmra.mxu1 %vm331_vm2, %v2722_v42 }
 0xd92   :  { %4237 = vmatmul.msk.bf16.vlgmr.msra.gmra.mxu2 %vm331_vm2, %v2722_v42  ;;  %2989 = vmatpush.bf16.msrb.mxu0 %v5529_v1  ;;  %v5777_v1 = vld [vmem:[%s6153_s16] sm:$0xff] }
 0xd93   :  { %3014 = vmatpush.bf16.msra.mxu1 %v5741_v62  ;;  %3027 = vmatpush.bf16.msra.mxu2 %v5764_v44 }
 0xd96   :  { %2990 = vmatpush.bf16.msrb.mxu0 %v5537_v5 }
 0xd97   :  { %3015 = vmatpush.bf16.msra.mxu1 %v5771_v45  ;;  %3028 = vmatpush.bf16.msra.mxu2 %v5777_v1 }
 0xe0e   :  { %v2735_v40 = vpop.f32.mrf.mxu0  ;;  %v2748_v39 = vpop.f32.mrf.mxu1 }
 0xe0f   :  { %v2753_v59 = vadd.f32 %v2752_v55, %v2735_v40  ;;  %v2774_v5 = vadd.f32 %v2773_v56, %v2748_v39 }
 0xe11   :  { %v4235_v49 = vmul.f32 -1.442695, %v2753_v59  ;;  %v4236_v50 = vmul.f32 -1.442695, %v2774_v5 }
 0xe13   :  { %4542 = vpow2.f32 %v4235_v49 }
 0xe14   :  { %4544 = vpow2.f32 %v4236_v50 }
 0xe15   :  { %v2804_v29 = vpop.f32.mrf.mxu2 }
 0xe16   :  { %v2737_v51 = vpop.f32.mrf.mxu0  ;;  %v2750_v54 = vpop.f32.mrf.mxu1  ;;  %v2805_v27 = vadd.f32 %v5632_v41, %v2804_v29 }
 0xe19   :  { %v4543_v52 = vpop.eup %4542 }
 0xe1a   :  { %v4545_v53 = vpop.eup %4544  ;;  %v2757_v6 = vadd.f32 1.0, %v4543_v52 }
 0xe1b   :  { %v2778_v57 = vadd.f32 1.0, %v4545_v53 }
 0xe1c   :  { %4546 = vrcp.f32 %v2757_v6  ;;  %v2769_v10 = vand.u32 2147483648, %v2757_v6  ;;  %v2767_v8 = vand.u32 2147483647, %v2757_v6  ;;  %vm2763_vm10 = vweird.f32 %v2757_v6 }
 0xe1d   :  { %4548 = vrcp.f32 %v2778_v57  ;;  %v2806_v63 = vpop.f32.mrf.mxu2  ;;  %v2790_v17 = vand.u32 2147483648, %v2778_v57  ;;  %vm2784_vm14 = vweird.f32 %v2778_v57  ;;  %v2788_v61 = vand.u32 2147483647, %v2778_v57 }
 0xe1e   :  { %v2770_v16 = vor.u32 1.1754944e-38, %v2769_v10  ;;  %vm2768_vm12 = vcmp.eq.f32.partialorder %v2767_v8, 8.507059e+37  ;;  %v2888_v8 = vld [vmem:[#allocation4 + $0x28] sm:$0xff] }
 0xe1f   :  { %v2791_v20 = vor.u32 1.1754944e-38, %v2790_v17  ;;  %vm2789_vm0 = vcmp.eq.f32.partialorder %v2788_v61, 8.507059e+37 }
 0xe22   :  { %v4547_v2 = vpop.eup %4546 }
 0xe23   :  { %v4549_v3 = vpop.eup %4548  ;;  %v2759_v47 = vmul.f32 %v4547_v2, %v2757_v6  ;;  %vm2764_vm9 = vweird.f32 %v4547_v2 }
 0xe24   :  { %v2780_v32 = vmul.f32 %v4549_v3, %v2778_v57  ;;  %vm2765_vm11 = vmor %vm2763_vm10, %vm2764_vm9  ;;  %vm2785_vm13 = vweird.f32 %v4549_v3 }
 0xe25   :  { %v2760_v33 = vsub.f32 1.0, %v2759_v47  ;;  %vm2786_vm15 = vmor %vm2784_vm14, %vm2785_vm13 }
 0xe26   :  { %v2781_v9 = vsub.f32 1.0, %v2780_v32 }
 0xe27   :  { %v2761_v11 = vmul.f32 %v4547_v2, %v2760_v33 }
 0xe28   :  { %v2782_v31 = vmul.f32 %v4549_v3, %v2781_v9 }
 0xe29   :  { %v2762_v14 = vadd.f32 %v4547_v2, %v2761_v11 }
 0xe2a   :  { %v2783_v60 = vadd.f32 %v4549_v3, %v2782_v31 }
 0xe2b   :  { %v2766_v12 = vsel %vm2765_vm11, %v4547_v2, %v2762_v14 }
 0xe2c   :  { %v2771_v13 = vsel %vm2768_vm12, %v2770_v16, %v2766_v12  ;;  %v2787_v46 = vsel %vm2786_vm15, %v4549_v3, %v2783_v60 }
 0xe2d   :  { %v2808_v18 = vmul.f32 %v2805_v27, %v2771_v13  ;;  %v2792_v21 = vsel %vm2789_vm0, %v2791_v20, %v2787_v46  ;;  %v2940_v46 = vld [vmem:[#allocation2 + $0x30] sm:$0xff] }
 0xe2e   :  { %v2811_v4 = vsub.f32 1.0, %v2792_v21  ;;  %v2813_v22 = vmul.f32 %v2792_v21, %v5750_v35  ;;  %v2961_v21 = vld [vmem:[#allocation3 + $0x30] sm:$0xff] }
 0xe2f   :  { %v2809_v43 = vadd.f32 %v2808_v18, %v2794_v26 }
 0xe31   :  { %4550 = vtanh.f32 %v2809_v43 }
 0xe37   :  { %v4551_v19 = vpop.eup %4550 }
 0xe38   :  { %v2812_v7 = vmul.f32 %v4551_v19, %v2811_v4 }
 0xe3a   :  { %v5782_v0 = vadd.f32 %v2813_v22, %v2812_v7 }
 0xe3c   :  { %2815 = vst.msk [vmem:[#allocation5 + $0x20] sm:$0xff] %vm331_vm2, %v5782_v0  ;;  %v2816_v36 = vpack.c.bf16 %v5782_v0, %v5782_v0 }
 0xe3e   :  { %4238 = vmatmul.msk.bf16.vlgmr.msra.gmra.mxu3 %vm331_vm2, %v2816_v36  ;;  %4239 = vmatmul.msk.bf16.vlgmr.msra.gmra.mxu0 %vm331_vm2, %v2816_v36 }
 0xe3f   :  { %4242 = vmatmul.msk.bf16.vlgmr.msrb.gmra.mxu1 %vm331_vm2, %v2816_v36  ;;  %3083 = vmatpush.bf16.msra.mxu3 %v5794_v37 }
 0xe40   :  { %3108 = vmatpush.bf16.msra.mxu0 %v5741_v62  ;;  %3121 = vmatpush.bf16.msrb.mxu1 %v5764_v44 }
 0xe43   :  { %3084 = vmatpush.bf16.msra.mxu3 %v5802_v23 }
 0xe44   :  { %3109 = vmatpush.bf16.msra.mxu0 %v5771_v45  ;;  %3122 = vmatpush.bf16.msrb.mxu1 %v5777_v1 }
 0xebb   :  { %v2842_v58 = vpop.f32.mrf.mxu0 }
 0xebc   :  { %v2868_v25 = vadd.f32 %v2867_v24, %v2842_v58  ;;  %v2898_v48 = vpop.f32.mrf.mxu1 }
 0xebd   :  { %v2899_v3 = vadd.f32 %v5632_v41, %v2898_v48 }
 0xebe   :  { %v4241_v15 = vmul.f32 -1.442695, %v2868_v25 }
 0xec0   :  { %4552 = vpow2.f32 %v4241_v15 }
 0xec1   :  { %v2829_v38 = vpop.f32.mrf.mxu3 }
 0xec2   :  { %v2847_v30 = vadd.f32 %v2846_v28, %v2829_v38 }
 0xec3   :  { %v2844_v34 = vpop.f32.mrf.mxu0 }
 0xec4   :  { %v4240_v35 = vmul.f32 -1.442695, %v2847_v30  ;;  %v2900_v42 = vpop.f32.mrf.mxu1 }
 0xec6   :  { %v4553_v40 = vpop.eup %4552  ;;  %4554 = vpow2.f32 %v4240_v35 }
 0xec7   :  { %v2872_v55 = vadd.f32 1.0, %v4553_v40 }
 0xec9   :  { %v2831_v39 = vpop.f32.mrf.mxu3  ;;  %4556 = vrcp.f32 %v2872_v55  ;;  %v2884_v9 = vand.u32 2147483648, %v2872_v55  ;;  %vm2878_vm8 = vweird.f32 %v2872_v55  ;;  %v2882_v11 = vand.u32 2147483647, %v2872_v55 }
 0xecb   :  { %v2885_v16 = vor.u32 1.1754944e-38, %v2884_v9  ;;  %vm2883_vm10 = vcmp.eq.f32.partialorder %v2882_v11, 8.507059e+37 }
 0xecc   :  { %v4555_v56 = vpop.eup %4554 }
 0xecd   :  { %v2851_v59 = vadd.f32 1.0, %v4555_v56 }
 0xecf   :  { %4558 = vrcp.f32 %v2851_v59  ;;  %v4557_v5 = vpop.eup %4556  ;;  %v2863_v52 = vand.u32 2147483648, %v2851_v59  ;;  %v2861_v6 = vand.u32 2147483647, %v2851_v59  ;;  %vm2857_vm4 = vweird.f32 %v2851_v59 }
 0xed0   :  { %v2874_v49 = vmul.f32 %v4557_v5, %v2872_v55  ;;  %vm2879_vm7 = vweird.f32 %v4557_v5 }
 0xed1   :  { %v2864_v2 = vor.u32 1.1754944e-38, %v2863_v52  ;;  %vm2862_vm6 = vcmp.eq.f32.partialorder %v2861_v6, 8.507059e+37  ;;  %vm2880_vm9 = vmor %vm2878_vm8, %vm2879_vm7 }
 0xed2   :  { %v2875_v51 = vsub.f32 1.0, %v2874_v49 }
 0xed4   :  { %v2876_v57 = vmul.f32 %v4557_v5, %v2875_v51 }
 0xed5   :  { %v4559_v50 = vpop.eup %4558 }
 0xed6   :  { %v2853_v29 = vmul.f32 %v4559_v50, %v2851_v59  ;;  %vm2858_vm3 = vweird.f32 %v4559_v50  ;;  %v2877_v32 = vadd.f32 %v4557_v5, %v2876_v57 }
 0xed7   :  { %vm2859_vm5 = vmor %vm2857_vm4, %vm2858_vm3 }
 0xed8   :  { %v2854_v54 = vsub.f32 1.0, %v2853_v29  ;;  %v2881_v14 = vsel %vm2880_vm9, %v4557_v5, %v2877_v32 }
 0xed9   :  { %v2886_v12 = vsel %vm2883_vm10, %v2885_v16, %v2881_v14 }
 0xeda   :  { %v2855_v53 = vmul.f32 %v4559_v50, %v2854_v54  ;;  %v2905_v27 = vsub.f32 1.0, %v2886_v12  ;;  %v2907_v13 = vmul.f32 %v2886_v12, %v5782_v0  ;;  %v3055_v12 = vld [vmem:[#allocation3 + $0x38] sm:$0xff] }
 0xedc   :  { %v2856_v63 = vadd.f32 %v4559_v50, %v2855_v53  ;;  %v2982_v53 = vld [vmem:[#allocation4 + $0x30] sm:$0xff] }
 0xede   :  { %v2860_v47 = vsel %vm2859_vm5, %v4559_v50, %v2856_v63 }
 0xedf   :  { %v2865_v33 = vsel %vm2862_vm6, %v2864_v2, %v2860_v47 }
 0xee0   :  { %v2902_v10 = vmul.f32 %v2899_v3, %v2865_v33 }
 0xee2   :  { %v2903_v31 = vadd.f32 %v2902_v10, %v2888_v8  ;;  %v3034_v8 = vld [vmem:[#allocation2 + $0x38] sm:$0xff] }
 0xee4   :  { %4560 = vtanh.f32 %v2903_v31 }
 0xeea   :  { %v4561_v60 = vpop.eup %4560 }
 0xeeb   :  { %v2906_v17 = vmul.f32 %v4561_v60, %v2905_v27 }
 0xeed   :  { %v5809_v18 = vadd.f32 %v2907_v13, %v2906_v17 }
 0xeef   :  { %2909 = vst.msk [vmem:[#allocation5 + $0x28] sm:$0xff] %vm331_vm2, %v5809_v18  ;;  %v2910_v61 = vpack.c.bf16 %v5809_v18, %v5809_v18 }
 0xef1   :  { %4243 = vmatmul.msk.bf16.vlgmr.msrb.gmra.mxu2 %vm331_vm2, %v2910_v61  ;;  %4244 = vmatmul.msk.bf16.vlgmr.msrb.gmra.mxu3 %vm331_vm2, %v2910_v61 }
 0xef2   :  { %4247 = vmatmul.msk.bf16.vlgmr.msrb.gmra.mxu0 %vm331_vm2, %v2910_v61  ;;  %3177 = vmatpush.bf16.msrb.mxu2 %v5794_v37 }
 0xef3   :  { %3202 = vmatpush.bf16.msrb.mxu3 %v5741_v62  ;;  %3215 = vmatpush.bf16.msrb.mxu0 %v5764_v44 }
 0xef6   :  { %3178 = vmatpush.bf16.msrb.mxu2 %v5802_v23 }
 0xef7   :  { %3203 = vmatpush.bf16.msrb.mxu3 %v5771_v45  ;;  %3216 = vmatpush.bf16.msrb.mxu0 %v5777_v1 }
 0xf6f   :  { %v2992_v26 = vpop.f32.mrf.mxu0 }
 0xf70   :  { %v2993_v49 = vadd.f32 %v5632_v41, %v2992_v26 }
 0xf74   :  { %v2923_v43 = vpop.f32.mrf.mxu2  ;;  %v2936_v20 = vpop.f32.mrf.mxu3 }
 0xf75   :  { %v2941_v4 = vadd.f32 %v2940_v46, %v2923_v43  ;;  %v2962_v19 = vadd.f32 %v2961_v21, %v2936_v20 }
 0xf77   :  { %v4245_v7 = vmul.f32 -1.442695, %v2941_v4  ;;  %v4246_v22 = vmul.f32 -1.442695, %v2962_v19  ;;  %v2994_v0 = vpop.f32.mrf.mxu0 }
 0xf79   :  { %4562 = vpow2.f32 %v4245_v7 }
 0xf7a   :  { %4564 = vpow2.f32 %v4246_v22 }
 0xf7c   :  { %v2925_v36 = vpop.f32.mrf.mxu2  ;;  %v2938_v58 = vpop.f32.mrf.mxu3 }
 0xf7f   :  { %v4563_v24 = vpop.eup %4562 }
 0xf80   :  { %v4565_v25 = vpop.eup %4564  ;;  %v2945_v48 = vadd.f32 1.0, %v4563_v24 }
 0xf81   :  { %v2966_v15 = vadd.f32 1.0, %v4565_v25 }
 0xf82   :  { %4566 = vrcp.f32 %v2945_v48  ;;  %v2957_v42 = vand.u32 2147483648, %v2945_v48  ;;  %v2955_v39 = vand.u32 2147483647, %v2945_v48  ;;  %vm2951_vm12 = vweird.f32 %v2945_v48 }
 0xf83   :  { %4568 = vrcp.f32 %v2966_v15  ;;  %v2978_v52 = vand.u32 2147483648, %v2966_v15  ;;  %vm2972_vm0 = vweird.f32 %v2966_v15  ;;  %v2976_v6 = vand.u32 2147483647, %v2966_v15 }
 0xf84   :  { %v2958_v5 = vor.u32 1.1754944e-38, %v2957_v42  ;;  %vm2956_vm14 = vcmp.eq.f32.partialorder %v2955_v39, 8.507059e+37 }
 0xf85   :  { %v2979_v2 = vor.u32 1.1754944e-38, %v2978_v52  ;;  %vm2977_vm4 = vcmp.eq.f32.partialorder %v2976_v6, 8.507059e+37 }
 0xf88   :  { %v4567_v38 = vpop.eup %4566 }
 0xf89   :  { %v4569_v28 = vpop.eup %4568  ;;  %v2947_v30 = vmul.f32 %v4567_v38, %v2945_v48  ;;  %vm2952_vm11 = vweird.f32 %v4567_v38 }
 0xf8a   :  { %v2968_v34 = vmul.f32 %v4569_v28, %v2966_v15  ;;  %vm2953_vm13 = vmor %vm2951_vm12, %vm2952_vm11  ;;  %vm2973_vm15 = vweird.f32 %v4569_v28 }
 0xf8b   :  { %v2948_v35 = vsub.f32 1.0, %v2947_v30  ;;  %vm2974_vm3 = vmor %vm2972_vm0, %vm2973_vm15 }
 0xf8c   :  { %v2969_v40 = vsub.f32 1.0, %v2968_v34 }
 0xf8d   :  { %v2949_v55 = vmul.f32 %v4567_v38, %v2948_v35 }
 0xf8e   :  { %v2970_v56 = vmul.f32 %v4569_v28, %v2969_v40 }
 0xf8f   :  { %v2950_v59 = vadd.f32 %v4567_v38, %v2949_v55  ;;  %v3076_v55 = vld [vmem:[#allocation4 + $0x38] sm:$0xff] }
 0xf90   :  { %v2971_v51 = vadd.f32 %v4569_v28, %v2970_v56 }
 0xf91   :  { %v2954_v50 = vsel %vm2953_vm13, %v4567_v38, %v2950_v59  ;;  %v5844_v38 = vld [vmem:[%s6157_s21] ss:$0 sm:$0xff] }
 0xf92   :  { %v2959_v29 = vsel %vm2956_vm14, %v2958_v5, %v2954_v50  ;;  %v2975_v63 = vsel %vm2974_vm3, %v4569_v28, %v2971_v51 }
 0xf93   :  { %v2996_v54 = vmul.f32 %v2993_v49, %v2959_v29  ;;  %v2980_v3 = vsel %vm2977_vm4, %v2979_v2, %v2975_v63  ;;  %v3149_v2 = vld [vmem:[#allocation3 + $0x40] sm:$0xff] }
 0xf94   :  { %v2999_v47 = vsub.f32 1.0, %v2980_v3  ;;  %v3001_v33 = vmul.f32 %v2980_v3, %v5809_v18 }
 0xf95   :  { %v2997_v57 = vadd.f32 %v2996_v54, %v2982_v53 }
 0xf97   :  { %4570 = vtanh.f32 %v2997_v57  ;;  %v3128_v57 = vld [vmem:[#allocation2 + $0x40] sm:$0xff] }
 0xf9d   :  { %v4571_v32 = vpop.eup %4570 }
 0xf9e   :  { %v3000_v41 = vmul.f32 %v4571_v32, %v2999_v47 }
 0xfa0   :  { %v5826_v9 = vadd.f32 %v3001_v33, %v3000_v41 }
 0xfa2   :  { %3003 = vst.msk [vmem:[#allocation5 + $0x30] sm:$0xff] %vm331_vm2, %v5826_v9  ;;  %v3004_v10 = vpack.c.bf16 %v5826_v9, %v5826_v9 }
 0xfa4   :  { %4248 = vmatmul.msk.bf16.vlgmr.msra.gmra.mxu1 %vm331_vm2, %v3004_v10  ;;  %4249 = vmatmul.msk.bf16.vlgmr.msra.gmra.mxu2 %vm331_vm2, %v3004_v10 }
 0xfa5   :  { %4252 = vmatmul.msk.bf16.vlgmr.msra.gmra.mxu3 %vm331_vm2, %v3004_v10  ;;  %3271 = vmatpush.bf16.msra.mxu1 %v5794_v37 }
 0xfa6   :  { %3296 = vmatpush.bf16.msra.mxu2 %v5741_v62  ;;  %3309 = vmatpush.bf16.msra.mxu3 %v5764_v44 }
 0xfa9   :  { %3272 = vmatpush.bf16.msra.mxu1 %v5802_v23 }
 0xfaa   :  { %3297 = vmatpush.bf16.msra.mxu2 %v5771_v45  ;;  %3310 = vmatpush.bf16.msra.mxu3 %v5777_v1 }
0x1021   :  { %v3017_v11 = vpop.f32.mrf.mxu1 }
0x1022   :  { %v3035_v31 = vadd.f32 %v3034_v8, %v3017_v11 }
0x1024   :  { %v4250_v14 = vmul.f32 -1.442695, %v3035_v31 }
0x1026   :  { %4572 = vpow2.f32 %v4250_v14 }
0x1027   :  { %v3030_v16 = vpop.f32.mrf.mxu2 }
0x1028   :  { %v3056_v27 = vadd.f32 %v3055_v12, %v3030_v16  ;;  %v3086_v60 = vpop.f32.mrf.mxu3 }
0x1029   :  { %v3019_v13 = vpop.f32.mrf.mxu1  ;;  %v3087_v28 = vadd.f32 %v5844_v38, %v3086_v60 }
0x102a   :  { %v4251_v17 = vmul.f32 -1.442695, %v3056_v27 }
0x102c   :  { %v4573_v18 = vpop.eup %4572  ;;  %4574 = vpow2.f32 %v4251_v17 }
0x102d   :  { %v3039_v61 = vadd.f32 1.0, %v4573_v18 }
0x102f   :  { %4576 = vrcp.f32 %v3039_v61  ;;  %v3032_v26 = vpop.f32.mrf.mxu2  ;;  %v3051_v7 = vand.u32 2147483648, %v3039_v61  ;;  %v3049_v0 = vand.u32 2147483647, %v3039_v61  ;;  %vm3045_vm6 = vweird.f32 %v3039_v61 }
0x1030   :  { %v3088_v43 = vpop.f32.mrf.mxu3 }
0x1031   :  { %v3052_v25 = vor.u32 1.1754944e-38, %v3051_v7  ;;  %vm3050_vm8 = vcmp.eq.f32.partialorder %v3049_v0, 8.507059e+37 }
0x1032   :  { %v4575_v46 = vpop.eup %4574 }
0x1033   :  { %v3060_v20 = vadd.f32 1.0, %v4575_v46 }
0x1035   :  { %v4577_v21 = vpop.eup %4576  ;;  %4578 = vrcp.f32 %v3060_v20  ;;  %v3072_v35 = vand.u32 2147483648, %v3060_v20  ;;  %v3070_v40 = vand.u32 2147483647, %v3060_v20  ;;  %vm3066_vm10 = vweird.f32 %v3060_v20 }
0x1036   :  { %v3041_v4 = vmul.f32 %v4577_v21, %v3039_v61  ;;  %vm3046_vm5 = vweird.f32 %v4577_v21 }
0x1037   :  { %vm3047_vm7 = vmor %vm3045_vm6, %vm3046_vm5  ;;  %v3073_v59 = vor.u32 1.1754944e-38, %v3072_v35  ;;  %vm3071_vm12 = vcmp.eq.f32.partialorder %v3070_v40, 8.507059e+37 }
0x1038   :  { %v3042_v19 = vsub.f32 1.0, %v3041_v4 }
0x103a   :  { %v3043_v22 = vmul.f32 %v4577_v21, %v3042_v19 }
0x103b   :  { %v4579_v36 = vpop.eup %4578 }
0x103c   :  { %v3062_v58 = vmul.f32 %v4579_v36, %v3060_v20  ;;  %v3044_v24 = vadd.f32 %v4577_v21, %v3043_v22  ;;  %vm3067_vm9 = vweird.f32 %v4579_v36 }
0x103d   :  { %vm3068_vm11 = vmor %vm3066_vm10, %vm3067_vm9 }
0x103e   :  { %v3063_v48 = vsub.f32 1.0, %v3062_v58  ;;  %v3048_v15 = vsel %vm3047_vm7, %v4577_v21, %v3044_v24  ;;  %v3170_v24 = vld [vmem:[#allocation4 + $0x40] sm:$0xff] }
0x103f   :  { %v3053_v30 = vsel %vm3050_vm8, %v3052_v25, %v3048_v15 }
0x1040   :  { %v3064_v34 = vmul.f32 %v4579_v36, %v3063_v48  ;;  %v3090_v42 = vmul.f32 %v3087_v28, %v3053_v30 }
0x1042   :  { %v3065_v39 = vadd.f32 %v4579_v36, %v3064_v34  ;;  %v3091_v56 = vadd.f32 %v3090_v42, %v3076_v55 }
0x1044   :  { %v3069_v5 = vsel %vm3068_vm11, %v4579_v36, %v3065_v39  ;;  %4580 = vtanh.f32 %v3091_v56  ;;  %v3243_v56 = vld [vmem:[#allocation3 + $0x48] sm:$0xff] }
0x1045   :  { %v3074_v49 = vsel %vm3071_vm12, %v3073_v59, %v3069_v5 }
0x1046   :  { %v3093_v50 = vsub.f32 1.0, %v3074_v49  ;;  %v3095_v54 = vmul.f32 %v3074_v49, %v5826_v9 }
0x104a   :  { %v4581_v29 = vpop.eup %4580 }
0x104b   :  { %v3094_v51 = vmul.f32 %v4581_v29, %v3093_v50  ;;  %v3222_v29 = vld [vmem:[#allocation2 + $0x48] sm:$0xff] }
0x104d   :  { %v5848_v52 = vadd.f32 %v3095_v54, %v3094_v51 }
0x104f   :  { %3097 = vst.msk [vmem:[#allocation5 + $0x38] sm:$0xff] %vm331_vm2, %v5848_v52  ;;  %v3098_v53 = vpack.c.bf16 %v5848_v52, %v5848_v52 }
0x1051   :  { %4253 = vmatmul.msk.bf16.vlgmr.msra.gmra.mxu0 %vm331_vm2, %v3098_v53  ;;  %4254 = vmatmul.msk.bf16.vlgmr.msrb.gmra.mxu1 %vm331_vm2, %v3098_v53 }
0x1052   :  { %4257 = vmatmul.msk.bf16.vlgmr.msrb.gmra.mxu2 %vm331_vm2, %v3098_v53  ;;  %3365 = vmatpush.bf16.msra.mxu0 %v5794_v37 }
0x1053   :  { %3390 = vmatpush.bf16.msrb.mxu1 %v5741_v62  ;;  %3403 = vmatpush.bf16.msrb.mxu2 %v5764_v44 }
0x1056   :  { %3366 = vmatpush.bf16.msra.mxu0 %v5802_v23 }
0x1057   :  { %3391 = vmatpush.bf16.msrb.mxu1 %v5771_v45  ;;  %3404 = vmatpush.bf16.msrb.mxu2 %v5777_v1 }
0x10ce   :  { %v3111_v6 = vpop.f32.mrf.mxu0  ;;  %v3124_v63 = vpop.f32.mrf.mxu1 }
0x10cf   :  { %v3129_v3 = vadd.f32 %v3128_v57, %v3111_v6  ;;  %v3150_v47 = vadd.f32 %v3149_v2, %v3124_v63 }
0x10d1   :  { %v4255_v32 = vmul.f32 -1.442695, %v3129_v3  ;;  %v4256_v41 = vmul.f32 -1.442695, %v3150_v47 }
0x10d3   :  { %4582 = vpow2.f32 %v4255_v32 }
0x10d4   :  { %4584 = vpow2.f32 %v4256_v41 }
0x10d5   :  { %v3180_v33 = vpop.f32.mrf.mxu2 }
0x10d6   :  { %v3113_v9 = vpop.f32.mrf.mxu0  ;;  %v3126_v10 = vpop.f32.mrf.mxu1  ;;  %v3181_v19 = vadd.f32 %v5844_v38, %v3180_v33 }
0x10d9   :  { %v4583_v11 = vpop.eup %4582 }
0x10da   :  { %v4585_v8 = vpop.eup %4584  ;;  %v3133_v31 = vadd.f32 1.0, %v4583_v11 }
0x10db   :  { %v3154_v14 = vadd.f32 1.0, %v4585_v8 }
0x10dc   :  { %4586 = vrcp.f32 %v3133_v31  ;;  %v3145_v61 = vand.u32 2147483648, %v3133_v31  ;;  %v3143_v43 = vand.u32 2147483647, %v3133_v31  ;;  %vm3139_vm14 = vweird.f32 %v3133_v31 }
0x10dd   :  { %4588 = vrcp.f32 %v3154_v14  ;;  %v3182_v16 = vpop.f32.mrf.mxu2  ;;  %v3166_v0 = vand.u32 2147483648, %v3154_v14  ;;  %vm3160_vm4 = vweird.f32 %v3154_v14  ;;  %v3164_v58 = vand.u32 2147483647, %v3154_v14 }
0x10de   :  { %v3146_v21 = vor.u32 1.1754944e-38, %v3145_v61  ;;  %vm3144_vm0 = vcmp.eq.f32.partialorder %v3143_v43, 8.507059e+37  ;;  %v3264_v43 = vld [vmem:[#allocation4 + $0x48] sm:$0xff] }
0x10df   :  { %v3167_v15 = vor.u32 1.1754944e-38, %v3166_v0  ;;  %vm3165_vm6 = vcmp.eq.f32.partialorder %v3164_v58, 8.507059e+37 }
0x10e2   :  { %v4587_v12 = vpop.eup %4586 }
0x10e3   :  { %v4589_v27 = vpop.eup %4588  ;;  %v3135_v60 = vmul.f32 %v4587_v12, %v3133_v31  ;;  %vm3140_vm13 = vweird.f32 %v4587_v12 }
0x10e4   :  { %v3156_v13 = vmul.f32 %v4589_v27, %v3154_v14  ;;  %vm3141_vm15 = vmor %vm3139_vm14, %vm3140_vm13  ;;  %vm3161_vm3 = vweird.f32 %v4589_v27 }
0x10e5   :  { %v3136_v17 = vsub.f32 1.0, %v3135_v60  ;;  %vm3162_vm5 = vmor %vm3160_vm4, %vm3161_vm3 }
0x10e6   :  { %v3157_v18 = vsub.f32 1.0, %v3156_v13 }
0x10e7   :  { %v3137_v26 = vmul.f32 %v4587_v12, %v3136_v17 }
0x10e8   :  { %v3158_v46 = vmul.f32 %v4589_v27, %v3157_v18 }
0x10e9   :  { %v3138_v20 = vadd.f32 %v4587_v12, %v3137_v26 }
0x10ea   :  { %v3159_v7 = vadd.f32 %v4589_v27, %v3158_v46 }
0x10eb   :  { %v3142_v4 = vsel %vm3141_vm15, %v4587_v12, %v3138_v20 }
0x10ec   :  { %v3147_v22 = vsel %vm3144_vm0, %v3146_v21, %v3142_v4  ;;  %v3163_v48 = vsel %vm3162_vm5, %v4589_v27, %v3159_v7 }
0x10ed   :  { %v3184_v36 = vmul.f32 %v3181_v19, %v3147_v22  ;;  %v3168_v28 = vsel %vm3165_vm6, %v3167_v15, %v3163_v48  ;;  %v3316_v48 = vld [vmem:[#allocation2 + $0x50] sm:$0xff] }
0x10ee   :  { %v3187_v30 = vsub.f32 1.0, %v3168_v28  ;;  %v3189_v42 = vmul.f32 %v3168_v28, %v5848_v52  ;;  %v3337_v28 = vld [vmem:[#allocation3 + $0x50] sm:$0xff] }
0x10ef   :  { %v3185_v25 = vadd.f32 %v3184_v36, %v3170_v24 }
0x10f1   :  { %4590 = vtanh.f32 %v3185_v25 }
0x10f7   :  { %v4591_v34 = vpop.eup %4590 }
0x10f8   :  { %v3188_v35 = vmul.f32 %v4591_v34, %v3187_v30 }
0x10fa   :  { %v5865_v40 = vadd.f32 %v3189_v42, %v3188_v35 }
0x10fc   :  { %3191 = vst.msk [vmem:[#allocation5 + $0x40] sm:$0xff] %vm331_vm2, %v5865_v40  ;;  %v3192_v55 = vpack.c.bf16 %v5865_v40, %v5865_v40 }
0x10fe   :  { %4258 = vmatmul.msk.bf16.vlgmr.msrb.gmra.mxu3 %vm331_vm2, %v3192_v55  ;;  %4259 = vmatmul.msk.bf16.vlgmr.msrb.gmra.mxu0 %vm331_vm2, %v3192_v55 }
0x10ff   :  { %4262 = vmatmul.msk.bf16.vlgmr.msra.gmra.mxu1 %vm331_vm2, %v3192_v55  ;;  %3459 = vmatpush.bf16.msrb.mxu3 %v5794_v37 }
0x1100   :  { %3484 = vmatpush.bf16.msrb.mxu0 %v5741_v62  ;;  %3497 = vmatpush.bf16.msra.mxu1 %v5764_v44 }
0x1103   :  { %3460 = vmatpush.bf16.msrb.mxu3 %v5802_v23 }
0x1104   :  { %3485 = vmatpush.bf16.msrb.mxu0 %v5771_v45  ;;  %3498 = vmatpush.bf16.msra.mxu1 %v5777_v1 }
0x117b   :  { %v3218_v39 = vpop.f32.mrf.mxu0 }
0x117c   :  { %v3244_v59 = vadd.f32 %v3243_v56, %v3218_v39  ;;  %v3274_v5 = vpop.f32.mrf.mxu1 }
0x117d   :  { %v3275_v27 = vadd.f32 %v5844_v38, %v3274_v5 }
0x117e   :  { %v4261_v49 = vmul.f32 -1.442695, %v3244_v59 }
0x1180   :  { %4592 = vpow2.f32 %v4261_v49 }
0x1181   :  { %v3205_v50 = vpop.f32.mrf.mxu3 }
0x1182   :  { %v3223_v51 = vadd.f32 %v3222_v29, %v3205_v50 }
0x1183   :  { %v3220_v54 = vpop.f32.mrf.mxu0 }
0x1184   :  { %v4260_v52 = vmul.f32 -1.442695, %v3223_v51  ;;  %v3276_v53 = vpop.f32.mrf.mxu1 }
0x1186   :  { %v4593_v6 = vpop.eup %4592  ;;  %4594 = vpow2.f32 %v4260_v52 }
0x1187   :  { %v3248_v57 = vadd.f32 1.0, %v4593_v6 }
0x1189   :  { %v3207_v63 = vpop.f32.mrf.mxu3  ;;  %4596 = vrcp.f32 %v3248_v57  ;;  %v3260_v18 = vand.u32 2147483648, %v3248_v57  ;;  %vm3254_vm12 = vweird.f32 %v3248_v57  ;;  %v3258_v26 = vand.u32 2147483647, %v3248_v57 }
0x118b   :  { %v3261_v21 = vor.u32 1.1754944e-38, %v3260_v18  ;;  %vm3259_vm14 = vcmp.eq.f32.partialorder %v3258_v26, 8.507059e+37  ;;  %v5912_v26 = vld [vmem:[%s6150_s15 + $0x8] sm:$0xff] }
0x118c   :  { %v4595_v2 = vpop.eup %4594 }
0x118d   :  { %v3227_v3 = vadd.f32 1.0, %v4595_v2 }
0x118f   :  { %4598 = vrcp.f32 %v3227_v3  ;;  %v4597_v47 = vpop.eup %4596  ;;  %v3239_v11 = vand.u32 2147483648, %v3227_v3  ;;  %v3237_v31 = vand.u32 2147483647, %v3227_v3  ;;  %vm3233_vm8 = vweird.f32 %v3227_v3 }
0x1190   :  { %v3250_v32 = vmul.f32 %v4597_v47, %v3248_v57  ;;  %vm3255_vm11 = vweird.f32 %v4597_v47 }
0x1191   :  { %v3240_v12 = vor.u32 1.1754944e-38, %v3239_v11  ;;  %vm3238_vm10 = vcmp.eq.f32.partialorder %v3237_v31, 8.507059e+37  ;;  %vm3256_vm13 = vmor %vm3254_vm12, %vm3255_vm11  ;;  %v3358_v11 = vld [vmem:[#allocation4 + $0x50] sm:$0xff] }
0x1192   :  { %v3251_v9 = vsub.f32 1.0, %v3250_v32 }
0x1194   :  { %v3252_v14 = vmul.f32 %v4597_v47, %v3251_v9 }
0x1195   :  { %v4599_v41 = vpop.eup %4598 }
0x1196   :  { %v3229_v33 = vmul.f32 %v4599_v41, %v3227_v3  ;;  %vm3234_vm7 = vweird.f32 %v4599_v41  ;;  %v3253_v13 = vadd.f32 %v4597_v47, %v3252_v14 }
0x1197   :  { %vm3235_vm9 = vmor %vm3233_vm8, %vm3234_vm7 }
0x1198   :  { %v3230_v10 = vsub.f32 1.0, %v3229_v33  ;;  %v3257_v20 = vsel %vm3256_vm13, %v4597_v47, %v3253_v13 }
0x1199   :  { %v3262_v4 = vsel %vm3259_vm14, %v3261_v21, %v3257_v20 }
0x119a   :  { %v3231_v8 = vmul.f32 %v4599_v41, %v3230_v10  ;;  %v3281_v19 = vsub.f32 1.0, %v3262_v4  ;;  %v3283_v22 = vmul.f32 %v3262_v4, %v5865_v40 }
0x119c   :  { %v3232_v16 = vadd.f32 %v4599_v41, %v3231_v8 }
0x119e   :  { %v3236_v60 = vsel %vm3235_vm9, %v4599_v41, %v3232_v16 }
0x119f   :  { %v3241_v17 = vsel %vm3238_vm10, %v3240_v12, %v3236_v60 }
0x11a0   :  { %v3278_v61 = vmul.f32 %v3275_v27, %v3241_v17 }
0x11a2   :  { %v3279_v46 = vadd.f32 %v3278_v61, %v3264_v43 }
0x11a4   :  { %4600 = vtanh.f32 %v3279_v46  ;;  %v3410_v46 = vld [vmem:[#allocation2 + $0x58] sm:$0xff] }
0x11aa   :  { %v4601_v7 = vpop.eup %4600 }
0x11ab   :  { %v3282_v0 = vmul.f32 %v4601_v7, %v3281_v19  ;;  %v3431_v19 = vld [vmem:[#allocation3 + $0x58] sm:$0xff] }
0x11ad   :  { %v5882_v36 = vadd.f32 %v3283_v22, %v3282_v0 }
0x11af   :  { %3285 = vst.msk [vmem:[#allocation5 + $0x48] sm:$0xff] %vm331_vm2, %v5882_v36  ;;  %v3286_v58 = vpack.c.bf16 %v5882_v36, %v5882_v36 }
0x11b1   :  { %4263 = vmatmul.msk.bf16.vlgmr.msra.gmra.mxu2 %vm331_vm2, %v3286_v58  ;;  %4264 = vmatmul.msk.bf16.vlgmr.msra.gmra.mxu3 %vm331_vm2, %v3286_v58 }
0x11b2   :  { %4267 = vmatmul.msk.bf16.vlgmr.msra.gmra.mxu0 %vm331_vm2, %v3286_v58  ;;  %3553 = vmatpush.bf16.msra.mxu2 %v5794_v37 }
0x11b3   :  { %3578 = vmatpush.bf16.msra.mxu3 %v5741_v62  ;;  %3591 = vmatpush.bf16.msra.mxu0 %v5764_v44 }
0x11b6   :  { %3554 = vmatpush.bf16.msra.mxu2 %v5802_v23 }
0x11b7   :  { %3579 = vmatpush.bf16.msra.mxu3 %v5771_v45  ;;  %3592 = vmatpush.bf16.msra.mxu0 %v5777_v1 }
0x122f   :  { %v3368_v24 = vpop.f32.mrf.mxu0 }
0x1230   :  { %v3369_v47 = vadd.f32 %v5844_v38, %v3368_v24 }
0x1234   :  { %v3299_v25 = vpop.f32.mrf.mxu2  ;;  %v3312_v15 = vpop.f32.mrf.mxu3 }
0x1235   :  { %v3317_v30 = vadd.f32 %v3316_v48, %v3299_v25  ;;  %v3338_v34 = vadd.f32 %v3337_v28, %v3312_v15 }
0x1237   :  { %v4265_v35 = vmul.f32 -1.442695, %v3317_v30  ;;  %v4266_v42 = vmul.f32 -1.442695, %v3338_v34  ;;  %v3370_v40 = vpop.f32.mrf.mxu0 }
0x1239   :  { %4602 = vpow2.f32 %v4265_v35 }
0x123a   :  { %4604 = vpow2.f32 %v4266_v42 }
0x123c   :  { %v3301_v62 = vpop.f32.mrf.mxu2  ;;  %v3314_v55 = vpop.f32.mrf.mxu3 }
0x123f   :  { %v4603_v39 = vpop.eup %4602 }
0x1240   :  { %v4605_v56 = vpop.eup %4604  ;;  %v3321_v59 = vadd.f32 1.0, %v4603_v39 }
0x1241   :  { %v3342_v5 = vadd.f32 1.0, %v4605_v56 }
0x1242   :  { %4606 = vrcp.f32 %v3321_v59  ;;  %v3333_v52 = vand.u32 2147483648, %v3321_v59  ;;  %v3331_v57 = vand.u32 2147483647, %v3321_v59  ;;  %vm3327_vm0 = vweird.f32 %v3321_v59 }
0x1243   :  { %4608 = vrcp.f32 %v3342_v5  ;;  %v3354_v10 = vand.u32 2147483648, %v3342_v5  ;;  %vm3348_vm6 = vweird.f32 %v3342_v5  ;;  %v3352_v8 = vand.u32 2147483647, %v3342_v5 }
0x1244   :  { %v3334_v3 = vor.u32 1.1754944e-38, %v3333_v52  ;;  %vm3332_vm4 = vcmp.eq.f32.partialorder %v3331_v57, 8.507059e+37 }
0x1245   :  { %v3355_v16 = vor.u32 1.1754944e-38, %v3354_v10  ;;  %vm3353_vm8 = vcmp.eq.f32.partialorder %v3352_v8, 8.507059e+37  ;;  %v4684_v10 = vld [vmem:[%s6150_s15] sm:$0xff] }
0x1246   :  { %v3504_v8 = vld [vmem:[#allocation2 + $0x60] sm:$0xff] }
0x1248   :  { %v4607_v49 = vpop.eup %4606 }
0x1249   :  { %v4609_v50 = vpop.eup %4608  ;;  %v3323_v29 = vmul.f32 %v4607_v49, %v3321_v59  ;;  %vm3328_vm15 = vweird.f32 %v4607_v49 }
0x124a   :  { %v3344_v51 = vmul.f32 %v4609_v50, %v3342_v5  ;;  %vm3329_vm3 = vmor %vm3327_vm0, %vm3328_vm15  ;;  %vm3349_vm5 = vweird.f32 %v4609_v50 }
0x124b   :  { %v3324_v54 = vsub.f32 1.0, %v3323_v29  ;;  %vm3350_vm7 = vmor %vm3348_vm6, %vm3349_vm5 }
0x124c   :  { %v3345_v53 = vsub.f32 1.0, %v3344_v51 }
0x124d   :  { %v3325_v6 = vmul.f32 %v4607_v49, %v3324_v54  ;;  %v3452_v54 = vld [vmem:[#allocation4 + $0x58] sm:$0xff] }
0x124e   :  { %v3346_v63 = vmul.f32 %v4609_v50, %v3345_v53 }
0x124f   :  { %v3326_v2 = vadd.f32 %v4607_v49, %v3325_v6 }
0x1250   :  { %v3347_v33 = vadd.f32 %v4609_v50, %v3346_v63 }
0x1251   :  { %v3330_v32 = vsel %vm3329_vm3, %v4607_v49, %v3326_v2 }
0x1252   :  { %v3335_v41 = vsel %vm3332_vm4, %v3334_v3, %v3330_v32  ;;  %v3351_v14 = vsel %vm3350_vm7, %v4609_v50, %v3347_v33 }
0x1253   :  { %v3372_v9 = vmul.f32 %v3369_v47, %v3335_v41  ;;  %v3356_v12 = vsel %vm3353_vm8, %v3355_v16, %v3351_v14  ;;  %v3525_v14 = vld [vmem:[#allocation3 + $0x60] sm:$0xff] }
0x1254   :  { %v3375_v27 = vsub.f32 1.0, %v3356_v12  ;;  %v3377_v17 = vmul.f32 %v3356_v12, %v5882_v36 }
0x1255   :  { %v3373_v31 = vadd.f32 %v3372_v9, %v3358_v11  ;;  %v4683_v9 = vld [vmem:[%s6153_s16 + $0x8] sm:$0xff]  ;;  %v4685_v11 = vld [vmem:[%s6153_s16] sm:$0xff] }
0x1257   :  { %4610 = vtanh.f32 %v3373_v31 }
0x125d   :  { %v4611_v60 = vpop.eup %4610 }
0x125e   :  { %v3376_v13 = vmul.f32 %v4611_v60, %v3375_v27 }
0x1260   :  { %v5899_v18 = vadd.f32 %v3377_v17, %v3376_v13 }
0x1262   :  { %3379 = vst.msk [vmem:[#allocation5 + $0x50] sm:$0xff] %vm331_vm2, %v5899_v18  ;;  %v3380_v61 = vpack.c.bf16 %v5899_v18, %v5899_v18 }
0x1264   :  { %4268 = vmatmul.msk.bf16.vlgmr.msrb.gmra.mxu1 %vm331_vm2, %v3380_v61  ;;  %4269 = vmatmul.msk.bf16.vlgmr.msrb.gmra.mxu2 %vm331_vm2, %v3380_v61 }
0x1265   :  { %4272 = vmatmul.msk.bf16.vlgmr.msrb.gmra.mxu3 %vm331_vm2, %v3380_v61  ;;  %3647 = vmatpush.bf16.msrb.mxu1 %v5794_v37 }
0x1266   :  { %3672 = vmatpush.bf16.msrb.mxu2 %v5912_v26  ;;  %3685 = vmatpush.bf16.msrb.mxu3 %v5764_v44 }
0x1269   :  { %3648 = vmatpush.bf16.msrb.mxu1 %v5802_v23 }
0x126a   :  { %3673 = vmatpush.bf16.msrb.mxu2 %v5771_v45  ;;  %3686 = vmatpush.bf16.msrb.mxu3 %v5777_v1 }
0x12e1   :  { %v3393_v43 = vpop.f32.mrf.mxu1 }
0x12e2   :  { %v3411_v20 = vadd.f32 %v3410_v46, %v3393_v43 }
0x12e4   :  { %v4270_v21 = vmul.f32 -1.442695, %v3411_v20 }
0x12e6   :  { %4612 = vpow2.f32 %v4270_v21 }
0x12e7   :  { %v3406_v4 = vpop.f32.mrf.mxu2 }
0x12e8   :  { %v3432_v7 = vadd.f32 %v3431_v19, %v3406_v4  ;;  %v3462_v22 = vpop.f32.mrf.mxu3 }
0x12e9   :  { %v3395_v0 = vpop.f32.mrf.mxu1  ;;  %v3463_v59 = vadd.f32 %v5844_v38, %v3462_v22 }
0x12ea   :  { %v4271_v36 = vmul.f32 -1.442695, %v3432_v7 }
0x12ec   :  { %v4613_v58 = vpop.eup %4612  ;;  %4614 = vpow2.f32 %v4271_v36 }
0x12ed   :  { %v3415_v44 = vadd.f32 1.0, %v4613_v58 }
0x12ef   :  { %4616 = vrcp.f32 %v3415_v44  ;;  %v3408_v24 = vpop.f32.mrf.mxu2  ;;  %v3427_v30 = vand.u32 2147483648, %v3415_v44  ;;  %v3425_v35 = vand.u32 2147483647, %v3415_v44  ;;  %vm3421_vm10 = vweird.f32 %v3415_v44 }
0x12f0   :  { %v3464_v25 = vpop.f32.mrf.mxu3 }
0x12f1   :  { %v3428_v55 = vor.u32 1.1754944e-38, %v3427_v30  ;;  %vm3426_vm12 = vcmp.eq.f32.partialorder %v3425_v35, 8.507059e+37  ;;  %v3546_v35 = vld [vmem:[#allocation4 + $0x60] sm:$0xff] }
0x12f2   :  { %v4615_v45 = vpop.eup %4614 }
0x12f3   :  { %v3436_v48 = vadd.f32 1.0, %v4615_v45 }
0x12f5   :  { %v4617_v1 = vpop.eup %4616  ;;  %4618 = vrcp.f32 %v3436_v48  ;;  %v3448_v50 = vand.u32 2147483648, %v3436_v48  ;;  %v3446_v51 = vand.u32 2147483647, %v3436_v48  ;;  %vm3442_vm14 = vweird.f32 %v3436_v48 }
0x12f6   :  { %v3417_v15 = vmul.f32 %v4617_v1, %v3415_v44  ;;  %vm3422_vm9 = vweird.f32 %v4617_v1 }
0x12f7   :  { %vm3423_vm11 = vmor %vm3421_vm10, %vm3422_vm9  ;;  %v3449_v6 = vor.u32 1.1754944e-38, %v3448_v50  ;;  %vm3447_vm0 = vcmp.eq.f32.partialorder %v3446_v51, 8.507059e+37  ;;  %v4687_v51 = vld [vmem:[%s6154_s17] sm:$0xff] }
0x12f8   :  { %v3418_v28 = vsub.f32 1.0, %v3417_v15 }
0x12fa   :  { %v3419_v34 = vmul.f32 %v4617_v1, %v3418_v28 }
0x12fb   :  { %v4619_v42 = vpop.eup %4618 }
0x12fc   :  { %v3438_v40 = vmul.f32 %v4619_v42, %v3436_v48  ;;  %v3420_v62 = vadd.f32 %v4617_v1, %v3419_v34  ;;  %vm3443_vm13 = vweird.f32 %v4619_v42 }
0x12fd   :  { %vm3444_vm15 = vmor %vm3442_vm14, %vm3443_vm13 }
0x12fe   :  { %v3439_v39 = vsub.f32 1.0, %v3438_v40  ;;  %v3424_v56 = vsel %vm3423_vm11, %v4617_v1, %v3420_v62 }
0x12ff   :  { %v3429_v5 = vsel %vm3426_vm12, %v3428_v55, %v3424_v56 }
0x1300   :  { %v3440_v49 = vmul.f32 %v4619_v42, %v3439_v39  ;;  %v3466_v29 = vmul.f32 %v3463_v59, %v3429_v5 }
0x1302   :  { %v3441_v52 = vadd.f32 %v4619_v42, %v3440_v49  ;;  %v3467_v53 = vadd.f32 %v3466_v29, %v3452_v54  ;;  %v4686_v29 = vld [vmem:[%s6154_s17 + $0x8] sm:$0xff] }
0x1304   :  { %v3445_v57 = vsel %vm3444_vm15, %v4619_v42, %v3441_v52  ;;  %4620 = vtanh.f32 %v3467_v53  ;;  %v3619_v52 = vld [vmem:[#allocation3 + $0x68] sm:$0xff] }
0x1305   :  { %v3450_v63 = vsel %vm3447_vm0, %v3449_v6, %v3445_v57 }
0x1306   :  { %v3469_v2 = vsub.f32 1.0, %v3450_v63  ;;  %v3471_v32 = vmul.f32 %v3450_v63, %v5899_v18 }
0x130a   :  { %v4621_v3 = vpop.eup %4620 }
0x130b   :  { %v3470_v47 = vmul.f32 %v4621_v3, %v3469_v2  ;;  %v3598_v2 = vld [vmem:[#allocation2 + $0x68] sm:$0xff] }
0x130d   :  { %v5921_v41 = vadd.f32 %v3471_v32, %v3470_v47 }
0x130f   :  { %3473 = vst.msk [vmem:[#allocation5 + $0x58] sm:$0xff] %vm331_vm2, %v5921_v41  ;;  %v3474_v33 = vpack.c.bf16 %v5921_v41, %v5921_v41 }
0x1311   :  { %4273 = vmatmul.msk.bf16.vlgmr.msrb.gmra.mxu0 %vm331_vm2, %v3474_v33  ;;  %4274 = vmatmul.msk.bf16.vlgmr.msra.gmra.mxu1 %vm331_vm2, %v3474_v33 }
0x1312   :  { %4277 = vmatmul.msk.bf16.vlgmr.msra.gmra.mxu2 %vm331_vm2, %v3474_v33  ;;  %3741 = vmatpush.bf16.msrb.mxu0 %v5794_v37 }
0x1313   :  { %3766 = vmatpush.bf16.msra.mxu1 %v5912_v26  ;;  %3779 = vmatpush.bf16.msra.mxu2 %v4683_v9 }
0x1316   :  { %3742 = vmatpush.bf16.msrb.mxu0 %v5802_v23 }
0x1317   :  { %3767 = vmatpush.bf16.msra.mxu1 %v4684_v10  ;;  %3780 = vmatpush.bf16.msra.mxu2 %v4685_v11 }
0x138e   :  { %v3487_v37 = vpop.f32.mrf.mxu0  ;;  %v3500_v31 = vpop.f32.mrf.mxu1 }
0x138f   :  { %v3505_v16 = vadd.f32 %v3504_v8, %v3487_v37  ;;  %v3526_v12 = vadd.f32 %v3525_v14, %v3500_v31  ;;  %v4328_v31 = vld [vmem:[%s6158_s22 + $0x8] sm:$0xff] }
0x1391   :  { %v4275_v27 = vmul.f32 -1.442695, %v3505_v16  ;;  %v4276_v60 = vmul.f32 -1.442695, %v3526_v12  ;;  %v4327_v16 = vld [vmem:[%s6158_s22] sm:$0xff] }
0x1393   :  { %4622 = vpow2.f32 %v4275_v27 }
0x1394   :  { %4624 = vpow2.f32 %v4276_v60 }
0x1395   :  { %v3556_v23 = vpop.f32.mrf.mxu2 }
0x1396   :  { %v3489_v13 = vpop.f32.mrf.mxu0  ;;  %v3502_v17 = vpop.f32.mrf.mxu1  ;;  %v3557_v48 = vadd.f32 %v5844_v38, %v3556_v23 }
0x1399   :  { %v4623_v18 = vpop.eup %4622 }
0x139a   :  { %v4625_v61 = vpop.eup %4624  ;;  %v3509_v26 = vadd.f32 1.0, %v4623_v18 }
0x139b   :  { %v3530_v43 = vadd.f32 1.0, %v4625_v61 }
0x139c   :  { %4626 = vrcp.f32 %v3509_v26  ;;  %v3521_v0 = vand.u32 2147483648, %v3509_v26  ;;  %v3519_v58 = vand.u32 2147483647, %v3509_v26  ;;  %vm3515_vm4 = vweird.f32 %v3509_v26 }
0x139d   :  { %4628 = vrcp.f32 %v3530_v43  ;;  %v3558_v46 = vpop.f32.mrf.mxu2  ;;  %v3542_v28 = vand.u32 2147483648, %v3530_v43  ;;  %vm3536_vm8 = vweird.f32 %v3530_v43  ;;  %v3540_v34 = vand.u32 2147483647, %v3530_v43 }
0x139e   :  { %v3522_v25 = vor.u32 1.1754944e-38, %v3521_v0  ;;  %vm3520_vm6 = vcmp.eq.f32.partialorder %v3519_v58, 8.507059e+37  ;;  %v3640_v0 = vld [vmem:[#allocation4 + $0x68] sm:$0xff] }
0x139f   :  { %v3543_v62 = vor.u32 1.1754944e-38, %v3542_v28  ;;  %vm3541_vm10 = vcmp.eq.f32.partialorder %v3540_v34, 8.507059e+37  ;;  %v3851_v28 = vld [vmem:[#allocation5 + $0x8] sm:$0xff] }
0x13a2   :  { %v4627_v20 = vpop.eup %4626 }
0x13a3   :  { %v4629_v21 = vpop.eup %4628  ;;  %v3511_v4 = vmul.f32 %v4627_v20, %v3509_v26  ;;  %vm3516_vm3 = vweird.f32 %v4627_v20 }
0x13a4   :  { %v3532_v19 = vmul.f32 %v4629_v21, %v3530_v43  ;;  %vm3517_vm5 = vmor %vm3515_vm4, %vm3516_vm3  ;;  %vm3537_vm7 = vweird.f32 %v4629_v21 }
0x13a5   :  { %v3512_v7 = vsub.f32 1.0, %v3511_v4  ;;  %vm3538_vm9 = vmor %vm3536_vm8, %vm3537_vm7 }
0x13a6   :  { %v3533_v22 = vsub.f32 1.0, %v3532_v19 }
0x13a7   :  { %v3513_v36 = vmul.f32 %v4627_v20, %v3512_v7 }
0x13a8   :  { %v3534_v44 = vmul.f32 %v4629_v21, %v3533_v22 }
0x13a9   :  { %v3514_v24 = vadd.f32 %v4627_v20, %v3513_v36 }
0x13aa   :  { %v3535_v1 = vadd.f32 %v4629_v21, %v3534_v44 }
0x13ab   :  { %v3518_v45 = vsel %vm3517_vm5, %v4627_v20, %v3514_v24 }
0x13ac   :  { %v3523_v15 = vsel %vm3520_vm6, %v3522_v25, %v3518_v45  ;;  %v3539_v40 = vsel %vm3538_vm9, %v4629_v21, %v3535_v1 }
0x13ad   :  { %v3560_v30 = vmul.f32 %v3557_v48, %v3523_v15  ;;  %v3544_v55 = vsel %vm3541_vm10, %v3543_v62, %v3539_v40  ;;  %v3855_v62 = vld [vmem:[#allocation5 + $0x28] sm:$0xff] }
0x13ae   :  { %v3563_v39 = vsub.f32 1.0, %v3544_v55  ;;  %v3565_v5 = vmul.f32 %v3544_v55, %v5921_v41  ;;  %v3854_v55 = vld [vmem:[#allocation5 + $0x20] sm:$0xff] }
0x13af   :  { %v3561_v42 = vadd.f32 %v3560_v30, %v3546_v35  ;;  %v3850_v30 = vld [vmem:[#allocation5] sm:$0xff]  ;;  %v3853_v35 = vld [vmem:[#allocation5 + $0x18] sm:$0xff] }
0x13b0   :  { %v3866_v34 = vpack.c.bf16 %v3851_v28, %v3850_v30 }
0x13b1   :  { %4630 = vtanh.f32 %v3561_v42  ;;  %v3852_v42 = vld [vmem:[#allocation5 + $0x10] sm:$0xff] }
0x13b2   :  { %v3867_v40 = vpack.c.bf16 %v3853_v35, %v3852_v42 }
0x13b7   :  { %v4631_v56 = vpop.eup %4630 }
0x13b8   :  { %v3564_v59 = vmul.f32 %v4631_v56, %v3563_v39  ;;  %v3868_v39 = vpack.c.bf16 %v3855_v62, %v3854_v55  ;;  %v3857_v56 = vld [vmem:[#allocation5 + $0x38] sm:$0xff]  ;;  %v3734_v62 = vld [vmem:[#allocation4 + $0x70] sm:$0xff] }
0x13ba   :  { %v5944_v49 = vadd.f32 %v3565_v5, %v3564_v59  ;;  %v3856_v59 = vld [vmem:[#allocation5 + $0x30] sm:$0xff] }
0x13bb   :  { %v3869_v5 = vpack.c.bf16 %v3857_v56, %v3856_v59 }
0x13bc   :  { %3567 = vst.msk [vmem:[#allocation5 + $0x60] sm:$0xff] %vm331_vm2, %v5944_v49  ;;  %v3568_v50 = vpack.c.bf16 %v5944_v49, %v5944_v49 }
0x13be   :  { %4278 = vmatmul.msk.bf16.vlgmr.msra.gmra.mxu3 %vm331_vm2, %v3568_v50  ;;  %4279 = vmatmul.msk.bf16.vlgmr.msra.gmra.mxu0 %vm331_vm2, %v3568_v50 }
0x13bf   :  { %4282 = vmatmul.msk.bf16.vlgmr.msrb.gmra.mxu1 %vm331_vm2, %v3568_v50  ;;  %3835 = vmatpush.bf16.msra.mxu3 %v4686_v29  ;;  %v3858_v50 = vld [vmem:[#allocation5 + $0x40] sm:$0xff] }
0x13c0   :  { %3924 = vmatpush.bf16.msra.mxu0 %v4328_v31  ;;  %v5986_v31 = vld [vmem:[%s6159_s23] ss:$0 sm:$0xff] }
0x13c3   :  { %3836 = vmatpush.bf16.msra.mxu3 %v4687_v51  ;;  %v3861_v51 = vld [vmem:[#allocation5 + $0x58] sm:$0xff] }
0x13c4   :  { %3925 = vmatpush.bf16.msra.mxu0 %v4327_v16 }
0x143b   :  { %v3594_v54 = vpop.f32.mrf.mxu0 }
0x143c   :  { %v3620_v53 = vadd.f32 %v3619_v52, %v3594_v54  ;;  %v3650_v6 = vpop.f32.mrf.mxu1  ;;  %v3860_v54 = vld [vmem:[#allocation5 + $0x50] sm:$0xff] }
0x143d   :  { %v3651_v46 = vadd.f32 %v5844_v38, %v3650_v6  ;;  %v3871_v52 = vpack.c.bf16 %v3861_v51, %v3860_v54  ;;  %v3862_v6 = vld [vmem:[#allocation5 + $0x60] sm:$0xff] }
0x143e   :  { %v4281_v57 = vmul.f32 -1.442695, %v3620_v53 }
0x1440   :  { %4632 = vpow2.f32 %v4281_v57 }
0x1441   :  { %v3581_v63 = vpop.f32.mrf.mxu3 }
0x1442   :  { %v3599_v3 = vadd.f32 %v3598_v2, %v3581_v63 }
0x1443   :  { %v3596_v47 = vpop.f32.mrf.mxu0 }
0x1444   :  { %v4280_v32 = vmul.f32 -1.442695, %v3599_v3  ;;  %v3652_v41 = vpop.f32.mrf.mxu1  ;;  %v3692_v3 = vld [vmem:[#allocation2 + $0x70] sm:$0xff] }
0x1446   :  { %v4633_v33 = vpop.eup %4632  ;;  %4634 = vpow2.f32 %v4280_v32  ;;  %v3713_v32 = vld [vmem:[#allocation3 + $0x70] sm:$0xff] }
0x1447   :  { %v3624_v9 = vadd.f32 1.0, %v4633_v33 }
0x1449   :  { %v3583_v10 = vpop.f32.mrf.mxu3  ;;  %4636 = vrcp.f32 %v3624_v9  ;;  %v3636_v19 = vand.u32 2147483648, %v3624_v9  ;;  %vm3630_vm0 = vweird.f32 %v3624_v9  ;;  %v3634_v22 = vand.u32 2147483647, %v3624_v9 }
0x144b   :  { %v3637_v44 = vor.u32 1.1754944e-38, %v3636_v19  ;;  %vm3635_vm4 = vcmp.eq.f32.partialorder %v3634_v22, 8.507059e+37 }
0x144c   :  { %v4635_v11 = vpop.eup %4634 }
0x144d   :  { %v3603_v37 = vadd.f32 1.0, %v4635_v11 }
0x144f   :  { %4638 = vrcp.f32 %v3603_v37  ;;  %v4637_v8 = vpop.eup %4636  ;;  %v3615_v13 = vand.u32 2147483648, %v3603_v37  ;;  %v3613_v18 = vand.u32 2147483647, %v3603_v37  ;;  %vm3609_vm12 = vweird.f32 %v3603_v37 }
0x1450   :  { %v3626_v14 = vmul.f32 %v4637_v8, %v3624_v9  ;;  %vm3631_vm15 = vweird.f32 %v4637_v8 }
0x1451   :  { %v3616_v43 = vor.u32 1.1754944e-38, %v3615_v13  ;;  %vm3614_vm14 = vcmp.eq.f32.partialorder %v3613_v18, 8.507059e+37  ;;  %vm3632_vm3 = vmor %vm3630_vm0, %vm3631_vm15  ;;  %v3967_v13 = vld [vmem:[%s6176_s1] sm:$0xff] }
0x1452   :  { %v3627_v60 = vsub.f32 1.0, %v3626_v14 }
0x1454   :  { %v3628_v61 = vmul.f32 %v4637_v8, %v3627_v60 }
0x1455   :  { %v4639_v12 = vpop.eup %4638 }
0x1456   :  { %v3605_v27 = vmul.f32 %v4639_v12, %v3603_v37  ;;  %vm3610_vm11 = vweird.f32 %v4639_v12  ;;  %v3629_v21 = vadd.f32 %v4637_v8, %v3628_v61  ;;  %v3968_v61 = vld [vmem:[%s6176_s1 + $0x8] sm:$0xff] }
0x1457   :  { %vm3611_vm13 = vmor %vm3609_vm12, %vm3610_vm11 }
0x1458   :  { %v3606_v23 = vsub.f32 1.0, %v3605_v27  ;;  %v3633_v58 = vsel %vm3632_vm3, %v4637_v8, %v3629_v21 }
0x1459   :  { %v3638_v24 = vsel %vm3635_vm4, %v3637_v44, %v3633_v58 }
0x145a   :  { %v3607_v17 = vmul.f32 %v4639_v12, %v3606_v23  ;;  %v3657_v25 = vsub.f32 1.0, %v3638_v24  ;;  %v3659_v38 = vmul.f32 %v3638_v24, %v5944_v49  ;;  %v3859_v49 = vld [vmem:[#allocation5 + $0x48] sm:$0xff] }
0x145b   :  { %v3870_v29 = vpack.c.bf16 %v3859_v49, %v3858_v50  ;;  %v3970_v49 = vld [vmem:[%s6176_s1 + $0x18] sm:$0xff] }
0x145c   :  { %v3608_v26 = vadd.f32 %v4639_v12, %v3607_v17 }
0x145e   :  { %v3612_v20 = vsel %vm3611_vm13, %v4639_v12, %v3608_v26 }
0x145f   :  { %v3617_v4 = vsel %vm3614_vm14, %v3616_v43, %v3612_v20 }
0x1460   :  { %v3654_v7 = vmul.f32 %v3651_v46, %v3617_v4 }
0x1462   :  { %v3655_v36 = vadd.f32 %v3654_v7, %v3640_v0 }
0x1464   :  { %4640 = vtanh.f32 %v3655_v36 }
0x146a   :  { %v4641_v45 = vpop.eup %4640 }
0x146b   :  { %v3658_v48 = vmul.f32 %v4641_v45, %v3657_v25  ;;  %v3969_v25 = vld [vmem:[%s6176_s1 + $0x10] sm:$0xff] }
0x146d   :  { %v5967_v1 = vadd.f32 %v3659_v38, %v3658_v48  ;;  %v6011_v48 = vld [vmem:[%s6157_s21] ss:$0 sm:$0xff] }
0x146f   :  { %3661 = vst.msk [vmem:[#allocation5 + $0x68] sm:$0xff] %vm331_vm2, %v5967_v1  ;;  %v3662_v15 = vpack.c.bf16 %v5967_v1, %v5967_v1 }
0x1471   :  { %4283 = vmatmul.msk.bf16.vlgmr.msrb.gmra.mxu2 %vm331_vm2, %v3662_v15  ;;  %4284 = vmatmul.msk.bf16.vlgmr.msrb.gmra.mxu3 %vm331_vm2, %v3662_v15 }
0x1472   :  { %4287 = vmatmul.msk.bf16.vlgmr.msrb.gmra.mxu0 %vm331_vm2, %v3662_v15 }
0x1476   :  { %v3863_v53 = vld [vmem:[#allocation5 + $0x68] sm:$0xff] }
0x1477   :  { %v3872_v57 = vpack.c.bf16 %v3863_v53, %v3862_v6 }
0x1482   :  { %4301 = vmatmul.msk.bf16.vlgmr.msra.gmra.mxu0 %vm331_vm2, %v3866_v34 }
0x1492   :  { %4302 = vmatmul.msk.bf16.gmra.mxu0 %vm331_vm2, %v3867_v40 }
0x14a2   :  { %4303 = vmatmul.msk.bf16.gmra.mxu0 %vm331_vm2, %v3868_v39 }
0x14b2   :  { %4304 = vmatmul.msk.bf16.gmra.mxu0 %vm331_vm2, %v3869_v5 }
0x14c2   :  { %4305 = vmatmul.msk.bf16.gmra.mxu0 %vm331_vm2, %v3870_v29 }
0x14d2   :  { %4306 = vmatmul.msk.bf16.gmra.mxu0 %vm331_vm2, %v3871_v52 }
0x14e2   :  { %4307 = vmatmul.msk.bf16.gmra.mxu0 %vm331_vm2, %v3872_v57 }
0x14ef   :  { %v3744_v63 = vpop.f32.mrf.mxu0 }
0x14f0   :  { %v3745_v15 = vadd.f32 %v6011_v48, %v3744_v63  ;;  %v3971_v63 = vld [vmem:[%s6176_s1 + $0x20] sm:$0xff] }
0x14f4   :  { %v3675_v2 = vpop.f32.mrf.mxu2  ;;  %v3688_v47 = vpop.f32.mrf.mxu3 }
0x14f5   :  { %v3693_v41 = vadd.f32 %v3692_v3, %v3675_v2  ;;  %v3714_v33 = vadd.f32 %v3713_v32, %v3688_v47 }
0x14f7   :  { %v4285_v9 = vmul.f32 -1.442695, %v3693_v41  ;;  %v4286_v10 = vmul.f32 -1.442695, %v3714_v33  ;;  %v3746_v11 = vpop.f32.mrf.mxu0  ;;  %v3972_v41 = vld [vmem:[%s6176_s1 + $0x28] sm:$0xff] }
0x14f8   :  { %v3973_v11 = vld [vmem:[%s6176_s1 + $0x30] sm:$0xff] }
0x14f9   :  { %4642 = vpow2.f32 %v4285_v9 }
0x14fa   :  { %4644 = vpow2.f32 %v4286_v10 }
0x14fc   :  { %v3677_v37 = vpop.f32.mrf.mxu2  ;;  %v3690_v8 = vpop.f32.mrf.mxu3 }
0x14ff   :  { %v4643_v14 = vpop.eup %4642  ;;  %v3927_v16 = vpop.f32.mrf.mxu0 }
0x1500   :  { %v4645_v12 = vpop.eup %4644  ;;  %v3697_v27 = vadd.f32 1.0, %v4643_v14  ;;  %v3928_v60 = vadd.f32 %v5986_v31, %v3927_v16  ;;  %v3974_v16 = vld [vmem:[%s6176_s1 + $0x38] sm:$0xff] }
0x1501   :  { %v3718_v23 = vadd.f32 1.0, %v4645_v12 }
0x1502   :  { %4646 = vrcp.f32 %v3697_v27  ;;  %v3983_v17 = vadd.f32 %v3967_v13, %v3928_v60  ;;  %v3709_v7 = vand.u32 2147483648, %v3697_v27  ;;  %v3707_v36 = vand.u32 2147483647, %v3697_v27 }
0x1503   :  { %4648 = vrcp.f32 %v3718_v23  ;;  %vm3703_vm6 = vweird.f32 %v3697_v27  ;;  %v3730_v40 = vand.u32 2147483648, %v3718_v23  ;;  %vm3724_vm10 = vweird.f32 %v3718_v23 }
0x1504   :  { %3999 = vst.msk [vmem:[%s6160_s24] sm:$0xff] %vm139_vm1, %v3983_v17  ;;  %v3710_v45 = vor.u32 1.1754944e-38, %v3709_v7  ;;  %vm3708_vm8 = vcmp.eq.f32.partialorder %v3707_v36, 8.507059e+37  ;;  %v3728_v55 = vand.u32 2147483647, %v3718_v23  ;;  %v3978_v7 = vld [vmem:[%s6176_s1 + $0x58] sm:$0xff] }
0x1505   :  { %v3731_v59 = vor.u32 1.1754944e-38, %v3730_v40  ;;  %v3807_v40 = vld [vmem:[#allocation3 + $0x78] sm:$0xff] }
0x1506   :  { %vm3729_vm12 = vcmp.eq.f32.partialorder %v3728_v55, 8.507059e+37 }
0x1507   :  { %v3929_v18 = vpop.f32.mrf.mxu0 }
0x1508   :  { %v4647_v26 = vpop.eup %4646  ;;  %v3930_v43 = vadd.f32 %v5986_v31, %v3929_v18 }
0x1509   :  { %v4649_v46 = vpop.eup %4648  ;;  %v3699_v20 = vmul.f32 %v4647_v26, %v3697_v27  ;;  %vm3704_vm5 = vweird.f32 %v4647_v26 }
0x150a   :  { %v3720_v21 = vmul.f32 %v4649_v46, %v3718_v23  ;;  %v3984_v4 = vadd.f32 %v3968_v61, %v3930_v43  ;;  %vm3705_vm7 = vmor %vm3703_vm6, %vm3704_vm5  ;;  %vm3725_vm9 = vweird.f32 %v4649_v46  ;;  %v3975_v23 = vld [vmem:[%s6176_s1 + $0x40] sm:$0xff]  ;;  %v3976_v61 = vld [vmem:[%s6176_s1 + $0x48] sm:$0xff] }
0x150b   :  { %v3700_v19 = vsub.f32 1.0, %v3699_v20  ;;  %vm3726_vm11 = vmor %vm3724_vm10, %vm3725_vm9  ;;  %v3977_v20 = vld [vmem:[%s6176_s1 + $0x50] sm:$0xff] }
0x150c   :  { %v3721_v22 = vsub.f32 1.0, %v3720_v21  ;;  %4000 = vst.msk [vmem:[%s6160_s24 + $0x8] sm:$0xff] %vm139_vm1, %v3984_v4 }
0x150d   :  { %v3701_v0 = vmul.f32 %v4647_v26, %v3700_v19 }
0x150e   :  { %v3722_v58 = vmul.f32 %v4649_v46, %v3721_v22 }
0x150f   :  { %v3702_v44 = vadd.f32 %v4647_v26, %v3701_v0  ;;  %v3932_v24 = vpop.f32.mrf.mxu0 }
0x1510   :  { %v3933_v38 = vadd.f32 %v5986_v31, %v3932_v24  ;;  %v3723_v34 = vadd.f32 %v4649_v46, %v3722_v58  ;;  %v3979_v58 = vld [vmem:[%s6176_s1 + $0x60] sm:$0xff] }
0x1511   :  { %v3706_v28 = vsel %vm3705_vm7, %v4647_v26, %v3702_v44 }
0x1512   :  { %v3711_v30 = vsel %vm3708_vm8, %v3710_v45, %v3706_v28  ;;  %v3985_v35 = vadd.f32 %v3969_v25, %v3933_v38  ;;  %v3727_v56 = vsel %vm3726_vm11, %v4649_v46, %v3723_v34  ;;  %v3980_v45 = vld [vmem:[%s6176_s1 + $0x68] sm:$0xff] }
0x1513   :  { %v3748_v42 = vmul.f32 %v3745_v15, %v3711_v30  ;;  %v3732_v29 = vsel %vm3729_vm12, %v3731_v59, %v3727_v56  ;;  %v3786_v30 = vld [vmem:[#allocation2 + $0x78] sm:$0xff] }
0x1514   :  { %4001 = vst.msk [vmem:[%s6160_s24 + $0x10] sm:$0xff] %vm139_vm1, %v3985_v35  ;;  %v3751_v54 = vsub.f32 1.0, %v3732_v29  ;;  %v3753_v6 = vmul.f32 %v3732_v29, %v5967_v1 }
0x1515   :  { %v3749_v39 = vadd.f32 %v3748_v42, %v3734_v62 }
0x1517   :  { %4650 = vtanh.f32 %v3749_v39  ;;  %v3934_v5 = vpop.f32.mrf.mxu0 }
0x1518   :  { %v3935_v50 = vadd.f32 %v5986_v31, %v3934_v5 }
0x151a   :  { %v3986_v51 = vadd.f32 %v3970_v49, %v3935_v50 }
0x151c   :  { %4002 = vst.msk [vmem:[%s6160_s24 + $0x18] sm:$0xff] %vm139_vm1, %v3986_v51 }
0x151d   :  { %v4651_v52 = vpop.eup %4650 }
0x151e   :  { %v3752_v53 = vmul.f32 %v4651_v52, %v3751_v54 }
0x151f   :  { %v3937_v57 = vpop.f32.mrf.mxu0 }
0x1520   :  { %v6030_v2 = vadd.f32 %v3753_v6, %v3752_v53  ;;  %v3938_v3 = vadd.f32 %v5986_v31, %v3937_v57 }
0x1522   :  { %3755 = vst.msk [vmem:[#allocation5 + $0x70] sm:$0xff] %vm331_vm2, %v6030_v2  ;;  %v3987_v47 = vadd.f32 %v3971_v63, %v3938_v3  ;;  %v3756_v32 = vpack.c.bf16 %v6030_v2, %v6030_v2 }
0x1524   :  { %4003 = vst.msk [vmem:[%s6160_s24 + $0x20] sm:$0xff] %vm139_vm1, %v3987_v47  ;;  %4288 = vmatmul.msk.bf16.vlgmr.msra.gmra.mxu1 %vm331_vm2, %v3756_v32  ;;  %4289 = vmatmul.msk.bf16.vlgmr.msra.gmra.mxu2 %vm331_vm2, %v3756_v32 }
0x1525   :  { %4292 = vmatmul.msk.bf16.vlgmr.msra.gmra.mxu3 %vm331_vm2, %v3756_v32 }
0x1527   :  { %v3939_v1 = vpop.f32.mrf.mxu0 }
0x1528   :  { %v3940_v33 = vadd.f32 %v5986_v31, %v3939_v1 }
0x152a   :  { %v3988_v9 = vadd.f32 %v3972_v41, %v3940_v33 }
0x152c   :  { %4004 = vst.msk [vmem:[%s6160_s24 + $0x28] sm:$0xff] %vm139_vm1, %v3988_v9 }
0x152f   :  { %v3942_v10 = vpop.f32.mrf.mxu0 }
0x1530   :  { %v3943_v37 = vadd.f32 %v5986_v31, %v3942_v10 }
0x1532   :  { %v3989_v8 = vadd.f32 %v3973_v11, %v3943_v37 }
0x1534   :  { %4005 = vst.msk [vmem:[%s6160_s24 + $0x30] sm:$0xff] %vm139_vm1, %v3989_v8 }
0x1537   :  { %v3944_v14 = vpop.f32.mrf.mxu0 }
0x1538   :  { %v3945_v12 = vadd.f32 %v5986_v31, %v3944_v14 }
0x153a   :  { %v3990_v27 = vadd.f32 %v3974_v16, %v3945_v12  ;;  %v3828_v16 = vld [vmem:[#allocation4 + $0x78] sm:$0xff] }
0x153c   :  { %4006 = vst.msk [vmem:[%s6160_s24 + $0x38] sm:$0xff] %vm139_vm1, %v3990_v27 }
0x153f   :  { %v3947_v60 = vpop.f32.mrf.mxu0 }
0x1540   :  { %v3948_v13 = vadd.f32 %v5986_v31, %v3947_v60 }
0x1542   :  { %v3991_v17 = vadd.f32 %v3975_v23, %v3948_v13 }
0x1544   :  { %4007 = vst.msk [vmem:[%s6160_s24 + $0x40] sm:$0xff] %vm139_vm1, %v3991_v17 }
0x1547   :  { %v3949_v18 = vpop.f32.mrf.mxu0 }
0x1548   :  { %v3950_v26 = vadd.f32 %v5986_v31, %v3949_v18 }
0x154a   :  { %v3992_v43 = vadd.f32 %v3976_v61, %v3950_v26 }
0x154c   :  { %4008 = vst.msk [vmem:[%s6160_s24 + $0x48] sm:$0xff] %vm139_vm1, %v3992_v43  ;;  %v3864_v43 = vld [vmem:[#allocation5 + $0x70] sm:$0xff] }
0x154f   :  { %v3952_v46 = vpop.f32.mrf.mxu0 }
0x1550   :  { %v3953_v21 = vadd.f32 %v5986_v31, %v3952_v46 }
0x1552   :  { %v3993_v4 = vadd.f32 %v3977_v20, %v3953_v21 }
0x1554   :  { %4009 = vst.msk [vmem:[%s6160_s24 + $0x50] sm:$0xff] %vm139_vm1, %v3993_v4  ;;  %v3981_v4 = vld [vmem:[%s6176_s1 + $0x70] sm:$0xff] }
0x1557   :  { %v3954_v19 = vpop.f32.mrf.mxu0 }
0x1558   :  { %v3955_v22 = vadd.f32 %v5986_v31, %v3954_v19 }
0x155a   :  { %v3994_v0 = vadd.f32 %v3978_v7, %v3955_v22  ;;  %v3982_v22 = vld [vmem:[%s6176_s1 + $0x78] sm:$0xff] }
0x155c   :  { %4010 = vst.msk [vmem:[%s6160_s24 + $0x58] sm:$0xff] %vm139_vm1, %v3994_v0 }
0x155f   :  { %v3957_v36 = vpop.f32.mrf.mxu0 }
0x1560   :  { %v3958_v44 = vadd.f32 %v5986_v31, %v3957_v36 }
0x1562   :  { %v3995_v24 = vadd.f32 %v3979_v58, %v3958_v44 }
0x1564   :  { %4011 = vst.msk [vmem:[%s6160_s24 + $0x60] sm:$0xff] %vm139_vm1, %v3995_v24 }
0x1567   :  { %v3959_v25 = vpop.f32.mrf.mxu0 }
0x1568   :  { %v3960_v38 = vadd.f32 %v5986_v31, %v3959_v25 }
0x156a   :  { %v3996_v15 = vadd.f32 %v3980_v45, %v3960_v38 }
0x156c   :  { %4012 = vst.msk [vmem:[%s6160_s24 + $0x68] sm:$0xff] %vm139_vm1, %v3996_v15 }
0x15a1   :  { %v3769_v28 = vpop.f32.mrf.mxu1 }
0x15a2   :  { %v3787_v34 = vadd.f32 %v3786_v30, %v3769_v28 }
0x15a4   :  { %v4290_v35 = vmul.f32 -1.442695, %v3787_v34 }
0x15a6   :  { %4652 = vpow2.f32 %v4290_v35 }
0x15a7   :  { %v3782_v42 = vpop.f32.mrf.mxu2 }
0x15a8   :  { %v3808_v62 = vadd.f32 %v3807_v40, %v3782_v42  ;;  %v3838_v55 = vpop.f32.mrf.mxu3 }
0x15a9   :  { %v3771_v39 = vpop.f32.mrf.mxu1  ;;  %v3839_v9 = vadd.f32 %v6011_v48, %v3838_v55 }
0x15aa   :  { %v4291_v56 = vmul.f32 -1.442695, %v3808_v62 }
0x15ac   :  { %v4653_v59 = vpop.eup %4652  ;;  %4654 = vpow2.f32 %v4291_v56 }
0x15ad   :  { %v3791_v5 = vadd.f32 1.0, %v4653_v59 }
0x15af   :  { %4656 = vrcp.f32 %v3791_v5  ;;  %v3784_v49 = vpop.f32.mrf.mxu2  ;;  %v3803_v6 = vand.u32 2147483648, %v3791_v5  ;;  %v3801_v63 = vand.u32 2147483647, %v3791_v5  ;;  %vm3797_vm14 = vweird.f32 %v3791_v5 }
0x15b0   :  { %v3840_v50 = vpop.f32.mrf.mxu3 }
0x15b1   :  { %v3804_v1 = vor.u32 1.1754944e-38, %v3803_v6  ;;  %vm3802_vm0 = vcmp.eq.f32.partialorder %v3801_v63, 8.507059e+37 }
0x15b2   :  { %v4655_v29 = vpop.eup %4654 }
0x15b3   :  { %v3812_v51 = vadd.f32 1.0, %v4655_v29 }
0x15b5   :  { %v4657_v54 = vpop.eup %4656  ;;  %4658 = vrcp.f32 %v3812_v51  ;;  %v3824_v37 = vand.u32 2147483648, %v3812_v51  ;;  %v3822_v14 = vand.u32 2147483647, %v3812_v51  ;;  %vm3818_vm4 = vweird.f32 %v3812_v51 }
0x15b6   :  { %v3793_v52 = vmul.f32 %v4657_v54, %v3791_v5  ;;  %vm3798_vm13 = vweird.f32 %v4657_v54 }
0x15b7   :  { %vm3799_vm15 = vmor %vm3797_vm14, %vm3798_vm13  ;;  %v3825_v60 = vor.u32 1.1754944e-38, %v3824_v37  ;;  %vm3823_vm6 = vcmp.eq.f32.partialorder %v3822_v14, 8.507059e+37 }
0x15b8   :  { %v3794_v53 = vsub.f32 1.0, %v3793_v52 }
0x15ba   :  { %v3795_v57 = vmul.f32 %v4657_v54, %v3794_v53 }
0x15bb   :  { %v4659_v3 = vpop.eup %4658 }
0x15bc   :  { %v3814_v47 = vmul.f32 %v4659_v3, %v3812_v51  ;;  %v3796_v32 = vadd.f32 %v4657_v54, %v3795_v57  ;;  %vm3819_vm3 = vweird.f32 %v4659_v3 }
0x15bd   :  { %vm3820_vm5 = vmor %vm3818_vm4, %vm3819_vm3 }
0x15be   :  { %v3815_v41 = vsub.f32 1.0, %v3814_v47  ;;  %v3800_v33 = vsel %vm3799_vm15, %v4657_v54, %v3796_v32 }
0x15bf   :  { %v3805_v10 = vsel %vm3802_vm0, %v3804_v1, %v3800_v33 }
0x15c0   :  { %v3816_v11 = vmul.f32 %v4659_v3, %v3815_v41  ;;  %v3842_v8 = vmul.f32 %v3839_v9, %v3805_v10 }
0x15c2   :  { %v3817_v12 = vadd.f32 %v4659_v3, %v3816_v11  ;;  %v3843_v27 = vadd.f32 %v3842_v8, %v3828_v16 }
0x15c4   :  { %v3821_v23 = vsel %vm3820_vm5, %v4659_v3, %v3817_v12  ;;  %4660 = vtanh.f32 %v3843_v27 }
0x15c5   :  { %v3826_v13 = vsel %vm3823_vm6, %v3825_v60, %v3821_v23 }
0x15c6   :  { %v3845_v17 = vsub.f32 1.0, %v3826_v13  ;;  %v3847_v48 = vmul.f32 %v3826_v13, %v6030_v2 }
0x15ca   :  { %v4661_v18 = vpop.eup %4660 }
0x15cb   :  { %v3846_v61 = vmul.f32 %v4661_v18, %v3845_v17 }
0x15cd   :  { %v3848_v26 = vadd.f32 %v3847_v48, %v3846_v61 }
0x15cf   :  { %3849 = vst.msk [vmem:[#allocation5 + $0x78] sm:$0xff] %vm331_vm2, %v3848_v26 }
0x15d6   :  { %v3865_v46 = vld [vmem:[#allocation5 + $0x78] sm:$0xff] }
0x15d7   :  { %v3873_v20 = vpack.c.bf16 %v3865_v46, %v3864_v43 }
0x15d9   :  { %4308 = vmatmul.msk.bf16.gmra.mxu0 %vm331_vm2, %v3873_v20 }
0x1656   :  { %v3962_v21 = vpop.f32.mrf.mxu0 }
0x1657   :  { %v3963_v19 = vadd.f32 %v5986_v31, %v3962_v21 }
0x1659   :  { %v3997_v7 = vadd.f32 %v3981_v4, %v3963_v19 }
0x165b   :  { %4013 = vst.msk [vmem:[%s6160_s24 + $0x70] sm:$0xff] %vm139_vm1, %v3997_v7 }
0x165e   :  { %v3964_v2 = vpop.f32.mrf.mxu0 }
0x165f   :  { %v3965_v0 = vadd.f32 %v5986_v31, %v3964_v2 }
0x1661   :  { %v3998_v36 = vadd.f32 %v3982_v22, %v3965_v0 }
0x1663   :  { %4014 = vst.msk [vmem:[%s6160_s24 + $0x78] sm:$0xff] %vm139_vm1, %v3998_v36 }

</bundles_post_ra>
